<compile_context>
chip_gen: v6e
topology: v6e:2x2x1
jax: 0.10.0
libtpu: 0.0.40
codegen_flags: <defaults>
</compile_context>

<pallas_src>
import functools

import jax
import jax.numpy as jnp
from jax.experimental import pallas as pl
from jax.experimental.pallas import tpu as pltpu


# --------------------------------------------------------------------------
# config (small but lane-friendly, consistent with Qwen2Moe module structure)
# --------------------------------------------------------------------------
class Config:
    vocab_size = 256
    hidden_size = 128
    num_attention_heads = 4
    num_key_value_heads = 2
    head_dim = 128                      # explicit head_dim attr (module reads getattr)
    intermediate_size = 256             # dense MLP layers
    moe_intermediate_size = 128         # per-expert FFN
    shared_expert_intermediate_size = 128
    num_experts = 4
    num_experts_per_tok = 2
    norm_topk_prob = True
    num_hidden_layers = 2
    decoder_sparse_step = 1
    mlp_only_layers = (0,)              # layer 0 dense MLP, layer 1 sparse MoE
    rms_norm_eps = 1e-6
    rope_theta = 10000.0


# --------------------------------------------------------------------------
# Pallas kernels
# --------------------------------------------------------------------------
def _norm_qkv_rope_kernel(eps, scale, hq, hkv, d,
                          h_ref, res_ref, w_ref, qkvw_ref, qkvb_ref,
                          cos_ref, sin_ref,
                          q_ref, k_ref, v_ref, nres_ref):
    """residual-add + RMSNorm + QKV proj (+bias) + RoPE + Q-scale, fused.

    Weights are [in, out] bf16; activations normalized in f32 then cast to
    bf16 for the MXU.  Q leaves already scaled by 1/sqrt(d).
    """
    x = h_ref[...] + res_ref[...]
    nres_ref[...] = x
    var = jnp.mean(x * x, axis=-1, keepdims=True)
    xn = x * jax.lax.rsqrt(var + eps) * w_ref[...]
    qkv = jnp.dot(xn.astype(jnp.bfloat16), qkvw_ref[...],
                  preferred_element_type=jnp.float32) + qkvb_ref[...]

    cos = cos_ref[...]
    sin = sin_ref[...]
    # rotate_half(x) == roll(x, d//2) * [-1]*d/2 ++ [+1]*d/2  (XLU, no concat)
    sign = jnp.where(
        jax.lax.broadcasted_iota(jnp.int32, (1, d), 1) < (d // 2),
        jnp.float32(-1.0), jnp.float32(1.0))

    def rope(xh):                                   # xh: [tm, d] f32
        return xh * cos + pltpu.roll(xh, shift=d // 2, axis=1) * sign * sin

    q_sz = hq * d
    kv_sz = hkv * d
    for hh in range(hq):
        qh = qkv[:, hh * d:(hh + 1) * d]
        q_ref[:, hh * d:(hh + 1) * d] = (rope(qh) * scale).astype(jnp.bfloat16)
    for hh in range(hkv):
        kh = qkv[:, q_sz + hh * d: q_sz + (hh + 1) * d]
        k_ref[:, hh * d:(hh + 1) * d] = rope(kh).astype(jnp.bfloat16)
        vh = qkv[:, q_sz + kv_sz + hh * d: q_sz + kv_sz + (hh + 1) * d]
        v_ref[:, hh * d:(hh + 1) * d] = vh.astype(jnp.bfloat16)


def _flash_attn_kernel(eps, hq, hkv, d, tq, tkv,
                       q_ref, k_ref, v_ref, ow_ref, res_ref, w_ref,
                       h_ref, nres_ref, m_sc, l_sc, acc_sc):
    """Flash-style causal GQA attention + per-head o_proj accumulation
    + residual-add + post-attention RMSNorm (epilogue), fused.

    grid = (q_tiles, kv_tiles); m/l/acc are VMEM scratch per q tile.
    """
    qi = pl.program_id(0)
    ki = pl.program_id(1)
    group = hq // hkv
    neg = jnp.float32(-1e30)

    @pl.when(ki == 0)
    def _():
        m_sc[...] = jnp.full_like(m_sc, neg)
        l_sc[...] = jnp.zeros_like(l_sc)
        acc_sc[...] = jnp.zeros_like(acc_sc)

    # skip kv tiles that lie entirely above the causal diagonal
    @pl.when(ki * tkv <= qi * tq + (tq - 1))
    def _():
        q = q_ref[...]                                   # [tq, hq*d] bf16 (scaled+roped)
        k = k_ref[...]                                   # [tkv, hkv*d] bf16 (roped)
        v = v_ref[...]
        row = qi * tq + jax.lax.broadcasted_iota(jnp.int32, (tq, tkv), 0)
        col = ki * tkv + jax.lax.broadcasted_iota(jnp.int32, (tq, tkv), 1)
        causal = row >= col
        for kvh in range(hkv):
            kh = k[:, kvh * d:(kvh + 1) * d]             # [tkv, d]
            vh = v[:, kvh * d:(kvh + 1) * d]
            for g in range(group):
                h_idx = kvh * group + g
                qh = q[:, h_idx * d:(h_idx + 1) * d]     # [tq, d]
                s = jax.lax.dot_general(qh, kh, (((1,), (1,)), ((), ())),
                                        preferred_element_type=jnp.float32)
                s = jnp.where(causal, s, neg)
                m_prev = m_sc[h_idx]                     # [tq, 1]
                m_new = jnp.maximum(m_prev, jnp.max(s, axis=-1, keepdims=True))
                alpha = jnp.exp(m_prev - m_new)
                p = jnp.exp(s - m_new)
                l_sc[h_idx] = alpha * l_sc[h_idx] + jnp.sum(p, axis=-1,
                                                            keepdims=True)
                acc_sc[h_idx] = alpha * acc_sc[h_idx] + jnp.dot(
                    p.astype(jnp.bfloat16), vh,
                    preferred_element_type=jnp.float32)
                m_sc[h_idx] = m_new

    @pl.when(ki == pl.num_programs(1) - 1)
    def _():
        hidden = h_ref.shape[1]
        o = jnp.zeros((tq, hidden), jnp.float32)
        for h_idx in range(hq):
            pv = acc_sc[h_idx] * pl.reciprocal(l_sc[h_idx], approx=True)
            o = o + jnp.dot(pv.astype(jnp.bfloat16),
                            ow_ref[h_idx * d:(h_idx + 1) * d, :],
                            preferred_element_type=jnp.float32)
        x = o + res_ref[...]
        nres_ref[...] = x
        var = jnp.mean(x * x, axis=-1, keepdims=True)
        h_ref[...] = x * jax.lax.rsqrt(var + eps) * w_ref[...]


def _mlp_kernel(x_ref, wg_ref, wu_ref, wd_ref, o_ref):
    """Dense gated MLP: SiLU(x@Wg) * (x@Wu) @ Wd; bf16 MXU, f32 elementwise."""
    x = x_ref[...].astype(jnp.bfloat16)
    g = jnp.dot(x, wg_ref[...], preferred_element_type=jnp.float32)
    u = jnp.dot(x, wu_ref[...], preferred_element_type=jnp.float32)
    act = (g * jax.nn.sigmoid(g) * u).astype(jnp.bfloat16)
    o_ref[...] = jnp.dot(act, wd_ref[...], preferred_element_type=jnp.float32)


def _moe_kernel(x_ref, eg_ref, eu_ref, ed_ref, r_ref,
                sg_ref, su_ref, sd_ref, sgp_ref, o_ref):
    """Fused sparse MoE: grid (token_tile, expert), weighted accumulation.

    Shared expert + shared gate + combine run in the last-expert epilogue.
    """
    e = pl.program_id(1)
    x = x_ref[...]
    xb = x.astype(jnp.bfloat16)

    @pl.when(e == 0)
    def _():
        o_ref[...] = jnp.zeros_like(o_ref)

    g = jnp.dot(xb, eg_ref[...], preferred_element_type=jnp.float32)
    u = jnp.dot(xb, eu_ref[...], preferred_element_type=jnp.float32)
    act = (g * jax.nn.sigmoid(g) * u).astype(jnp.bfloat16)
    d = jnp.dot(act, ed_ref[...], preferred_element_type=jnp.float32)
    o_ref[...] += d * r_ref[...]                 # r_ref: [tm, 1] routing weights

    @pl.when(e == pl.num_programs(1) - 1)
    def _():
        sg = jnp.dot(xb, sg_ref[...], preferred_element_type=jnp.float32)
        su = jnp.dot(xb, su_ref[...], preferred_element_type=jnp.float32)
        sact = (sg * jax.nn.sigmoid(sg) * su).astype(jnp.bfloat16)
        shared = jnp.dot(sact, sd_ref[...], preferred_element_type=jnp.float32)
        gate = jax.nn.sigmoid(jnp.dot(xb, sgp_ref[...],
                                      preferred_element_type=jnp.float32))
        o_ref[...] += gate * shared


def _final_norm_kernel(eps, x_ref, res_ref, w_ref, o_ref):
    x = x_ref[...] + res_ref[...]
    var = jnp.mean(x * x, axis=-1, keepdims=True)
    o_ref[...] = x * jax.lax.rsqrt(var + eps) * w_ref[...]


def _linear_kernel(x_ref, w_ref, o_ref):
    o_ref[...] = jnp.dot(x_ref[...].astype(jnp.bfloat16), w_ref[...],
                         preferred_element_type=jnp.float32)


# --------------------------------------------------------------------------
# pallas_call wrappers
# --------------------------------------------------------------------------
def norm_qkv_rope(h, residual, ln_w, qkv_w, qkv_b, cos, sin, cfg, scale, tm):
    t, hidden = h.shape
    d = cfg.head_dim
    hq, hkv = cfg.num_attention_heads, cfg.num_key_value_heads
    n_out = qkv_w.shape[1]
    kern = functools.partial(_norm_qkv_rope_kernel, cfg.rms_norm_eps, scale,
                             hq, hkv, d)
    return pl.pallas_call(
        kern,
        grid=(t // tm,),
        in_specs=[
            pl.BlockSpec((tm, hidden), lambda i: (i, 0)),      # h
            pl.BlockSpec((tm, hidden), lambda i: (i, 0)),      # residual
            pl.BlockSpec((1, hidden), lambda i: (0, 0)),       # input_ln
            pl.BlockSpec((hidden, n_out), lambda i: (0, 0)),   # qkv_w [in,out]
            pl.BlockSpec((1, n_out), lambda i: (0, 0)),        # qkv_b
            pl.BlockSpec((tm, d), lambda i: (i, 0)),           # cos
            pl.BlockSpec((tm, d), lambda i: (i, 0)),           # sin
        ],
        out_specs=(
            pl.BlockSpec((tm, hq * d), lambda i: (i, 0)),
            pl.BlockSpec((tm, hkv * d), lambda i: (i, 0)),
            pl.BlockSpec((tm, hkv * d), lambda i: (i, 0)),
            pl.BlockSpec((tm, hidden), lambda i: (i, 0)),
        ),
        out_shape=(
            jax.ShapeDtypeStruct((t, hq * d), jnp.bfloat16),
            jax.ShapeDtypeStruct((t, hkv * d), jnp.bfloat16),
            jax.ShapeDtypeStruct((t, hkv * d), jnp.bfloat16),
            jax.ShapeDtypeStruct((t, hidden), jnp.float32),
        ),
        input_output_aliases={1: 3},            # residual updated in place
        compiler_params=pltpu.CompilerParams(dimension_semantics=("parallel",)),
    )(h, residual, ln_w, qkv_w, qkv_b, cos, sin)


def attn_block(q, k, v, o_w, residual, post_ln_w, cfg, tq, tkv):
    t = q.shape[0]
    hidden = o_w.shape[1]
    hq, hkv, d = cfg.num_attention_heads, cfg.num_key_value_heads, cfg.head_dim
    kern = functools.partial(_flash_attn_kernel, cfg.rms_norm_eps,
                             hq, hkv, d, tq, tkv)
    return pl.pallas_call(
        kern,
        grid=(t // tq, t // tkv),
        in_specs=[
            pl.BlockSpec((tq, hq * d), lambda qi, ki: (qi, 0)),    # q
            pl.BlockSpec((tkv, hkv * d), lambda qi, ki: (ki, 0)),  # k
            pl.BlockSpec((tkv, hkv * d), lambda qi, ki: (ki, 0)),  # v
            pl.BlockSpec((hq * d, hidden), lambda qi, ki: (0, 0)), # o_w [in,out]
            pl.BlockSpec((tq, hidden), lambda qi, ki: (qi, 0)),    # residual
            pl.BlockSpec((1, hidden), lambda qi, ki: (0, 0)),      # post_ln
        ],
        out_specs=(
            pl.BlockSpec((tq, hidden), lambda qi, ki: (qi, 0)),
            pl.BlockSpec((tq, hidden), lambda qi, ki: (qi, 0)),
        ),
        out_shape=(
            jax.ShapeDtypeStruct((t, hidden), jnp.float32),
            jax.ShapeDtypeStruct((t, hidden), jnp.float32),
        ),
        scratch_shapes=[
            pltpu.VMEM((hq, tq, 1), jnp.float32),   # m
            pltpu.VMEM((hq, tq, 1), jnp.float32),   # l
            pltpu.VMEM((hq, tq, d), jnp.float32),   # acc
        ],
        input_output_aliases={4: 1},            # residual updated in place
        compiler_params=pltpu.CompilerParams(
            dimension_semantics=("parallel", "arbitrary")),
    )(q, k, v, o_w, residual, post_ln_w)


def mlp(x, w_gate, w_up, w_down, tm):
    t, hidden = x.shape
    inter = w_gate.shape[1]
    return pl.pallas_call(
        _mlp_kernel,
        grid=(t // tm,),
        in_specs=[
            pl.BlockSpec((tm, hidden), lambda i: (i, 0)),
            pl.BlockSpec((hidden, inter), lambda i: (0, 0)),
            pl.BlockSpec((hidden, inter), lambda i: (0, 0)),
            pl.BlockSpec((inter, hidden), lambda i: (0, 0)),
        ],
        out_specs=pl.BlockSpec((tm, hidden), lambda i: (i, 0)),
        out_shape=jax.ShapeDtypeStruct((t, hidden), jnp.float32),
        compiler_params=pltpu.CompilerParams(dimension_semantics=("parallel",)),
    )(x, w_gate, w_up, w_down)


def fused_moe(x, e_gate, e_up, e_down, routing_t,
              s_gate, s_up, s_down, s_gate_proj, tm):
    """x:[N,H] f32; e_gate/e_up:[E,H,I] bf16; e_down:[E,I,H]; routing_t:[E,N,1]."""
    n_tok, hidden = x.shape
    num_experts, _, inter = e_gate.shape
    ise = s_gate.shape[1]
    return pl.pallas_call(
        _moe_kernel,
        grid=(n_tok // tm, num_experts),
        in_specs=[
            pl.BlockSpec((tm, hidden), lambda i, e: (i, 0)),            # x
            pl.BlockSpec((None, hidden, inter), lambda i, e: (e, 0, 0)),  # gate_e
            pl.BlockSpec((None, hidden, inter), lambda i, e: (e, 0, 0)),  # up_e
            pl.BlockSpec((None, inter, hidden), lambda i, e: (e, 0, 0)),  # down_e
            pl.BlockSpec((None, tm, 1), lambda i, e: (e, i, 0)),          # routing
            pl.BlockSpec((hidden, ise), lambda i, e: (0, 0)),           # shared gate
            pl.BlockSpec((hidden, ise), lambda i, e: (0, 0)),           # shared up
            pl.BlockSpec((ise, hidden), lambda i, e: (0, 0)),           # shared down
            pl.BlockSpec((hidden, 1), lambda i, e: (0, 0)),             # shared gate proj
        ],
        out_specs=pl.BlockSpec((tm, hidden), lambda i, e: (i, 0)),
        out_shape=jax.ShapeDtypeStruct((n_tok, hidden), jnp.float32),
        compiler_params=pltpu.CompilerParams(
            dimension_semantics=("parallel", "arbitrary")),   # reduction axis last
    )(x, e_gate, e_up, e_down, routing_t, s_gate, s_up, s_down, s_gate_proj)


def final_norm(x, residual, w, eps, tm):
    t, hidden = x.shape
    return pl.pallas_call(
        functools.partial(_final_norm_kernel, eps),
        grid=(t // tm,),
        in_specs=[pl.BlockSpec((tm, hidden), lambda i: (i, 0)),
                  pl.BlockSpec((tm, hidden), lambda i: (i, 0)),
                  pl.BlockSpec((1, hidden), lambda i: (0, 0))],
        out_specs=pl.BlockSpec((tm, hidden), lambda i: (i, 0)),
        out_shape=jax.ShapeDtypeStruct((t, hidden), jnp.float32),
        compiler_params=pltpu.CompilerParams(dimension_semantics=("parallel",)),
    )(x, residual, w)


def linear_tiled(x, w, tm, tn):
    t, hidden = x.shape
    n = w.shape[1]
    return pl.pallas_call(
        _linear_kernel,
        grid=(t // tm, n // tn),
        in_specs=[pl.BlockSpec((tm, hidden), lambda i, j: (i, 0)),
                  pl.BlockSpec((hidden, tn), lambda i, j: (0, j))],
        out_specs=pl.BlockSpec((tm, tn), lambda i, j: (i, j)),
        out_shape=jax.ShapeDtypeStruct((t, n), jnp.float32),
        compiler_params=pltpu.CompilerParams(
            dimension_semantics=("parallel", "parallel")),
    )(x, w)


# --------------------------------------------------------------------------
# JAX glue (rope tables, top-k routing, params, model driver)
# --------------------------------------------------------------------------
def rope_cos_sin(position_ids, dim, theta):
    inv_freq = 1.0 / (theta ** (jnp.arange(0, dim, 2, dtype=jnp.float32) / dim))
    freqs = position_ids.astype(jnp.float32)[:, None] * inv_freq[None, :]
    emb = jnp.concatenate([freqs, freqs], axis=-1)
    return jnp.cos(emb), jnp.sin(emb)


def softmax_topk_routing(router_logits, top_k, renormalize, num_experts):
    probs = jax.nn.softmax(router_logits.astype(jnp.float32), axis=-1)
    topk_w, topk_ids = jax.lax.top_k(probs, top_k)
    if renormalize:
        topk_w = topk_w / jnp.sum(topk_w, axis=-1, keepdims=True)
    routing = jnp.sum(
        jax.nn.one_hot(topk_ids, num_experts, dtype=jnp.float32)
        * topk_w[..., None], axis=1)
    return routing  # [N, E]


def init_params(key, cfg):
    # weights stored pre-transposed to [in, out] and cast to bf16 (MXU-native)
    def nrm(k, shape, dtype=jnp.bfloat16):
        return (jax.random.normal(k, shape, dtype=jnp.float32) * 0.02).astype(dtype)

    h = cfg.hidden_size
    hd = cfg.head_dim
    qkv_out = (cfg.num_attention_heads + 2 * cfg.num_key_value_heads) * hd
    keys = iter(jax.random.split(key, 512))

    layers = []
    for layer_idx in range(cfg.num_hidden_layers):
        is_moe = (layer_idx not in cfg.mlp_only_layers
                  and cfg.num_experts > 0
                  and (layer_idx + 1) % cfg.decoder_sparse_step == 0)
        lp = {
            'input_ln': jnp.ones((1, h), jnp.float32),
            'post_ln': jnp.ones((1, h), jnp.float32),
            'qkv_w': nrm(next(keys), (h, qkv_out)),
            'qkv_b': nrm(next(keys), (1, qkv_out), jnp.float32),
            'o_w': nrm(next(keys), (cfg.num_attention_heads * hd, h)),
        }
        if is_moe:
            i = cfg.moe_intermediate_size
            si = cfg.shared_expert_intermediate_size
            lp['gate_w'] = nrm(next(keys), (h, cfg.num_experts), jnp.float32)
            lp['experts_gate'] = nrm(next(keys), (cfg.num_experts, h, i))
            lp['experts_up'] = nrm(next(keys), (cfg.num_experts, h, i))
            lp['experts_down'] = nrm(next(keys), (cfg.num_experts, i, h))
            lp['shared_gate'] = nrm(next(keys), (h, si))
            lp['shared_up'] = nrm(next(keys), (h, si))
            lp['shared_down'] = nrm(next(keys), (si, h))
            lp['shared_gate_proj'] = nrm(next(keys), (h, 1))
        else:
            i = cfg.intermediate_size
            lp['mlp_gate'] = nrm(next(keys), (h, i))
            lp['mlp_up'] = nrm(next(keys), (h, i))
            lp['mlp_down'] = nrm(next(keys), (i, h))
        layers.append(lp)

    return {
        'embed': nrm(next(keys), (cfg.vocab_size, h), jnp.float32),
        'layers': layers,
        'final_norm': jnp.ones((1, h), jnp.float32),
        'lm_head': nrm(next(keys), (h, cfg.vocab_size)),
    }


def qwen2_moe_forward(params, input_ids, position_ids, cfg,
                      tm=64, tq=64, tkv=64):
    """Returns hidden_states [B, T, H] (matches Qwen2MoeForCausalLM.forward)."""
    b, t = input_ids.shape
    assert b == 1, "synthetic prefill path supports batch=1"
    assert cfg.num_attention_heads % cfg.num_key_value_heads == 0

    h = jnp.take(params['embed'], input_ids.reshape(-1), axis=0)      # [B*T, H]
    cos, sin = rope_cos_sin(position_ids.reshape(-1), cfg.head_dim,
                            cfg.rope_theta)                           # [T, D]
    scale = 1.0 / (cfg.head_dim ** 0.5)

    residual = jnp.zeros_like(h)   # first layer residual-add of zeros == no-op
    for layer_idx, lp in enumerate(params['layers']):
        is_moe = (layer_idx not in cfg.mlp_only_layers
                  and cfg.num_experts > 0
                  and (layer_idx + 1) % cfg.decoder_sparse_step == 0)

        # ---- fused: residual add + input RMSNorm + QKV + RoPE + Q-scale ----
        q, k, v, residual = norm_qkv_rope(h, residual, lp['input_ln'],
                                          lp['qkv_w'], lp['qkv_b'],
                                          cos, sin, cfg, scale, tm)

        # ---- flash-style causal GQA attention + o_proj + add + RMSNorm ----
        h, residual = attn_block(q, k, v, lp['o_w'], residual,
                                 lp['post_ln'], cfg, tq, tkv)

        # ---- MLP / sparse MoE block ----
        if is_moe:
            router_logits = jnp.dot(h, lp['gate_w'])                  # [N, E]
            routing = softmax_topk_routing(router_logits,
                                           cfg.num_experts_per_tok,
                                           cfg.norm_topk_prob,
                                           cfg.num_experts)
            routing_t = routing.T[:, :, None]                         # [E, N, 1]
            h = fused_moe(h, lp['experts_gate'], lp['experts_up'],
                          lp['experts_down'], routing_t,
                          lp['shared_gate'], lp['shared_up'],
                          lp['shared_down'], lp['shared_gate_proj'], tm)
        else:
            h = mlp(h, lp['mlp_gate'], lp['mlp_up'], lp['mlp_down'], tm)

    h = final_norm(h, residual, params['final_norm'], cfg.rms_norm_eps, tm)
    return h.reshape(b, t, cfg.hidden_size)


def get_logits(params, hidden_states, cfg, tm=64, tv=128):
    flat = hidden_states.reshape(-1, cfg.hidden_size)
    return linear_tiled(flat, params['lm_head'], tm, tv).reshape(
        *hidden_states.shape[:-1], cfg.vocab_size)


# --------------------------------------------------------------------------
if __name__ == "__main__":
    cfg = Config()
    params = init_params(jax.random.PRNGKey(0), cfg)

    B, T = 1, 128
    input_ids = jax.random.randint(jax.random.PRNGKey(1), (B, T), 0,
                                   cfg.vocab_size)
    position_ids = jnp.arange(T, dtype=jnp.int32)[None, :]

    fwd = jax.jit(lambda p, ids, pos: qwen2_moe_forward(p, ids, pos, cfg))
    hidden = fwd(params, input_ids, position_ids)
    logits = get_logits(params, hidden, cfg)
    jax.block_until_ready((hidden, logits))

    assert hidden.shape == (B, T, cfg.hidden_size)
    assert logits.shape == (B, T, cfg.vocab_size)
    print("KERNEL_OK")
</pallas_src>

<mosaic_0001>
module attributes {stable_mosaic.version = 11 : i64} {
  func.func @_norm_qkv_rope_kernel(%arg0: i32, %arg1: memref<64x128xf32, #tpu.memory_space<vmem>>, %arg2: memref<64x128xf32, #tpu.memory_space<vmem>>, %arg3: memref<1x128xf32, #tpu.memory_space<vmem>>, %arg4: memref<128x1024xbf16, #tpu.memory_space<vmem>>, %arg5: memref<1x1024xf32, #tpu.memory_space<vmem>>, %arg6: memref<64x128xf32, #tpu.memory_space<vmem>>, %arg7: memref<64x128xf32, #tpu.memory_space<vmem>>, %arg8: memref<64x512xbf16, #tpu.memory_space<vmem>>, %arg9: memref<64x256xbf16, #tpu.memory_space<vmem>>, %arg10: memref<64x256xbf16, #tpu.memory_space<vmem>>, %arg11: memref<64x128xf32, #tpu.memory_space<vmem>>) attributes {dimension_semantics = [#tpu.dimension_semantics<parallel>], iteration_bounds = array<i64: 2>, scalar_prefetch = 0 : i64, scratch_operands = 0 : i64, tpu.core_type = #tpu.core_type<tc>, window_params = [{transform_indices = @transform_0, window_bounds = array<i64: 64, 128>}, {transform_indices = @transform_1, window_bounds = array<i64: 64, 128>}, {pipeline_mode = #tpu.pipeline_mode<synchronous>, transform_indices = @transform_2, window_bounds = array<i64: 1, 128>}, {pipeline_mode = #tpu.pipeline_mode<synchronous>, transform_indices = @transform_3, window_bounds = array<i64: 128, 1024>}, {pipeline_mode = #tpu.pipeline_mode<synchronous>, transform_indices = @transform_4, window_bounds = array<i64: 1, 1024>}, {transform_indices = @transform_5, window_bounds = array<i64: 64, 128>}, {transform_indices = @transform_6, window_bounds = array<i64: 64, 128>}, {transform_indices = @transform_7, window_bounds = array<i64: 64, 512>}, {transform_indices = @transform_8, window_bounds = array<i64: 64, 256>}, {transform_indices = @transform_9, window_bounds = array<i64: 64, 256>}, {transform_indices = @transform_10, window_bounds = array<i64: 64, 128>}]} {
    %c0 = arith.constant 0 : index
    %c0_0 = arith.constant 0 : index
    %0 = vector.load %arg1[%c0, %c0_0] : memref<64x128xf32, #tpu.memory_space<vmem>>, vector<64x128xf32>
    %c0_1 = arith.constant 0 : index
    %c0_2 = arith.constant 0 : index
    %1 = vector.load %arg2[%c0_1, %c0_2] : memref<64x128xf32, #tpu.memory_space<vmem>>, vector<64x128xf32>
    %2 = arith.addf %0, %1 : vector<64x128xf32>
    %c0_3 = arith.constant 0 : index
    %c0_4 = arith.constant 0 : index
    %3 = vector.load %arg11[%c0_3, %c0_4] : memref<64x128xf32, #tpu.memory_space<vmem>>, vector<64x128xf32>
    tpu.vector_store %arg11[%c0_3, %c0_4], %2 {strides = array<i32>} : memref<64x128xf32, #tpu.memory_space<vmem>>, vector<64x128xf32>,
    %4 = arith.mulf %2, %2 : vector<64x128xf32>
    %cst = arith.constant dense<0.000000e+00> : vector<64xf32>
    %5 = vector.multi_reduction <add>, %4, %cst [1] : vector<64x128xf32> to vector<64xf32>
    %6 = vector.shape_cast %5 : vector<64xf32> to vector<64x1xf32>
    %cst_5 = arith.constant 1.280000e+02 : f32
    %7 = vector.broadcast %cst_5 : f32 to vector<64x1xf32>
    %8 = arith.divf %6, %7 : vector<64x1xf32>
    %cst_6 = arith.constant 9.99999997E-7 : f32
    %9 = vector.broadcast %cst_6 : f32 to vector<64x1xf32>
    %10 = arith.addf %8, %9 : vector<64x1xf32>
    %11 = math.rsqrt %10 : vector<64x1xf32>
    %12 = vector.broadcast %11 : vector<64x1xf32> to vector<64x128xf32>
    %13 = arith.mulf %2, %12 : vector<64x128xf32>
    %c0_7 = arith.constant 0 : index
    %c0_8 = arith.constant 0 : index
    %14 = vector.load %arg3[%c0_7, %c0_8] : memref<1x128xf32, #tpu.memory_space<vmem>>, vector<1x128xf32>
    %15 = vector.broadcast %14 : vector<1x128xf32> to vector<64x128xf32>
    %16 = arith.mulf %13, %15 : vector<64x128xf32>
    %17 = arith.truncf %16 : vector<64x128xf32> to vector<64x128xbf16>
    %c0_9 = arith.constant 0 : index
    %c0_10 = arith.constant 0 : index
    %18 = vector.load %arg4[%c0_9, %c0_10] : memref<128x1024xbf16, #tpu.memory_space<vmem>>, vector<128x1024xbf16>
    %cst_11 = arith.constant dense<0.000000e+00> : vector<64x1024xf32>
    %19 = tpu.matmul %17, %18, %cst_11 {dimension_numbers = #tpu.dot_dimension_numbers<[1], [0], [0], [1], [0, 0, 1, 1], [], []>} : vector<64x128xbf16>, vector<128x1024xbf16>, vector<64x1024xf32> -> vector<64x1024xf32>
    %c0_12 = arith.constant 0 : index
    %c0_13 = arith.constant 0 : index
    %20 = vector.load %arg5[%c0_12, %c0_13] : memref<1x1024xf32, #tpu.memory_space<vmem>>, vector<1x1024xf32>
    %21 = vector.broadcast %20 : vector<1x1024xf32> to vector<64x1024xf32>
    %22 = arith.addf %19, %21 : vector<64x1024xf32>
    %c0_14 = arith.constant 0 : index
    %c0_15 = arith.constant 0 : index
    %23 = vector.load %arg6[%c0_14, %c0_15] : memref<64x128xf32, #tpu.memory_space<vmem>>, vector<64x128xf32>
    %c0_16 = arith.constant 0 : index
    %c0_17 = arith.constant 0 : index
    %24 = vector.load %arg7[%c0_16, %c0_17] : memref<64x128xf32, #tpu.memory_space<vmem>>, vector<64x128xf32>
    %25 = tpu.iota {dimensions = array<i32: 1>} : vector<1x128xi32>
    %c64_i32 = arith.constant 64 : i32
    %26 = vector.broadcast %c64_i32 : i32 to vector<1x128xi32>
    %27 = arith.cmpi slt, %25, %26 : vector<1x128xi32>
    %cst_18 = arith.constant -1.000000e+00 : f32
    %cst_19 = arith.constant 1.000000e+00 : f32
    %28 = vector.broadcast %cst_18 : f32 to vector<1x128xf32>
    %29 = vector.broadcast %cst_19 : f32 to vector<1x128xf32>
    %30 = arith.select %27, %28, %29 : vector<1x128xi1>, vector<1x128xf32>
    %31 = vector.extract_strided_slice %22 {offsets = [0, 0], sizes = [64, 128], strides = [1, 1]} : vector<64x1024xf32> to vector<64x128xf32>
    %32 = arith.mulf %31, %23 : vector<64x128xf32>
    %c64_i32_20 = arith.constant 64 : i32
    %33 = tpu.dynamic_rotate %31 by %c64_i32_20 dim 1 : vector<64x128xf32>, i32 -> vector<64x128xf32>
    %34 = vector.broadcast %30 : vector<1x128xf32> to vector<64x128xf32>
    %35 = arith.mulf %33, %34 : vector<64x128xf32>
    %36 = arith.mulf %35, %24 : vector<64x128xf32>
    %37 = arith.addf %32, %36 : vector<64x128xf32>
    %cst_21 = arith.constant 0.0883883461 : f32
    %38 = vector.broadcast %cst_21 : f32 to vector<64x128xf32>
    %39 = arith.mulf %37, %38 : vector<64x128xf32>
    %40 = arith.truncf %39 : vector<64x128xf32> to vector<64x128xbf16>
    %c0_22 = arith.constant 0 : index
    %c0_23 = arith.constant 0 : index
    %41 = vector.load %arg8[%c0_22, %c0_23] : memref<64x512xbf16, #tpu.memory_space<vmem>>, vector<64x128xbf16>
    tpu.vector_store %arg8[%c0_22, %c0_23], %40 {strides = array<i32>} : memref<64x512xbf16, #tpu.memory_space<vmem>>, vector<64x128xbf16>,
    %42 = vector.extract_strided_slice %22 {offsets = [0, 128], sizes = [64, 128], strides = [1, 1]} : vector<64x1024xf32> to vector<64x128xf32>
    %43 = arith.mulf %42, %23 : vector<64x128xf32>
    %c64_i32_24 = arith.constant 64 : i32
    %44 = tpu.dynamic_rotate %42 by %c64_i32_24 dim 1 : vector<64x128xf32>, i32 -> vector<64x128xf32>
    %45 = vector.broadcast %30 : vector<1x128xf32> to vector<64x128xf32>
    %46 = arith.mulf %44, %45 : vector<64x128xf32>
    %47 = arith.mulf %46, %24 : vector<64x128xf32>
    %48 = arith.addf %43, %47 : vector<64x128xf32>
    %cst_25 = arith.constant 0.0883883461 : f32
    %49 = vector.broadcast %cst_25 : f32 to vector<64x128xf32>
    %50 = arith.mulf %48, %49 : vector<64x128xf32>
    %51 = arith.truncf %50 : vector<64x128xf32> to vector<64x128xbf16>
    %c0_26 = arith.constant 0 : index
    %c128 = arith.constant 128 : index
    %52 = vector.load %arg8[%c0_26, %c128] : memref<64x512xbf16, #tpu.memory_space<vmem>>, vector<64x128xbf16>
    tpu.vector_store %arg8[%c0_26, %c128], %51 {strides = array<i32>} : memref<64x512xbf16, #tpu.memory_space<vmem>>, vector<64x128xbf16>,
    %53 = vector.extract_strided_slice %22 {offsets = [0, 256], sizes = [64, 128], strides = [1, 1]} : vector<64x1024xf32> to vector<64x128xf32>
    %54 = arith.mulf %53, %23 : vector<64x128xf32>
    %c64_i32_27 = arith.constant 64 : i32
    %55 = tpu.dynamic_rotate %53 by %c64_i32_27 dim 1 : vector<64x128xf32>, i32 -> vector<64x128xf32>
    %56 = vector.broadcast %30 : vector<1x128xf32> to vector<64x128xf32>
    %57 = arith.mulf %55, %56 : vector<64x128xf32>
    %58 = arith.mulf %57, %24 : vector<64x128xf32>
    %59 = arith.addf %54, %58 : vector<64x128xf32>
    %cst_28 = arith.constant 0.0883883461 : f32
    %60 = vector.broadcast %cst_28 : f32 to vector<64x128xf32>
    %61 = arith.mulf %59, %60 : vector<64x128xf32>
    %62 = arith.truncf %61 : vector<64x128xf32> to vector<64x128xbf16>
    %c0_29 = arith.constant 0 : index
    %c256 = arith.constant 256 : index
    %63 = vector.load %arg8[%c0_29, %c256] : memref<64x512xbf16, #tpu.memory_space<vmem>>, vector<64x128xbf16>
    tpu.vector_store %arg8[%c0_29, %c256], %62 {strides = array<i32>} : memref<64x512xbf16, #tpu.memory_space<vmem>>, vector<64x128xbf16>,
    %64 = vector.extract_strided_slice %22 {offsets = [0, 384], sizes = [64, 128], strides = [1, 1]} : vector<64x1024xf32> to vector<64x128xf32>
    %65 = arith.mulf %64, %23 : vector<64x128xf32>
    %c64_i32_30 = arith.constant 64 : i32
    %66 = tpu.dynamic_rotate %64 by %c64_i32_30 dim 1 : vector<64x128xf32>, i32 -> vector<64x128xf32>
    %67 = vector.broadcast %30 : vector<1x128xf32> to vector<64x128xf32>
    %68 = arith.mulf %66, %67 : vector<64x128xf32>
    %69 = arith.mulf %68, %24 : vector<64x128xf32>
    %70 = arith.addf %65, %69 : vector<64x128xf32>
    %cst_31 = arith.constant 0.0883883461 : f32
    %71 = vector.broadcast %cst_31 : f32 to vector<64x128xf32>
    %72 = arith.mulf %70, %71 : vector<64x128xf32>
    %73 = arith.truncf %72 : vector<64x128xf32> to vector<64x128xbf16>
    %c0_32 = arith.constant 0 : index
    %c384 = arith.constant 384 : index
    %74 = vector.load %arg8[%c0_32, %c384] : memref<64x512xbf16, #tpu.memory_space<vmem>>, vector<64x128xbf16>
    tpu.vector_store %arg8[%c0_32, %c384], %73 {strides = array<i32>} : memref<64x512xbf16, #tpu.memory_space<vmem>>, vector<64x128xbf16>,
    %75 = vector.extract_strided_slice %22 {offsets = [0, 512], sizes = [64, 128], strides = [1, 1]} : vector<64x1024xf32> to vector<64x128xf32>
    %76 = arith.mulf %75, %23 : vector<64x128xf32>
    %c64_i32_33 = arith.constant 64 : i32
    %77 = tpu.dynamic_rotate %75 by %c64_i32_33 dim 1 : vector<64x128xf32>, i32 -> vector<64x128xf32>
    %78 = vector.broadcast %30 : vector<1x128xf32> to vector<64x128xf32>
    %79 = arith.mulf %77, %78 : vector<64x128xf32>
    %80 = arith.mulf %79, %24 : vector<64x128xf32>
    %81 = arith.addf %76, %80 : vector<64x128xf32>
    %82 = arith.truncf %81 : vector<64x128xf32> to vector<64x128xbf16>
    %c0_34 = arith.constant 0 : index
    %c0_35 = arith.constant 0 : index
    %83 = vector.load %arg9[%c0_34, %c0_35] : memref<64x256xbf16, #tpu.memory_space<vmem>>, vector<64x128xbf16>
    tpu.vector_store %arg9[%c0_34, %c0_35], %82 {strides = array<i32>} : memref<64x256xbf16, #tpu.memory_space<vmem>>, vector<64x128xbf16>,
    %84 = vector.extract_strided_slice %22 {offsets = [0, 768], sizes = [64, 128], strides = [1, 1]} : vector<64x1024xf32> to vector<64x128xf32>
    %85 = arith.truncf %84 : vector<64x128xf32> to vector<64x128xbf16>
    %c0_36 = arith.constant 0 : index
    %c0_37 = arith.constant 0 : index
    %86 = vector.load %arg10[%c0_36, %c0_37] : memref<64x256xbf16, #tpu.memory_space<vmem>>, vector<64x128xbf16>
    tpu.vector_store %arg10[%c0_36, %c0_37], %85 {strides = array<i32>} : memref<64x256xbf16, #tpu.memory_space<vmem>>, vector<64x128xbf16>,
    %87 = vector.extract_strided_slice %22 {offsets = [0, 640], sizes = [64, 128], strides = [1, 1]} : vector<64x1024xf32> to vector<64x128xf32>
    %88 = arith.mulf %87, %23 : vector<64x128xf32>
    %c64_i32_38 = arith.constant 64 : i32
    %89 = tpu.dynamic_rotate %87 by %c64_i32_38 dim 1 : vector<64x128xf32>, i32 -> vector<64x128xf32>
    %90 = vector.broadcast %30 : vector<1x128xf32> to vector<64x128xf32>
    %91 = arith.mulf %89, %90 : vector<64x128xf32>
    %92 = arith.mulf %91, %24 : vector<64x128xf32>
    %93 = arith.addf %88, %92 : vector<64x128xf32>
    %94 = arith.truncf %93 : vector<64x128xf32> to vector<64x128xbf16>
    %c0_39 = arith.constant 0 : index
    %c128_40 = arith.constant 128 : index
    %95 = vector.load %arg9[%c0_39, %c128_40] : memref<64x256xbf16, #tpu.memory_space<vmem>>, vector<64x128xbf16>
    tpu.vector_store %arg9[%c0_39, %c128_40], %94 {strides = array<i32>} : memref<64x256xbf16, #tpu.memory_space<vmem>>, vector<64x128xbf16>,
    %96 = vector.extract_strided_slice %22 {offsets = [0, 896], sizes = [64, 128], strides = [1, 1]} : vector<64x1024xf32> to vector<64x128xf32>
    %97 = arith.truncf %96 : vector<64x128xf32> to vector<64x128xbf16>
    %c0_41 = arith.constant 0 : index
    %c128_42 = arith.constant 128 : index
    %98 = vector.load %arg10[%c0_41, %c128_42] : memref<64x256xbf16, #tpu.memory_space<vmem>>, vector<64x128xbf16>
    tpu.vector_store %arg10[%c0_41, %c128_42], %97 {strides = array<i32>} : memref<64x256xbf16, #tpu.memory_space<vmem>>, vector<64x128xbf16>,
    return
  }
  func.func @transform_0(%arg0: i32) -> (i32, i32) {
    %c0_i32 = arith.constant 0 : i32
    %c0_i32_0 = arith.constant 0 : i32
    return %arg0, %c0_i32 : i32, i32
  }
  func.func @transform_1(%arg0: i32) -> (i32, i32) {
    %c0_i32 = arith.constant 0 : i32
    %c0_i32_0 = arith.constant 0 : i32
    return %arg0, %c0_i32 : i32, i32
  }
  func.func @transform_2(%arg0: i32) -> (i32, i32) {
    %c0_i32 = arith.constant 0 : i32
    %c0_i32_0 = arith.constant 0 : i32
    %c0_i32_1 = arith.constant 0 : i32
    return %c0_i32, %c0_i32_0 : i32, i32
  }
  func.func @transform_3(%arg0: i32) -> (i32, i32) {
    %c0_i32 = arith.constant 0 : i32
    %c0_i32_0 = arith.constant 0 : i32
    %c0_i32_1 = arith.constant 0 : i32
    return %c0_i32, %c0_i32_0 : i32, i32
  }
  func.func @transform_4(%arg0: i32) -> (i32, i32) {
    %c0_i32 = arith.constant 0 : i32
    %c0_i32_0 = arith.constant 0 : i32
    %c0_i32_1 = arith.constant 0 : i32
    return %c0_i32, %c0_i32_0 : i32, i32
  }
  func.func @transform_5(%arg0: i32) -> (i32, i32) {
    %c0_i32 = arith.constant 0 : i32
    %c0_i32_0 = arith.constant 0 : i32
    return %arg0, %c0_i32 : i32, i32
  }
  func.func @transform_6(%arg0: i32) -> (i32, i32) {
    %c0_i32 = arith.constant 0 : i32
    %c0_i32_0 = arith.constant 0 : i32
    return %arg0, %c0_i32 : i32, i32
  }
  func.func @transform_7(%arg0: i32) -> (i32, i32) {
    %c0_i32 = arith.constant 0 : i32
    %c0_i32_0 = arith.constant 0 : i32
    return %arg0, %c0_i32 : i32, i32
  }
  func.func @transform_8(%arg0: i32) -> (i32, i32) {
    %c0_i32 = arith.constant 0 : i32
    %c0_i32_0 = arith.constant 0 : i32
    return %arg0, %c0_i32 : i32, i32
  }
  func.func @transform_9(%arg0: i32) -> (i32, i32) {
    %c0_i32 = arith.constant 0 : i32
    %c0_i32_0 = arith.constant 0 : i32
    return %arg0, %c0_i32 : i32, i32
  }
  func.func @transform_10(%arg0: i32) -> (i32, i32) {
    %c0_i32 = arith.constant 0 : i32
    %c0_i32_0 = arith.constant 0 : i32
    return %arg0, %c0_i32 : i32, i32
  }
}

module attributes {stable_mosaic.version = 11 : i64} {
  func.func @_mlp_kernel(%arg0: i32, %arg1: memref<64x128xf32, #tpu.memory_space<vmem>>, %arg2: memref<128x256xbf16, #tpu.memory_space<vmem>>, %arg3: memref<128x256xbf16, #tpu.memory_space<vmem>>, %arg4: memref<256x128xbf16, #tpu.memory_space<vmem>>, %arg5: memref<64x128xf32, #tpu.memory_space<vmem>>) attributes {dimension_semantics = [#tpu.dimension_semantics<parallel>], iteration_bounds = array<i64: 2>, scalar_prefetch = 0 : i64, scratch_operands = 0 : i64, tpu.core_type = #tpu.core_type<tc>, window_params = [{transform_indices = @transform_0, window_bounds = array<i64: 64, 128>}, {pipeline_mode = #tpu.pipeline_mode<synchronous>, transform_indices = @transform_1, window_bounds = array<i64: 128, 256>}, {pipeline_mode = #tpu.pipeline_mode<synchronous>, transform_indices = @transform_2, window_bounds = array<i64: 128, 256>}, {pipeline_mode = #tpu.pipeline_mode<synchronous>, transform_indices = @transform_3, window_bounds = array<i64: 256, 128>}, {transform_indices = @transform_4, window_bounds = array<i64: 64, 128>}]} {
    %c0 = arith.constant 0 : index
    %c0_0 = arith.constant 0 : index
    %0 = vector.load %arg1[%c0, %c0_0] : memref<64x128xf32, #tpu.memory_space<vmem>>, vector<64x128xf32>
    %1 = arith.truncf %0 : vector<64x128xf32> to vector<64x128xbf16>
    %c0_1 = arith.constant 0 : index
    %c0_2 = arith.constant 0 : index
    %2 = vector.load %arg2[%c0_1, %c0_2] : memref<128x256xbf16, #tpu.memory_space<vmem>>, vector<128x256xbf16>
    %cst = arith.constant dense<0.000000e+00> : vector<64x256xf32>
    %3 = tpu.matmul %1, %2, %cst {dimension_numbers = #tpu.dot_dimension_numbers<[1], [0], [0], [1], [0, 0, 1, 1], [], []>} : vector<64x128xbf16>, vector<128x256xbf16>, vector<64x256xf32> -> vector<64x256xf32>
    %c0_3 = arith.constant 0 : index
    %c0_4 = arith.constant 0 : index
    %4 = vector.load %arg3[%c0_3, %c0_4] : memref<128x256xbf16, #tpu.memory_space<vmem>>, vector<128x256xbf16>
    %cst_5 = arith.constant dense<0.000000e+00> : vector<64x256xf32>
    %5 = tpu.matmul %1, %4, %cst_5 {dimension_numbers = #tpu.dot_dimension_numbers<[1], [0], [0], [1], [0, 0, 1, 1], [], []>} : vector<64x128xbf16>, vector<128x256xbf16>, vector<64x256xf32> -> vector<64x256xf32>
    %6 = arith.negf %3 : vector<64x256xf32>
    %7 = math.exp %6 : vector<64x256xf32>
    %cst_6 = arith.constant 1.000000e+00 : f32
    %8 = vector.broadcast %cst_6 : f32 to vector<64x256xf32>
    %9 = arith.addf %8, %7 : vector<64x256xf32>
    %10 = arith.divf %8, %9 : vector<64x256xf32>
    %11 = arith.mulf %3, %10 : vector<64x256xf32>
    %12 = arith.mulf %11, %5 : vector<64x256xf32>
    %13 = arith.truncf %12 : vector<64x256xf32> to vector<64x256xbf16>
    %c0_7 = arith.constant 0 : index
    %c0_8 = arith.constant 0 : index
    %14 = vector.load %arg4[%c0_7, %c0_8] : memref<256x128xbf16, #tpu.memory_space<vmem>>, vector<256x128xbf16>
    %cst_9 = arith.constant dense<0.000000e+00> : vector<64x128xf32>
    %15 = tpu.matmul %13, %14, %cst_9 {dimension_numbers = #tpu.dot_dimension_numbers<[1], [0], [0], [1], [0, 0, 1, 1], [], []>} : vector<64x256xbf16>, vector<256x128xbf16>, vector<64x128xf32> -> vector<64x128xf32>
    %c0_10 = arith.constant 0 : index
    %c0_11 = arith.constant 0 : index
    %16 = vector.load %arg5[%c0_10, %c0_11] : memref<64x128xf32, #tpu.memory_space<vmem>>, vector<64x128xf32>
    tpu.vector_store %arg5[%c0_10, %c0_11], %15 {strides = array<i32>} : memref<64x128xf32, #tpu.memory_space<vmem>>, vector<64x128xf32>,
    return
  }
  func.func @transform_0(%arg0: i32) -> (i32, i32) {
    %c0_i32 = arith.constant 0 : i32
    %c0_i32_0 = arith.constant 0 : i32
    return %arg0, %c0_i32 : i32, i32
  }
  func.func @transform_1(%arg0: i32) -> (i32, i32) {
    %c0_i32 = arith.constant 0 : i32
    %c0_i32_0 = arith.constant 0 : i32
    %c0_i32_1 = arith.constant 0 : i32
    return %c0_i32, %c0_i32_0 : i32, i32
  }
  func.func @transform_2(%arg0: i32) -> (i32, i32) {
    %c0_i32 = arith.constant 0 : i32
    %c0_i32_0 = arith.constant 0 : i32
    %c0_i32_1 = arith.constant 0 : i32
    return %c0_i32, %c0_i32_0 : i32, i32
  }
  func.func @transform_3(%arg0: i32) -> (i32, i32) {
    %c0_i32 = arith.constant 0 : i32
    %c0_i32_0 = arith.constant 0 : i32
    %c0_i32_1 = arith.constant 0 : i32
    return %c0_i32, %c0_i32_0 : i32, i32
  }
  func.func @transform_4(%arg0: i32) -> (i32, i32) {
    %c0_i32 = arith.constant 0 : i32
    %c0_i32_0 = arith.constant 0 : i32
    return %arg0, %c0_i32 : i32, i32
  }
}

module attributes {stable_mosaic.version = 11 : i64} {
  func.func @_flash_attn_kernel(%arg0: i32, %arg1: i32, %arg2: memref<64x512xbf16, #tpu.memory_space<vmem>>, %arg3: memref<64x256xbf16, #tpu.memory_space<vmem>>, %arg4: memref<64x256xbf16, #tpu.memory_space<vmem>>, %arg5: memref<512x128xbf16, #tpu.memory_space<vmem>>, %arg6: memref<64x128xf32, #tpu.memory_space<vmem>>, %arg7: memref<1x128xf32, #tpu.memory_space<vmem>>, %arg8: memref<64x128xf32, #tpu.memory_space<vmem>>, %arg9: memref<64x128xf32, #tpu.memory_space<vmem>>, %arg10: memref<4x64x1xf32, #tpu.memory_space<vmem>>, %arg11: memref<4x64x1xf32, #tpu.memory_space<vmem>>, %arg12: memref<4x64x128xf32, #tpu.memory_space<vmem>>) attributes {dimension_semantics = [#tpu.dimension_semantics<parallel>, #tpu.dimension_semantics<arbitrary>], iteration_bounds = array<i64: 2, 2>, scalar_prefetch = 0 : i64, scratch_operands = 3 : i64, tpu.core_type = #tpu.core_type<tc>, window_params = [{transform_indices = @transform_0, window_bounds = array<i64: 64, 512>}, {transform_indices = @transform_1, window_bounds = array<i64: 64, 256>}, {transform_indices = @transform_2, window_bounds = array<i64: 64, 256>}, {pipeline_mode = #tpu.pipeline_mode<synchronous>, transform_indices = @transform_3, window_bounds = array<i64: 512, 128>}, {transform_indices = @transform_4, window_bounds = array<i64: 64, 128>}, {pipeline_mode = #tpu.pipeline_mode<synchronous>, transform_indices = @transform_5, window_bounds = array<i64: 1, 128>}, {transform_indices = @transform_6, window_bounds = array<i64: 64, 128>}, {transform_indices = @transform_7, window_bounds = array<i64: 64, 128>}]} {
    %c0_i32 = arith.constant 0 : i32
    %0 = arith.cmpi eq, %arg1, %c0_i32 : i32
    %1 = arith.extui %0 : i1 to i32
    %cst = arith.constant -1.000000e+30 : f32
    %c0_i32_0 = arith.constant 0 : i32
    %2 = arith.cmpi ne, %1, %c0_i32_0 : i32
    scf.if %2 {
      %12 = vector.broadcast %cst : f32 to vector<4x64x1xf32>
      %c0 = arith.constant 0 : index
      %c0_5 = arith.constant 0 : index
      %c0_6 = arith.constant 0 : index
      %13 = vector.load %arg10[%c0, %c0_5, %c0_6] : memref<4x64x1xf32, #tpu.memory_space<vmem>>, vector<4x64x1xf32>
      tpu.vector_store %arg10[%c0, %c0_5, %c0_6], %12 {strides = array<i32>} : memref<4x64x1xf32, #tpu.memory_space<vmem>>, vector<4x64x1xf32>,
      %cst_7 = arith.constant 0.000000e+00 : f32
      %14 = vector.broadcast %cst_7 : f32 to vector<4x64x1xf32>
      %c0_8 = arith.constant 0 : index
      %c0_9 = arith.constant 0 : index
      %c0_10 = arith.constant 0 : index
      %15 = vector.load %arg11[%c0_8, %c0_9, %c0_10] : memref<4x64x1xf32, #tpu.memory_space<vmem>>, vector<4x64x1xf32>
      tpu.vector_store %arg11[%c0_8, %c0_9, %c0_10], %14 {strides = array<i32>} : memref<4x64x1xf32, #tpu.memory_space<vmem>>, vector<4x64x1xf32>,
      %cst_11 = arith.constant 0.000000e+00 : f32
      %16 = vector.broadcast %cst_11 : f32 to vector<4x64x128xf32>
      %c0_12 = arith.constant 0 : index
      %c0_13 = arith.constant 0 : index
      %c0_14 = arith.constant 0 : index
      %17 = vector.load %arg12[%c0_12, %c0_13, %c0_14] : memref<4x64x128xf32, #tpu.memory_space<vmem>>, vector<4x64x128xf32>
      tpu.vector_store %arg12[%c0_12, %c0_13, %c0_14], %16 {strides = array<i32>} : memref<4x64x128xf32, #tpu.memory_space<vmem>>, vector<4x64x128xf32>,
    } else {
    }
    %c64_i32 = arith.constant 64 : i32
    %3 = arith.muli %arg1, %c64_i32 : i32
    %c64_i32_1 = arith.constant 64 : i32
    %4 = arith.muli %arg0, %c64_i32_1 : i32
    %c63_i32 = arith.constant 63 : i32
    %5 = arith.addi %4, %c63_i32 : i32
    %6 = arith.cmpi sle, %3, %5 : i32
    %7 = arith.extui %6 : i1 to i32
    %cst_2 = arith.constant -1.000000e+30 : f32
    %c0_i32_3 = arith.constant 0 : i32
    %8 = arith.cmpi ne, %7, %c0_i32_3 : i32
    scf.if %8 {
      %c0 = arith.constant 0 : index
      %c0_5 = arith.constant 0 : index
      %12 = vector.load %arg2[%c0, %c0_5] : memref<64x512xbf16, #tpu.memory_space<vmem>>, vector<64x512xbf16>
      %c0_6 = arith.constant 0 : index
      %c0_7 = arith.constant 0 : index
      %13 = vector.load %arg3[%c0_6, %c0_7] : memref<64x256xbf16, #tpu.memory_space<vmem>>, vector<64x256xbf16>
      %c0_8 = arith.constant 0 : index
      %c0_9 = arith.constant 0 : index
      %14 = vector.load %arg4[%c0_8, %c0_9] : memref<64x256xbf16, #tpu.memory_space<vmem>>, vector<64x256xbf16>
      %c64_i32_10 = arith.constant 64 : i32
      %15 = arith.muli %arg0, %c64_i32_10 : i32
      %16 = tpu.iota {dimensions = array<i32: 0>} : vector<64x64xi32>
      %17 = vector.broadcast %15 : i32 to vector<64x64xi32>
      %18 = arith.addi %17, %16 : vector<64x64xi32>
      %c64_i32_11 = arith.constant 64 : i32
      %19 = arith.muli %arg1, %c64_i32_11 : i32
      %20 = tpu.iota {dimensions = array<i32: 1>} : vector<64x64xi32>
      %21 = vector.broadcast %19 : i32 to vector<64x64xi32>
      %22 = arith.addi %21, %20 : vector<64x64xi32>
      %23 = arith.cmpi sge, %18, %22 : vector<64x64xi32>
      %24 = vector.extract_strided_slice %13 {offsets = [0, 0], sizes = [64, 128], strides = [1, 1]} : vector<64x256xbf16> to vector<64x128xbf16>
      %25 = vector.extract_strided_slice %14 {offsets = [0, 0], sizes = [64, 128], strides = [1, 1]} : vector<64x256xbf16> to vector<64x128xbf16>
      %26 = vector.extract_strided_slice %12 {offsets = [0, 0], sizes = [64, 128], strides = [1, 1]} : vector<64x512xbf16> to vector<64x128xbf16>
      %cst_12 = arith.constant dense<0.000000e+00> : vector<64x64xf32>
      %27 = tpu.matmul %26, %24, %cst_12 {dimension_numbers = #tpu.dot_dimension_numbers<[1], [1], [0], [0], [0, 0, 1, 0], [], []>} : vector<64x128xbf16>, vector<64x128xbf16>, vector<64x64xf32> -> vector<64x64xf32>
      %28 = vector.broadcast %cst_2 : f32 to vector<64x64xf32>
      %29 = arith.select %23, %27, %28 : vector<64x64xi1>, vector<64x64xf32>
      %c0_13 = arith.constant 0 : index
      %c0_14 = arith.constant 0 : index
      %c0_15 = arith.constant 0 : index
      %30 = vector.load %arg10[%c0_13, %c0_14, %c0_15] : memref<4x64x1xf32, #tpu.memory_space<vmem>>, vector<1x64x1xf32>
      %31 = vector.shape_cast %30 : vector<1x64x1xf32> to vector<64x1xf32>
      %cst_16 = arith.constant dense<0xFF800000> : vector<64xf32>
      %32 = vector.multi_reduction <maximumf>, %29, %cst_16 [1] : vector<64x64xf32> to vector<64xf32>
      %33 = vector.shape_cast %32 : vector<64xf32> to vector<64x1xf32>
      %34 = arith.maximumf %31, %33 : vector<64x1xf32>
      %35 = arith.subf %31, %34 : vector<64x1xf32>
      %36 = math.exp %35 : vector<64x1xf32>
      %37 = vector.broadcast %34 : vector<64x1xf32> to vector<64x64xf32>
      %38 = arith.subf %29, %37 : vector<64x64xf32>
      %39 = math.exp %38 : vector<64x64xf32>
      %c0_17 = arith.constant 0 : index
      %c0_18 = arith.constant 0 : index
      %c0_19 = arith.constant 0 : index
      %40 = vector.load %arg11[%c0_17, %c0_18, %c0_19] : memref<4x64x1xf32, #tpu.memory_space<vmem>>, vector<1x64x1xf32>
      %41 = vector.shape_cast %40 : vector<1x64x1xf32> to vector<64x1xf32>
      %42 = arith.mulf %36, %41 : vector<64x1xf32>
      %cst_20 = arith.constant dense<0.000000e+00> : vector<64xf32>
      %43 = vector.multi_reduction <add>, %39, %cst_20 [1] : vector<64x64xf32> to vector<64xf32>
      %44 = vector.shape_cast %43 : vector<64xf32> to vector<64x1xf32>
      %45 = arith.addf %42, %44 : vector<64x1xf32>
      %c0_21 = arith.constant 0 : index
      %c0_22 = arith.constant 0 : index
      %c0_23 = arith.constant 0 : index
      %46 = vector.load %arg11[%c0_21, %c0_22, %c0_23] : memref<4x64x1xf32, #tpu.memory_space<vmem>>, vector<1x64x1xf32>
      %47 = vector.shape_cast %46 : vector<1x64x1xf32> to vector<64x1xf32>
      %48 = vector.shape_cast %45 : vector<64x1xf32> to vector<1x64x1xf32>
      tpu.vector_store %arg11[%c0_21, %c0_22, %c0_23], %48 {strides = array<i32>} : memref<4x64x1xf32, #tpu.memory_space<vmem>>, vector<1x64x1xf32>,
      %c0_24 = arith.constant 0 : index
      %c0_25 = arith.constant 0 : index
      %c0_26 = arith.constant 0 : index
      %49 = vector.load %arg12[%c0_24, %c0_25, %c0_26] : memref<4x64x128xf32, #tpu.memory_space<vmem>>, vector<1x64x128xf32>
      %50 = vector.shape_cast %49 : vector<1x64x128xf32> to vector<64x128xf32>
      %51 = vector.broadcast %36 : vector<64x1xf32> to vector<64x128xf32>
      %52 = arith.mulf %51, %50 : vector<64x128xf32>
      %53 = arith.truncf %39 : vector<64x64xf32> to vector<64x64xbf16>
      %cst_27 = arith.constant dense<0.000000e+00> : vector<64x128xf32>
      %54 = tpu.matmul %53, %25, %cst_27 {dimension_numbers = #tpu.dot_dimension_numbers<[1], [0], [0], [1], [0, 0, 1, 1], [], []>} : vector<64x64xbf16>, vector<64x128xbf16>, vector<64x128xf32> -> vector<64x128xf32>
      %55 = arith.addf %52, %54 : vector<64x128xf32>
      %c0_28 = arith.constant 0 : index
      %c0_29 = arith.constant 0 : index
      %c0_30 = arith.constant 0 : index
      %56 = vector.load %arg12[%c0_28, %c0_29, %c0_30] : memref<4x64x128xf32, #tpu.memory_space<vmem>>, vector<1x64x128xf32>
      %57 = vector.shape_cast %56 : vector<1x64x128xf32> to vector<64x128xf32>
      %58 = vector.shape_cast %55 : vector<64x128xf32> to vector<1x64x128xf32>
      tpu.vector_store %arg12[%c0_28, %c0_29, %c0_30], %58 {strides = array<i32>} : memref<4x64x128xf32, #tpu.memory_space<vmem>>, vector<1x64x128xf32>,
      %c0_31 = arith.constant 0 : index
      %c0_32 = arith.constant 0 : index
      %c0_33 = arith.constant 0 : index
      %59 = vector.load %arg10[%c0_31, %c0_32, %c0_33] : memref<4x64x1xf32, #tpu.memory_space<vmem>>, vector<1x64x1xf32>
      %60 = vector.shape_cast %59 : vector<1x64x1xf32> to vector<64x1xf32>
      %61 = vector.shape_cast %34 : vector<64x1xf32> to vector<1x64x1xf32>
      tpu.vector_store %arg10[%c0_31, %c0_32, %c0_33], %61 {strides = array<i32>} : memref<4x64x1xf32, #tpu.memory_space<vmem>>, vector<1x64x1xf32>,
      %62 = vector.extract_strided_slice %12 {offsets = [0, 128], sizes = [64, 128], strides = [1, 1]} : vector<64x512xbf16> to vector<64x128xbf16>
      %cst_34 = arith.constant dense<0.000000e+00> : vector<64x64xf32>
      %63 = tpu.matmul %62, %24, %cst_34 {dimension_numbers = #tpu.dot_dimension_numbers<[1], [1], [0], [0], [0, 0, 1, 0], [], []>} : vector<64x128xbf16>, vector<64x128xbf16>, vector<64x64xf32> -> vector<64x64xf32>
      %64 = vector.broadcast %cst_2 : f32 to vector<64x64xf32>
      %65 = arith.select %23, %63, %64 : vector<64x64xi1>, vector<64x64xf32>
      %c1 = arith.constant 1 : index
      %c0_35 = arith.constant 0 : index
      %c0_36 = arith.constant 0 : index
      %66 = vector.load %arg10[%c1, %c0_35, %c0_36] : memref<4x64x1xf32, #tpu.memory_space<vmem>>, vector<1x64x1xf32>
      %67 = vector.shape_cast %66 : vector<1x64x1xf32> to vector<64x1xf32>
      %cst_37 = arith.constant dense<0xFF800000> : vector<64xf32>
      %68 = vector.multi_reduction <maximumf>, %65, %cst_37 [1] : vector<64x64xf32> to vector<64xf32>
      %69 = vector.shape_cast %68 : vector<64xf32> to vector<64x1xf32>
      %70 = arith.maximumf %67, %69 : vector<64x1xf32>
      %71 = arith.subf %67, %70 : vector<64x1xf32>
      %72 = math.exp %71 : vector<64x1xf32>
      %73 = vector.broadcast %70 : vector<64x1xf32> to vector<64x64xf32>
      %74 = arith.subf %65, %73 : vector<64x64xf32>
      %75 = math.exp %74 : vector<64x64xf32>
      %c1_38 = arith.constant 1 : index
      %c0_39 = arith.constant 0 : index
      %c0_40 = arith.constant 0 : index
      %76 = vector.load %arg11[%c1_38, %c0_39, %c0_40] : memref<4x64x1xf32, #tpu.memory_space<vmem>>, vector<1x64x1xf32>
      %77 = vector.shape_cast %76 : vector<1x64x1xf32> to vector<64x1xf32>
      %78 = arith.mulf %72, %77 : vector<64x1xf32>
      %cst_41 = arith.constant dense<0.000000e+00> : vector<64xf32>
      %79 = vector.multi_reduction <add>, %75, %cst_41 [1] : vector<64x64xf32> to vector<64xf32>
      %80 = vector.shape_cast %79 : vector<64xf32> to vector<64x1xf32>
      %81 = arith.addf %78, %80 : vector<64x1xf32>
      %c1_42 = arith.constant 1 : index
      %c0_43 = arith.constant 0 : index
      %c0_44 = arith.constant 0 : index
      %82 = vector.load %arg11[%c1_42, %c0_43, %c0_44] : memref<4x64x1xf32, #tpu.memory_space<vmem>>, vector<1x64x1xf32>
      %83 = vector.shape_cast %82 : vector<1x64x1xf32> to vector<64x1xf32>
      %84 = vector.shape_cast %81 : vector<64x1xf32> to vector<1x64x1xf32>
      tpu.vector_store %arg11[%c1_42, %c0_43, %c0_44], %84 {strides = array<i32>} : memref<4x64x1xf32, #tpu.memory_space<vmem>>, vector<1x64x1xf32>,
      %c1_45 = arith.constant 1 : index
      %c0_46 = arith.constant 0 : index
      %c0_47 = arith.constant 0 : index
      %85 = vector.load %arg12[%c1_45, %c0_46, %c0_47] : memref<4x64x128xf32, #tpu.memory_space<vmem>>, vector<1x64x128xf32>
      %86 = vector.shape_cast %85 : vector<1x64x128xf32> to vector<64x128xf32>
      %87 = vector.broadcast %72 : vector<64x1xf32> to vector<64x128xf32>
      %88 = arith.mulf %87, %86 : vector<64x128xf32>
      %89 = arith.truncf %75 : vector<64x64xf32> to vector<64x64xbf16>
      %cst_48 = arith.constant dense<0.000000e+00> : vector<64x128xf32>
      %90 = tpu.matmul %89, %25, %cst_48 {dimension_numbers = #tpu.dot_dimension_numbers<[1], [0], [0], [1], [0, 0, 1, 1], [], []>} : vector<64x64xbf16>, vector<64x128xbf16>, vector<64x128xf32> -> vector<64x128xf32>
      %91 = arith.addf %88, %90 : vector<64x128xf32>
      %c1_49 = arith.constant 1 : index
      %c0_50 = arith.constant 0 : index
      %c0_51 = arith.constant 0 : index
      %92 = vector.load %arg12[%c1_49, %c0_50, %c0_51] : memref<4x64x128xf32, #tpu.memory_space<vmem>>, vector<1x64x128xf32>
      %93 = vector.shape_cast %92 : vector<1x64x128xf32> to vector<64x128xf32>
      %94 = vector.shape_cast %91 : vector<64x128xf32> to vector<1x64x128xf32>
      tpu.vector_store %arg12[%c1_49, %c0_50, %c0_51], %94 {strides = array<i32>} : memref<4x64x128xf32, #tpu.memory_space<vmem>>, vector<1x64x128xf32>,
      %c1_52 = arith.constant 1 : index
      %c0_53 = arith.constant 0 : index
      %c0_54 = arith.constant 0 : index
      %95 = vector.load %arg10[%c1_52, %c0_53, %c0_54] : memref<4x64x1xf32, #tpu.memory_space<vmem>>, vector<1x64x1xf32>
      %96 = vector.shape_cast %95 : vector<1x64x1xf32> to vector<64x1xf32>
      %97 = vector.shape_cast %70 : vector<64x1xf32> to vector<1x64x1xf32>
      tpu.vector_store %arg10[%c1_52, %c0_53, %c0_54], %97 {strides = array<i32>} : memref<4x64x1xf32, #tpu.memory_space<vmem>>, vector<1x64x1xf32>,
      %98 = vector.extract_strided_slice %13 {offsets = [0, 128], sizes = [64, 128], strides = [1, 1]} : vector<64x256xbf16> to vector<64x128xbf16>
      %99 = vector.extract_strided_slice %14 {offsets = [0, 128], sizes = [64, 128], strides = [1, 1]} : vector<64x256xbf16> to vector<64x128xbf16>
      %100 = vector.extract_strided_slice %12 {offsets = [0, 256], sizes = [64, 128], strides = [1, 1]} : vector<64x512xbf16> to vector<64x128xbf16>
      %cst_55 = arith.constant dense<0.000000e+00> : vector<64x64xf32>
      %101 = tpu.matmul %100, %98, %cst_55 {dimension_numbers = #tpu.dot_dimension_numbers<[1], [1], [0], [0], [0, 0, 1, 0], [], []>} : vector<64x128xbf16>, vector<64x128xbf16>, vector<64x64xf32> -> vector<64x64xf32>
      %102 = vector.broadcast %cst_2 : f32 to vector<64x64xf32>
      %103 = arith.select %23, %101, %102 : vector<64x64xi1>, vector<64x64xf32>
      %c2 = arith.constant 2 : index
      %c0_56 = arith.constant 0 : index
      %c0_57 = arith.constant 0 : index
      %104 = vector.load %arg10[%c2, %c0_56, %c0_57] : memref<4x64x1xf32, #tpu.memory_space<vmem>>, vector<1x64x1xf32>
      %105 = vector.shape_cast %104 : vector<1x64x1xf32> to vector<64x1xf32>
      %cst_58 = arith.constant dense<0xFF800000> : vector<64xf32>
      %106 = vector.multi_reduction <maximumf>, %103, %cst_58 [1] : vector<64x64xf32> to vector<64xf32>
      %107 = vector.shape_cast %106 : vector<64xf32> to vector<64x1xf32>
      %108 = arith.maximumf %105, %107 : vector<64x1xf32>
      %109 = arith.subf %105, %108 : vector<64x1xf32>
      %110 = math.exp %109 : vector<64x1xf32>
      %111 = vector.broadcast %108 : vector<64x1xf32> to vector<64x64xf32>
      %112 = arith.subf %103, %111 : vector<64x64xf32>
      %113 = math.exp %112 : vector<64x64xf32>
      %c2_59 = arith.constant 2 : index
      %c0_60 = arith.constant 0 : index
      %c0_61 = arith.constant 0 : index
      %114 = vector.load %arg11[%c2_59, %c0_60, %c0_61] : memref<4x64x1xf32, #tpu.memory_space<vmem>>, vector<1x64x1xf32>
      %115 = vector.shape_cast %114 : vector<1x64x1xf32> to vector<64x1xf32>
      %116 = arith.mulf %110, %115 : vector<64x1xf32>
      %cst_62 = arith.constant dense<0.000000e+00> : vector<64xf32>
      %117 = vector.multi_reduction <add>, %113, %cst_62 [1] : vector<64x64xf32> to vector<64xf32>
      %118 = vector.shape_cast %117 : vector<64xf32> to vector<64x1xf32>
      %119 = arith.addf %116, %118 : vector<64x1xf32>
      %c2_63 = arith.constant 2 : index
      %c0_64 = arith.constant 0 : index
      %c0_65 = arith.constant 0 : index
      %120 = vector.load %arg11[%c2_63, %c0_64, %c0_65] : memref<4x64x1xf32, #tpu.memory_space<vmem>>, vector<1x64x1xf32>
      %121 = vector.shape_cast %120 : vector<1x64x1xf32> to vector<64x1xf32>
      %122 = vector.shape_cast %119 : vector<64x1xf32> to vector<1x64x1xf32>
      tpu.vector_store %arg11[%c2_63, %c0_64, %c0_65], %122 {strides = array<i32>} : memref<4x64x1xf32, #tpu.memory_space<vmem>>, vector<1x64x1xf32>,
      %c2_66 = arith.constant 2 : index
      %c0_67 = arith.constant 0 : index
      %c0_68 = arith.constant 0 : index
      %123 = vector.load %arg12[%c2_66, %c0_67, %c0_68] : memref<4x64x128xf32, #tpu.memory_space<vmem>>, vector<1x64x128xf32>
      %124 = vector.shape_cast %123 : vector<1x64x128xf32> to vector<64x128xf32>
      %125 = vector.broadcast %110 : vector<64x1xf32> to vector<64x128xf32>
      %126 = arith.mulf %125, %124 : vector<64x128xf32>
      %127 = arith.truncf %113 : vector<64x64xf32> to vector<64x64xbf16>
      %cst_69 = arith.constant dense<0.000000e+00> : vector<64x128xf32>
      %128 = tpu.matmul %127, %99, %cst_69 {dimension_numbers = #tpu.dot_dimension_numbers<[1], [0], [0], [1], [0, 0, 1, 1], [], []>} : vector<64x64xbf16>, vector<64x128xbf16>, vector<64x128xf32> -> vector<64x128xf32>
      %129 = arith.addf %126, %128 : vector<64x128xf32>
      %c2_70 = arith.constant 2 : index
      %c0_71 = arith.constant 0 : index
      %c0_72 = arith.constant 0 : index
      %130 = vector.load %arg12[%c2_70, %c0_71, %c0_72] : memref<4x64x128xf32, #tpu.memory_space<vmem>>, vector<1x64x128xf32>
      %131 = vector.shape_cast %130 : vector<1x64x128xf32> to vector<64x128xf32>
      %132 = vector.shape_cast %129 : vector<64x128xf32> to vector<1x64x128xf32>
      tpu.vector_store %arg12[%c2_70, %c0_71, %c0_72], %132 {strides = array<i32>} : memref<4x64x128xf32, #tpu.memory_space<vmem>>, vector<1x64x128xf32>,
      %c2_73 = arith.constant 2 : index
      %c0_74 = arith.constant 0 : index
      %c0_75 = arith.constant 0 : index
      %133 = vector.load %arg10[%c2_73, %c0_74, %c0_75] : memref<4x64x1xf32, #tpu.memory_space<vmem>>, vector<1x64x1xf32>
      %134 = vector.shape_cast %133 : vector<1x64x1xf32> to vector<64x1xf32>
      %135 = vector.shape_cast %108 : vector<64x1xf32> to vector<1x64x1xf32>
      tpu.vector_store %arg10[%c2_73, %c0_74, %c0_75], %135 {strides = array<i32>} : memref<4x64x1xf32, #tpu.memory_space<vmem>>, vector<1x64x1xf32>,
      %136 = vector.extract_strided_slice %12 {offsets = [0, 384], sizes = [64, 128], strides = [1, 1]} : vector<64x512xbf16> to vector<64x128xbf16>
      %cst_76 = arith.constant dense<0.000000e+00> : vector<64x64xf32>
      %137 = tpu.matmul %136, %98, %cst_76 {dimension_numbers = #tpu.dot_dimension_numbers<[1], [1], [0], [0], [0, 0, 1, 0], [], []>} : vector<64x128xbf16>, vector<64x128xbf16>, vector<64x64xf32> -> vector<64x64xf32>
      %138 = vector.broadcast %cst_2 : f32 to vector<64x64xf32>
      %139 = arith.select %23, %137, %138 : vector<64x64xi1>, vector<64x64xf32>
      %c3 = arith.constant 3 : index
      %c0_77 = arith.constant 0 : index
      %c0_78 = arith.constant 0 : index
      %140 = vector.load %arg10[%c3, %c0_77, %c0_78] : memref<4x64x1xf32, #tpu.memory_space<vmem>>, vector<1x64x1xf32>
      %141 = vector.shape_cast %140 : vector<1x64x1xf32> to vector<64x1xf32>
      %cst_79 = arith.constant dense<0xFF800000> : vector<64xf32>
      %142 = vector.multi_reduction <maximumf>, %139, %cst_79 [1] : vector<64x64xf32> to vector<64xf32>
      %143 = vector.shape_cast %142 : vector<64xf32> to vector<64x1xf32>
      %144 = arith.maximumf %141, %143 : vector<64x1xf32>
      %145 = arith.subf %141, %144 : vector<64x1xf32>
      %146 = math.exp %145 : vector<64x1xf32>
      %147 = vector.broadcast %144 : vector<64x1xf32> to vector<64x64xf32>
      %148 = arith.subf %139, %147 : vector<64x64xf32>
      %149 = math.exp %148 : vector<64x64xf32>
      %c3_80 = arith.constant 3 : index
      %c0_81 = arith.constant 0 : index
      %c0_82 = arith.constant 0 : index
      %150 = vector.load %arg11[%c3_80, %c0_81, %c0_82] : memref<4x64x1xf32, #tpu.memory_space<vmem>>, vector<1x64x1xf32>
      %151 = vector.shape_cast %150 : vector<1x64x1xf32> to vector<64x1xf32>
      %152 = arith.mulf %146, %151 : vector<64x1xf32>
      %cst_83 = arith.constant dense<0.000000e+00> : vector<64xf32>
      %153 = vector.multi_reduction <add>, %149, %cst_83 [1] : vector<64x64xf32> to vector<64xf32>
      %154 = vector.shape_cast %153 : vector<64xf32> to vector<64x1xf32>
      %155 = arith.addf %152, %154 : vector<64x1xf32>
      %c3_84 = arith.constant 3 : index
      %c0_85 = arith.constant 0 : index
      %c0_86 = arith.constant 0 : index
      %156 = vector.load %arg11[%c3_84, %c0_85, %c0_86] : memref<4x64x1xf32, #tpu.memory_space<vmem>>, vector<1x64x1xf32>
      %157 = vector.shape_cast %156 : vector<1x64x1xf32> to vector<64x1xf32>
      %158 = vector.shape_cast %155 : vector<64x1xf32> to vector<1x64x1xf32>
      tpu.vector_store %arg11[%c3_84, %c0_85, %c0_86], %158 {strides = array<i32>} : memref<4x64x1xf32, #tpu.memory_space<vmem>>, vector<1x64x1xf32>,
      %c3_87 = arith.constant 3 : index
      %c0_88 = arith.constant 0 : index
      %c0_89 = arith.constant 0 : index
      %159 = vector.load %arg12[%c3_87, %c0_88, %c0_89] : memref<4x64x128xf32, #tpu.memory_space<vmem>>, vector<1x64x128xf32>
      %160 = vector.shape_cast %159 : vector<1x64x128xf32> to vector<64x128xf32>
      %161 = vector.broadcast %146 : vector<64x1xf32> to vector<64x128xf32>
      %162 = arith.mulf %161, %160 : vector<64x128xf32>
      %163 = arith.truncf %149 : vector<64x64xf32> to vector<64x64xbf16>
      %cst_90 = arith.constant dense<0.000000e+00> : vector<64x128xf32>
      %164 = tpu.matmul %163, %99, %cst_90 {dimension_numbers = #tpu.dot_dimension_numbers<[1], [0], [0], [1], [0, 0, 1, 1], [], []>} : vector<64x64xbf16>, vector<64x128xbf16>, vector<64x128xf32> -> vector<64x128xf32>
      %165 = arith.addf %162, %164 : vector<64x128xf32>
      %c3_91 = arith.constant 3 : index
      %c0_92 = arith.constant 0 : index
      %c0_93 = arith.constant 0 : index
      %166 = vector.load %arg12[%c3_91, %c0_92, %c0_93] : memref<4x64x128xf32, #tpu.memory_space<vmem>>, vector<1x64x128xf32>
      %167 = vector.shape_cast %166 : vector<1x64x128xf32> to vector<64x128xf32>
      %168 = vector.shape_cast %165 : vector<64x128xf32> to vector<1x64x128xf32>
      tpu.vector_store %arg12[%c3_91, %c0_92, %c0_93], %168 {strides = array<i32>} : memref<4x64x128xf32, #tpu.memory_space<vmem>>, vector<1x64x128xf32>,
      %c3_94 = arith.constant 3 : index
      %c0_95 = arith.constant 0 : index
      %c0_96 = arith.constant 0 : index
      %169 = vector.load %arg10[%c3_94, %c0_95, %c0_96] : memref<4x64x1xf32, #tpu.memory_space<vmem>>, vector<1x64x1xf32>
      %170 = vector.shape_cast %169 : vector<1x64x1xf32> to vector<64x1xf32>
      %171 = vector.shape_cast %144 : vector<64x1xf32> to vector<1x64x1xf32>
      tpu.vector_store %arg10[%c3_94, %c0_95, %c0_96], %171 {strides = array<i32>} : memref<4x64x1xf32, #tpu.memory_space<vmem>>, vector<1x64x1xf32>,
    } else {
    }
    %c1_i32 = arith.constant 1 : i32
    %9 = arith.cmpi eq, %arg1, %c1_i32 : i32
    %10 = arith.extui %9 : i1 to i32
    %c0_i32_4 = arith.constant 0 : i32
    %11 = arith.cmpi ne, %10, %c0_i32_4 : i32
    scf.if %11 {
      %cst_5 = arith.constant 0.000000e+00 : f32
      %12 = vector.broadcast %cst_5 : f32 to vector<64x128xf32>
      %c0 = arith.constant 0 : index
      %c0_6 = arith.constant 0 : index
      %c0_7 = arith.constant 0 : index
      %13 = vector.load %arg12[%c0, %c0_6, %c0_7] : memref<4x64x128xf32, #tpu.memory_space<vmem>>, vector<1x64x128xf32>
      %14 = vector.shape_cast %13 : vector<1x64x128xf32> to vector<64x128xf32>
      %c0_8 = arith.constant 0 : index
      %c0_9 = arith.constant 0 : index
      %c0_10 = arith.constant 0 : index
      %15 = vector.load %arg11[%c0_8, %c0_9, %c0_10] : memref<4x64x1xf32, #tpu.memory_space<vmem>>, vector<1x64x1xf32>
      %16 = vector.shape_cast %15 : vector<1x64x1xf32> to vector<64x1xf32>
      %17 = tpu.reciprocal %16 {approx = true} : vector<64x1xf32> -> vector<64x1xf32>
      %18 = vector.broadcast %17 : vector<64x1xf32> to vector<64x128xf32>
      %19 = arith.mulf %14, %18 : vector<64x128xf32>
      %20 = arith.truncf %19 : vector<64x128xf32> to vector<64x128xbf16>
      %c0_11 = arith.constant 0 : index
      %c0_12 = arith.constant 0 : index
      %21 = vector.load %arg5[%c0_11, %c0_12] : memref<512x128xbf16, #tpu.memory_space<vmem>>, vector<128x128xbf16>
      %cst_13 = arith.constant dense<0.000000e+00> : vector<64x128xf32>
      %22 = tpu.matmul %20, %21, %cst_13 {dimension_numbers = #tpu.dot_dimension_numbers<[1], [0], [0], [1], [0, 0, 1, 1], [], []>} : vector<64x128xbf16>, vector<128x128xbf16>, vector<64x128xf32> -> vector<64x128xf32>
      %23 = arith.addf %12, %22 : vector<64x128xf32>
      %c1 = arith.constant 1 : index
      %c0_14 = arith.constant 0 : index
      %c0_15 = arith.constant 0 : index
      %24 = vector.load %arg12[%c1, %c0_14, %c0_15] : memref<4x64x128xf32, #tpu.memory_space<vmem>>, vector<1x64x128xf32>
      %25 = vector.shape_cast %24 : vector<1x64x128xf32> to vector<64x128xf32>
      %c1_16 = arith.constant 1 : index
      %c0_17 = arith.constant 0 : index
      %c0_18 = arith.constant 0 : index
      %26 = vector.load %arg11[%c1_16, %c0_17, %c0_18] : memref<4x64x1xf32, #tpu.memory_space<vmem>>, vector<1x64x1xf32>
      %27 = vector.shape_cast %26 : vector<1x64x1xf32> to vector<64x1xf32>
      %28 = tpu.reciprocal %27 {approx = true} : vector<64x1xf32> -> vector<64x1xf32>
      %29 = vector.broadcast %28 : vector<64x1xf32> to vector<64x128xf32>
      %30 = arith.mulf %25, %29 : vector<64x128xf32>
      %31 = arith.truncf %30 : vector<64x128xf32> to vector<64x128xbf16>
      %c128 = arith.constant 128 : index
      %c0_19 = arith.constant 0 : index
      %32 = vector.load %arg5[%c128, %c0_19] : memref<512x128xbf16, #tpu.memory_space<vmem>>, vector<128x128xbf16>
      %cst_20 = arith.constant dense<0.000000e+00> : vector<64x128xf32>
      %33 = tpu.matmul %31, %32, %cst_20 {dimension_numbers = #tpu.dot_dimension_numbers<[1], [0], [0], [1], [0, 0, 1, 1], [], []>} : vector<64x128xbf16>, vector<128x128xbf16>, vector<64x128xf32> -> vector<64x128xf32>
      %34 = arith.addf %23, %33 : vector<64x128xf32>
      %c2 = arith.constant 2 : index
      %c0_21 = arith.constant 0 : index
      %c0_22 = arith.constant 0 : index
      %35 = vector.load %arg12[%c2, %c0_21, %c0_22] : memref<4x64x128xf32, #tpu.memory_space<vmem>>, vector<1x64x128xf32>
      %36 = vector.shape_cast %35 : vector<1x64x128xf32> to vector<64x128xf32>
      %c2_23 = arith.constant 2 : index
      %c0_24 = arith.constant 0 : index
      %c0_25 = arith.constant 0 : index
      %37 = vector.load %arg11[%c2_23, %c0_24, %c0_25] : memref<4x64x1xf32, #tpu.memory_space<vmem>>, vector<1x64x1xf32>
      %38 = vector.shape_cast %37 : vector<1x64x1xf32> to vector<64x1xf32>
      %39 = tpu.reciprocal %38 {approx = true} : vector<64x1xf32> -> vector<64x1xf32>
      %40 = vector.broadcast %39 : vector<64x1xf32> to vector<64x128xf32>
      %41 = arith.mulf %36, %40 : vector<64x128xf32>
      %42 = arith.truncf %41 : vector<64x128xf32> to vector<64x128xbf16>
      %c256 = arith.constant 256 : index
      %c0_26 = arith.constant 0 : index
      %43 = vector.load %arg5[%c256, %c0_26] : memref<512x128xbf16, #tpu.memory_space<vmem>>, vector<128x128xbf16>
      %cst_27 = arith.constant dense<0.000000e+00> : vector<64x128xf32>
      %44 = tpu.matmul %42, %43, %cst_27 {dimension_numbers = #tpu.dot_dimension_numbers<[1], [0], [0], [1], [0, 0, 1, 1], [], []>} : vector<64x128xbf16>, vector<128x128xbf16>, vector<64x128xf32> -> vector<64x128xf32>
      %45 = arith.addf %34, %44 : vector<64x128xf32>
      %c3 = arith.constant 3 : index
      %c0_28 = arith.constant 0 : index
      %c0_29 = arith.constant 0 : index
      %46 = vector.load %arg12[%c3, %c0_28, %c0_29] : memref<4x64x128xf32, #tpu.memory_space<vmem>>, vector<1x64x128xf32>
      %47 = vector.shape_cast %46 : vector<1x64x128xf32> to vector<64x128xf32>
      %c3_30 = arith.constant 3 : index
      %c0_31 = arith.constant 0 : index
      %c0_32 = arith.constant 0 : index
      %48 = vector.load %arg11[%c3_30, %c0_31, %c0_32] : memref<4x64x1xf32, #tpu.memory_space<vmem>>, vector<1x64x1xf32>
      %49 = vector.shape_cast %48 : vector<1x64x1xf32> to vector<64x1xf32>
      %50 = tpu.reciprocal %49 {approx = true} : vector<64x1xf32> -> vector<64x1xf32>
      %51 = vector.broadcast %50 : vector<64x1xf32> to vector<64x128xf32>
      %52 = arith.mulf %47, %51 : vector<64x128xf32>
      %53 = arith.truncf %52 : vector<64x128xf32> to vector<64x128xbf16>
      %c384 = arith.constant 384 : index
      %c0_33 = arith.constant 0 : index
      %54 = vector.load %arg5[%c384, %c0_33] : memref<512x128xbf16, #tpu.memory_space<vmem>>, vector<128x128xbf16>
      %cst_34 = arith.constant dense<0.000000e+00> : vector<64x128xf32>
      %55 = tpu.matmul %53, %54, %cst_34 {dimension_numbers = #tpu.dot_dimension_numbers<[1], [0], [0], [1], [0, 0, 1, 1], [], []>} : vector<64x128xbf16>, vector<128x128xbf16>, vector<64x128xf32> -> vector<64x128xf32>
      %56 = arith.addf %45, %55 : vector<64x128xf32>
      %c0_35 = arith.constant 0 : index
      %c0_36 = arith.constant 0 : index
      %57 = vector.load %arg6[%c0_35, %c0_36] : memref<64x128xf32, #tpu.memory_space<vmem>>, vector<64x128xf32>
      %58 = arith.addf %56, %57 : vector<64x128xf32>
      %c0_37 = arith.constant 0 : index
      %c0_38 = arith.constant 0 : index
      %59 = vector.load %arg9[%c0_37, %c0_38] : memref<64x128xf32, #tpu.memory_space<vmem>>, vector<64x128xf32>
      tpu.vector_store %arg9[%c0_37, %c0_38], %58 {strides = array<i32>} : memref<64x128xf32, #tpu.memory_space<vmem>>, vector<64x128xf32>,
      %60 = arith.mulf %58, %58 : vector<64x128xf32>
      %cst_39 = arith.constant dense<0.000000e+00> : vector<64xf32>
      %61 = vector.multi_reduction <add>, %60, %cst_39 [1] : vector<64x128xf32> to vector<64xf32>
      %62 = vector.shape_cast %61 : vector<64xf32> to vector<64x1xf32>
      %cst_40 = arith.constant 1.280000e+02 : f32
      %63 = vector.broadcast %cst_40 : f32 to vector<64x1xf32>
      %64 = arith.divf %62, %63 : vector<64x1xf32>
      %cst_41 = arith.constant 9.99999997E-7 : f32
      %65 = vector.broadcast %cst_41 : f32 to vector<64x1xf32>
      %66 = arith.addf %64, %65 : vector<64x1xf32>
      %67 = math.rsqrt %66 : vector<64x1xf32>
      %68 = vector.broadcast %67 : vector<64x1xf32> to vector<64x128xf32>
      %69 = arith.mulf %58, %68 : vector<64x128xf32>
      %c0_42 = arith.constant 0 : index
      %c0_43 = arith.constant 0 : index
      %70 = vector.load %arg7[%c0_42, %c0_43] : memref<1x128xf32, #tpu.memory_space<vmem>>, vector<1x128xf32>
      %71 = vector.broadcast %70 : vector<1x128xf32> to vector<64x128xf32>
      %72 = arith.mulf %69, %71 : vector<64x128xf32>
      %c0_44 = arith.constant 0 : index
      %c0_45 = arith.constant 0 : index
      %73 = vector.load %arg8[%c0_44, %c0_45] : memref<64x128xf32, #tpu.memory_space<vmem>>, vector<64x128xf32>
      tpu.vector_store %arg8[%c0_44, %c0_45], %72 {strides = array<i32>} : memref<64x128xf32, #tpu.memory_space<vmem>>, vector<64x128xf32>,
    } else {
    }
    return
  }
  func.func @transform_0(%arg0: i32, %arg1: i32) -> (i32, i32) {
    %c0_i32 = arith.constant 0 : i32
    %c0_i32_0 = arith.constant 0 : i32
    return %arg0, %c0_i32 : i32, i32
  }
  func.func @transform_1(%arg0: i32, %arg1: i32) -> (i32, i32) {
    %c0_i32 = arith.constant 0 : i32
    %c0_i32_0 = arith.constant 0 : i32
    return %arg1, %c0_i32 : i32, i32
  }
  func.func @transform_2(%arg0: i32, %arg1: i32) -> (i32, i32) {
    %c0_i32 = arith.constant 0 : i32
    %c0_i32_0 = arith.constant 0 : i32
    return %arg1, %c0_i32 : i32, i32
  }
  func.func @transform_3(%arg0: i32, %arg1: i32) -> (i32, i32) {
    %c0_i32 = arith.constant 0 : i32
    %c0_i32_0 = arith.constant 0 : i32
    %c0_i32_1 = arith.constant 0 : i32
    return %c0_i32, %c0_i32_0 : i32, i32
  }
  func.func @transform_4(%arg0: i32, %arg1: i32) -> (i32, i32) {
    %c0_i32 = arith.constant 0 : i32
    %c0_i32_0 = arith.constant 0 : i32
    return %arg0, %c0_i32 : i32, i32
  }
  func.func @transform_5(%arg0: i32, %arg1: i32) -> (i32, i32) {
    %c0_i32 = arith.constant 0 : i32
    %c0_i32_0 = arith.constant 0 : i32
    %c0_i32_1 = arith.constant 0 : i32
    return %c0_i32, %c0_i32_0 : i32, i32
  }
  func.func @transform_6(%arg0: i32, %arg1: i32) -> (i32, i32) {
    %c0_i32 = arith.constant 0 : i32
    %c0_i32_0 = arith.constant 0 : i32
    return %arg0, %c0_i32 : i32, i32
  }
  func.func @transform_7(%arg0: i32, %arg1: i32) -> (i32, i32) {
    %c0_i32 = arith.constant 0 : i32
    %c0_i32_0 = arith.constant 0 : i32
    return %arg0, %c0_i32 : i32, i32
  }
}

module attributes {stable_mosaic.version = 11 : i64} {
  func.func @_moe_kernel(%arg0: i32, %arg1: i32, %arg2: memref<64x128xf32, #tpu.memory_space<vmem>>, %arg3: memref<1x128x128xbf16, #tpu.memory_space<vmem>>, %arg4: memref<1x128x128xbf16, #tpu.memory_space<vmem>>, %arg5: memref<1x128x128xbf16, #tpu.memory_space<vmem>>, %arg6: memref<1x64x1xf32, #tpu.memory_space<vmem>>, %arg7: memref<128x128xbf16, #tpu.memory_space<vmem>>, %arg8: memref<128x128xbf16, #tpu.memory_space<vmem>>, %arg9: memref<128x128xbf16, #tpu.memory_space<vmem>>, %arg10: memref<128x1xbf16, #tpu.memory_space<vmem>>, %arg11: memref<64x128xf32, #tpu.memory_space<vmem>>) attributes {dimension_semantics = [#tpu.dimension_semantics<parallel>, #tpu.dimension_semantics<arbitrary>], iteration_bounds = array<i64: 2, 4>, scalar_prefetch = 0 : i64, scratch_operands = 0 : i64, tpu.core_type = #tpu.core_type<tc>, window_params = [{transform_indices = @transform_0, window_bounds = array<i64: 64, 128>}, {transform_indices = @transform_1, window_bounds = array<i64: 1, 128, 128>}, {transform_indices = @transform_2, window_bounds = array<i64: 1, 128, 128>}, {transform_indices = @transform_3, window_bounds = array<i64: 1, 128, 128>}, {transform_indices = @transform_4, window_bounds = array<i64: 1, 64, 1>}, {pipeline_mode = #tpu.pipeline_mode<synchronous>, transform_indices = @transform_5, window_bounds = array<i64: 128, 128>}, {pipeline_mode = #tpu.pipeline_mode<synchronous>, transform_indices = @transform_6, window_bounds = array<i64: 128, 128>}, {pipeline_mode = #tpu.pipeline_mode<synchronous>, transform_indices = @transform_7, window_bounds = array<i64: 128, 128>}, {pipeline_mode = #tpu.pipeline_mode<synchronous>, transform_indices = @transform_8, window_bounds = array<i64: 128, 1>}, {transform_indices = @transform_9, window_bounds = array<i64: 64, 128>}]} {
    %c0 = arith.constant 0 : index
    %c0_0 = arith.constant 0 : index
    %0 = vector.load %arg2[%c0, %c0_0] : memref<64x128xf32, #tpu.memory_space<vmem>>, vector<64x128xf32>
    %1 = arith.truncf %0 : vector<64x128xf32> to vector<64x128xbf16>
    %c0_i32 = arith.constant 0 : i32
    %2 = arith.cmpi eq, %arg1, %c0_i32 : i32
    %3 = arith.extui %2 : i1 to i32
    %c0_i32_1 = arith.constant 0 : i32
    %4 = arith.cmpi ne, %3, %c0_i32_1 : i32
    scf.if %4 {
      %cst_22 = arith.constant 0.000000e+00 : f32
      %32 = vector.broadcast %cst_22 : f32 to vector<64x128xf32>
      %c0_23 = arith.constant 0 : index
      %c0_24 = arith.constant 0 : index
      %33 = vector.load %arg11[%c0_23, %c0_24] : memref<64x128xf32, #tpu.memory_space<vmem>>, vector<64x128xf32>
      tpu.vector_store %arg11[%c0_23, %c0_24], %32 {strides = array<i32>} : memref<64x128xf32, #tpu.memory_space<vmem>>, vector<64x128xf32>,
    } else {
    }
    %c0_2 = arith.constant 0 : index
    %c0_3 = arith.constant 0 : index
    %c0_4 = arith.constant 0 : index
    %5 = vector.load %arg3[%c0_2, %c0_3, %c0_4] : memref<1x128x128xbf16, #tpu.memory_space<vmem>>, vector<1x128x128xbf16>
    %6 = vector.shape_cast %5 : vector<1x128x128xbf16> to vector<128x128xbf16>
    %cst = arith.constant dense<0.000000e+00> : vector<64x128xf32>
    %7 = tpu.matmul %1, %6, %cst {dimension_numbers = #tpu.dot_dimension_numbers<[1], [0], [0], [1], [0, 0, 1, 1], [], []>} : vector<64x128xbf16>, vector<128x128xbf16>, vector<64x128xf32> -> vector<64x128xf32>
    %c0_5 = arith.constant 0 : index
    %c0_6 = arith.constant 0 : index
    %c0_7 = arith.constant 0 : index
    %8 = vector.load %arg4[%c0_5, %c0_6, %c0_7] : memref<1x128x128xbf16, #tpu.memory_space<vmem>>, vector<1x128x128xbf16>
    %9 = vector.shape_cast %8 : vector<1x128x128xbf16> to vector<128x128xbf16>
    %cst_8 = arith.constant dense<0.000000e+00> : vector<64x128xf32>
    %10 = tpu.matmul %1, %9, %cst_8 {dimension_numbers = #tpu.dot_dimension_numbers<[1], [0], [0], [1], [0, 0, 1, 1], [], []>} : vector<64x128xbf16>, vector<128x128xbf16>, vector<64x128xf32> -> vector<64x128xf32>
    %11 = arith.negf %7 : vector<64x128xf32>
    %12 = math.exp %11 : vector<64x128xf32>
    %cst_9 = arith.constant 1.000000e+00 : f32
    %13 = vector.broadcast %cst_9 : f32 to vector<64x128xf32>
    %14 = arith.addf %13, %12 : vector<64x128xf32>
    %15 = arith.divf %13, %14 : vector<64x128xf32>
    %16 = arith.mulf %7, %15 : vector<64x128xf32>
    %17 = arith.mulf %16, %10 : vector<64x128xf32>
    %18 = arith.truncf %17 : vector<64x128xf32> to vector<64x128xbf16>
    %c0_10 = arith.constant 0 : index
    %c0_11 = arith.constant 0 : index
    %c0_12 = arith.constant 0 : index
    %19 = vector.load %arg5[%c0_10, %c0_11, %c0_12] : memref<1x128x128xbf16, #tpu.memory_space<vmem>>, vector<1x128x128xbf16>
    %20 = vector.shape_cast %19 : vector<1x128x128xbf16> to vector<128x128xbf16>
    %cst_13 = arith.constant dense<0.000000e+00> : vector<64x128xf32>
    %21 = tpu.matmul %18, %20, %cst_13 {dimension_numbers = #tpu.dot_dimension_numbers<[1], [0], [0], [1], [0, 0, 1, 1], [], []>} : vector<64x128xbf16>, vector<128x128xbf16>, vector<64x128xf32> -> vector<64x128xf32>
    %c0_14 = arith.constant 0 : index
    %c0_15 = arith.constant 0 : index
    %22 = vector.load %arg11[%c0_14, %c0_15] : memref<64x128xf32, #tpu.memory_space<vmem>>, vector<64x128xf32>
    %c0_16 = arith.constant 0 : index
    %c0_17 = arith.constant 0 : index
    %c0_18 = arith.constant 0 : index
    %23 = vector.load %arg6[%c0_16, %c0_17, %c0_18] : memref<1x64x1xf32, #tpu.memory_space<vmem>>, vector<1x64x1xf32>
    %24 = vector.shape_cast %23 : vector<1x64x1xf32> to vector<64x1xf32>
    %25 = vector.broadcast %24 : vector<64x1xf32> to vector<64x128xf32>
    %26 = arith.mulf %21, %25 : vector<64x128xf32>
    %27 = arith.addf %22, %26 : vector<64x128xf32>
    %c0_19 = arith.constant 0 : index
    %c0_20 = arith.constant 0 : index
    %28 = vector.load %arg11[%c0_19, %c0_20] : memref<64x128xf32, #tpu.memory_space<vmem>>, vector<64x128xf32>
    tpu.vector_store %arg11[%c0_19, %c0_20], %27 {strides = array<i32>} : memref<64x128xf32, #tpu.memory_space<vmem>>, vector<64x128xf32>,
    %c3_i32 = arith.constant 3 : i32
    %29 = arith.cmpi eq, %arg1, %c3_i32 : i32
    %30 = arith.extui %29 : i1 to i32
    %c0_i32_21 = arith.constant 0 : i32
    %31 = arith.cmpi ne, %30, %c0_i32_21 : i32
    scf.if %31 {
      %c0_22 = arith.constant 0 : index
      %c0_23 = arith.constant 0 : index
      %32 = vector.load %arg7[%c0_22, %c0_23] : memref<128x128xbf16, #tpu.memory_space<vmem>>, vector<128x128xbf16>
      %cst_24 = arith.constant dense<0.000000e+00> : vector<64x128xf32>
      %33 = tpu.matmul %1, %32, %cst_24 {dimension_numbers = #tpu.dot_dimension_numbers<[1], [0], [0], [1], [0, 0, 1, 1], [], []>} : vector<64x128xbf16>, vector<128x128xbf16>, vector<64x128xf32> -> vector<64x128xf32>
      %c0_25 = arith.constant 0 : index
      %c0_26 = arith.constant 0 : index
      %34 = vector.load %arg8[%c0_25, %c0_26] : memref<128x128xbf16, #tpu.memory_space<vmem>>, vector<128x128xbf16>
      %cst_27 = arith.constant dense<0.000000e+00> : vector<64x128xf32>
      %35 = tpu.matmul %1, %34, %cst_27 {dimension_numbers = #tpu.dot_dimension_numbers<[1], [0], [0], [1], [0, 0, 1, 1], [], []>} : vector<64x128xbf16>, vector<128x128xbf16>, vector<64x128xf32> -> vector<64x128xf32>
      %36 = arith.negf %33 : vector<64x128xf32>
      %37 = math.exp %36 : vector<64x128xf32>
      %cst_28 = arith.constant 1.000000e+00 : f32
      %38 = vector.broadcast %cst_28 : f32 to vector<64x128xf32>
      %39 = arith.addf %38, %37 : vector<64x128xf32>
      %40 = arith.divf %38, %39 : vector<64x128xf32>
      %41 = arith.mulf %33, %40 : vector<64x128xf32>
      %42 = arith.mulf %41, %35 : vector<64x128xf32>
      %43 = arith.truncf %42 : vector<64x128xf32> to vector<64x128xbf16>
      %c0_29 = arith.constant 0 : index
      %c0_30 = arith.constant 0 : index
      %44 = vector.load %arg9[%c0_29, %c0_30] : memref<128x128xbf16, #tpu.memory_space<vmem>>, vector<128x128xbf16>
      %cst_31 = arith.constant dense<0.000000e+00> : vector<64x128xf32>
      %45 = tpu.matmul %43, %44, %cst_31 {dimension_numbers = #tpu.dot_dimension_numbers<[1], [0], [0], [1], [0, 0, 1, 1], [], []>} : vector<64x128xbf16>, vector<128x128xbf16>, vector<64x128xf32> -> vector<64x128xf32>
      %c0_32 = arith.constant 0 : index
      %c0_33 = arith.constant 0 : index
      %46 = vector.load %arg10[%c0_32, %c0_33] : memref<128x1xbf16, #tpu.memory_space<vmem>>, vector<128x1xbf16>
      %cst_34 = arith.constant dense<0.000000e+00> : vector<64x1xf32>
      %47 = tpu.matmul %1, %46, %cst_34 {dimension_numbers = #tpu.dot_dimension_numbers<[1], [0], [0], [1], [0, 0, 1, 1], [], []>} : vector<64x128xbf16>, vector<128x1xbf16>, vector<64x1xf32> -> vector<64x1xf32>
      %48 = arith.negf %47 : vector<64x1xf32>
      %49 = math.exp %48 : vector<64x1xf32>
      %cst_35 = arith.constant 1.000000e+00 : f32
      %50 = vector.broadcast %cst_35 : f32 to vector<64x1xf32>
      %51 = arith.addf %50, %49 : vector<64x1xf32>
      %52 = arith.divf %50, %51 : vector<64x1xf32>
      %c0_36 = arith.constant 0 : index
      %c0_37 = arith.constant 0 : index
      %53 = vector.load %arg11[%c0_36, %c0_37] : memref<64x128xf32, #tpu.memory_space<vmem>>, vector<64x128xf32>
      %54 = vector.broadcast %52 : vector<64x1xf32> to vector<64x128xf32>
      %55 = arith.mulf %54, %45 : vector<64x128xf32>
      %56 = arith.addf %53, %55 : vector<64x128xf32>
      %c0_38 = arith.constant 0 : index
      %c0_39 = arith.constant 0 : index
      %57 = vector.load %arg11[%c0_38, %c0_39] : memref<64x128xf32, #tpu.memory_space<vmem>>, vector<64x128xf32>
      tpu.vector_store %arg11[%c0_38, %c0_39], %56 {strides = array<i32>} : memref<64x128xf32, #tpu.memory_space<vmem>>, vector<64x128xf32>,
    } else {
    }
    return
  }
  func.func @transform_0(%arg0: i32, %arg1: i32) -> (i32, i32) {
    %c0_i32 = arith.constant 0 : i32
    %c0_i32_0 = arith.constant 0 : i32
    return %arg0, %c0_i32 : i32, i32
  }
  func.func @transform_1(%arg0: i32, %arg1: i32) -> (i32, i32, i32) {
    %c0_i32 = arith.constant 0 : i32
    %c0_i32_0 = arith.constant 0 : i32
    %c0_i32_1 = arith.constant 0 : i32
    return %arg1, %c0_i32, %c0_i32_0 : i32, i32, i32
  }
  func.func @transform_2(%arg0: i32, %arg1: i32) -> (i32, i32, i32) {
    %c0_i32 = arith.constant 0 : i32
    %c0_i32_0 = arith.constant 0 : i32
    %c0_i32_1 = arith.constant 0 : i32
    return %arg1, %c0_i32, %c0_i32_0 : i32, i32, i32
  }
  func.func @transform_3(%arg0: i32, %arg1: i32) -> (i32, i32, i32) {
    %c0_i32 = arith.constant 0 : i32
    %c0_i32_0 = arith.constant 0 : i32
    %c0_i32_1 = arith.constant 0 : i32
    return %arg1, %c0_i32, %c0_i32_0 : i32, i32, i32
  }
  func.func @transform_4(%arg0: i32, %arg1: i32) -> (i32, i32, i32) {
    %c0_i32 = arith.constant 0 : i32
    %c0_i32_0 = arith.constant 0 : i32
    return %arg1, %arg0, %c0_i32 : i32, i32, i32
  }
  func.func @transform_5(%arg0: i32, %arg1: i32) -> (i32, i32) {
    %c0_i32 = arith.constant 0 : i32
    %c0_i32_0 = arith.constant 0 : i32
    %c0_i32_1 = arith.constant 0 : i32
    return %c0_i32, %c0_i32_0 : i32, i32
  }
  func.func @transform_6(%arg0: i32, %arg1: i32) -> (i32, i32) {
    %c0_i32 = arith.constant 0 : i32
    %c0_i32_0 = arith.constant 0 : i32
    %c0_i32_1 = arith.constant 0 : i32
    return %c0_i32, %c0_i32_0 : i32, i32
  }
  func.func @transform_7(%arg0: i32, %arg1: i32) -> (i32, i32) {
    %c0_i32 = arith.constant 0 : i32
    %c0_i32_0 = arith.constant 0 : i32
    %c0_i32_1 = arith.constant 0 : i32
    return %c0_i32, %c0_i32_0 : i32, i32
  }
  func.func @transform_8(%arg0: i32, %arg1: i32) -> (i32, i32) {
    %c0_i32 = arith.constant 0 : i32
    %c0_i32_0 = arith.constant 0 : i32
    %c0_i32_1 = arith.constant 0 : i32
    return %c0_i32, %c0_i32_0 : i32, i32
  }
  func.func @transform_9(%arg0: i32, %arg1: i32) -> (i32, i32) {
    %c0_i32 = arith.constant 0 : i32
    %c0_i32_0 = arith.constant 0 : i32
    return %arg0, %c0_i32 : i32, i32
  }
}

module attributes {stable_mosaic.version = 11 : i64} {
  func.func @_final_norm_kernel(%arg0: i32, %arg1: memref<64x128xf32, #tpu.memory_space<vmem>>, %arg2: memref<64x128xf32, #tpu.memory_space<vmem>>, %arg3: memref<1x128xf32, #tpu.memory_space<vmem>>, %arg4: memref<64x128xf32, #tpu.memory_space<vmem>>) attributes {dimension_semantics = [#tpu.dimension_semantics<parallel>], iteration_bounds = array<i64: 2>, scalar_prefetch = 0 : i64, scratch_operands = 0 : i64, tpu.core_type = #tpu.core_type<tc>, window_params = [{transform_indices = @transform_0, window_bounds = array<i64: 64, 128>}, {transform_indices = @transform_1, window_bounds = array<i64: 64, 128>}, {pipeline_mode = #tpu.pipeline_mode<synchronous>, transform_indices = @transform_2, window_bounds = array<i64: 1, 128>}, {transform_indices = @transform_3, window_bounds = array<i64: 64, 128>}]} {
    %c0 = arith.constant 0 : index
    %c0_0 = arith.constant 0 : index
    %0 = vector.load %arg1[%c0, %c0_0] : memref<64x128xf32, #tpu.memory_space<vmem>>, vector<64x128xf32>
    %c0_1 = arith.constant 0 : index
    %c0_2 = arith.constant 0 : index
    %1 = vector.load %arg2[%c0_1, %c0_2] : memref<64x128xf32, #tpu.memory_space<vmem>>, vector<64x128xf32>
    %2 = arith.addf %0, %1 : vector<64x128xf32>
    %3 = arith.mulf %2, %2 : vector<64x128xf32>
    %cst = arith.constant dense<0.000000e+00> : vector<64xf32>
    %4 = vector.multi_reduction <add>, %3, %cst [1] : vector<64x128xf32> to vector<64xf32>
    %5 = vector.shape_cast %4 : vector<64xf32> to vector<64x1xf32>
    %cst_3 = arith.constant 1.280000e+02 : f32
    %6 = vector.broadcast %cst_3 : f32 to vector<64x1xf32>
    %7 = arith.divf %5, %6 : vector<64x1xf32>
    %cst_4 = arith.constant 9.99999997E-7 : f32
    %8 = vector.broadcast %cst_4 : f32 to vector<64x1xf32>
    %9 = arith.addf %7, %8 : vector<64x1xf32>
    %10 = math.rsqrt %9 : vector<64x1xf32>
    %11 = vector.broadcast %10 : vector<64x1xf32> to vector<64x128xf32>
    %12 = arith.mulf %2, %11 : vector<64x128xf32>
    %c0_5 = arith.constant 0 : index
    %c0_6 = arith.constant 0 : index
    %13 = vector.load %arg3[%c0_5, %c0_6] : memref<1x128xf32, #tpu.memory_space<vmem>>, vector<1x128xf32>
    %14 = vector.broadcast %13 : vector<1x128xf32> to vector<64x128xf32>
    %15 = arith.mulf %12, %14 : vector<64x128xf32>
    %c0_7 = arith.constant 0 : index
    %c0_8 = arith.constant 0 : index
    %16 = vector.load %arg4[%c0_7, %c0_8] : memref<64x128xf32, #tpu.memory_space<vmem>>, vector<64x128xf32>
    tpu.vector_store %arg4[%c0_7, %c0_8], %15 {strides = array<i32>} : memref<64x128xf32, #tpu.memory_space<vmem>>, vector<64x128xf32>,
    return
  }
  func.func @transform_0(%arg0: i32) -> (i32, i32) {
    %c0_i32 = arith.constant 0 : i32
    %c0_i32_0 = arith.constant 0 : i32
    return %arg0, %c0_i32 : i32, i32
  }
  func.func @transform_1(%arg0: i32) -> (i32, i32) {
    %c0_i32 = arith.constant 0 : i32
    %c0_i32_0 = arith.constant 0 : i32
    return %arg0, %c0_i32 : i32, i32
  }
  func.func @transform_2(%arg0: i32) -> (i32, i32) {
    %c0_i32 = arith.constant 0 : i32
    %c0_i32_0 = arith.constant 0 : i32
    %c0_i32_1 = arith.constant 0 : i32
    return %c0_i32, %c0_i32_0 : i32, i32
  }
  func.func @transform_3(%arg0: i32) -> (i32, i32) {
    %c0_i32 = arith.constant 0 : i32
    %c0_i32_0 = arith.constant 0 : i32
    return %arg0, %c0_i32 : i32, i32
  }
}

</mosaic_0001>

<bundles_post_ra>
// kernel: _lambda_.9
= control target key start
LH: loop header
LB: loop body
LE: loop exit
PB: predicated region body
PF: predicated region fallthrough
CT: control target
= control target key end

     0   :  { %s1247_s15 = smov 0   ;;  %s1528_s0 = inlined_call_operand.vmem [shape: f32[128,128], index: 0, kind: input, shape index: {}]   ;;  %s1529_s1 = inlined_call_operand.vmem [shape: bf16[128,256], index: 1, kind: input, shape index: {}]   ;;  %s1530_s2 = inlined_call_operand.vmem [shape: bf16[128,256], index: 2, kind: input, shape index: {}]   ;;  %s1531_s3 = inlined_call_operand.vmem [shape: bf16[256,128], index: 3, kind: input, shape index: {}]   ;;  %s1532_s4 = inlined_call_operand.vmem [shape: f32[128,128], index: 4, kind: output, shape index: {}]  }
   0x1 LB: > { %s945_s16 = sadd.s32 4294967295, %s1219_s15   ;;  %p949_p0 = scmp.ge.s32.totalorder %s1219_s15, 1  ;;  %s1219_s15 = sphi %s1247_s15, %s14_s15  }
   0x2   : > { %p163_p1 = scmp.lt.s32.totalorder %s1219_s15, 3 }
   0x4   : > { %p164_p2 = pnand %p949_p0, %p163_p1 }
   0x5   : > { %s950_s29 = sshll.u32 (!%p164_p2), %s945_s16, 3 }
   0x6   : > { %167 = sbr.rel (%p164_p2) target bundleno = 510 (0x1fe), region = 36  ;;  %p190_p3 = scmp.lt.s32.totalorder (!%p164_p2), %s950_s29, 15 }
   0xb   : > { %v1085_v0 = vld [vmem:[%s1529_s1 + $0x74] ss:$8 sps:$4 sm:$0xff]   ;;  %v1087_v1 = vld [vmem:[%s1529_s1 + $0x70] ss:$8 sps:$4 sm:$0xff]   ;;  %v1221_v2 = vmov 0   ;;  %s1534_s29 = smov (!%p190_p3, %s950_s29), 15 }
   0xc   : > { %342 = vmatprep.mubr.bf16.mxu0 %v1221_v2  ;;  %511 = vmatprep.mubr.bf16.mxu1 %v1221_v2  ;;  %v1088_v3 = vld [vmem:[%s1529_s1 + $0x64] ss:$8 sps:$4 sm:$0xff]   ;;  %v1090_v4 = vld [vmem:[%s1529_s1 + $0x60] ss:$8 sps:$4 sm:$0xff]   ;;  %v1091_v5 = vld [vmem:[%s1529_s1 + $0x54] ss:$8 sps:$4 sm:$0xff]  }
   0xd   : > { %310 = vmatprep.subr.bf16.mxu0 %v1085_v0  ;;  %v1093_v6 = vld [vmem:[%s1529_s1 + $0x50] ss:$8 sps:$4 sm:$0xff]   ;;  %v1094_v7 = vld [vmem:[%s1529_s1 + $0x44] ss:$8 sps:$4 sm:$0xff]   ;;  %v1096_v8 = vld [vmem:[%s1529_s1 + $0x40] ss:$8 sps:$4 sm:$0xff]  }
   0xe   : > { %311 = vmatpush1.bf16.msra.mxu0 %v1087_v1  ;;  %v1108_v9 = vld [vmem:[%s1530_s2 + $0x74] ss:$8 sps:$4 sm:$0xff]   ;;  %v1111_v10 = vld [vmem:[%s1530_s2 + $0x70] ss:$8 sps:$4 sm:$0xff]   ;;  %v1112_v12 = vld [vmem:[%s1530_s2 + $0x64] ss:$8 sps:$4 sm:$0xff]  }
   0xf   : > { %312 = vmatprep.subr.bf16.mxu0 %v1088_v3  ;;  %v1097_v11 = vld [vmem:[%s1529_s1 + $0x34] ss:$8 sps:$4 sm:$0xff]   ;;  %479 = vmatprep.subr.bf16.mxu1 %v1108_v9  ;;  %v1114_v13 = vld [vmem:[%s1530_s2 + $0x60] ss:$8 sps:$4 sm:$0xff]   ;;  %v1099_v14 = vld [vmem:[%s1529_s1 + $0x30] ss:$8 sps:$4 sm:$0xff]  }
  0x10   : > { %480 = vmatpush1.bf16.msra.mxu1 %v1111_v10  ;;  %v1115_v15 = vld [vmem:[%s1530_s2 + $0x54] ss:$8 sps:$4 sm:$0xff]   ;;  %v1100_v16 = vld [vmem:[%s1529_s1 + $0x24] ss:$8 sps:$4 sm:$0xff]   ;;  %v1102_v17 = vld [vmem:[%s1529_s1 + $0x20] ss:$8 sps:$4 sm:$0xff]  }
  0x11   : > { %481 = vmatprep.subr.bf16.mxu1 %v1112_v12  ;;  %v1117_v18 = vld [vmem:[%s1530_s2 + $0x50] ss:$8 sps:$4 sm:$0xff]   ;;  %s951_s30 = sshll.u32 %s1534_s29, 3  ;;  %v1118_v19 = vld [vmem:[%s1530_s2 + $0x44] ss:$8 sps:$4 sm:$0xff]  }
  0x12   : > { %313 = vmatpush1.bf16.msra.mxu0 %v1090_v4  ;;  %v1103_v20 = vld [vmem:[%s1529_s1 + $0x14] ss:$8 sps:$4 sm:$0xff]   ;;  %v1105_v21 = vld [vmem:[%s1529_s1 + $0x10] ss:$8 sps:$4 sm:$0xff]   ;;  %s1328_s13 = scalar_lea.vmem %s1528_s0, %s951_s30  ;;  %v1120_v22 = vld [vmem:[%s1530_s2 + $0x40] ss:$8 sps:$4 sm:$0xff]   ;;  %s1515_s25 = scalar_lea.vmem %s1532_s4, %s951_s30 }
  0x13   : > { %314 = vmatprep.subr.bf16.mxu0 %v1091_v5  ;;  %v1106_v23 = vld [vmem:[%s1529_s1 + $0x4] ss:$8 sps:$4 sm:$0xff]   ;;  %v1121_v24 = vld [vmem:[%s1530_s2 + $0x34] ss:$8 sps:$4 sm:$0xff]   ;;  %v1123_v25 = vld [vmem:[%s1530_s2 + $0x30] ss:$8 sps:$4 sm:$0xff]  }
  0x14   : > { %482 = vmatpush1.bf16.msra.mxu1 %v1114_v13  ;;  %v1110_v26 = vld [vmem:[%s1529_s1] ss:$8 sps:$4 sm:$0xff]   ;;  %v1124_v29 = vld [vmem:[%s1530_s2 + $0x24] ss:$8 sps:$4 sm:$0xff]   ;;  %v1127_v31 = vld [vmem:[%s1530_s2 + $0x14] ss:$8 sps:$4 sm:$0xff]  }
  0x15   : > { %483 = vmatprep.subr.bf16.mxu1 %v1115_v15  ;;  %v202_v27 = vld [vmem:[%s1328_s13] sm:$0xff]  ;;  %v203_v28 = vld [vmem:[%s1328_s13 + $0x8] sm:$0xff]  ;;  %v1129_v33 = vld [vmem:[%s1530_s2 + $0x10] ss:$8 sps:$4 sm:$0xff]  }
  0x16   : > { %315 = vmatpush1.bf16.msra.mxu0 %v1093_v6  ;;  %v1126_v30 = vld [vmem:[%s1530_s2 + $0x20] ss:$8 sps:$4 sm:$0xff]   ;;  %v210_v32 = vpack.c.bf16 %v203_v28, %v202_v27  ;;  %v204_v34 = vld [vmem:[%s1328_s13 + $0x10] sm:$0xff]  ;;  %v205_v35 = vld [vmem:[%s1328_s13 + $0x18] sm:$0xff] }
  0x17   : > { %316 = vmatprep.subr.bf16.mxu0 %v1094_v7  ;;  %v1130_v36 = vld [vmem:[%s1530_s2 + $0x4] ss:$8 sps:$4 sm:$0xff]   ;;  %v211_v37 = vpack.c.bf16 %v205_v35, %v204_v34  ;;  %v1132_v38 = vld [vmem:[%s1530_s2] ss:$8 sps:$4 sm:$0xff]   ;;  %v208_v42 = vld [vmem:[%s1328_s13 + $0x30] sm:$0xff] }
  0x18   : > { %484 = vmatpush1.bf16.msra.mxu1 %v1117_v18  ;;  %v206_v39 = vld [vmem:[%s1328_s13 + $0x20] sm:$0xff]  ;;  %v207_v40 = vld [vmem:[%s1328_s13 + $0x28] sm:$0xff]  ;;  %v209_v43 = vld [vmem:[%s1328_s13 + $0x38] sm:$0xff] }
  0x19   : > { %485 = vmatprep.subr.bf16.mxu1 %v1118_v19  ;;  %v212_v41 = vpack.c.bf16 %v207_v40, %v206_v39  ;;  %v213_v44 = vpack.c.bf16 %v209_v43, %v208_v42  ;;  %v1133_v45 = vld [vmem:[%s1531_s3 + $0x78] sm:$0xff]   ;;  %v1135_v47 = vld [vmem:[%s1531_s3 + $0x70] sm:$0xff]   ;;  %v1137_v49 = vld [vmem:[%s1531_s3 + $0x68] sm:$0xff]  }
  0x1a   : > { %317 = vmatpush1.bf16.msra.mxu0 %v1096_v8  ;;  %v1134_v46 = vld [vmem:[%s1531_s3 + $0x38] sm:$0xff]   ;;  %v1136_v48 = vld [vmem:[%s1531_s3 + $0x30] sm:$0xff]   ;;  %v1138_v50 = vld [vmem:[%s1531_s3 + $0x28] sm:$0xff]  }
  0x1b   : > { %318 = vmatprep.subr.bf16.mxu0 %v1097_v11  ;;  %v1139_v51 = vld [vmem:[%s1531_s3 + $0x60] sm:$0xff]   ;;  %v1141_v53 = vld [vmem:[%s1531_s3 + $0x58] sm:$0xff]   ;;  %v1143_v55 = vld [vmem:[%s1531_s3 + $0x50] sm:$0xff]  }
  0x1c   : > { %486 = vmatpush1.bf16.msra.mxu1 %v1120_v22  ;;  %v1140_v52 = vld [vmem:[%s1531_s3 + $0x20] sm:$0xff]   ;;  %v1142_v54 = vld [vmem:[%s1531_s3 + $0x18] sm:$0xff]   ;;  %v1144_v56 = vld [vmem:[%s1531_s3 + $0x10] sm:$0xff]  }
  0x1d   : > { %487 = vmatprep.subr.bf16.mxu1 %v1121_v24  ;;  %v1145_v57 = vld [vmem:[%s1531_s3 + $0x48] sm:$0xff]   ;;  %v1147_v59 = vld [vmem:[%s1531_s3 + $0x40] sm:$0xff]  }
  0x1e   : > { %319 = vmatpush1.bf16.msra.mxu0 %v1099_v14  ;;  %v1146_v58 = vld [vmem:[%s1531_s3 + $0x8] sm:$0xff]   ;;  %v1148_v60 = vld [vmem:[%s1531_s3] sm:$0xff]  }
  0x1f   : > { %320 = vmatprep.subr.bf16.mxu0 %v1100_v16 }
  0x20   : > { %488 = vmatpush1.bf16.msra.mxu1 %v1123_v25 }
  0x21   : > { %489 = vmatprep.subr.bf16.mxu1 %v1124_v29 }
  0x22   : > { %321 = vmatpush1.bf16.msra.mxu0 %v1102_v17 }
  0x23   : > { %322 = vmatprep.subr.bf16.mxu0 %v1103_v20 }
  0x24   : > { %490 = vmatpush1.bf16.msra.mxu1 %v1126_v30 }
  0x25   : > { %491 = vmatprep.subr.bf16.mxu1 %v1127_v31 }
  0x26   : > { %323 = vmatpush1.bf16.msra.mxu0 %v1105_v21 }
  0x27   : > { %324 = vmatprep.subr.bf16.mxu0 %v1106_v23 }
  0x28   : > { %492 = vmatpush1.bf16.msra.mxu1 %v1129_v33 }
  0x29   : > { %493 = vmatprep.subr.bf16.mxu1 %v1130_v36 }
  0x2a   : > { %325 = vmatpush1.bf16.msra.mxu0 %v1110_v26 }
  0x2b   : > { %1020 = vmatprep.subr.bf16.mxu0 %v1133_v45 }
  0x2c   : > { %494 = vmatpush1.bf16.msra.mxu1 %v1132_v38 }
  0x2d   : > { %343 = vmatmul.mubr.bf16.vlgmr.msra.gmra.mxu0 %v210_v32  ;;  %1060 = vmatprep.subr.bf16.mxu1 %v1133_v45 }
  0x2e   : > { %352 = vmatprep.mubr.bf16.mxu0 %v1221_v2  ;;  %1021 = vmatpush3.bf16.msra.mxu0 %v1134_v46 }
  0x2f   : > { %512 = vmatmul.mubr.bf16.vlgmr.msra.gmra.mxu1 %v210_v32  ;;  %1022 = vmatprep.subr.bf16.mxu0 %v1135_v47 }
  0x30   : > { %521 = vmatprep.mubr.bf16.mxu1 %v1221_v2  ;;  %1068 = vmatpush3.bf16.msra.mxu1 %v1134_v46 }
  0x31   : > { %1061 = vmatprep.subr.bf16.mxu1 %v1135_v47 }
  0x32   : > { %1023 = vmatpush3.bf16.msra.mxu0 %v1136_v48 }
  0x33   : > { %1024 = vmatprep.subr.bf16.mxu0 %v1137_v49 }
  0x34   : > { %1069 = vmatpush3.bf16.msra.mxu1 %v1136_v48 }
  0x35   : > { %353 = vmatmul.mubr.bf16.gmra.mxu0 %v211_v37  ;;  %1062 = vmatprep.subr.bf16.mxu1 %v1137_v49 }
  0x36   : > { %362 = vmatprep.mubr.bf16.mxu0 %v1221_v2  ;;  %1025 = vmatpush3.bf16.msra.mxu0 %v1138_v50 }
  0x37   : > { %522 = vmatmul.mubr.bf16.gmra.mxu1 %v211_v37  ;;  %1026 = vmatprep.subr.bf16.mxu0 %v1139_v51 }
  0x38   : > { %531 = vmatprep.mubr.bf16.mxu1 %v1221_v2  ;;  %1070 = vmatpush3.bf16.msra.mxu1 %v1138_v50 }
  0x39   : > { %1063 = vmatprep.subr.bf16.mxu1 %v1139_v51 }
  0x3a   : > { %1027 = vmatpush3.bf16.msra.mxu0 %v1140_v52 }
  0x3b   : > { %1028 = vmatprep.subr.bf16.mxu0 %v1141_v53 }
  0x3c   : > { %1071 = vmatpush3.bf16.msra.mxu1 %v1140_v52 }
  0x3d   : > { %363 = vmatmul.mubr.bf16.gmra.mxu0 %v212_v41  ;;  %1064 = vmatprep.subr.bf16.mxu1 %v1141_v53 }
  0x3e   : > { %372 = vmatprep.mubr.bf16.mxu0 %v1221_v2  ;;  %1029 = vmatpush3.bf16.msra.mxu0 %v1142_v54 }
  0x3f   : > { %532 = vmatmul.mubr.bf16.gmra.mxu1 %v212_v41  ;;  %1030 = vmatprep.subr.bf16.mxu0 %v1143_v55 }
  0x40   : > { %541 = vmatprep.mubr.bf16.mxu1 %v1221_v2  ;;  %1072 = vmatpush3.bf16.msra.mxu1 %v1142_v54 }
  0x41   : > { %1065 = vmatprep.subr.bf16.mxu1 %v1143_v55 }
  0x42   : > { %1031 = vmatpush3.bf16.msra.mxu0 %v1144_v56 }
  0x43   : > { %1032 = vmatprep.subr.bf16.mxu0 %v1145_v57 }
  0x44   : > { %1073 = vmatpush3.bf16.msra.mxu1 %v1144_v56 }
  0x45   : > { %373 = vmatmul.mubr.bf16.gmra.mxu0 %v213_v44  ;;  %1066 = vmatprep.subr.bf16.mxu1 %v1145_v57 }
  0x46   : > { %1033 = vmatpush3.bf16.msra.mxu0 %v1146_v58 }
  0x47   : > { %542 = vmatmul.mubr.bf16.gmra.mxu1 %v213_v44  ;;  %1034 = vmatprep.subr.bf16.mxu0 %v1147_v59 }
  0x48   : > { %1074 = vmatpush3.bf16.msra.mxu1 %v1146_v58 }
  0x49   : > { %1067 = vmatprep.subr.bf16.mxu1 %v1147_v59 }
  0x4a   : > { %1035 = vmatpush3.bf16.msra.mxu0 %v1148_v60 }
  0x4c   : > { %1075 = vmatpush3.bf16.msra.mxu1 %v1148_v60 }
  0xed   : > { %v1425_v61 = vpop.f32.mrf.mxu0 }
  0xee   : > { %v986_v62 = vmul.f32 -1.442695, %v1425_v61 }
  0xef   : > { %v1428_v63 = vpop.f32.mrf.mxu0  ;;  %v1443_v9 = vpop.f32.mrf.mxu1 }
  0xf0   : > { %1149 = vpow2.f32 %v986_v62  ;;  %v987_v0 = vmul.f32 -1.442695, %v1428_v63 }
  0xf1   : > { %v1431_v1 = vpop.f32.mrf.mxu0  ;;  %v1448_v12 = vpop.f32.mrf.mxu1 }
  0xf2   : > { %1151 = vpow2.f32 %v987_v0  ;;  %v988_v2 = vmul.f32 -1.442695, %v1431_v1 }
  0xf3   : > { %v1434_v3 = vpop.f32.mrf.mxu0  ;;  %v1453_v15 = vpop.f32.mrf.mxu1 }
  0xf4   : > { %1153 = vpow2.f32 %v988_v2  ;;  %v989_v4 = vmul.f32 -1.442695, %v1434_v3 }
  0xf5   : > { %v1437_v5 = vpop.f32.mrf.mxu0  ;;  %v1458_v20 = vpop.f32.mrf.mxu1 }
  0xf6   : > { %1155 = vpow2.f32 %v989_v4  ;;  %v990_v6 = vmul.f32 -1.442695, %v1437_v5 }
  0xf7   : > { %v1440_v7 = vpop.f32.mrf.mxu0  ;;  %v1466_v29 = vpop.f32.mrf.mxu1 }
  0xf8   : > { %1157 = vpow2.f32 %v990_v6  ;;  %v991_v8 = vmul.f32 -1.442695, %v1440_v7 }
  0xf9   : > { %v1445_v10 = vpop.f32.mrf.mxu0  ;;  %v1474_v38 = vpop.f32.mrf.mxu1 }
  0xfa   : > { %1159 = vpow2.f32 %v991_v8  ;;  %v992_v11 = vmul.f32 -1.442695, %v1445_v10 }
  0xfb   : > { %v1450_v13 = vpop.f32.mrf.mxu0  ;;  %v527_v47 = vpop.f32.mrf.mxu1 }
  0xfc   : > { %1161 = vpow2.f32 %v992_v11  ;;  %v993_v14 = vmul.f32 -1.442695, %v1450_v13 }
  0xfd   : > { %v1150_v16 = vpop.eup %1149  ;;  %v1455_v17 = vpop.f32.mrf.mxu0 }
  0xfe   : > { %v600_v18 = vadd.f32 1.0, %v1150_v16  ;;  %1163 = vpow2.f32 %v993_v14  ;;  %v994_v19 = vmul.f32 -1.442695, %v1455_v17  ;;  %v529_v54 = vpop.f32.mrf.mxu1 }
  0xff   : > { %v1152_v21 = vpop.eup %1151  ;;  %v1460_v22 = vpop.f32.mrf.mxu0 }
 0x100   : > { %1165 = vrcp.f32 %v600_v18  ;;  %v601_v23 = vadd.f32 1.0, %v1152_v21  ;;  %v995_v24 = vmul.f32 -1.442695, %v1460_v22  ;;  %v1487_v2 = vpop.f32.mrf.mxu1 }
 0x101   : > { %v1154_v25 = vpop.eup %1153  ;;  %1167 = vpow2.f32 %v994_v19  ;;  %v1463_v26 = vpop.f32.mrf.mxu0 }
 0x102   : > { %1169 = vrcp.f32 %v601_v23  ;;  %v602_v27 = vadd.f32 1.0, %v1154_v25  ;;  %v996_v28 = vmul.f32 -1.442695, %v1463_v26  ;;  %v535_v23 = vpop.f32.mrf.mxu1 }
 0x103   : > { %v1156_v30 = vpop.eup %1155  ;;  %1171 = vpow2.f32 %v995_v24  ;;  %v1468_v31 = vpop.f32.mrf.mxu0 }
 0x104   : > { %1173 = vrcp.f32 %v602_v27  ;;  %v603_v32 = vadd.f32 1.0, %v1156_v30  ;;  %v997_v33 = vmul.f32 -1.442695, %v1468_v31 }
 0x105   : > { %v1158_v34 = vpop.eup %1157  ;;  %1175 = vpow2.f32 %v996_v28  ;;  %v1471_v35 = vpop.f32.mrf.mxu0 }
 0x106   : > { %1177 = vrcp.f32 %v603_v32  ;;  %v604_v36 = vadd.f32 1.0, %v1158_v34  ;;  %v998_v37 = vmul.f32 -1.442695, %v1471_v35 }
 0x107   : > { %v1160_v39 = vpop.eup %1159  ;;  %1179 = vpow2.f32 %v997_v33  ;;  %v1476_v40 = vpop.f32.mrf.mxu0 }
 0x108   : > { %1181 = vrcp.f32 %v604_v36  ;;  %v605_v41 = vadd.f32 1.0, %v1160_v39  ;;  %v999_v42 = vmul.f32 -1.442695, %v1476_v40 }
 0x109   : > { %v1162_v43 = vpop.eup %1161  ;;  %1183 = vpow2.f32 %v998_v37  ;;  %v1479_v44 = vpop.f32.mrf.mxu0 }
 0x10a   : > { %1185 = vrcp.f32 %v605_v41  ;;  %v606_v45 = vadd.f32 1.0, %v1162_v43  ;;  %v1000_v46 = vmul.f32 -1.442695, %v1479_v44 }
 0x10b   : > { %v1164_v48 = vpop.eup %1163  ;;  %1187 = vpow2.f32 %v999_v42  ;;  %v1482_v49 = vpop.f32.mrf.mxu0 }
 0x10c   : > { %1189 = vrcp.f32 %v606_v45  ;;  %v607_v50 = vadd.f32 1.0, %v1164_v48  ;;  %v1001_v51 = vmul.f32 -1.442695, %v1482_v49 }
 0x10d   : > { %v1166_v52 = vpop.eup %1165  ;;  %1191 = vpow2.f32 %v1000_v46 }
 0x10e   : > { %v1168_v53 = vpop.eup %1167  ;;  %1193 = vrcp.f32 %v607_v50  ;;  %v648_v6 = vmul.f32 %v1166_v52, %v1425_v61 }
 0x10f   : > { %v1170_v55 = vpop.eup %1169  ;;  %1195 = vpow2.f32 %v1001_v51  ;;  %v608_v57 = vadd.f32 1.0, %v1168_v53 }
 0x110   : > { %v1172_v56 = vpop.eup %1171  ;;  %v649_v62 = vmul.f32 %v1170_v55, %v1428_v63  ;;  %v664_v61 = vmul.f32 %v648_v6, %v1443_v9 }
 0x111   : > { %v1174_v58 = vpop.eup %1173  ;;  %v609_v59 = vadd.f32 1.0, %v1172_v56 }
 0x112   : > { %v1176_v60 = vpop.eup %1175  ;;  %v650_v0 = vmul.f32 %v1174_v58, %v1431_v1  ;;  %v665_v63 = vmul.f32 %v649_v62, %v1448_v12  ;;  %v537_v12 = vpop.f32.mrf.mxu1 }
 0x113   : > { %v1178_v4 = vpop.eup %1177  ;;  %1197 = vrcp.f32 %v609_v59  ;;  %v610_v8 = vadd.f32 1.0, %v1176_v60 }
 0x114   : > { %v1180_v11 = vpop.eup %1179  ;;  %v651_v14 = vmul.f32 %v1178_v4, %v1434_v3  ;;  %1199 = vrcp.f32 %v608_v57  ;;  %v666_v19 = vmul.f32 %v650_v0, %v1453_v15  ;;  %v539_v45 = vpop.f32.mrf.mxu1 }
 0x115   : > { %v1182_v16 = vpop.eup %1181  ;;  %1201 = vrcp.f32 %v610_v8  ;;  %v611_v18 = vadd.f32 1.0, %v1180_v11 }
 0x116   : > { %v1184_v21 = vpop.eup %1183  ;;  %v667_v1 = vmul.f32 %v651_v14, %v1458_v20  ;;  %v680_v32 = vpack.c.bf16 %v666_v19, %v664_v61  ;;  %v652_v20 = vmul.f32 %v1182_v16, %v1437_v5  ;;  %v543_v52 = vpop.f32.mrf.mxu1 }
 0x117   : > { %v1186_v24 = vpop.eup %1185  ;;  %1203 = vrcp.f32 %v611_v18  ;;  %v612_v27 = vadd.f32 1.0, %v1184_v21 }
 0x118   : > { %v1188_v25 = vpop.eup %1187  ;;  %v681_v28 = vpack.c.bf16 %v667_v1, %v665_v63  ;;  %v653_v34 = vmul.f32 %v1186_v24, %v1440_v7  ;;  %v545_v56 = vpop.f32.mrf.mxu1 }
 0x119   : > { %v1190_v3 = vpop.eup %1189  ;;  %v613_v30 = vadd.f32 1.0, %v1188_v25 }
 0x11a   : > { %v1192_v33 = vpop.eup %1191  ;;  %v654_v15 = vmul.f32 %v1190_v3, %v1445_v10  ;;  %848 = vmatprep.mubr.bf16.mxu0 %v681_v28  ;;  %v669_v43 = vmul.f32 %v653_v34, %v1474_v38  ;;  %v668_v10 = vmul.f32 %v652_v20, %v1466_v29 }
 0x11b   : > { %v1194_v36 = vpop.eup %1193  ;;  %1205 = vrcp.f32 %v613_v30  ;;  %v614_v37 = vadd.f32 1.0, %v1192_v33  ;;  %849 = vmatmul.mubr.bf16.vlgmr.msra.gmra.mxu0 %v680_v32 }
 0x11c   : > { %v1196_v9 = vpop.eup %1195  ;;  %v655_v39 = vmul.f32 %v1194_v36, %v1450_v13  ;;  %1207 = vrcp.f32 %v612_v27  ;;  %v670_v42 = vmul.f32 %v654_v15, %v527_v47 }
 0x11d   : > { %1209 = vrcp.f32 %v614_v37  ;;  %v615_v41 = vadd.f32 1.0, %v1196_v9 }
 0x11e   : > { %v671_v7 = vmul.f32 %v655_v39, %v529_v54  ;;  %v682_v50 = vpack.c.bf16 %v670_v42, %v668_v10 }
 0x11f   : > { %1211 = vrcp.f32 %v615_v41 }
 0x120   : > { %v1198_v46 = vpop.eup %1197  ;;  %v683_v48 = vpack.c.bf16 %v671_v7, %v669_v43 }
 0x121   : > { %v1200_v5 = vpop.eup %1199  ;;  %v657_v13 = vmul.f32 %v1198_v46, %v1460_v22  ;;  %v547_v22 = vpop.f32.mrf.mxu1 }
 0x122   : > { %v1202_v51 = vpop.eup %1201  ;;  %856 = vmatprep.mubr.bf16.mxu0 %v683_v48  ;;  %v656_v38 = vmul.f32 %v1200_v5, %v1455_v17 }
 0x123   : > { %v658_v53 = vmul.f32 %v1202_v51, %v1463_v26  ;;  %857 = vmatmul.mubr.bf16.gmra.mxu0 %v682_v50  ;;  %v673_v29 = vmul.f32 %v657_v13, %v535_v23  ;;  %v549_v14 = vpop.f32.mrf.mxu1 }
 0x124   : > { %v1204_v47 = vpop.eup %1203  ;;  %v672_v59 = vmul.f32 %v656_v38, %v1487_v2 }
 0x125   : > { %v659_v54 = vmul.f32 %v1204_v47, %v1468_v31  ;;  %v674_v55 = vmul.f32 %v658_v53, %v537_v12 }
 0x127   : > { %v675_v57 = vmul.f32 %v659_v54, %v539_v45  ;;  %v684_v4 = vpack.c.bf16 %v674_v55, %v672_v59 }
 0x128   : > { %v1206_v58 = vpop.eup %1205 }
 0x129   : > { %v1208_v60 = vpop.eup %1207  ;;  %v685_v62 = vpack.c.bf16 %v675_v57, %v673_v29  ;;  %v661_v26 = vmul.f32 %v1206_v58, %v1476_v40 }
 0x12a   : > { %v1210_v0 = vpop.eup %1209  ;;  %v660_v31 = vmul.f32 %v1208_v60, %v1471_v35 }
 0x12b   : > { %v662_v6 = vmul.f32 %v1210_v0, %v1479_v44  ;;  %864 = vmatprep.mubr.bf16.mxu1 %v685_v62  ;;  %v677_v2 = vmul.f32 %v661_v26, %v545_v56 }
 0x12c   : > { %v1212_v17 = vpop.eup %1211  ;;  %865 = vmatmul.mubr.bf16.vlgmr.msra.gmra.mxu1 %v684_v4  ;;  %v676_v18 = vmul.f32 %v660_v31, %v543_v52 }
 0x12d   : > { %v663_v8 = vmul.f32 %v1212_v17, %v1482_v49  ;;  %v678_v11 = vmul.f32 %v662_v6, %v547_v22 }
 0x12f   : > { %v679_v16 = vmul.f32 %v663_v8, %v549_v14  ;;  %v686_v21 = vpack.c.bf16 %v678_v11, %v676_v18 }
 0x131   : > { %v687_v19 = vpack.c.bf16 %v679_v16, %v677_v2 }
 0x133   : > { %872 = vmatprep.mubr.bf16.mxu1 %v687_v19 }
 0x134   : > { %873 = vmatmul.mubr.bf16.gmra.mxu1 %v686_v21 }
 0x1db   : > { %v1036_v40 = vpop.f32.mrf.mxu0 }
 0x1dd   : > { %v1037_v35 = vpop.f32.mrf.mxu0 }
 0x1de   : > { %v1038_v44 = vadd.f32 %v1037_v35, %v1036_v40 }
 0x1df   : > { %v1039_v49 = vpop.f32.mrf.mxu0 }
 0x1e0   : > { %881 = vst [vmem:[%s1515_s25] sm:$0xff] %v1038_v44 }
 0x1e1   : > { %v1040_v63 = vpop.f32.mrf.mxu0 }
 0x1e2   : > { %v1041_v1 = vadd.f32 %v1040_v63, %v1039_v49 }
 0x1e3   : > { %v1042_v23 = vpop.f32.mrf.mxu0 }
 0x1e4   : > { %882 = vst [vmem:[%s1515_s25 + $0x8] sm:$0xff] %v1041_v1 }
 0x1e5   : > { %v1043_v24 = vpop.f32.mrf.mxu0 }
 0x1e6   : > { %v1044_v61 = vadd.f32 %v1043_v24, %v1042_v23 }
 0x1e7   : > { %v1045_v25 = vpop.f32.mrf.mxu0 }
 0x1e8   : > { %883 = vst [vmem:[%s1515_s25 + $0x10] sm:$0xff] %v1044_v61 }
 0x1e9   : > { %v1046_v27 = vpop.f32.mrf.mxu0 }
 0x1ea   : > { %v1047_v28 = vadd.f32 %v1046_v27, %v1045_v25 }
 0x1ec   : > { %884 = vst [vmem:[%s1515_s25 + $0x18] sm:$0xff] %v1047_v28  ;;  %v1048_v3 = vpop.f32.mrf.mxu1 }
 0x1ee   : > { %v1049_v30 = vpop.f32.mrf.mxu1 }
 0x1ef   : > { %v1050_v32 = vadd.f32 %v1049_v30, %v1048_v3 }
 0x1f0   : > { %v1051_v33 = vpop.f32.mrf.mxu1 }
 0x1f1   : > { %885 = vst [vmem:[%s1515_s25 + $0x20] sm:$0xff] %v1050_v32 }
 0x1f2   : > { %v1052_v34 = vpop.f32.mrf.mxu1 }
 0x1f3   : > { %v1053_v15 = vadd.f32 %v1052_v34, %v1051_v33 }
 0x1f4   : > { %v1054_v12 = vpop.f32.mrf.mxu1 }
 0x1f5   : > { %886 = vst [vmem:[%s1515_s25 + $0x28] sm:$0xff] %v1053_v15 }
 0x1f6   : > { %v1055_v36 = vpop.f32.mrf.mxu1 }
 0x1f7   : > { %v1056_v20 = vadd.f32 %v1055_v36, %v1054_v12 }
 0x1f8   : > { %v1057_v37 = vpop.f32.mrf.mxu1 }
 0x1f9   : > { %887 = vst [vmem:[%s1515_s25 + $0x30] sm:$0xff] %v1056_v20 }
 0x1fa   : > { %v1058_v9 = vpop.f32.mrf.mxu1 }
 0x1fb   : > { %v1059_v39 = vadd.f32 %v1058_v9, %v1057_v37 }
 0x1fd   : > { %888 = vst [vmem:[%s1515_s25 + $0x38] sm:$0xff] %v1059_v39 }
 0x1fe PF: > { %s14_s15 = sadd.s32 1, %s1219_s15  }
 0x1ff   : > { %p11_p4 = scmp.ge.s32.totalorder %s14_s15, 4  }
 0x201   :  { %13 = sbr.rel (!%p11_p4) target bundleno = 1 (0x1), region = 66 }

// kernel: _lambda_.7
= control target key start
LH: loop header
LB: loop body
LE: loop exit
PB: predicated region body
PF: predicated region fallthrough
CT: control target
= control target key end

     0   :  { %s2477_s13 = smov 0   ;;  %s3492_s0 = inlined_call_operand.vmem [shape: f32[128,128], index: 0, kind: input, shape index: {}]   ;;  %s3493_s1 = inlined_call_operand.vmem [shape: f32[128,128], index: 1, kind: input, shape index: {}, may-alias: {1,10}]   ;;  %s3494_s2 = inlined_call_operand.vmem [shape: f32[1,128], index: 2, kind: input, shape index: {}]   ;;  %s3495_s3 = inlined_call_operand.vmem [shape: bf16[128,1024], index: 3, kind: input, shape index: {}]   ;;  %s3496_s4 = inlined_call_operand.vmem [shape: f32[1,1024], index: 4, kind: input, shape index: {}]   ;;  %s3497_s5 = inlined_call_operand.vmem [shape: f32[128,128], index: 5, kind: input, shape index: {}]   ;;  %s3498_s6 = inlined_call_operand.vmem [shape: f32[128,128], index: 6, kind: input, shape index: {}]   ;;  %s3499_s7 = inlined_call_operand.vmem [shape: bf16[128,512], index: 7, kind: output, shape index: {0}]   ;;  %s3500_s8 = inlined_call_operand.vmem [shape: bf16[128,256], index: 8, kind: output, shape index: {1}]   ;;  %s3501_s9 = inlined_call_operand.vmem [shape: bf16[128,256], index: 9, kind: output, shape index: {2}]   ;;  %s3502_s10 = inlined_call_operand.vmem [shape: f32[128,128], index: 10, kind: output, shape index: {3}, may-alias: {1,10}]  }
   0x1 LB: > { %s2162_s14 = sadd.s32 4294967295, %s2417_s13   ;;  %p2166_p0 = scmp.ge.s32.totalorder %s2417_s13, 1  ;;  %s2417_s13 = sphi %s2477_s13, %s21_s13  }
   0x2   : > { %p353_p1 = scmp.lt.s32.totalorder %s2417_s13, 3 }
   0x4   : > { %p354_p2 = pnand %p2166_p0, %p353_p1 }
   0x6   : > { %357 = sbr.rel (%p354_p2) target bundleno = 609 (0x261), region = 48 }
   0xb   : > { %s2167_s15 = sshll.u32 %s2162_s14, 3  ;;  %v640_v0 = vld [vmem:[%s3495_s3 + $0x1c0] sm:$0xff]  ;;  %v641_v2 = vld [vmem:[%s3495_s3 + $0x1c8] sm:$0xff]  ;;  %s2420_s21 = smov 64  }
   0xc   : > { %v644_v1 = vld [vmem:[%s3495_s3 + $0x1e0] sm:$0xff]  ;;  %p425_p3 = scmp.lt.s32.totalorder %s2167_s15, 15  ;;  %v645_v4 = vld [vmem:[%s3495_s3 + $0x1e8] sm:$0xff] }
   0xd   : > { %v2244_v3 = vcombine.high %v640_v0, %v644_v1  ;;  %v2243_v5 = vcombine.low %v640_v0, %v644_v1  ;;  %v2246_v6 = vcombine.high %v641_v2, %v645_v4  ;;  %v2245_v7 = vcombine.low %v641_v2, %v645_v4  ;;  %v632_v38 = vld [vmem:[%s3495_s3 + $0x180] sm:$0xff]  ;;  %v633_v40 = vld [vmem:[%s3495_s3 + $0x188] sm:$0xff] }
   0xe   : > { %s3513_s15 = smov (!%p425_p3, %s2167_s15), 15  ;;  %v636_v39 = vld [vmem:[%s3495_s3 + $0x1a0] sm:$0xff]  ;;  %v637_v43 = vld [vmem:[%s3495_s3 + $0x1a8] sm:$0xff] }
   0xf   : > { %1010 = vmatprep.subr.bf16.mxu0 %v2244_v3  ;;  %1083 = vmatprep.subr.bf16.mxu1 %v2246_v6  ;;  %s2500_s24 = sshll.u32 %s3513_s15, 3  ;;  %v2236_v42 = vcombine.high %v632_v38, %v636_v39  ;;  %v2238_v45 = vcombine.high %v633_v40, %v637_v43  ;;  %v2235_v46 = vcombine.low %v632_v38, %v636_v39  ;;  %v624_v48 = vld [vmem:[%s3495_s3 + $0x140] sm:$0xff]  ;;  %v625_v50 = vld [vmem:[%s3495_s3 + $0x148] sm:$0xff]  ;;  %s2317_s12 = sshll.u32 %s3513_s15, 4 }
  0x10   : > { %1011 = vmatpush1.bf16.msra.mxu0 %v2243_v5  ;;  %1084 = vmatpush1.bf16.msra.mxu1 %v2245_v7  ;;  %s428_s27 = scalar_lea.vmem %s3492_s0, %s2500_s24  ;;  %s434_s30 = scalar_lea.vmem %s3493_s1, %s2500_s24  ;;  %v2237_v47 = vcombine.low %v633_v40, %v637_v43  ;;  %v628_v49 = vld [vmem:[%s3495_s3 + $0x160] sm:$0xff]  ;;  %v629_v52 = vld [vmem:[%s3495_s3 + $0x168] sm:$0xff]  ;;  %v2653_v43 = vld [vmem:[%s3495_s3 + $0x1d8] sm:$0xff] }
  0x11   : > { %v476_v8 = vld [vmem:[%s428_s27] sm:$0xff]  ;;  %v477_v10 = vld [vmem:[%s428_s27 + $0x8] sm:$0xff]  ;;  %v478_v13 = vld [vmem:[%s428_s27 + $0x10] sm:$0xff]  ;;  %s473_s14 = scalar_lea.vmem %s3502_s10, %s2500_s24  ;;  %1012 = vmatprep.subr.bf16.mxu0 %v2236_v42  ;;  %1085 = vmatprep.subr.bf16.mxu1 %v2238_v45  ;;  %v2228_v51 = vcombine.high %v624_v48, %v628_v49  ;;  %v2230_v53 = vcombine.high %v625_v50, %v629_v52  ;;  %v2227_v54 = vcombine.low %v624_v48, %v628_v49  ;;  %s2952_s25 = scalar_lea.vmem %s3497_s5, %s2500_s24 }
  0x12   : > { %v484_v9 = vld [vmem:[%s434_s30] sm:$0xff]  ;;  %v485_v12 = vld [vmem:[%s434_s30 + $0x8] sm:$0xff]  ;;  %v486_v14 = vld [vmem:[%s434_s30 + $0x10] sm:$0xff]  ;;  %v2229_v55 = vcombine.low %v625_v50, %v629_v52  ;;  %s2962_s28 = scalar_lea.vmem %s3501_s9, %s2500_s24  ;;  %s3194_s11 = scalar_lea.vmem %s3498_s6, %s2500_s24 }
  0x13   : > { %v2510_v11 = vadd.f32 %v484_v9, %v476_v8  ;;  %v2512_v15 = vadd.f32 %v485_v12, %v477_v10  ;;  %v2514_v16 = vadd.f32 %v486_v14, %v478_v13  ;;  %v479_v17 = vld [vmem:[%s428_s27 + $0x18] sm:$0xff]  ;;  %v481_v19 = vld [vmem:[%s428_s27 + $0x28] sm:$0xff]  ;;  %v480_v23 = vld [vmem:[%s428_s27 + $0x20] sm:$0xff]  ;;  %s3217_s17 = scalar_lea.vmem %s3499_s7, %s2317_s12  ;;  %s3406_s19 = scalar_lea.vmem %s3500_s8, %s2500_s24 }
  0x14   : > { %v487_v18 = vld [vmem:[%s434_s30 + $0x18] sm:$0xff]  ;;  %v489_v22 = vld [vmem:[%s434_s30 + $0x28] sm:$0xff]  ;;  %v488_v24 = vld [vmem:[%s434_s30 + $0x20] sm:$0xff]  ;;  %1013 = vmatpush1.bf16.msra.mxu0 %v2235_v46  ;;  %1086 = vmatpush1.bf16.msra.mxu1 %v2237_v47 }
  0x15   : > { %v508_v20 = vmul.f32 %v2510_v11, %v2510_v11  ;;  %v2518_v21 = vadd.f32 %v487_v18, %v479_v17  ;;  %v510_v25 = vmul.f32 %v2514_v16, %v2514_v16  ;;  %v2526_v26 = vadd.f32 %v489_v22, %v481_v19  ;;  %v483_v28 = vld [vmem:[%s428_s27 + $0x38] sm:$0xff]  ;;  %v482_v30 = vld [vmem:[%s428_s27 + $0x30] sm:$0xff]  ;;  %1014 = vmatprep.subr.bf16.mxu0 %v2228_v51  ;;  %v616_v56 = vld [vmem:[%s3495_s3 + $0x100] sm:$0xff] }
  0x16   : > { %v2528_v27 = vadd.f32 %v488_v24, %v480_v23  ;;  %v491_v29 = vld [vmem:[%s434_s30 + $0x38] sm:$0xff]  ;;  %v509_v31 = vmul.f32 %v2512_v15, %v2512_v15  ;;  %v490_v33 = vld [vmem:[%s434_s30 + $0x30] sm:$0xff]  ;;  %1087 = vmatprep.subr.bf16.mxu1 %v2230_v53  ;;  %v620_v57 = vld [vmem:[%s3495_s3 + $0x120] sm:$0xff] }
  0x17   : > { %516 = vadd.xlane.f32.xlu0 %v508_v20  ;;  %v2532_v32 = vadd.f32 %v491_v29, %v483_v28  ;;  %520 = vadd.xlane.f32.xlu1 %v510_v25  ;;  %v511_v34 = vmul.f32 %v2518_v21, %v2518_v21  ;;  %v2536_v35 = vadd.f32 %v490_v33, %v482_v30  ;;  %v617_v58 = vld [vmem:[%s3495_s3 + $0x108] sm:$0xff]  ;;  %v608_v0 = vld [vmem:[%s3495_s3 + $0xc0] sm:$0xff]  ;;  %v2419_v33 = vmov 0   ;;  %v2648_v42 = vld [vmem:[%s3495_s3 + $0x1f0] sm:$0xff] }
  0x18   : > { %501 = vst [vmem:[%s473_s14 + $0x8] sm:$0xff] %v2512_v15  ;;  %502 = vst [vmem:[%s473_s14 + $0x10] sm:$0xff] %v2514_v16  ;;  %v512_v36 = vmul.f32 %v2528_v27, %v2528_v27  ;;  %v513_v37 = vmul.f32 %v2526_v26, %v2526_v26  ;;  %1015 = vmatpush1.bf16.msra.mxu0 %v2227_v54  ;;  %1088 = vmatpush1.bf16.msra.mxu1 %v2229_v55  ;;  %v621_v60 = vld [vmem:[%s3495_s3 + $0x128] sm:$0xff]  ;;  %v612_v1 = vld [vmem:[%s3495_s3 + $0xe0] sm:$0xff] }
  0x19   : > { %503 = vst [vmem:[%s473_s14 + $0x18] sm:$0xff] %v2518_v21  ;;  %504 = vst [vmem:[%s473_s14 + $0x20] sm:$0xff] %v2528_v27  ;;  %v514_v41 = vmul.f32 %v2536_v35, %v2536_v35  ;;  %v515_v44 = vmul.f32 %v2532_v32, %v2532_v32  ;;  %v2220_v59 = vcombine.high %v616_v56, %v620_v57  ;;  %v609_v2 = vld [vmem:[%s3495_s3 + $0xc8] sm:$0xff]  ;;  %v600_v6 = vld [vmem:[%s3495_s3 + $0x80] sm:$0xff]  ;;  %1042 = vmatprep.mubr.bf16.mxu0 %v2419_v33 }
  0x1a   : > { %505 = vst [vmem:[%s473_s14 + $0x28] sm:$0xff] %v2526_v26  ;;  %500 = vst [vmem:[%s473_s14] sm:$0xff] %v2510_v11  ;;  %v2222_v61 = vcombine.high %v617_v58, %v621_v60  ;;  %v2219_v62 = vcombine.low %v616_v56, %v620_v57  ;;  %v2221_v63 = vcombine.low %v617_v58, %v621_v60  ;;  %v613_v4 = vld [vmem:[%s3495_s3 + $0xe8] sm:$0xff]  ;;  %v604_v7 = vld [vmem:[%s3495_s3 + $0xa0] sm:$0xff]  ;;  %1115 = vmatprep.mubr.bf16.mxu1 %v2419_v33 }
  0x1b   : > { %507 = vst [vmem:[%s473_s14 + $0x38] sm:$0xff] %v2532_v32  ;;  %506 = vst [vmem:[%s473_s14 + $0x30] sm:$0xff] %v2536_v35  ;;  %518 = vadd.xlane.f32.xlu0 %v509_v31  ;;  %522 = vadd.xlane.f32.xlu1 %v511_v34  ;;  %v2212_v3 = vcombine.high %v608_v0, %v612_v1  ;;  %v2211_v5 = vcombine.low %v608_v0, %v612_v1  ;;  %v601_v12 = vld [vmem:[%s3495_s3 + $0x88] sm:$0xff]  ;;  %v592_v18 = vld [vmem:[%s3495_s3 + $0x40] sm:$0xff] }
  0x1c   : > { %1016 = vmatprep.subr.bf16.mxu0 %v2220_v59  ;;  %1089 = vmatprep.subr.bf16.mxu1 %v2222_v61  ;;  %v2214_v8 = vcombine.high %v609_v2, %v613_v4  ;;  %v2213_v9 = vcombine.low %v609_v2, %v613_v4  ;;  %v2204_v10 = vcombine.high %v600_v6, %v604_v7  ;;  %v605_v13 = vld [vmem:[%s3495_s3 + $0xa8] sm:$0xff]  ;;  %v596_v19 = vld [vmem:[%s3495_s3 + $0x60] sm:$0xff]  ;;  %v2660_v45 = vld [vmem:[%s3495_s3 + $0x1f8] sm:$0xff] }
  0x1d   : > { %1017 = vmatpush1.bf16.msra.mxu0 %v2219_v62  ;;  %1090 = vmatpush1.bf16.msra.mxu1 %v2221_v63  ;;  %v2206_v14 = vcombine.high %v601_v12, %v605_v13  ;;  %v2203_v17 = vcombine.low %v600_v6, %v604_v7  ;;  %v593_v20 = vld [vmem:[%s3495_s3 + $0x48] sm:$0xff]  ;;  %v2205_v22 = vcombine.low %v601_v12, %v605_v13  ;;  %v584_v28 = vld [vmem:[%s3495_s3] sm:$0xff] }
  0x1e   : > { %1018 = vmatprep.subr.bf16.mxu0 %v2212_v3  ;;  %1091 = vmatprep.subr.bf16.mxu1 %v2214_v8  ;;  %v2196_v23 = vcombine.high %v592_v18, %v596_v19  ;;  %v597_v24 = vld [vmem:[%s3495_s3 + $0x68] sm:$0xff]  ;;  %v588_v29 = vld [vmem:[%s3495_s3 + $0x20] sm:$0xff]  ;;  %v2195_v34 = vcombine.low %v592_v18, %v596_v19  ;;  %v2249_v47 = vcombine.low %v2653_v43, %v2660_v45  ;;  %v634_v19 = vld [vmem:[%s3495_s3 + $0x190] sm:$0xff] }
  0x1f   : > { %524 = vadd.xlane.f32.xlu0 %v512_v36  ;;  %526 = vadd.xlane.f32.xlu1 %v513_v37  ;;  %v2198_v25 = vcombine.high %v593_v20, %v597_v24  ;;  %v585_v30 = vld [vmem:[%s3495_s3 + $0x8] sm:$0xff]  ;;  %v2197_v36 = vcombine.low %v593_v20, %v597_v24  ;;  %v2188_v37 = vcombine.high %v584_v28, %v588_v29  ;;  %v638_v20 = vld [vmem:[%s3495_s3 + $0x1b0] sm:$0xff] }
  0x20   : > { %v589_v31 = vld [vmem:[%s3495_s3 + $0x28] sm:$0xff]  ;;  %v2187_v39 = vcombine.low %v584_v28, %v588_v29  ;;  %v2250_v48 = vcombine.high %v2653_v43, %v2660_v45  ;;  %v2240_v29 = vcombine.high %v634_v19, %v638_v20  ;;  %v623_v43 = vld [vmem:[%s3495_s3 + $0x138] sm:$0xff] }
  0x21   : > { %1019 = vmatpush1.bf16.msra.mxu0 %v2211_v5  ;;  %1092 = vmatpush1.bf16.msra.mxu1 %v2213_v9  ;;  %v2190_v38 = vcombine.high %v585_v30, %v589_v31  ;;  %v2189_v40 = vcombine.low %v585_v30, %v589_v31  ;;  %v626_v31 = vld [vmem:[%s3495_s3 + $0x150] sm:$0xff] }
  0x22   : > { %1020 = vmatprep.subr.bf16.mxu0 %v2204_v10  ;;  %1093 = vmatprep.subr.bf16.mxu1 %v2206_v14  ;;  %v2672_v14 = vld [vmem:[%s3494_s2] ss:$0 sm:$0xff] }
  0x23   : > { %528 = vadd.xlane.f32.xlu0 %v514_v41  ;;  %530 = vadd.xlane.f32.xlu1 %v515_v44  ;;  %v2643_v41 = vld [vmem:[%s3495_s3 + $0x1d0] sm:$0xff] }
  0x24   : > { %v2248_v44 = vcombine.high %v2643_v41, %v2648_v42  ;;  %v2247_v46 = vcombine.low %v2643_v41, %v2648_v42  ;;  %v622_v41 = vld [vmem:[%s3495_s3 + $0x130] sm:$0xff]  ;;  %v619_v42 = vld [vmem:[%s3495_s3 + $0x118] sm:$0xff] }
  0x25   : > { %1021 = vmatpush1.bf16.msra.mxu0 %v2203_v17  ;;  %1094 = vmatpush1.bf16.msra.mxu1 %v2205_v22  ;;  %v639_v22 = vld [vmem:[%s3495_s3 + $0x1b8] sm:$0xff] }
  0x26   : > { %1022 = vmatprep.subr.bf16.mxu0 %v2196_v23  ;;  %1095 = vmatprep.subr.bf16.mxu1 %v2198_v25 }
  0x29   : > { %1023 = vmatpush1.bf16.msra.mxu0 %v2195_v34  ;;  %1096 = vmatpush1.bf16.msra.mxu1 %v2197_v36  ;;  %v630_v34 = vld [vmem:[%s3495_s3 + $0x170] sm:$0xff]  ;;  %v627_v36 = vld [vmem:[%s3495_s3 + $0x158] sm:$0xff] }
  0x2a   : > { %1024 = vmatprep.subr.bf16.mxu0 %v2188_v37  ;;  %1097 = vmatprep.subr.bf16.mxu1 %v2190_v38 }
  0x2d   : > { %1025 = vmatpush1.bf16.msra.mxu0 %v2187_v39  ;;  %1098 = vmatpush1.bf16.msra.mxu1 %v2189_v40  ;;  %v2239_v40 = vcombine.low %v634_v19, %v638_v20 }
  0x2e   : > { %1156 = vmatprep.subr.bf16.mxu0 %v2248_v44  ;;  %1229 = vmatprep.subr.bf16.mxu1 %v2250_v48  ;;  %v2232_v48 = vcombine.high %v626_v31, %v630_v34 }
  0xa0   : > { %v517_v49 = vpop.xlane.xlu0 %516  ;;  %v521_v51 = vpop.xlane.xlu1 %520 }
  0xa1   : > { %v533_v50 = vmul.f32 0.0078125, %v517_v49  ;;  %v535_v52 = vmul.f32 0.0078125, %v521_v51  ;;  %v2231_v51 = vcombine.low %v626_v31, %v630_v34 }
  0xa3   : > { %v541_v53 = vadd.f32 1e-06, %v533_v50  ;;  %v543_v55 = vadd.f32 1e-06, %v535_v52  ;;  %v618_v50 = vld [vmem:[%s3495_s3 + $0x110] sm:$0xff] }
  0xa4   : > { %v519_v54 = vpop.xlane.xlu0 %518  ;;  %v523_v57 = vpop.xlane.xlu1 %522 }
  0xa5   : > { %2395 = vrsqrt.f32 %v541_v53  ;;  %v534_v56 = vmul.f32 0.0078125, %v519_v54  ;;  %v536_v58 = vmul.f32 0.0078125, %v523_v57  ;;  %v2224_v53 = vcombine.high %v618_v50, %v622_v41  ;;  %v614_v57 = vld [vmem:[%s3495_s3 + $0xf0] sm:$0xff] }
  0xa6   : > { %2397 = vrsqrt.f32 %v543_v55  ;;  %v2226_v54 = vcombine.high %v619_v42, %v623_v43  ;;  %v610_v55 = vld [vmem:[%s3495_s3 + $0xd0] sm:$0xff] }
  0xa7   : > { %v542_v59 = vadd.f32 1e-06, %v534_v56  ;;  %v544_v60 = vadd.f32 1e-06, %v536_v58 }
  0xa8   : > { %v525_v61 = vpop.xlane.xlu0 %524  ;;  %v527_v62 = vpop.xlane.xlu1 %526 }
  0xa9   : > { %2399 = vrsqrt.f32 %v542_v59  ;;  %v537_v63 = vmul.f32 0.0078125, %v525_v61  ;;  %v538_v0 = vmul.f32 0.0078125, %v527_v62  ;;  %v2223_v61 = vcombine.low %v618_v50, %v622_v41 }
  0xaa   : > { %2401 = vrsqrt.f32 %v544_v60  ;;  %v2225_v62 = vcombine.low %v619_v42, %v623_v43 }
  0xab   : > { %v545_v1 = vadd.f32 1e-06, %v537_v63  ;;  %v546_v3 = vadd.f32 1e-06, %v538_v0  ;;  %v2216_v63 = vcombine.high %v610_v55, %v614_v57 }
  0xac   : > { %v529_v2 = vpop.xlane.xlu0 %528  ;;  %v531_v4 = vpop.xlane.xlu1 %530 }
  0xad   : > { %v539_v5 = vmul.f32 0.0078125, %v529_v2  ;;  %2403 = vrsqrt.f32 %v545_v1  ;;  %v540_v6 = vmul.f32 0.0078125, %v531_v4  ;;  %v602_v1 = vld [vmem:[%s3495_s3 + $0x90] sm:$0xff]  ;;  %v607_v4 = vld [vmem:[%s3495_s3 + $0xb8] sm:$0xff] }
  0xae   : > { %2405 = vrsqrt.f32 %v546_v3  ;;  %v606_v2 = vld [vmem:[%s3495_s3 + $0xb0] sm:$0xff]  ;;  %v603_v3 = vld [vmem:[%s3495_s3 + $0x98] sm:$0xff] }
  0xaf   : > { %v547_v8 = vadd.f32 1e-06, %v539_v5  ;;  %v548_v9 = vadd.f32 1e-06, %v540_v6  ;;  %v2207_v20 = vcombine.low %v602_v1, %v606_v2 }
  0xb1   : > { %2407 = vrsqrt.f32 %v547_v8  ;;  %v2215_v8 = vcombine.low %v610_v55, %v614_v57 }
  0xb2   : > { %v2396_v7 = vpop.eup %2395  ;;  %2409 = vrsqrt.f32 %v548_v9 }
  0xb3   : > { %v2398_v10 = vpop.eup %2397  ;;  %v557_v12 = vmul.f32 %v2396_v7, %v2510_v11  ;;  %v635_v11 = vld [vmem:[%s3495_s3 + $0x198] sm:$0xff] }
  0xb4   : > { %v559_v24 = vmul.f32 %v2398_v10, %v2514_v16  ;;  %v2242_v30 = vcombine.high %v635_v11, %v639_v22  ;;  %v631_v16 = vld [vmem:[%s3495_s3 + $0x178] sm:$0xff]  ;;  %v2241_v44 = vcombine.low %v635_v11, %v639_v22  ;;  %v2208_v10 = vcombine.high %v602_v1, %v606_v2 }
  0xb5   : > { %v572_v23 = vmul.f32 %v2672_v14, %v557_v12  ;;  %v2234_v49 = vcombine.high %v627_v36, %v631_v16  ;;  %v2233_v52 = vcombine.low %v627_v36, %v631_v16  ;;  %v2210_v12 = vcombine.high %v603_v3, %v607_v4 }
  0xb6   : > { %v2400_v13 = vpop.eup %2399  ;;  %v574_v37 = vmul.f32 %v2672_v14, %v559_v24  ;;  %v2209_v11 = vcombine.low %v603_v3, %v607_v4  ;;  %v587_v24 = vld [vmem:[%s3495_s3 + $0x18] sm:$0xff] }
  0xb7   : > { %v2402_v17 = vpop.eup %2401  ;;  %v558_v18 = vmul.f32 %v2400_v13, %v2512_v15  ;;  %v594_v13 = vld [vmem:[%s3495_s3 + $0x50] sm:$0xff] }
  0xb8   : > { %v560_v25 = vmul.f32 %v2402_v17, %v2518_v21  ;;  %v598_v17 = vld [vmem:[%s3495_s3 + $0x70] sm:$0xff] }
  0xb9   : > { %v573_v15 = vmul.f32 %v2672_v14, %v558_v18  ;;  %v2200_v22 = vcombine.high %v594_v13, %v598_v17 }
  0xba   : > { %v2404_v21 = vpop.eup %2403  ;;  %v575_v38 = vmul.f32 %v2672_v14, %v560_v25  ;;  %v591_v25 = vld [vmem:[%s3495_s3 + $0x38] sm:$0xff] }
  0xbb   : > { %v2691_v28 = vpack.c.bf16 %v573_v15, %v572_v23  ;;  %v2406_v39 = vpop.eup %2405  ;;  %v586_v15 = vld [vmem:[%s3495_s3 + $0x10] sm:$0xff]  ;;  %v2194_v36 = vcombine.high %v587_v24, %v591_v25 }
  0xbc   : > { %v2729_v45 = vpack.c.bf16 %v575_v38, %v574_v37 }
  0xbd   : > { %1043 = vmatmul.mubr.bf16.vlgmr.msra.gmra.mxu0 %v2691_v28  ;;  %1116 = vmatmul.mubr.bf16.vlgmr.msra.gmra.mxu1 %v2691_v28 }
  0xbe   : > { %1157 = vmatpush1.bf16.msra.mxu0 %v2247_v46  ;;  %1230 = vmatpush1.bf16.msra.mxu1 %v2249_v47  ;;  %v561_v46 = vmul.f32 %v2404_v21, %v2528_v27  ;;  %v562_v47 = vmul.f32 %v2406_v39, %v2526_v26  ;;  %v2408_v56 = vpop.eup %2407  ;;  %v611_v26 = vld [vmem:[%s3495_s3 + $0xd8] sm:$0xff]  ;;  %v2193_v21 = vcombine.low %v587_v24, %v591_v25  ;;  %v2812_v39 = vld [vmem:[%s3496_s4] sm:$0xff] }
  0xbf   : > { %1158 = vmatprep.subr.bf16.mxu0 %v2240_v29  ;;  %1231 = vmatprep.subr.bf16.mxu1 %v2242_v30  ;;  %v615_v27 = vld [vmem:[%s3495_s3 + $0xf8] sm:$0xff]  ;;  %v2410_v58 = vpop.eup %2409  ;;  %v563_v6 = vmul.f32 %v2408_v56, %v2536_v35  ;;  %v2199_v30 = vcombine.low %v594_v13, %v598_v17 }
  0xc0   : > { %1052 = vmatprep.mubr.bf16.mxu0 %v2419_v33  ;;  %1125 = vmatprep.mubr.bf16.mxu1 %v2419_v33  ;;  %v576_v59 = vmul.f32 %v2672_v14, %v561_v46  ;;  %v577_v60 = vmul.f32 %v2672_v14, %v562_v47  ;;  %v2218_v0 = vcombine.high %v611_v26, %v615_v27  ;;  %v599_v35 = vld [vmem:[%s3495_s3 + $0x78] sm:$0xff] }
  0xc1   : > { %v564_v7 = vmul.f32 %v2410_v58, %v2532_v32  ;;  %v2217_v9 = vcombine.low %v611_v26, %v615_v27  ;;  %v595_v32 = vld [vmem:[%s3495_s3 + $0x58] sm:$0xff]  ;;  %v578_v18 = vmul.f32 %v2672_v14, %v563_v6 }
  0xc2   : > { %1159 = vmatpush1.bf16.msra.mxu0 %v2239_v40  ;;  %1232 = vmatpush1.bf16.msra.mxu1 %v2241_v44  ;;  %v582_v5 = vpack.c.bf16 %v577_v60, %v576_v59  ;;  %v2202_v23 = vcombine.high %v595_v32, %v599_v35  ;;  %v2201_v31 = vcombine.low %v595_v32, %v599_v35 }
  0xc3   : > { %1160 = vmatprep.subr.bf16.mxu0 %v2232_v48  ;;  %1233 = vmatprep.subr.bf16.mxu1 %v2234_v49  ;;  %v579_v19 = vmul.f32 %v2672_v14, %v564_v7  ;;  %v590_v14 = vld [vmem:[%s3495_s3 + $0x30] sm:$0xff] }
  0xc4   : > { %v2192_v34 = vcombine.high %v586_v15, %v590_v14  ;;  %v2191_v16 = vcombine.low %v586_v15, %v590_v14 }
  0xc5   : > { %1053 = vmatmul.mubr.bf16.gmra.mxu0 %v2729_v45  ;;  %1126 = vmatmul.mubr.bf16.gmra.mxu1 %v2729_v45  ;;  %v583_v29 = vpack.c.bf16 %v579_v19, %v578_v18 }
  0xc6   : > { %1161 = vmatpush1.bf16.msra.mxu0 %v2231_v51  ;;  %1234 = vmatpush1.bf16.msra.mxu1 %v2233_v52 }
  0xc7   : > { %1162 = vmatprep.subr.bf16.mxu0 %v2224_v53  ;;  %1235 = vmatprep.subr.bf16.mxu1 %v2226_v54 }
  0xc8   : > { %1062 = vmatprep.mubr.bf16.mxu0 %v2419_v33  ;;  %1135 = vmatprep.mubr.bf16.mxu1 %v2419_v33 }
  0xca   : > { %1163 = vmatpush1.bf16.msra.mxu0 %v2223_v61  ;;  %1236 = vmatpush1.bf16.msra.mxu1 %v2225_v62 }
  0xcb   : > { %1164 = vmatprep.subr.bf16.mxu0 %v2216_v63  ;;  %1237 = vmatprep.subr.bf16.mxu1 %v2218_v0 }
  0xcd   : > { %1063 = vmatmul.mubr.bf16.gmra.mxu0 %v582_v5  ;;  %1136 = vmatmul.mubr.bf16.gmra.mxu1 %v582_v5 }
  0xce   : > { %1165 = vmatpush1.bf16.msra.mxu0 %v2215_v8  ;;  %1238 = vmatpush1.bf16.msra.mxu1 %v2217_v9 }
  0xcf   : > { %1166 = vmatprep.subr.bf16.mxu0 %v2208_v10  ;;  %1239 = vmatprep.subr.bf16.mxu1 %v2210_v12 }
  0xd0   : > { %1072 = vmatprep.mubr.bf16.mxu0 %v2419_v33  ;;  %1145 = vmatprep.mubr.bf16.mxu1 %v2419_v33 }
  0xd2   : > { %1167 = vmatpush1.bf16.msra.mxu0 %v2207_v20  ;;  %1240 = vmatpush1.bf16.msra.mxu1 %v2209_v11 }
  0xd3   : > { %1168 = vmatprep.subr.bf16.mxu0 %v2200_v22  ;;  %1241 = vmatprep.subr.bf16.mxu1 %v2202_v23 }
  0xd5   : > { %1073 = vmatmul.mubr.bf16.gmra.mxu0 %v583_v29  ;;  %1146 = vmatmul.mubr.bf16.gmra.mxu1 %v583_v29 }
  0xd6   : > { %1169 = vmatpush1.bf16.msra.mxu0 %v2199_v30  ;;  %1242 = vmatpush1.bf16.msra.mxu1 %v2201_v31 }
  0xd7   : > { %1170 = vmatprep.subr.bf16.mxu0 %v2192_v34  ;;  %1243 = vmatprep.subr.bf16.mxu1 %v2194_v36 }
  0xd8   : > { %1188 = vmatprep.mubr.bf16.mxu0 %v2419_v33  ;;  %1261 = vmatprep.mubr.bf16.mxu1 %v2419_v33 }
  0xda   : > { %1171 = vmatpush1.bf16.msra.mxu0 %v2191_v16  ;;  %1244 = vmatpush1.bf16.msra.mxu1 %v2193_v21 }
  0xdd   : > { %1189 = vmatmul.mubr.bf16.vlgmr.msra.gmra.mxu0 %v2691_v28  ;;  %1262 = vmatmul.mubr.bf16.vlgmr.msra.gmra.mxu1 %v2691_v28  ;;  %v650_v28 = vlaneseq }
  0xde   : > { %1198 = vmatprep.mubr.bf16.mxu0 %v2419_v33  ;;  %1271 = vmatprep.mubr.bf16.mxu1 %v2419_v33 }
  0xdf   : > { %v2806_v37 = vshrl.u32 %v650_v28, 7 }
  0xe1   : > { %v652_v38 = vsub.s32 0, %v2806_v37  ;;  %v660_v44 = vsub.s32 2, %v2806_v37  ;;  %v656_v41 = vsub.s32 1, %v2806_v37  ;;  %v664_v53 = vsub.s32 3, %v2806_v37 }
  0xe2   : > { %v676_v20 = vsub.s32 6, %v2806_v37  ;;  %v672_v15 = vsub.s32 5, %v2806_v37  ;;  %v680_v14 = vsub.s32 7, %v2806_v37  ;;  %v668_v16 = vsub.s32 4, %v2806_v37 }
  0xe3   : > { %v2815_v40 = vrot.slane %v2812_v39, %v652_v38  ;;  %v2822_v50 = vrot.slane %v2812_v39, %v660_v44  ;;  %v2834_v52 = vrot.slane %v2812_v39, %v656_v41  ;;  %v2848_v58 = vrot.slane %v2812_v39, %v664_v53 }
  0xe4   : > { %v2926_v31 = vrot.slane %v2812_v39, %v676_v20  ;;  %v2936_v21 = vrot.slane %v2812_v39, %v672_v15  ;;  %v2939_v38 = vrot.slane %v2812_v39, %v680_v14 }
  0xe5   : > { %1199 = vmatmul.mubr.bf16.gmra.mxu0 %v2729_v45  ;;  %1272 = vmatmul.mubr.bf16.gmra.mxu1 %v2729_v45 }
  0xe6   : > { %1208 = vmatprep.mubr.bf16.mxu0 %v2419_v33  ;;  %1281 = vmatprep.mubr.bf16.mxu1 %v2419_v33 }
  0xed   : > { %1209 = vmatmul.mubr.bf16.gmra.mxu0 %v582_v5  ;;  %1282 = vmatmul.mubr.bf16.gmra.mxu1 %v582_v5 }
  0xee   : > { %1218 = vmatprep.mubr.bf16.mxu0 %v2419_v33  ;;  %1291 = vmatprep.mubr.bf16.mxu1 %v2419_v33 }
  0xf5   : > { %1219 = vmatmul.mubr.bf16.gmra.mxu0 %v583_v29  ;;  %1292 = vmatmul.mubr.bf16.gmra.mxu1 %v583_v29 }
 0x17d   : > { %v1044_v48 = vpop.f32.mrf.mxu0  ;;  %v1117_v33 = vpop.f32.mrf.mxu1 }
 0x17e   : > { %v2819_v49 = vadd.f32 %v1044_v48, %v2815_v40  ;;  %v2831_v51 = vadd.f32 %v1117_v33, %v2822_v50 }
 0x17f   : > { %v1046_v42 = vpop.f32.mrf.mxu0  ;;  %v1119_v43 = vpop.f32.mrf.mxu1 }
 0x180   : > { %1330 = vrot.lane.b32.xlu0 %v2819_v49, %s2420_s21  ;;  %v2845_v27 = vadd.f32 %v1046_v42, %v2834_v52  ;;  %v2858_v0 = vadd.f32 %v1119_v43, %v2848_v58 }
 0x181   : > { %v1048_v45 = vpop.f32.mrf.mxu0  ;;  %v1121_v46 = vpop.f32.mrf.mxu1 }
 0x182   : > { %v2828_v47 = vadd.f32 %v1048_v45, %v2815_v40  ;;  %v2842_v26 = vadd.f32 %v1121_v46, %v2822_v50  ;;  %v2965_v45 = vrot.slane %v2812_v39, %v668_v16 }
 0x183   : > { %v1050_v54 = vpop.f32.mrf.mxu0  ;;  %v1123_v55 = vpop.f32.mrf.mxu1 }
 0x184   : > { %1332 = vrot.lane.b32.xlu1 %v2828_v47, %s2420_s21  ;;  %1522 = vrot.lane.b32.xlu0 %v2831_v51, %s2420_s21  ;;  %v2855_v63 = vadd.f32 %v1050_v54, %v2834_v52  ;;  %v2868_v6 = vadd.f32 %v1123_v55, %v2848_v58  ;;  %v2974_v55 = vld [vmem:[%s2952_s25] sm:$0xff] }
 0x185   : > { %v1054_v56 = vpop.f32.mrf.mxu0  ;;  %v1127_v57 = vpop.f32.mrf.mxu1 }
 0x186   : > { %v2863_v3 = vadd.f32 %v1127_v57, %v2822_v50  ;;  %v2881_v12 = vadd.f32 %v1054_v56, %v2815_v40 }
 0x187   : > { %v1056_v59 = vpop.f32.mrf.mxu0  ;;  %v1129_v60 = vpop.f32.mrf.mxu1 }
 0x188   : > { %1524 = vrot.lane.b32.xlu1 %v2842_v26, %s2420_s21  ;;  %1426 = vrot.lane.b32.xlu0 %v2845_v27, %s2420_s21  ;;  %v2884_v13 = vadd.f32 %v1056_v59, %v2834_v52  ;;  %v2903_v11 = vadd.f32 %v1129_v60, %v2848_v58 }
 0x189   : > { %v1058_v61 = vpop.f32.mrf.mxu0  ;;  %v1131_v62 = vpop.f32.mrf.mxu1 }
 0x18a   : > { %v2899_v19 = vadd.f32 %v1058_v61, %v2815_v40  ;;  %v2923_v30 = vadd.f32 %v1131_v62, %v2822_v50 }
 0x18b   : > { %v1060_v1 = vpop.f32.mrf.mxu0  ;;  %v1133_v2 = vpop.f32.mrf.mxu1 }
 0x18c   : > { %1428 = vrot.lane.b32.xlu1 %v2855_v63, %s2420_s21  ;;  %1618 = vrot.lane.b32.xlu0 %v2858_v0, %s2420_s21  ;;  %v2955_v37 = vadd.f32 %v1060_v1, %v2834_v52  ;;  %v2977_v56 = vadd.f32 %v1133_v2, %v2848_v58  ;;  %v2994_v2 = vld [vmem:[%s2952_s25 + $0x8] sm:$0xff] }
 0x18d   : > { %v1064_v4 = vpop.f32.mrf.mxu0  ;;  %v1137_v5 = vpop.f32.mrf.mxu1 }
 0x18e   : > { %v2914_v24 = vadd.f32 %v1064_v4, %v2815_v40  ;;  %v2942_v44 = vadd.f32 %v1137_v5, %v2822_v50 }
 0x18f   : > { %v1066_v7 = vpop.f32.mrf.mxu0  ;;  %v2870_v8 = vpop.f32.mrf.mxu1 }
 0x190   : > { %1620 = vrot.lane.b32.xlu1 %v2868_v6, %s2420_s21  ;;  %1526 = vrot.lane.b32.xlu0 %v2863_v3, %s2420_s21  ;;  %v2980_v57 = vadd.f32 %v1066_v7, %v2834_v52 }
 0x191   : > { %v2876_v9 = vpop.f32.mrf.mxu0  ;;  %v2878_v10 = vpop.f32.mrf.mxu1 }
 0x193   : > { %v2886_v17 = vpop.f32.mrf.mxu0  ;;  %v2888_v32 = vpop.f32.mrf.mxu1 }
 0x194   : > { %1334 = vrot.lane.b32.xlu1 %v2881_v12, %s2420_s21  ;;  %1430 = vrot.lane.b32.xlu0 %v2884_v13, %s2420_s21 }
 0x195   : > { %v2894_v35 = vpop.f32.mrf.mxu0  ;;  %v2896_v18 = vpop.f32.mrf.mxu1 }
 0x197   : > { %v2905_v22 = vpop.f32.mrf.mxu0  ;;  %v2907_v23 = vpop.f32.mrf.mxu1 }
 0x198   : > { %1336 = vrot.lane.b32.xlu1 %v2899_v19, %s2420_s21  ;;  %1622 = vrot.lane.b32.xlu0 %v2903_v11, %s2420_s21 }
 0x199   : > { %v2918_v25 = vpop.f32.mrf.mxu0  ;;  %v2920_v29 = vpop.f32.mrf.mxu1 }
 0x19b   : > { %v2928_v34 = vpop.f32.mrf.mxu0  ;;  %v2930_v36 = vpop.f32.mrf.mxu1 }
 0x19c   : > { %1528 = vrot.lane.b32.xlu1 %v2923_v30, %s2420_s21  ;;  %1338 = vrot.lane.b32.xlu0 %v2914_v24, %s2420_s21 }
 0x19d   : > { %v2946_v48 = vpop.f32.mrf.mxu0  ;;  %v1263_v33 = vpop.f32.mrf.mxu1 }
 0x19e   : > { %v1264_v41 = vadd.f32 %v1263_v33, %v2926_v31  ;;  %v3011_v33 = vadd.f32 %v2876_v9, %v2815_v40  ;;  %v3029_v9 = vadd.f32 %v2894_v35, %v2815_v40 }
 0x19f   : > { %v1192_v42 = vpop.f32.mrf.mxu0  ;;  %v1265_v43 = vpop.f32.mrf.mxu1 }
 0x1a0   : > { %v2360_v46 = vpack.c.bf16 %v1264_v41, %v1264_v41  ;;  %v2968_v53 = vadd.f32 %v1192_v42, %v2936_v21  ;;  %v1266_v54 = vadd.f32 %v1265_v43, %v2939_v38  ;;  %1432 = vrot.lane.b32.xlu1 %v2955_v37, %s2420_s21  ;;  %1530 = vrot.lane.b32.xlu0 %v2942_v44, %s2420_s21 }
 0x1a1   : > { %v1194_v39 = vpop.f32.mrf.mxu0  ;;  %v1267_v59 = vpop.f32.mrf.mxu1 }
 0x1a2   : > { %1826 = vst [vmem:[%s2962_s28] sm:$0xf] %v2360_v46  ;;  %v2987_v60 = vmul.f32 %v2974_v55, %v2968_v53  ;;  %v2376_v61 = vpack.c.bf16 %v1266_v54, %v1266_v54  ;;  %v2990_v62 = vadd.f32 %v1194_v39, %v2965_v45  ;;  %v1268_v1 = vadd.f32 %v1267_v59, %v2926_v31 }
 0x1a3   : > { %v1196_v4 = vpop.f32.mrf.mxu0  ;;  %v1269_v5 = vpop.f32.mrf.mxu1  ;;  %v3021_v46 = vadd.f32 %v2870_v8, %v2848_v58  ;;  %v3035_v8 = vadd.f32 %v2878_v10, %v2822_v50 }
 0x1a4   : > { %1954 = vst [vmem:[%s2962_s28 + $0x4] sm:$0xf] %v2376_v61  ;;  %v2999_v7 = vmul.f32 %v2994_v2, %v2990_v62  ;;  %v2361_v20 = vpack.c.bf16 %v1268_v1, %v1268_v1  ;;  %v3002_v15 = vadd.f32 %v1196_v4, %v2936_v21  ;;  %v1270_v14 = vadd.f32 %v1269_v5, %v2939_v38 }
 0x1a5   : > { %1624 = vrot.lane.b32.xlu1 %v2977_v56, %s2420_s21  ;;  %1434 = vrot.lane.b32.xlu0 %v2980_v57, %s2420_s21  ;;  %v1273_v16 = vpop.f32.mrf.mxu1 }
 0x1a6   : > { %1827 = vst [vmem:[%s2962_s28 + $0x8] sm:$0xf] %v2361_v20  ;;  %v3016_v41 = vmul.f32 %v2994_v2, %v3002_v15  ;;  %v2377_v42 = vpack.c.bf16 %v1270_v14, %v1270_v14  ;;  %v1274_v43 = vadd.f32 %v1273_v16, %v2926_v31  ;;  %v3045_v14 = vadd.f32 %v2896_v18, %v2822_v50 }
 0x1a7   : > { %v1275_v54 = vpop.f32.mrf.mxu1  ;;  %v3051_v16 = vadd.f32 %v2886_v17, %v2834_v52 }
 0x1a8   : > { %1955 = vst [vmem:[%s2962_s28 + $0xc] sm:$0xf] %v2377_v42  ;;  %v2362_v39 = vpack.c.bf16 %v1274_v43, %v1274_v43  ;;  %v1276_v59 = vadd.f32 %v1275_v54, %v2939_v38 }
 0x1a9   : > { %1340 = vrot.lane.b32.xlu1 %v3011_v33, %s2420_s21  ;;  %1626 = vrot.lane.b32.xlu0 %v3021_v46, %s2420_s21  ;;  %v1277_v61 = vpop.f32.mrf.mxu1 }
 0x1aa   : > { %1828 = vst [vmem:[%s2962_s28 + $0x10] sm:$0xf] %v2362_v39  ;;  %v2378_v1 = vpack.c.bf16 %v1276_v59, %v1276_v59  ;;  %v1278_v4 = vadd.f32 %v1277_v61, %v2926_v31  ;;  %v1200_v39 = vpop.f32.mrf.mxu0  ;;  %v3061_v61 = vadd.f32 %v2905_v22, %v2834_v52 }
 0x1ab   : > { %v1279_v5 = vpop.f32.mrf.mxu1 }
 0x1ac   : > { %1956 = vst [vmem:[%s2962_s28 + $0x14] sm:$0xf] %v2378_v1  ;;  %v2363_v20 = vpack.c.bf16 %v1278_v4, %v1278_v4  ;;  %v1280_v35 = vadd.f32 %v1279_v5, %v2939_v38  ;;  %v3067_v1 = vadd.f32 %v2888_v32, %v2848_v58 }
 0x1ad   : > { %1532 = vrot.lane.b32.xlu1 %v3035_v8, %s2420_s21  ;;  %1342 = vrot.lane.b32.xlu0 %v3029_v9, %s2420_s21  ;;  %v1283_v10 = vpop.f32.mrf.mxu1 }
 0x1ae   : > { %1829 = vst [vmem:[%s2962_s28 + $0x18] sm:$0xf] %v2363_v20  ;;  %v2379_v42 = vpack.c.bf16 %v1280_v35, %v1280_v35  ;;  %v1284_v43 = vadd.f32 %v1283_v10, %v2926_v31  ;;  %v1202_v35 = vpop.f32.mrf.mxu0 }
 0x1af   : > { %v1285_v54 = vpop.f32.mrf.mxu1 }
 0x1b0   : > { %1957 = vst [vmem:[%s2962_s28 + $0x1c] sm:$0xf] %v2379_v42  ;;  %v2364_v59 = vpack.c.bf16 %v1284_v43, %v1284_v43  ;;  %v1286_v18 = vadd.f32 %v1285_v54, %v2939_v38  ;;  %v3079_v42 = vadd.f32 %v2918_v25, %v2815_v40  ;;  %v3095_v25 = vadd.f32 %v2920_v29, %v2822_v50 }
 0x1b1   : > { %1436 = vrot.lane.b32.xlu1 %v3051_v16, %s2420_s21  ;;  %1534 = vrot.lane.b32.xlu0 %v3045_v14, %s2420_s21  ;;  %v1287_v17 = vpop.f32.mrf.mxu1  ;;  %v3111_v50 = vadd.f32 %v2928_v34, %v2834_v52  ;;  %v3131_v52 = vadd.f32 %v1202_v35, %v2936_v21 }
 0x1b2   : > { %1830 = vst [vmem:[%s2962_s28 + $0x20] sm:$0xf] %v2364_v59  ;;  %v2380_v4 = vpack.c.bf16 %v1286_v18, %v1286_v18  ;;  %v1288_v5 = vadd.f32 %v1287_v17, %v2926_v31  ;;  %v3085_v59 = vadd.f32 %v2907_v23, %v2848_v58  ;;  %v1204_v17 = vpop.f32.mrf.mxu0 }
 0x1b3   : > { %v1289_v20 = vpop.f32.mrf.mxu1 }
 0x1b4   : > { %1958 = vst [vmem:[%s2962_s28 + $0x24] sm:$0xf] %v2380_v4  ;;  %v2365_v10 = vpack.c.bf16 %v1288_v5, %v1288_v5  ;;  %v1290_v22 = vadd.f32 %v1289_v20, %v2939_v38 }
 0x1b5   : > { %1628 = vrot.lane.b32.xlu1 %v3067_v1, %s2420_s21  ;;  %1438 = vrot.lane.b32.xlu0 %v3061_v61, %s2420_s21  ;;  %v1293_v32 = vpop.f32.mrf.mxu1 }
 0x1b6   : > { %1831 = vst [vmem:[%s2962_s28 + $0x28] sm:$0xf] %v2365_v10  ;;  %v2381_v43 = vpack.c.bf16 %v1290_v22, %v1290_v22  ;;  %v1294_v54 = vadd.f32 %v1293_v32, %v2926_v31  ;;  %v3101_v10 = vadd.f32 %v2946_v48, %v2965_v45  ;;  %v1206_v32 = vpop.f32.mrf.mxu0  ;;  %v3124_v48 = vadd.f32 %v1200_v39, %v2965_v45 }
 0x1b7   : > { %v1295_v18 = vpop.f32.mrf.mxu1  ;;  %v3155_v35 = vadd.f32 %v1206_v32, %v2936_v21 }
 0x1b8   : > { %1959 = vst [vmem:[%s2962_s28 + $0x2c] sm:$0xf] %v2381_v43  ;;  %v2366_v4 = vpack.c.bf16 %v1294_v54, %v1294_v54  ;;  %v1296_v5 = vadd.f32 %v1295_v18, %v2939_v38 }
 0x1b9   : > { %1344 = vrot.lane.b32.xlu1 %v3079_v42, %s2420_s21  ;;  %1630 = vrot.lane.b32.xlu0 %v3085_v59, %s2420_s21  ;;  %v1297_v40 = vpop.f32.mrf.mxu1 }
 0x1ba   : > { %1832 = vst [vmem:[%s2962_s28 + $0x30] sm:$0xf] %v2366_v4  ;;  %v2382_v23 = vpack.c.bf16 %v1296_v5, %v1296_v5  ;;  %v1298_v20 = vadd.f32 %v1297_v40, %v2926_v31  ;;  %v1210_v31 = vpop.f32.mrf.mxu0 }
 0x1bb   : > { %v1299_v22 = vpop.f32.mrf.mxu1 }
 0x1bc   : > { %1960 = vst [vmem:[%s2962_s28 + $0x34] sm:$0xf] %v2382_v23  ;;  %v2367_v43 = vpack.c.bf16 %v1298_v20, %v1298_v20  ;;  %v1300_v54 = vadd.f32 %v1299_v22, %v2939_v38  ;;  %v3121_v38 = vadd.f32 %v2930_v36, %v2848_v58  ;;  %v1212_v18 = vpop.f32.mrf.mxu0  ;;  %v3138_v58 = vadd.f32 %v1210_v31, %v2965_v45 }
 0x1bd   : > { %1536 = vrot.lane.b32.xlu1 %v3095_v25, %s2420_s21  ;;  %1714 = vrot.lane.b32.xlu0 %v3101_v10, %s2420_s21  ;;  %v3148_v39 = vadd.f32 %v1212_v18, %v2936_v21  ;;  %v1322_v18 = vmul.f32 %v2974_v55, %v2819_v49  ;;  %v1514_v49 = vmul.f32 %v2974_v55, %v2831_v51 }
 0x1be   : > { %1833 = vst [vmem:[%s2962_s28 + $0x38] sm:$0xf] %v2367_v43  ;;  %v2383_v29 = vpack.c.bf16 %v1300_v54, %v1300_v54  ;;  %v1214_v34 = vpop.f32.mrf.mxu0  ;;  %v1319_v43 = vand.u32 127, %v650_v28  ;;  %v1418_v51 = vmul.f32 %v2974_v55, %v2845_v27 }
 0x1c0   : > { %1961 = vst [vmem:[%s2962_s28 + $0x3c] sm:$0xf] %v2383_v29  ;;  %v1216_v36 = vpop.f32.mrf.mxu0  ;;  %vm1320_vm0 = vcmp.lt.s32.totalorder %v1319_v43, 64  ;;  %v3199_v29 = vld [vmem:[%s3194_s11] sm:$0xff]  ;;  %v1323_v43 = vmul.f32 %v2994_v2, %v2828_v47 }
 0x1c1   : > { %1440 = vrot.lane.b32.xlu1 %v3111_v50, %s2420_s21  ;;  %1842 = vrot.lane.b32.xlu0 %v2968_v53, %s2420_s21  ;;  %v3145_v53 = vadd.f32 %v1204_v17, %v2965_v45  ;;  %v3165_v17 = vadd.f32 %v1214_v34, %v2965_v45  ;;  %v3175_v40 = vadd.f32 %v1216_v36, %v2936_v21  ;;  %v3206_v34 = vld [vmem:[%s3194_s11 + $0x8] sm:$0xff] }
 0x1c3   : > { %3506 = vst [vmem:[#allocation2_spill] sm:$0xff] %v3175_v40 }
 0x1c5   : > { %1632 = vrot.lane.b32.xlu1 %v3121_v38, %s2420_s21  ;;  %1718 = vrot.lane.b32.xlu0 %v3124_v48, %s2420_s21 }
 0x1c9   : > { %1716 = vrot.lane.b32.xlu1 %v2990_v62, %s2420_s21  ;;  %1846 = vrot.lane.b32.xlu0 %v3131_v52, %s2420_s21  ;;  %v1220_v62 = vpop.f32.mrf.mxu0 }
 0x1cb   : > { %v1222_v4 = vpop.f32.mrf.mxu0 }
 0x1cc   : > { %v3168_v5 = vadd.f32 %v1222_v4, %v2936_v21 }
 0x1cd   : > { %1844 = vrot.lane.b32.xlu1 %v3002_v15, %s2420_s21  ;;  %1722 = vrot.lane.b32.xlu0 %v3138_v58, %s2420_s21  ;;  %v3158_v15 = vadd.f32 %v1220_v62, %v2965_v45  ;;  %v1224_v23 = vpop.f32.mrf.mxu0 }
 0x1ce   : > { %v3180_v20 = vadd.f32 %v1224_v23, %v2965_v45  ;;  %v2421_v45 = vmov 1.0  }
 0x1cf   : > { %v1226_v22 = vpop.f32.mrf.mxu0  ;;  %v3196_v54 = vsel %vm1320_vm0, -1.0, %v2421_v45 }
 0x1d0   : > { %3507 = vst [vmem:[#allocation3_spill] sm:$0xff] %v3180_v20  ;;  %v3185_v32 = vadd.f32 %v1226_v22, %v2936_v21 }
 0x1d1   : > { %1720 = vrot.lane.b32.xlu1 %v3145_v53, %s2420_s21  ;;  %1850 = vrot.lane.b32.xlu0 %v3148_v39, %s2420_s21 }
 0x1d2   : > { %3508 = vst [vmem:[#allocation4_spill] sm:$0xff] %v3185_v32 }
 0x1d5   : > { %1848 = vrot.lane.b32.xlu1 %v3155_v35, %s2420_s21  ;;  %1726 = vrot.lane.b32.xlu0 %v3158_v15, %s2420_s21 }
 0x1d9   : > { %1724 = vrot.lane.b32.xlu1 %v3165_v17, %s2420_s21  ;;  %1854 = vrot.lane.b32.xlu0 %v3168_v5, %s2420_s21 }
 0x1dd   : > { %1852 = vrot.lane.b32.xlu1 %v3175_v40, %s2420_s21 }
 0x1e1   : > { %1728 = vrot.lane.b32.xlu1 %v3180_v20, %s2420_s21 }
 0x1e5   : > { %1856 = vrot.lane.b32.xlu1 %v3185_v32, %s2420_s21  ;;  %v1515_v32 = vmul.f32 %v2994_v2, %v2842_v26 }
 0x1f2   : > { %v1331_v21 = vpop.permute.xlu0 %1330 }
 0x1f3   : > { %v1346_v31 = vmul.f32 %v1331_v21, %v3196_v54 }
 0x1f5   : > { %v1354_v28 = vmul.f32 %v1346_v31, %v3199_v29 }
 0x1f6   : > { %v1333_v36 = vpop.permute.xlu1 %1332  ;;  %v1523_v23 = vpop.permute.xlu0 %1522 }
 0x1f7   : > { %v1362_v62 = vadd.f32 %v1354_v28, %v1322_v18  ;;  %v1347_v4 = vmul.f32 %v1333_v36, %v3196_v54  ;;  %v1538_v22 = vmul.f32 %v1523_v23, %v3196_v54 }
 0x1f9   : > { %v1370_v45 = vmul.f32 0.088388346, %v1362_v62  ;;  %v1355_v21 = vmul.f32 %v1347_v4, %v3206_v34  ;;  %v1546_v31 = vmul.f32 %v1538_v22, %v3199_v29 }
 0x1fa   : > { %v1525_v18 = vpop.permute.xlu1 %1524  ;;  %v1427_v47 = vpop.permute.xlu0 %1426 }
 0x1fb   : > { %v2320_v28 = vpack.c.bf16 %v1370_v45, %v1370_v45  ;;  %v1363_v36 = vadd.f32 %v1355_v21, %v1323_v43  ;;  %v1539_v23 = vmul.f32 %v1525_v18, %v3196_v54  ;;  %v1554_v62 = vadd.f32 %v1546_v31, %v1514_v49 }
 0x1fc   : > { %v1442_v4 = vmul.f32 %v1427_v47, %v3196_v54 }
 0x1fd   : > { %1410 = vst [vmem:[%s3217_s17] sm:$0xf] %v2320_v28  ;;  %v1371_v20 = vmul.f32 0.088388346, %v1363_v36  ;;  %v1547_v40 = vmul.f32 %v1539_v23, %v3206_v34  ;;  %v1562_v22 = vmul.f32 0.088388346, %v1554_v62  ;;  %v1419_v23 = vmul.f32 %v2994_v2, %v2855_v63 }
 0x1fe   : > { %v1450_v43 = vmul.f32 %v1442_v4, %v3199_v29  ;;  %v1429_v45 = vpop.permute.xlu1 %1428  ;;  %v1619_v18 = vpop.permute.xlu0 %1618  ;;  %v3242_v4 = vld [vmem:[%s2952_s25 + $0x10] sm:$0xff] }
 0x1ff   : > { %v2321_v21 = vpack.c.bf16 %v1371_v20, %v1371_v20  ;;  %v1555_v49 = vadd.f32 %v1547_v40, %v1515_v32  ;;  %v1443_v31 = vmul.f32 %v1429_v45, %v3196_v54  ;;  %v2336_v26 = vpack.c.bf16 %v1562_v22, %v1562_v22 }
 0x200   : > { %v1458_v28 = vadd.f32 %v1450_v43, %v1418_v51  ;;  %v1634_v36 = vmul.f32 %v1619_v18, %v3196_v54  ;;  %v1610_v20 = vmul.f32 %v2974_v55, %v2858_v0  ;;  %v3246_v43 = vld [vmem:[%s3194_s11 + $0x10] sm:$0xff]  ;;  %v1611_v0 = vmul.f32 %v2994_v2, %v2868_v6 }
 0x201   : > { %1411 = vst [vmem:[%s3217_s17 + $0x10] sm:$0xf] %v2321_v21  ;;  %v1563_v27 = vmul.f32 0.088388346, %v1555_v49  ;;  %v1451_v47 = vmul.f32 %v1443_v31, %v3206_v34  ;;  %1602 = vst [vmem:[%s3217_s17 + $0x8] sm:$0xf] %v2336_v26 }
 0x202   : > { %v1466_v40 = vmul.f32 0.088388346, %v1458_v28  ;;  %v1642_v32 = vmul.f32 %v1634_v36, %v3199_v29  ;;  %v1621_v62 = vpop.permute.xlu1 %1620  ;;  %v1527_v45 = vpop.permute.xlu0 %1526  ;;  %v1516_v28 = vmul.f32 %v3242_v4, %v2863_v3  ;;  %v1324_v3 = vmul.f32 %v3242_v4, %v2881_v12 }
 0x203   : > { %v2337_v51 = vpack.c.bf16 %v1563_v27, %v1563_v27  ;;  %v1459_v22 = vadd.f32 %v1451_v47, %v1419_v23  ;;  %v1635_v63 = vmul.f32 %v1621_v62, %v3196_v54  ;;  %v1540_v31 = vmul.f32 %v1527_v45, %v3196_v54  ;;  %v3266_v45 = vld [vmem:[%s2952_s25 + $0x18] sm:$0xff] }
 0x204   : > { %v2328_v21 = vpack.c.bf16 %v1466_v40, %v1466_v40  ;;  %v1650_v49 = vadd.f32 %v1642_v32, %v1610_v20 }
 0x205   : > { %1603 = vst [vmem:[%s3217_s17 + $0x18] sm:$0xf] %v2337_v51  ;;  %v1467_v18 = vmul.f32 0.088388346, %v1459_v22  ;;  %v1643_v26 = vmul.f32 %v1635_v63, %v3206_v34  ;;  %v1548_v23 = vmul.f32 %v1540_v31, %v3246_v43  ;;  %v1420_v63 = vmul.f32 %v3242_v4, %v2884_v13  ;;  %v3271_v31 = vld [vmem:[%s3194_s11 + $0x18] sm:$0xff] }
 0x206   : > { %1506 = vst [vmem:[%s3217_s17 + $0x4] sm:$0xf] %v2328_v21  ;;  %v1658_v36 = vmul.f32 0.088388346, %v1650_v49  ;;  %v1335_v27 = vpop.permute.xlu1 %1334  ;;  %v1431_v2 = vpop.permute.xlu0 %1430 }
 0x207   : > { %v2329_v47 = vpack.c.bf16 %v1467_v18, %v1467_v18  ;;  %v1651_v20 = vadd.f32 %v1643_v26, %v1611_v0  ;;  %v1348_v6 = vmul.f32 %v1335_v27, %v3196_v54  ;;  %v1556_v32 = vadd.f32 %v1548_v23, %v1516_v28 }
 0x208   : > { %v2344_v40 = vpack.c.bf16 %v1658_v36, %v1658_v36  ;;  %v1444_v62 = vmul.f32 %v1431_v2, %v3196_v54  ;;  %v1325_v27 = vmul.f32 %v3266_v45, %v2899_v19 }
 0x209   : > { %1507 = vst [vmem:[%s3217_s17 + $0x14] sm:$0xf] %v2329_v47  ;;  %v1659_v51 = vmul.f32 0.088388346, %v1651_v20  ;;  %v1356_v22 = vmul.f32 %v1348_v6, %v3246_v43  ;;  %v1564_v21 = vmul.f32 0.088388346, %v1556_v32  ;;  %v1612_v6 = vmul.f32 %v3242_v4, %v2903_v11 }
 0x20a   : > { %1698 = vst [vmem:[%s3217_s17 + $0xc] sm:$0xf] %v2344_v40  ;;  %v1452_v49 = vmul.f32 %v1444_v62, %v3246_v43  ;;  %v1337_v0 = vpop.permute.xlu1 %1336  ;;  %v1623_v28 = vpop.permute.xlu0 %1622  ;;  %v3284_v62 = vld [vmem:[%s2952_s25 + $0x20] sm:$0xff]  ;;  %v1517_v11 = vmul.f32 %v3266_v45, %v2923_v30 }
 0x20b   : > { %v2345_v18 = vpack.c.bf16 %v1659_v51, %v1659_v51  ;;  %v1364_v12 = vadd.f32 %v1356_v22, %v1324_v3  ;;  %v1349_v26 = vmul.f32 %v1337_v0, %v3196_v54  ;;  %v2338_v36 = vpack.c.bf16 %v1564_v21, %v1564_v21  ;;  %v3288_v22 = vld [vmem:[%s3194_s11 + $0x20] sm:$0xff] }
 0x20c   : > { %v1460_v23 = vadd.f32 %v1452_v49, %v1420_v63  ;;  %v1636_v13 = vmul.f32 %v1623_v28, %v3196_v54 }
 0x20d   : > { %1699 = vst [vmem:[%s3217_s17 + $0x1c] sm:$0xf] %v2345_v18  ;;  %v1372_v47 = vmul.f32 0.088388346, %v1364_v12  ;;  %v1357_v20 = vmul.f32 %v1349_v26, %v3271_v31  ;;  %1604 = vst [vmem:[%s3217_s17 + $0x28] sm:$0xf] %v2338_v36  ;;  %v1326_v26 = vmul.f32 %v3284_v62, %v2914_v24 }
 0x20e   : > { %v1468_v2 = vmul.f32 0.088388346, %v1460_v23  ;;  %v1644_v40 = vmul.f32 %v1636_v13, %v3246_v43  ;;  %v1529_v32 = vpop.permute.xlu1 %1528  ;;  %v1339_v63 = vpop.permute.xlu0 %1338 }
 0x20f   : > { %v2322_v3 = vpack.c.bf16 %v1372_v47, %v1372_v47  ;;  %v1365_v51 = vadd.f32 %v1357_v20, %v1325_v27  ;;  %v1541_v19 = vmul.f32 %v1529_v32, %v3196_v54  ;;  %v1350_v0 = vmul.f32 %v1339_v63, %v3196_v54 }
 0x210   : > { %v2330_v21 = vpack.c.bf16 %v1468_v2, %v1468_v2  ;;  %v1652_v49 = vadd.f32 %v1644_v40, %v1612_v6  ;;  %v1421_v40 = vmul.f32 %v3266_v45, %v2955_v37 }
 0x211   : > { %1412 = vst [vmem:[%s3217_s17 + $0x20] sm:$0xf] %v2322_v3  ;;  %v1373_v18 = vmul.f32 0.088388346, %v1365_v51  ;;  %v1549_v12 = vmul.f32 %v1541_v19, %v3271_v31  ;;  %v1358_v36 = vmul.f32 %v1350_v0, %v3288_v22  ;;  %v1518_v3 = vmul.f32 %v3284_v62, %v2942_v44 }
 0x212   : > { %1508 = vst [vmem:[%s3217_s17 + $0x24] sm:$0xf] %v2330_v21  ;;  %v1660_v28 = vmul.f32 0.088388346, %v1652_v49  ;;  %v1433_v23 = vpop.permute.xlu1 %1432  ;;  %v1531_v20 = vpop.permute.xlu0 %1530  ;;  %v1613_v44 = vmul.f32 %v3266_v45, %v2977_v56 }
 0x213   : > { %v2323_v13 = vpack.c.bf16 %v1373_v18, %v1373_v18  ;;  %v1557_v27 = vadd.f32 %v1549_v12, %v1517_v11  ;;  %v1445_v47 = vmul.f32 %v1433_v23, %v3196_v54  ;;  %v1366_v6 = vadd.f32 %v1358_v36, %v1326_v26  ;;  %v3318_v23 = vld [vmem:[%s2952_s25 + $0x28] sm:$0xff] }
 0x214   : > { %v2346_v30 = vpack.c.bf16 %v1660_v28, %v1660_v28  ;;  %v1542_v2 = vmul.f32 %v1531_v20, %v3196_v54  ;;  %v1422_v36 = vmul.f32 %v3284_v62, %v2980_v57 }
 0x215   : > { %1413 = vst [vmem:[%s3217_s17 + $0x30] sm:$0xf] %v2323_v13  ;;  %v1565_v24 = vmul.f32 0.088388346, %v1557_v27  ;;  %v1453_v32 = vmul.f32 %v1445_v47, %v3271_v31  ;;  %v1374_v51 = vmul.f32 0.088388346, %v1366_v6 }
 0x216   : > { %1700 = vst [vmem:[%s3217_s17 + $0x2c] sm:$0xf] %v2346_v30  ;;  %v1550_v19 = vmul.f32 %v1542_v2, %v3288_v22  ;;  %v3323_v47 = vld [vmem:[%s3194_s11 + $0x28] sm:$0xff] }
 0x217   : > { %v1625_v63 = vpop.permute.xlu1 %1624  ;;  %v2339_v21 = vpack.c.bf16 %v1565_v24, %v1565_v24  ;;  %v1461_v49 = vadd.f32 %v1453_v32, %v1421_v40  ;;  %v1435_v0 = vpop.permute.xlu0 %1434  ;;  %v2324_v11 = vpack.c.bf16 %v1374_v51, %v1374_v51  ;;  %v1327_v32 = vmul.f32 %v3318_v23, %v3011_v33 }
 0x218   : > { %v1637_v37 = vmul.f32 %v1625_v63, %v3196_v54  ;;  %v1558_v18 = vadd.f32 %v1550_v19, %v1518_v3  ;;  %v1446_v12 = vmul.f32 %v1435_v0, %v3196_v54  ;;  %v1614_v19 = vmul.f32 %v3284_v62, %v3021_v46 }
 0x219   : > { %1605 = vst [vmem:[%s3217_s17 + $0x38] sm:$0xf] %v2339_v21  ;;  %v1469_v26 = vmul.f32 0.088388346, %v1461_v49  ;;  %1414 = vst [vmem:[%s3217_s17 + $0x40] sm:$0xf] %v2324_v11  ;;  %v1519_v46 = vmul.f32 %v3318_v23, %v3035_v8 }
 0x21a   : > { %v1645_v28 = vmul.f32 %v1637_v37, %v3271_v31  ;;  %v1566_v13 = vmul.f32 0.088388346, %v1558_v18  ;;  %v1454_v27 = vmul.f32 %v1446_v12, %v3288_v22  ;;  %v3336_v37 = vld [vmem:[%s2952_s25 + $0x30] sm:$0xff] }
 0x21b   : > { %v1341_v20 = vpop.permute.xlu1 %1340  ;;  %v2331_v30 = vpack.c.bf16 %v1469_v26, %v1469_v26  ;;  %v1627_v2 = vpop.permute.xlu0 %1626  ;;  %v3340_v18 = vld [vmem:[%s3194_s11 + $0x30] sm:$0xff] }
 0x21c   : > { %v1653_v56 = vadd.f32 %v1645_v28, %v1613_v44  ;;  %v1351_v6 = vmul.f32 %v1341_v20, %v3196_v54  ;;  %v2340_v40 = vpack.c.bf16 %v1566_v13, %v1566_v13  ;;  %v1462_v24 = vadd.f32 %v1454_v27, %v1422_v36 }
 0x21d   : > { %v1638_v57 = vmul.f32 %v1627_v2, %v3196_v54  ;;  %1509 = vst [vmem:[%s3217_s17 + $0x34] sm:$0xf] %v2331_v30  ;;  %v1328_v27 = vmul.f32 %v3336_v37, %v3029_v9 }
 0x21e   : > { %v1661_v3 = vmul.f32 0.088388346, %v1653_v56  ;;  %v1359_v51 = vmul.f32 %v1351_v6, %v3323_v47  ;;  %1606 = vst [vmem:[%s3217_s17 + $0x48] sm:$0xf] %v2340_v40  ;;  %v1470_v63 = vmul.f32 0.088388346, %v1462_v24 }
 0x21f   : > { %v1646_v21 = vmul.f32 %v1638_v57, %v3288_v22  ;;  %v1533_v49 = vpop.permute.xlu1 %1532  ;;  %v1343_v12 = vpop.permute.xlu0 %1342 }
 0x220   : > { %v2347_v0 = vpack.c.bf16 %v1661_v3, %v1661_v3  ;;  %v1367_v11 = vadd.f32 %v1359_v51, %v1327_v32  ;;  %v1543_v33 = vmul.f32 %v1533_v49, %v3196_v54  ;;  %v2332_v44 = vpack.c.bf16 %v1470_v63, %v1470_v63 }
 0x221   : > { %v1654_v26 = vadd.f32 %v1646_v21, %v1614_v19  ;;  %v1352_v28 = vmul.f32 %v1343_v12, %v3196_v54  ;;  %v1423_v3 = vmul.f32 %v3318_v23, %v3051_v16  ;;  %v1520_v19 = vmul.f32 %v3336_v37, %v3045_v14 }
 0x222   : > { %1701 = vst [vmem:[%s3217_s17 + $0x3c] sm:$0xf] %v2347_v0  ;;  %v1375_v36 = vmul.f32 0.088388346, %v1367_v11  ;;  %v1551_v13 = vmul.f32 %v1543_v33, %v3323_v47  ;;  %1510 = vst [vmem:[%s3217_s17 + $0x44] sm:$0xf] %v2332_v44  ;;  %v1615_v14 = vmul.f32 %v3318_v23, %v3067_v1 }
 0x223   : > { %v1662_v20 = vmul.f32 0.088388346, %v1654_v26  ;;  %v1360_v30 = vmul.f32 %v1352_v28, %v3340_v18  ;;  %v1437_v56 = vpop.permute.xlu1 %1436  ;;  %v1535_v24 = vpop.permute.xlu0 %1534 }
 0x224   : > { %v2325_v6 = vpack.c.bf16 %v1375_v36, %v1375_v36  ;;  %v1559_v2 = vadd.f32 %v1551_v13, %v1519_v46  ;;  %v1447_v40 = vmul.f32 %v1437_v56, %v3196_v54  ;;  %v1544_v32 = vmul.f32 %v1535_v24, %v3196_v54  ;;  %v3370_v13 = vld [vmem:[%s2952_s25 + $0x38] sm:$0xff] }
 0x225   : > { %v2348_v8 = vpack.c.bf16 %v1662_v20, %v1662_v20  ;;  %v1368_v57 = vadd.f32 %v1360_v30, %v1328_v27  ;;  %v1424_v36 = vmul.f32 %v3336_v37, %v3061_v61  ;;  %v3375_v30 = vld [vmem:[%s3194_s11 + $0x38] sm:$0xff]  ;;  %v1329_v61 = vmul.f32 %v3370_v13, %v3079_v42 }
 0x226   : > { %1415 = vst [vmem:[%s3217_s17 + $0x50] sm:$0xf] %v2325_v6  ;;  %v1567_v9 = vmul.f32 0.088388346, %v1559_v2  ;;  %v1455_v51 = vmul.f32 %v1447_v40, %v3323_v47  ;;  %v1552_v21 = vmul.f32 %v1544_v32, %v3340_v18 }
 0x227   : > { %1702 = vst [vmem:[%s3217_s17 + $0x4c] sm:$0xf] %v2348_v8  ;;  %v1376_v63 = vmul.f32 0.088388346, %v1368_v57  ;;  %v1629_v49 = vpop.permute.xlu1 %1628  ;;  %v1439_v33 = vpop.permute.xlu0 %1438 }
 0x228   : > { %v2341_v0 = vpack.c.bf16 %v1567_v9, %v1567_v9  ;;  %v1463_v11 = vadd.f32 %v1455_v51, %v1423_v3  ;;  %v1639_v16 = vmul.f32 %v1629_v49, %v3196_v54  ;;  %v1560_v44 = vadd.f32 %v1552_v21, %v1520_v19 }
 0x229   : > { %v2326_v12 = vpack.c.bf16 %v1376_v63, %v1376_v63  ;;  %v1448_v26 = vmul.f32 %v1439_v33, %v3196_v54  ;;  %v1616_v9 = vmul.f32 %v3336_v37, %v3085_v59 }
 0x22a   : > { %1607 = vst [vmem:[%s3217_s17 + $0x58] sm:$0xf] %v2341_v0  ;;  %v1471_v28 = vmul.f32 0.088388346, %v1463_v11  ;;  %v1647_v46 = vmul.f32 %v1639_v16, %v3323_v47  ;;  %v1568_v27 = vmul.f32 0.088388346, %v1560_v44 }
 0x22b   : > { %1416 = vst [vmem:[%s3217_s17 + $0x60] sm:$0xf] %v2326_v12  ;;  %v1456_v20 = vmul.f32 %v1448_v26, %v3340_v18  ;;  %v1345_v56 = vpop.permute.xlu1 %1344  ;;  %v1631_v40 = vpop.permute.xlu0 %1630  ;;  %v1521_v12 = vmul.f32 %v3370_v13, %v3095_v25  ;;  %v1706_v26 = vmul.f32 %v2974_v55, %v3101_v10 }
 0x22c   : > { %v2333_v6 = vpack.c.bf16 %v1471_v28, %v1471_v28  ;;  %v1655_v1 = vadd.f32 %v1647_v46, %v1615_v14  ;;  %v1353_v2 = vmul.f32 %v1345_v56, %v3196_v54  ;;  %v2342_v24 = vpack.c.bf16 %v1568_v27, %v1568_v27 }
 0x22d   : > { %v1464_v8 = vadd.f32 %v1456_v20, %v1424_v36  ;;  %v1640_v57 = vmul.f32 %v1631_v40, %v3196_v54 }
 0x22e   : > { %1511 = vst [vmem:[%s3217_s17 + $0x54] sm:$0xf] %v2333_v6  ;;  %v1663_v32 = vmul.f32 0.088388346, %v1655_v1  ;;  %v1361_v3 = vmul.f32 %v1353_v2, %v3375_v30  ;;  %1608 = vst [vmem:[%s3217_s17 + $0x68] sm:$0xf] %v2342_v24  ;;  %v1425_v2 = vmul.f32 %v3370_v13, %v3111_v50 }
 0x22f   : > { %v1472_v51 = vmul.f32 0.088388346, %v1464_v8  ;;  %v1648_v19 = vmul.f32 %v1640_v57, %v3340_v18  ;;  %v1537_v63 = vpop.permute.xlu1 %1536  ;;  %v1715_v11 = vpop.permute.xlu0 %1714 }
 0x230   : > { %v2349_v21 = vpack.c.bf16 %v1663_v32, %v1663_v32  ;;  %v1369_v49 = vadd.f32 %v1361_v3, %v1329_v61  ;;  %v1545_v0 = vmul.f32 %v1537_v63, %v3196_v54  ;;  %v1730_v33 = vmul.f32 %v1715_v11, %v3196_v54 }
 0x231   : > { %v2334_v42 = vpack.c.bf16 %v1472_v51, %v1472_v51  ;;  %v1656_v16 = vadd.f32 %v1648_v19, %v1616_v9  ;;  %v1617_v51 = vmul.f32 %v3370_v13, %v3121_v38  ;;  %v1708_v63 = vmul.f32 %v3242_v4, %v3124_v48 }
 0x232   : > { %1703 = vst [vmem:[%s3217_s17 + $0x5c] sm:$0xf] %v2349_v21  ;;  %v1377_v59 = vmul.f32 0.088388346, %v1369_v49  ;;  %v1553_v44 = vmul.f32 %v1545_v0, %v3375_v30  ;;  %v1738_v28 = vmul.f32 %v1730_v33, %v3199_v29  ;;  %v1836_v48 = vmul.f32 %v3242_v4, %v3131_v52 }
 0x233   : > { %1512 = vst [vmem:[%s3217_s17 + $0x64] sm:$0xf] %v2334_v42  ;;  %v1664_v14 = vmul.f32 0.088388346, %v1656_v16  ;;  %v1441_v46 = vpop.permute.xlu1 %1440  ;;  %v1843_v25 = vpop.permute.xlu0 %1842  ;;  %v1710_v4 = vmul.f32 %v3284_v62, %v3138_v58 }
 0x234   : > { %v2327_v36 = vpack.c.bf16 %v1377_v59, %v1377_v59  ;;  %v1561_v27 = vadd.f32 %v1553_v44, %v1521_v12  ;;  %v1449_v20 = vmul.f32 %v1441_v46, %v3196_v54  ;;  %v1746_v6 = vadd.f32 %v1738_v28, %v1706_v26 }
 0x235   : > { %v2350_v56 = vpack.c.bf16 %v1664_v14, %v1664_v14  ;;  %v1858_v1 = vmul.f32 %v1843_v25, %v3196_v54 }
 0x236   : > { %1417 = vst [vmem:[%s3217_s17 + $0x70] sm:$0xf] %v2327_v36  ;;  %v1569_v55 = vmul.f32 0.088388346, %v1561_v27  ;;  %v1457_v10 = vmul.f32 %v1449_v20, %v3375_v30  ;;  %v2352_v40 = vpack.c.bf16 %v1746_v6, %v1746_v6 }
 0x237   : > { %1704 = vst [vmem:[%s3217_s17 + $0x6c] sm:$0xf] %v2350_v56  ;;  %v1866_v24 = vmul.f32 %v1858_v1, %v3199_v29  ;;  %v1633_v8 = vpop.permute.xlu1 %1632  ;;  %v1719_v32 = vpop.permute.xlu0 %1718 }
 0x238   : > { %v2343_v57 = vpack.c.bf16 %v1569_v55, %v1569_v55  ;;  %v1465_v61 = vadd.f32 %v1457_v10, %v1425_v2  ;;  %v1641_v50 = vmul.f32 %v1633_v8, %v3196_v54  ;;  %1786 = vst [vmem:[%s3406_s19] sm:$0xf] %v2352_v40  ;;  %v1732_v9 = vmul.f32 %v1719_v32, %v3196_v54 }
 0x239   : > { %v1874_v3 = vadd.f32 %v1866_v24, %v2987_v60  ;;  %v1838_v8 = vmul.f32 %v3284_v62, %v3148_v39  ;;  %v1712_v62 = vmul.f32 %v3336_v37, %v3158_v15 }
 0x23a   : > { %1609 = vst [vmem:[%s3217_s17 + $0x78] sm:$0xf] %v2343_v57  ;;  %v1473_v19 = vmul.f32 0.088388346, %v1465_v61  ;;  %v1649_v29 = vmul.f32 %v1641_v50, %v3375_v30  ;;  %v1740_v49 = vmul.f32 %v1732_v9, %v3246_v43 }
 0x23b   : > { %v2368_v21 = vpack.c.bf16 %v1874_v3, %v1874_v3  ;;  %v1717_v0 = vpop.permute.xlu1 %1716  ;;  %v1847_v16 = vpop.permute.xlu0 %1846 }
 0x23c   : > { %v2335_v11 = vpack.c.bf16 %v1473_v19, %v1473_v19  ;;  %v1657_v42 = vadd.f32 %v1649_v29, %v1617_v51  ;;  %v1731_v60 = vmul.f32 %v1717_v0, %v3196_v54  ;;  %v1748_v33 = vadd.f32 %v1740_v49, %v1708_v63 }
 0x23d   : > { %1914 = vst [vmem:[%s3406_s19 + $0x4] sm:$0xf] %v2368_v21  ;;  %v1860_v38 = vmul.f32 %v1847_v16, %v3196_v54  ;;  %v1837_v51 = vmul.f32 %v3266_v45, %v3155_v35 }
 0x23e   : > { %1513 = vst [vmem:[%s3217_s17 + $0x74] sm:$0xf] %v2335_v11  ;;  %v1665_v12 = vmul.f32 0.088388346, %v1657_v42  ;;  %v1739_v59 = vmul.f32 %v1731_v60, %v3206_v34  ;;  %v2354_v44 = vpack.c.bf16 %v1748_v33, %v1748_v33  ;;  %v1840_v42 = vmul.f32 %v3336_v37, %v3168_v5 }
 0x23f   : > { %v1868_v26 = vmul.f32 %v1860_v38, %v3246_v43  ;;  %v1845_v14 = vpop.permute.xlu1 %1844  ;;  %v1723_v27 = vpop.permute.xlu0 %1722 }
 0x240   : > { %v2351_v28 = vpack.c.bf16 %v1665_v12, %v1665_v12  ;;  %v1747_v46 = vadd.f32 %v1739_v59, %v2999_v7  ;;  %v1859_v36 = vmul.f32 %v1845_v14, %v3196_v54  ;;  %1788 = vst [vmem:[%s3406_s19 + $0x10] sm:$0xf] %v2354_v44  ;;  %v1734_v25 = vmul.f32 %v1723_v27, %v3196_v54 }
 0x241   : > { %v1876_v20 = vadd.f32 %v1868_v26, %v1836_v48 }
 0x242   : > { %1705 = vst [vmem:[%s3217_s17 + $0x7c] sm:$0xf] %v2351_v28  ;;  %v2353_v56 = vpack.c.bf16 %v1747_v46, %v1747_v46  ;;  %v1867_v52 = vmul.f32 %v1859_v36, %v3206_v34  ;;  %v1742_v6 = vmul.f32 %v1734_v25, %v3288_v22  ;;  %v1709_v34 = vmul.f32 %v3266_v45, %v3145_v53  ;;  %v3510_v28 = vld [vmem:[#allocation3_spill] sm:$0xff]  ;;  %v3511_v25 = vld [vmem:[#allocation4_spill] sm:$0xff] }
 0x243   : > { %v2370_v43 = vpack.c.bf16 %v1876_v20, %v1876_v20  ;;  %v1721_v7 = vpop.permute.xlu1 %1720  ;;  %v1851_v55 = vpop.permute.xlu0 %1850  ;;  %v1711_v45 = vmul.f32 %v3318_v23, %v3165_v17  ;;  %v3509_v17 = vld [vmem:[#allocation2_spill] sm:$0xff]  ;;  %v1713_v46 = vmul.f32 %v3370_v13, %v3510_v28 }
 0x244   : > { %1787 = vst [vmem:[%s3406_s19 + $0x8] sm:$0xf] %v2353_v56  ;;  %v1875_v1 = vadd.f32 %v1867_v52, %v3016_v41  ;;  %v1733_v2 = vmul.f32 %v1721_v7, %v3196_v54  ;;  %v1750_v10 = vadd.f32 %v1742_v6, %v1710_v4  ;;  %v1862_v40 = vmul.f32 %v1851_v55, %v3196_v54 }
 0x245   : > { %1916 = vst [vmem:[%s3406_s19 + $0x14] sm:$0xf] %v2370_v43  ;;  %v1839_v48 = vmul.f32 %v3318_v23, %v3509_v17  ;;  %v1841_v56 = vmul.f32 %v3370_v13, %v3511_v25 }
 0x246   : > { %v2369_v58 = vpack.c.bf16 %v1875_v1, %v1875_v1  ;;  %v1741_v24 = vmul.f32 %v1733_v2, %v3271_v31  ;;  %v2356_v57 = vpack.c.bf16 %v1750_v10, %v1750_v10  ;;  %v1870_v41 = vmul.f32 %v1862_v40, %v3288_v22 }
 0x247   : > { %v1849_v61 = vpop.permute.xlu1 %1848  ;;  %v1727_v3 = vpop.permute.xlu0 %1726 }
 0x248   : > { %1915 = vst [vmem:[%s3406_s19 + $0xc] sm:$0xf] %v2369_v58  ;;  %v1749_v50 = vadd.f32 %v1741_v24, %v1709_v34  ;;  %v1861_v32 = vmul.f32 %v1849_v61, %v3196_v54  ;;  %1790 = vst [vmem:[%s3406_s19 + $0x20] sm:$0xf] %v2356_v57  ;;  %v1878_v9 = vadd.f32 %v1870_v41, %v1838_v8 }
 0x249   : > { %v1736_v53 = vmul.f32 %v1727_v3, %v3196_v54 }
 0x24a   : > { %v2355_v19 = vpack.c.bf16 %v1749_v50, %v1749_v50  ;;  %v1869_v39 = vmul.f32 %v1861_v32, %v3271_v31  ;;  %v2372_v22 = vpack.c.bf16 %v1878_v9, %v1878_v9 }
 0x24b   : > { %v1744_v29 = vmul.f32 %v1736_v53, %v3340_v18  ;;  %v1725_v63 = vpop.permute.xlu1 %1724  ;;  %v1855_v0 = vpop.permute.xlu0 %1854 }
 0x24c   : > { %1789 = vst [vmem:[%s3406_s19 + $0x18] sm:$0xf] %v2355_v19  ;;  %v1877_v21 = vadd.f32 %v1869_v39, %v1837_v51  ;;  %v1735_v49 = vmul.f32 %v1725_v63, %v3196_v54  ;;  %1918 = vst [vmem:[%s3406_s19 + $0x24] sm:$0xf] %v2372_v22  ;;  %v1864_v35 = vmul.f32 %v1855_v0, %v3196_v54 }
 0x24d   : > { %v1752_v11 = vadd.f32 %v1744_v29, %v1712_v62 }
 0x24e   : > { %v2371_v31 = vpack.c.bf16 %v1877_v21, %v1877_v21  ;;  %v1743_v15 = vmul.f32 %v1735_v49, %v3323_v47  ;;  %v1872_v16 = vmul.f32 %v1864_v35, %v3340_v18 }
 0x24f   : > { %v2358_v60 = vpack.c.bf16 %v1752_v11, %v1752_v11  ;;  %v1853_v33 = vpop.permute.xlu1 %1852 }
 0x250   : > { %1917 = vst [vmem:[%s3406_s19 + $0x1c] sm:$0xf] %v2371_v31  ;;  %v1751_v38 = vadd.f32 %v1743_v15, %v1711_v45  ;;  %v1863_v12 = vmul.f32 %v1853_v33, %v3196_v54  ;;  %v1880_v59 = vadd.f32 %v1872_v16, %v1840_v42 }
 0x251   : > { %1792 = vst [vmem:[%s3406_s19 + $0x30] sm:$0xf] %v2358_v60 }
 0x252   : > { %v2357_v44 = vpack.c.bf16 %v1751_v38, %v1751_v38  ;;  %v1871_v26 = vmul.f32 %v1863_v12, %v3323_v47  ;;  %v2374_v14 = vpack.c.bf16 %v1880_v59, %v1880_v59 }
 0x253   : > { %v1729_v5 = vpop.permute.xlu1 %1728 }
 0x254   : > { %1791 = vst [vmem:[%s3406_s19 + $0x28] sm:$0xf] %v2357_v44  ;;  %v1879_v37 = vadd.f32 %v1871_v26, %v1839_v48  ;;  %v1737_v18 = vmul.f32 %v1729_v5, %v3196_v54  ;;  %1920 = vst [vmem:[%s3406_s19 + $0x34] sm:$0xf] %v2374_v14 }
 0x256   : > { %v2373_v36 = vpack.c.bf16 %v1879_v37, %v1879_v37  ;;  %v1745_v27 = vmul.f32 %v1737_v18, %v3375_v30 }
 0x257   : > { %v1857_v20 = vpop.permute.xlu1 %1856 }
 0x258   : > { %1919 = vst [vmem:[%s3406_s19 + $0x2c] sm:$0xf] %v2373_v36  ;;  %v1753_v23 = vadd.f32 %v1745_v27, %v1713_v46  ;;  %v1865_v47 = vmul.f32 %v1857_v20, %v3196_v54 }
 0x25a   : > { %v2359_v52 = vpack.c.bf16 %v1753_v23, %v1753_v23  ;;  %v1873_v4 = vmul.f32 %v1865_v47, %v3375_v30 }
 0x25c   : > { %1793 = vst [vmem:[%s3406_s19 + $0x38] sm:$0xf] %v2359_v52  ;;  %v1881_v43 = vadd.f32 %v1873_v4, %v1841_v56 }
 0x25e   : > { %v2375_v6 = vpack.c.bf16 %v1881_v43, %v1881_v43 }
 0x260   : > { %1921 = vst [vmem:[%s3406_s19 + $0x3c] sm:$0xf] %v2375_v6 }
 0x261 PF: > { %s21_s13 = sadd.s32 1, %s2417_s13  }
 0x262   : > { %p18_p4 = scmp.ge.s32.totalorder %s21_s13, 4  }
 0x264   :  { %20 = sbr.rel (!%p18_p4) target bundleno = 1 (0x1), region = 123 }

// kernel: _lambda_.8
= control target key start
LH: loop header
LB: loop body
LE: loop exit
PB: predicated region body
PF: predicated region fallthrough
CT: control target
= control target key end

     0   :  { %s4338_s24 = smov 0   ;;  %s4340_s25 = smov 0   ;;  %s5913_s0 = inlined_call_operand.vmem [shape: bf16[128,512], index: 0, kind: input, shape index: {}]   ;;  %s5914_s1 = inlined_call_operand.vmem [shape: bf16[128,256], index: 1, kind: input, shape index: {}]   ;;  %s5915_s2 = inlined_call_operand.vmem [shape: bf16[128,256], index: 2, kind: input, shape index: {}]   ;;  %s5916_s3 = inlined_call_operand.vmem [shape: bf16[512,128], index: 3, kind: input, shape index: {}]   ;;  %s5917_s4 = inlined_call_operand.vmem [shape: f32[128,128], index: 4, kind: input, shape index: {}, may-alias: {4,7}]   ;;  %s5918_s5 = inlined_call_operand.vmem [shape: f32[1,128], index: 5, kind: input, shape index: {}]   ;;  %s5919_s6 = inlined_call_operand.vmem [shape: f32[128,128], index: 6, kind: output, shape index: {0}]   ;;  %s5920_s7 = inlined_call_operand.vmem [shape: f32[128,128], index: 7, kind: output, shape index: {1}, may-alias: {4,7}]  }
   0x1   :  { %s4342_s26 = smov 0   ;;  %s4344_s27 = smov 0  }
   0x2   :  { %s4346_s28 = smov 0  }
   0x3 LB: > { %s27_s29 = sadd.s32 1, %s4284_s26  ;;  %s30_s30 = sadd.s32 1, %s4288_s27  ;;  %s4292_s28 = sphi %s4346_s28, %s18_s28   ;;  %s4288_s27 = sphi %s4344_s27, %s6088_s27   ;;  %s4284_s26 = sphi %s4342_s26, %s6087_s26   ;;  %s4280_s25 = sphi %s4340_s25, %s6086_s25   ;;  %s4276_s24 = sphi %s4338_s24, %s6085_s24  }
   0x4   : > { %p28_p0 = scmp.ge.s32.totalorder %s27_s29, 2  ;;  %p3489_p1 = scmp.ge.s32.totalorder %s4292_s28, 1 }
   0x5   : > { %p289_p2 = scmp.lt.s32.totalorder %s4292_s28, 5 }
   0x6   : > { %s6090_s29 = smov (%p28_p0, %s27_s29), 0  ;;  %s6092_s30 = smov (!%p28_p0, %s30_s30), %s4288_s27 }
   0x7   : > { %p290_p3 = pnand %p3489_p1, %p289_p2  ;;  %p32_p4 = scmp.ge.s32.totalorder %s6092_s30, 2 }
   0x8   : > { %s3490_s8 = sshll.u32 (!%p290_p3), %s4280_s25, 3  ;;  %s3493_s9 = sshll.u32 (!%p290_p3), %s4276_s24, 3 }
   0x9   : > { %s6094_s30 = smov (%p32_p4, %s6092_s30), 0  ;;  %293 = sbr.rel (%p290_p3) target bundleno = 2968 (0xb98), region = 44 }
   0xa   : > { %5955 = sst [smem:[#allocation5_spill]] %s6094_s30  ;;  %p345_p5 = scmp.lt.s32.totalorder (!%p290_p3), %s3490_s8, 15 }
   0xb   : > { %p352_p6 = scmp.lt.s32.totalorder (!%p290_p3), %s3493_s9, 15  ;;  %p3505_p7 = scmp.ne.s32.totalorder (!%p290_p3), %s4276_s24, 0 }
   0xe   : > { %s6096_s8 = smov (!%p345_p5, %s3490_s8), 15  ;;  %s6098_s9 = smov (!%p352_p6, %s3493_s9), 15 }
   0xf   : > { %s3593_s10 = sshll.u32 %s6096_s8, 4  ;;  %s3500_s11 = sshll.u32 %s6096_s8, 3 }
  0x10   : > { %s4377_s14 = scalar_lea.vmem %s5913_s0, %s3593_s10  ;;  %s3594_s15 = sshll.u32 %s6098_s9, 3 }
  0x11   : > { %s4382_s18 = scalar_lea.vmem %s5914_s1, %s3594_s15  ;;  %s4387_s21 = scalar_lea.vmem %s5915_s2, %s3594_s15 }
  0x12   : > { %s4392_s8 = scalar_lea.vmem %s5917_s4, %s3500_s11  ;;  %s4397_s10 = scalar_lea.vmem %s5919_s6, %s3500_s11 }
  0x13   : > { %s4402_s16 = scalar_lea.vmem %s5920_s7, %s3500_s11  ;;  %387 = sbr.rel (%p3505_p7) target bundleno = 73 (0x49), region = 48 }
  0x18   : > { %vm388_vm0 = vcmask 7168   ;;  %v4294_v0 = vmov -1e+30   ;;  %v4295_v1 = vmov 0.0  }
  0x19   : > { %389 = vst.msk [vmem:[#allocation2] sm:$0xff] %vm388_vm0, %v4294_v0  ;;  %390 = vst.msk [vmem:[#allocation2 + $0x8] sm:$0xff] %vm388_vm0, %v4294_v0 }
  0x1a   : > { %391 = vst.msk [vmem:[#allocation2 + $0x10] sm:$0xff] %vm388_vm0, %v4294_v0  ;;  %392 = vst.msk [vmem:[#allocation2 + $0x18] sm:$0xff] %vm388_vm0, %v4294_v0 }
  0x1b   : > { %393 = vst.msk [vmem:[#allocation2 + $0x20] sm:$0xff] %vm388_vm0, %v4294_v0  ;;  %394 = vst.msk [vmem:[#allocation2 + $0x28] sm:$0xff] %vm388_vm0, %v4294_v0 }
  0x1c   : > { %395 = vst.msk [vmem:[#allocation2 + $0x30] sm:$0xff] %vm388_vm0, %v4294_v0  ;;  %396 = vst.msk [vmem:[#allocation2 + $0x38] sm:$0xff] %vm388_vm0, %v4294_v0 }
  0x1d   : > { %397 = vst.msk [vmem:[#allocation2 + $0x40] sm:$0xff] %vm388_vm0, %v4294_v0  ;;  %398 = vst.msk [vmem:[#allocation2 + $0x48] sm:$0xff] %vm388_vm0, %v4294_v0 }
  0x1e   : > { %399 = vst.msk [vmem:[#allocation2 + $0x50] sm:$0xff] %vm388_vm0, %v4294_v0  ;;  %400 = vst.msk [vmem:[#allocation2 + $0x58] sm:$0xff] %vm388_vm0, %v4294_v0 }
  0x1f   : > { %401 = vst.msk [vmem:[#allocation2 + $0x60] sm:$0xff] %vm388_vm0, %v4294_v0  ;;  %402 = vst.msk [vmem:[#allocation2 + $0x68] sm:$0xff] %vm388_vm0, %v4294_v0 }
  0x20   : > { %403 = vst.msk [vmem:[#allocation2 + $0x70] sm:$0xff] %vm388_vm0, %v4294_v0  ;;  %404 = vst.msk [vmem:[#allocation2 + $0x78] sm:$0xff] %vm388_vm0, %v4294_v0 }
  0x21   : > { %405 = vst.msk [vmem:[#allocation2 + $0x80] sm:$0xff] %vm388_vm0, %v4294_v0  ;;  %406 = vst.msk [vmem:[#allocation2 + $0x88] sm:$0xff] %vm388_vm0, %v4294_v0 }
  0x22   : > { %407 = vst.msk [vmem:[#allocation2 + $0x90] sm:$0xff] %vm388_vm0, %v4294_v0  ;;  %408 = vst.msk [vmem:[#allocation2 + $0x98] sm:$0xff] %vm388_vm0, %v4294_v0 }
  0x23   : > { %409 = vst.msk [vmem:[#allocation2 + $0xa0] sm:$0xff] %vm388_vm0, %v4294_v0  ;;  %410 = vst.msk [vmem:[#allocation2 + $0xa8] sm:$0xff] %vm388_vm0, %v4294_v0 }
  0x24   : > { %411 = vst.msk [vmem:[#allocation2 + $0xb0] sm:$0xff] %vm388_vm0, %v4294_v0  ;;  %412 = vst.msk [vmem:[#allocation2 + $0xb8] sm:$0xff] %vm388_vm0, %v4294_v0 }
  0x25   : > { %413 = vst.msk [vmem:[#allocation2 + $0xc0] sm:$0xff] %vm388_vm0, %v4294_v0  ;;  %414 = vst.msk [vmem:[#allocation2 + $0xc8] sm:$0xff] %vm388_vm0, %v4294_v0 }
  0x26   : > { %415 = vst.msk [vmem:[#allocation2 + $0xd0] sm:$0xff] %vm388_vm0, %v4294_v0  ;;  %416 = vst.msk [vmem:[#allocation2 + $0xd8] sm:$0xff] %vm388_vm0, %v4294_v0 }
  0x27   : > { %417 = vst.msk [vmem:[#allocation2 + $0xe0] sm:$0xff] %vm388_vm0, %v4294_v0  ;;  %418 = vst.msk [vmem:[#allocation2 + $0xe8] sm:$0xff] %vm388_vm0, %v4294_v0 }
  0x28   : > { %419 = vst.msk [vmem:[#allocation2 + $0xf0] sm:$0xff] %vm388_vm0, %v4294_v0  ;;  %420 = vst.msk [vmem:[#allocation2 + $0xf8] sm:$0xff] %vm388_vm0, %v4294_v0 }
  0x29   : > { %421 = vst.msk [vmem:[#allocation3] sm:$0xff] %vm388_vm0, %v4295_v1  ;;  %422 = vst.msk [vmem:[#allocation3 + $0x8] sm:$0xff] %vm388_vm0, %v4295_v1 }
  0x2a   : > { %423 = vst.msk [vmem:[#allocation3 + $0x10] sm:$0xff] %vm388_vm0, %v4295_v1  ;;  %424 = vst.msk [vmem:[#allocation3 + $0x18] sm:$0xff] %vm388_vm0, %v4295_v1 }
  0x2b   : > { %425 = vst.msk [vmem:[#allocation3 + $0x20] sm:$0xff] %vm388_vm0, %v4295_v1  ;;  %426 = vst.msk [vmem:[#allocation3 + $0x28] sm:$0xff] %vm388_vm0, %v4295_v1 }
  0x2c   : > { %427 = vst.msk [vmem:[#allocation3 + $0x30] sm:$0xff] %vm388_vm0, %v4295_v1  ;;  %428 = vst.msk [vmem:[#allocation3 + $0x38] sm:$0xff] %vm388_vm0, %v4295_v1 }
  0x2d   : > { %429 = vst.msk [vmem:[#allocation3 + $0x40] sm:$0xff] %vm388_vm0, %v4295_v1  ;;  %430 = vst.msk [vmem:[#allocation3 + $0x48] sm:$0xff] %vm388_vm0, %v4295_v1 }
  0x2e   : > { %431 = vst.msk [vmem:[#allocation3 + $0x50] sm:$0xff] %vm388_vm0, %v4295_v1  ;;  %432 = vst.msk [vmem:[#allocation3 + $0x58] sm:$0xff] %vm388_vm0, %v4295_v1 }
  0x2f   : > { %433 = vst.msk [vmem:[#allocation3 + $0x60] sm:$0xff] %vm388_vm0, %v4295_v1  ;;  %434 = vst.msk [vmem:[#allocation3 + $0x68] sm:$0xff] %vm388_vm0, %v4295_v1 }
  0x30   : > { %435 = vst.msk [vmem:[#allocation3 + $0x70] sm:$0xff] %vm388_vm0, %v4295_v1  ;;  %436 = vst.msk [vmem:[#allocation3 + $0x78] sm:$0xff] %vm388_vm0, %v4295_v1 }
  0x31   : > { %437 = vst.msk [vmem:[#allocation3 + $0x80] sm:$0xff] %vm388_vm0, %v4295_v1  ;;  %438 = vst.msk [vmem:[#allocation3 + $0x88] sm:$0xff] %vm388_vm0, %v4295_v1 }
  0x32   : > { %439 = vst.msk [vmem:[#allocation3 + $0x90] sm:$0xff] %vm388_vm0, %v4295_v1  ;;  %440 = vst.msk [vmem:[#allocation3 + $0x98] sm:$0xff] %vm388_vm0, %v4295_v1 }
  0x33   : > { %441 = vst.msk [vmem:[#allocation3 + $0xa0] sm:$0xff] %vm388_vm0, %v4295_v1  ;;  %442 = vst.msk [vmem:[#allocation3 + $0xa8] sm:$0xff] %vm388_vm0, %v4295_v1 }
  0x34   : > { %443 = vst.msk [vmem:[#allocation3 + $0xb0] sm:$0xff] %vm388_vm0, %v4295_v1  ;;  %444 = vst.msk [vmem:[#allocation3 + $0xb8] sm:$0xff] %vm388_vm0, %v4295_v1 }
  0x35   : > { %445 = vst.msk [vmem:[#allocation3 + $0xc0] sm:$0xff] %vm388_vm0, %v4295_v1  ;;  %446 = vst.msk [vmem:[#allocation3 + $0xc8] sm:$0xff] %vm388_vm0, %v4295_v1 }
  0x36   : > { %447 = vst.msk [vmem:[#allocation3 + $0xd0] sm:$0xff] %vm388_vm0, %v4295_v1  ;;  %448 = vst.msk [vmem:[#allocation3 + $0xd8] sm:$0xff] %vm388_vm0, %v4295_v1 }
  0x37   : > { %449 = vst.msk [vmem:[#allocation3 + $0xe0] sm:$0xff] %vm388_vm0, %v4295_v1  ;;  %450 = vst.msk [vmem:[#allocation3 + $0xe8] sm:$0xff] %vm388_vm0, %v4295_v1 }
  0x38   : > { %451 = vst.msk [vmem:[#allocation3 + $0xf0] sm:$0xff] %vm388_vm0, %v4295_v1  ;;  %452 = vst.msk [vmem:[#allocation3 + $0xf8] sm:$0xff] %vm388_vm0, %v4295_v1 }
  0x39   : > { %453 = vst [vmem:[#allocation4 + $0xb0] sm:$0xff] %v4295_v1  ;;  %454 = vst [vmem:[#allocation4] sm:$0xff] %v4295_v1 }
  0x3a   : > { %455 = vst [vmem:[#allocation4 + $0xd8] sm:$0xff] %v4295_v1  ;;  %456 = vst [vmem:[#allocation4 + $0x18] sm:$0xff] %v4295_v1 }
  0x3b   : > { %457 = vst [vmem:[#allocation4 + $0x50] sm:$0xff] %v4295_v1  ;;  %458 = vst [vmem:[#allocation4 + $0x68] sm:$0xff] %v4295_v1 }
  0x3c   : > { %459 = vst [vmem:[#allocation4 + $0x30] sm:$0xff] %v4295_v1  ;;  %460 = vst [vmem:[#allocation4 + $0x48] sm:$0xff] %v4295_v1 }
  0x3d   : > { %461 = vst [vmem:[#allocation4 + $0x80] sm:$0xff] %v4295_v1  ;;  %462 = vst [vmem:[#allocation4 + $0x88] sm:$0xff] %v4295_v1 }
  0x3e   : > { %463 = vst [vmem:[#allocation4 + $0xe8] sm:$0xff] %v4295_v1  ;;  %464 = vst [vmem:[#allocation4 + $0xb8] sm:$0xff] %v4295_v1 }
  0x3f   : > { %465 = vst [vmem:[#allocation4 + $0x60] sm:$0xff] %v4295_v1  ;;  %466 = vst [vmem:[#allocation4 + $0xf0] sm:$0xff] %v4295_v1 }
  0x40   : > { %467 = vst [vmem:[#allocation4 + $0x8] sm:$0xff] %v4295_v1  ;;  %468 = vst [vmem:[#allocation4 + $0x78] sm:$0xff] %v4295_v1 }
  0x41   : > { %469 = vst [vmem:[#allocation4 + $0x38] sm:$0xff] %v4295_v1  ;;  %470 = vst [vmem:[#allocation4 + $0x58] sm:$0xff] %v4295_v1 }
  0x42   : > { %471 = vst [vmem:[#allocation4 + $0x40] sm:$0xff] %v4295_v1  ;;  %472 = vst [vmem:[#allocation4 + $0xc8] sm:$0xff] %v4295_v1 }
  0x43   : > { %473 = vst [vmem:[#allocation4 + $0xe0] sm:$0xff] %v4295_v1  ;;  %474 = vst [vmem:[#allocation4 + $0x90] sm:$0xff] %v4295_v1 }
  0x44   : > { %475 = vst [vmem:[#allocation4 + $0x70] sm:$0xff] %v4295_v1  ;;  %476 = vst [vmem:[#allocation4 + $0xc0] sm:$0xff] %v4295_v1 }
  0x45   : > { %477 = vst [vmem:[#allocation4 + $0xa8] sm:$0xff] %v4295_v1  ;;  %478 = vst [vmem:[#allocation4 + $0xd0] sm:$0xff] %v4295_v1 }
  0x46   : > { %479 = vst [vmem:[#allocation4 + $0x10] sm:$0xff] %v4295_v1  ;;  %480 = vst [vmem:[#allocation4 + $0x28] sm:$0xff] %v4295_v1 }
  0x47   : > { %481 = vst [vmem:[#allocation4 + $0xa0] sm:$0xff] %v4295_v1  ;;  %482 = vst [vmem:[#allocation4 + $0xf8] sm:$0xff] %v4295_v1 }
  0x48   : > { %483 = vst [vmem:[#allocation4 + $0x20] sm:$0xff] %v4295_v1  ;;  %484 = vst [vmem:[#allocation4 + $0x98] sm:$0xff] %v4295_v1 }
  0x49 PF: > { %s3506_s30 = sshll.u32 %s4276_s24, 6  ;;  %s3507_s11 = sshll.u32 %s4280_s25, 6 }
  0x4a   : > { %s487_s15 = sadd.s32 63, %s3507_s11 }
  0x4b   : > { %p3508_p8 = scmp.gt.s32.totalorder %s3506_s30, %s487_s15 }
  0x4d   : > { %491 = sbr.rel (%p3508_p8) target bundleno = 2386 (0x952), region = 52 }
  0x52   : > { %v4538_v2 = vld [vmem:[%s4382_s18 + $0x30] ss:$8 sps:$4 sm:$0xff]   ;;  %v4541_v3 = vld [vmem:[%s4382_s18 + $0x20] ss:$8 sps:$4 sm:$0xff]   ;;  %v524_v10 = vlaneseq  ;;  %v533_v14 = vstv %s3507_s11  ;;  %v544_v15 = vstv %s3506_s30  ;;  %vm683_vm2 = vcmask 523264  }
  0x53   : > { %3708 = vmatprep.subr.bf16.mxu0 %v4538_v2  ;;  %v3986_v4 = vld [vmem:[%s4377_s14] ss:$16 sps:$4 sm:$0xff]   ;;  %v4296_v51 = vmov 0   ;;  %vm852_vm10 = vcmask 7168   ;;  %v4660_v61 = vld [vmem:[#allocation2 + $0x18] sm:$0xff]  ;;  %v4670_v1 = vld [vmem:[#allocation2 + $0x8] sm:$0xff] }
  0x54   : > { %3709 = vmatpush3.bf16.xpose.msra.mxu0 %v4538_v2  ;;  %3716 = vmatprep.mubr.bf16.mxu0 %v3986_v4  ;;  %v4548_v5 = vld [vmem:[%s4382_s18 + $0x10] ss:$8 sps:$4 sm:$0xff]   ;;  %v4553_v6 = vld [vmem:[%s4382_s18] ss:$8 sps:$4 sm:$0xff]   ;;  %v525_v11 = vshrl.u32 %v524_v10, 7  ;;  %v543_v13 = vand.u32 127, %v524_v10 }
  0x55   : > { %3710 = vmatprep.subr.bf16.mxu0 %v4541_v3  ;;  %v3989_v7 = vld [vmem:[%s4377_s14 + $0x20] ss:$16 sps:$4 sm:$0xff]   ;;  %3977 = vset.pattern.permute.xlu1 %v4296_v51 }
  0x56   : > { %v3992_v8 = vld [vmem:[%s4377_s14 + $0x40] ss:$16 sps:$4 sm:$0xff]   ;;  %v527_v12 = vadd.s32 16, %v525_v11  ;;  %v4565_v17 = vadd.s32 %v544_v15, %v543_v13  ;;  %v528_v18 = vadd.s32 24, %v525_v11  ;;  %v526_v19 = vadd.s32 8, %v525_v11  ;;  %3976 = vset.pattern.permute.xlu0 %v4296_v51 }
  0x57   : > { %v3994_v9 = vld [vmem:[%s4377_s14 + $0x60] ss:$16 sps:$4 sm:$0xff]   ;;  %v4567_v20 = vadd.s32 %v533_v14, %v525_v11  ;;  %v531_v24 = vadd.s32 48, %v525_v11  ;;  %v529_v25 = vadd.s32 32, %v525_v11  ;;  %v530_v34 = vadd.s32 40, %v525_v11 }
  0x58   : > { %v4563_v16 = vadd.s32 %v533_v14, %v527_v12  ;;  %v4571_v21 = vadd.s32 %v533_v14, %v528_v18  ;;  %v4573_v22 = vadd.s32 %v533_v14, %v526_v19  ;;  %v532_v38 = vadd.s32 56, %v525_v11  ;;  %v4653_v56 = vld [vmem:[#allocation2 + $0x10] sm:$0xff]  ;;  %v4655_v58 = vld [vmem:[#allocation2] sm:$0xff]  ;;  %v4700_v19 = vld [vmem:[#allocation2 + $0x28] sm:$0xff] }
  0x59   : > { %vm546_vm3 = vcmp.ge.s32.totalorder %v4567_v20, %v4565_v17  ;;  %v4595_v32 = vadd.s32 %v533_v14, %v531_v24  ;;  %v4597_v33 = vadd.s32 %v533_v14, %v529_v25  ;;  %v4617_v42 = vadd.s32 %v533_v14, %v530_v34  ;;  %v4687_v11 = vld [vmem:[#allocation2 + $0x20] sm:$0xff]  ;;  %v4698_v18 = vld [vmem:[#allocation2 + $0x30] sm:$0xff] }
  0x5a   : > { %vm548_vm1 = vcmp.ge.s32.totalorder %v4563_v16, %v4565_v17  ;;  %vm549_vm4 = vcmp.ge.s32.totalorder %v4571_v21, %v4565_v17  ;;  %vm547_vm5 = vcmp.ge.s32.totalorder %v4573_v22, %v4565_v17  ;;  %v4619_v44 = vadd.s32 %v533_v14, %v532_v38  ;;  %v3996_v14 = vld [vmem:[%s4387_s21 + $0x30] ss:$8 sps:$4 sm:$0xff]  }
  0x5b   : > { %vm552_vm6 = vcmp.ge.s32.totalorder %v4595_v32, %v4565_v17  ;;  %vm550_vm7 = vcmp.ge.s32.totalorder %v4597_v33, %v4565_v17  ;;  %vm551_vm8 = vcmp.ge.s32.totalorder %v4617_v42, %v4565_v17  ;;  %3724 = vmatprep.subr.bf16.mxu1 %v3996_v14  ;;  %v4000_v38 = vld [vmem:[%s4387_s21 + $0x10] ss:$8 sps:$4 sm:$0xff]  }
  0x5c   : > { %3711 = vmatpush3.bf16.xpose.msra.mxu0 %v4541_v3  ;;  %vm553_vm9 = vcmp.ge.s32.totalorder %v4619_v44, %v4565_v17  ;;  %3725 = vmatpush3.bf16.msra.mxu1 %v3996_v14  ;;  %v4879_v34 = vld [vmem:[#allocation2 + $0x50] sm:$0xff]  ;;  %v5367_v17 = vld [vmem:[#allocation2 + $0xc0] sm:$0xff] }
  0x5d   : > { %3712 = vmatprep.subr.bf16.mxu0 %v4548_v5  ;;  %5967 = vst [vmem:[#allocation17_spill] sm:$0xff] %v4879_v34  ;;  %v5362_v32 = vld [vmem:[#allocation2 + $0xd0] sm:$0xff] }
  0x64   : > { %3713 = vmatpush3.bf16.xpose.msra.mxu0 %v4548_v5 }
  0x65   : > { %3714 = vmatprep.subr.bf16.mxu0 %v4553_v6 }
  0x6c   : > { %3715 = vmatpush3.bf16.xpose.msra.mxu0 %v4553_v6 }
  0x6d   : > { %3756 = vmatprep.subr.bf16.mxu0 %v3996_v14 }
  0x73   : > { %3717 = vmatmul.mubr.bf16.vlgmr.msra.gmra.mxu0 %v3989_v7 }
  0x74   : > { %3720 = vmatprep.mubr.bf16.mxu0 %v3992_v8  ;;  %3757 = vmatpush3.bf16.msra.mxu0 %v3996_v14 }
  0x7b   : > { %3721 = vmatmul.mubr.bf16.gmra.mxu0 %v3994_v9  ;;  %v4896_v9 = vld [vmem:[#allocation2 + $0x68] sm:$0xff] }
  0x7c   : > { %5970 = vst [vmem:[#allocation20_spill] sm:$0xff] %v4896_v9 }
 0x133   : > { %v3718_v23 = vpop.f32.mrf.mxu0 }
 0x134   : > { %v4580_v26 = vsel %vm548_vm1, %v3718_v23, -1e+30  ;;  %v4894_v23 = vld [vmem:[#allocation2 + $0x60] sm:$0xff] }
 0x135   : > { %v636_v27 = vpop.f32.mrf.mxu0  ;;  %v690_v28 = vsel %vm683_vm2, %v4580_v26, -inf  ;;  %5969 = vst [vmem:[#allocation19_spill] sm:$0xff] %v4894_v23 }
 0x136   : > { %v4589_v29 = vsel %vm546_vm3, %v636_v27, -1e+30  ;;  %691 = vmax.xlane.f32.xlu1 %v690_v28  ;;  %v3998_v27 = vld [vmem:[%s4387_s21 + $0x20] ss:$8 sps:$4 sm:$0xff]  }
 0x137   : > { %v3719_v30 = vpop.f32.mrf.mxu0  ;;  %v684_v31 = vsel %vm683_vm2, %v4589_v29, -inf  ;;  %3726 = vmatprep.subr.bf16.mxu1 %v3998_v27  ;;  %3758 = vmatprep.subr.bf16.mxu0 %v3998_v27 }
 0x138   : > { %v4602_v35 = vsel %vm549_vm4, %v3719_v30, -1e+30  ;;  %685 = vmax.xlane.f32.xlu0 %v684_v31  ;;  %v4714_v31 = vld [vmem:[#allocation2 + $0x38] sm:$0xff]  ;;  %3727 = vmatpush3.bf16.msra.mxu1 %v3998_v27 }
 0x139   : > { %v639_v36 = vpop.f32.mrf.mxu0  ;;  %v693_v37 = vsel %vm683_vm2, %v4602_v35, -inf  ;;  %3759 = vmatpush3.bf16.msra.mxu0 %v3998_v27  ;;  %3728 = vmatprep.subr.bf16.mxu1 %v4000_v38 }
 0x13a   : > { %v4609_v39 = vsel %vm547_vm5, %v639_v36, -1e+30  ;;  %694 = vmax.xlane.f32.xlu1 %v693_v37  ;;  %3760 = vmatprep.subr.bf16.mxu0 %v4000_v38  ;;  %v4866_v36 = vld [vmem:[#allocation2 + $0x48] sm:$0xff] }
 0x13b   : > { %v3722_v40 = vpop.f32.mrf.mxu0  ;;  %v687_v41 = vsel %vm683_vm2, %v4609_v39, -inf  ;;  %5964 = vst [vmem:[#allocation14_spill] sm:$0xff] %v4866_v36 }
 0x13c   : > { %688 = vmax.xlane.f32.xlu0 %v687_v41  ;;  %v4624_v45 = vsel %vm552_vm6, %v3722_v40, -1e+30  ;;  %3729 = vmatpush3.bf16.msra.mxu1 %v4000_v38 }
 0x13d   : > { %v652_v43 = vpop.f32.mrf.mxu0  ;;  %v702_v50 = vsel %vm683_vm2, %v4624_v45, -inf  ;;  %3761 = vmatpush3.bf16.msra.mxu0 %v4000_v38 }
 0x13e   : > { %v4629_v46 = vsel %vm550_vm7, %v652_v43, -1e+30  ;;  %v4002_v43 = vld [vmem:[%s4387_s21] ss:$8 sps:$4 sm:$0xff]  }
 0x13f   : > { %v3723_v47 = vpop.f32.mrf.mxu0  ;;  %v696_v48 = vsel %vm683_vm2, %v4629_v46, -inf  ;;  %3730 = vmatprep.subr.bf16.mxu1 %v4002_v43  ;;  %3762 = vmatprep.subr.bf16.mxu0 %v4002_v43 }
 0x140   : > { %697 = vmax.xlane.f32.xlu0 %v696_v48  ;;  %v4649_v54 = vsel %vm553_vm9, %v3723_v47, -1e+30  ;;  %3731 = vmatpush3.bf16.msra.mxu1 %v4002_v43 }
 0x141   : > { %v655_v49 = vpop.f32.mrf.mxu0  ;;  %v705_v55 = vsel %vm683_vm2, %v4649_v54, -inf  ;;  %3740 = vmatprep.subr.bf16.mxu1 %v4538_v2  ;;  %3763 = vmatpush3.bf16.msra.mxu0 %v4002_v43 }
 0x142   : > { %v4642_v52 = vsel %vm551_vm8, %v655_v49, -1e+30 }
 0x143   : > { %v699_v53 = vsel %vm683_vm2, %v4642_v52, -inf }
 0x144   : > { %703 = vmax.xlane.f32.xlu0 %v702_v50  ;;  %700 = vmax.xlane.f32.xlu1 %v699_v53 }
 0x148   : > { %706 = vmax.xlane.f32.xlu1 %v705_v55 }
 0x1bf   : > { %v692_v57 = vpop.xlane.xlu1 %691 }
 0x1c0   : > { %v4658_v59 = vmax.f32 %v4653_v56, %v692_v57 }
 0x1c1   : > { %v686_v60 = vpop.xlane.xlu0 %685 }
 0x1c2   : > { %1040 = vst.msk [vmem:[#allocation2 + $0x10] sm:$0xff] %vm852_vm10, %v4658_v59  ;;  %v4667_v63 = vmax.f32 %v4655_v58, %v686_v60  ;;  %752 = vperm.xlu1 %3977, %v4658_v59  }
 0x1c3   : > { %v695_v0 = vpop.xlane.xlu1 %694 }
 0x1c4   : > { %1038 = vst.msk [vmem:[#allocation2] sm:$0xff] %vm852_vm10, %v4667_v63  ;;  %v4677_v7 = vmax.f32 %v4660_v61, %v695_v0  ;;  %742 = vperm.xlu0 %3976, %v4667_v63  }
 0x1c5   : > { %v689_v8 = vpop.xlane.xlu0 %688 }
 0x1c6   : > { %1041 = vst.msk [vmem:[#allocation2 + $0x18] sm:$0xff] %vm852_vm10, %v4677_v7  ;;  %v4685_v10 = vmax.f32 %v4670_v1, %v689_v8 }
 0x1c8   : > { %1039 = vst.msk [vmem:[#allocation2 + $0x8] sm:$0xff] %vm852_vm10, %v4685_v10  ;;  %747 = vperm.xlu1 %3977, %v4685_v10  }
 0x1c9   : > { %v698_v13 = vpop.xlane.xlu0 %697 }
 0x1ca   : > { %v4696_v15 = vmax.f32 %v4687_v11, %v698_v13 }
 0x1cc   : > { %1042 = vst.msk [vmem:[#allocation2 + $0x20] sm:$0xff] %vm852_vm10, %v4696_v15  ;;  %757 = vperm.xlu1 %3977, %v4677_v7  }
 0x1cd   : > { %v704_v24 = vpop.xlane.xlu0 %703  ;;  %v701_v25 = vpop.xlane.xlu1 %700 }
 0x1ce   : > { %v4709_v28 = vmax.f32 %v4698_v18, %v704_v24  ;;  %v4712_v30 = vmax.f32 %v4700_v19, %v701_v25 }
 0x1d0   : > { %1044 = vst.msk [vmem:[#allocation2 + $0x30] sm:$0xff] %vm852_vm10, %v4709_v28  ;;  %1043 = vst.msk [vmem:[#allocation2 + $0x28] sm:$0xff] %vm852_vm10, %v4712_v30  ;;  %772 = vperm.xlu1 %3977, %v4709_v28  }
 0x1d1   : > { %v707_v37 = vpop.xlane.xlu1 %706 }
 0x1d2   : > { %v4727_v40 = vmax.f32 %v4714_v31, %v707_v37 }
 0x1d4   : > { %1045 = vst.msk [vmem:[#allocation2 + $0x38] sm:$0xff] %vm852_vm10, %v4727_v40  ;;  %762 = vperm.xlu1 %3977, %v4696_v15  }
 0x1d8   : > { %767 = vperm.xlu1 %3977, %v4712_v30  }
 0x1dc   : > { %777 = vperm.xlu1 %3977, %v4727_v40  }
 0x23d   : > { %v753_v47 = vpop.permute.xlu1 %752 }
 0x23e   : > { %v782_v50 = vsub.f32 %v4580_v26, %v753_v47 }
 0x23f   : > { %v743_v48 = vpop.permute.xlu0 %742 }
 0x240   : > { %v780_v49 = vsub.f32 %v4589_v29, %v743_v48  ;;  %v792_v60 = vmul.f32 1.442695, %v782_v50 }
 0x242   : > { %v788_v51 = vmul.f32 1.442695, %v780_v49 }
 0x243   : > { %v748_v53 = vpop.permute.xlu1 %747 }
 0x244   : > { %v781_v55 = vsub.f32 %v4609_v39, %v748_v53  ;;  %4012 = vpow2.f32 %v788_v51 }
 0x246   : > { %v790_v57 = vmul.f32 1.442695, %v781_v55 }
 0x247   : > { %v758_v0 = vpop.permute.xlu1 %757 }
 0x248   : > { %4014 = vpow2.f32 %v790_v57  ;;  %v783_v8 = vsub.f32 %v4602_v35, %v758_v0  ;;  %v3988_v57 = vld [vmem:[%s4377_s14 + $0x4] ss:$16 sps:$4 sm:$0xff]  }
 0x249   : > { %4016 = vpow2.f32 %v792_v60  ;;  %v502_v0 = vld [vmem:[%s4377_s14 + $0x50] sm:$0xff] }
 0x24a   : > { %v794_v13 = vmul.f32 1.442695, %v783_v8  ;;  %v3991_v8 = vld [vmem:[%s4377_s14 + $0x24] ss:$16 sps:$4 sm:$0xff]  }
 0x24b   : > { %v773_v14 = vpop.permute.xlu1 %772 }
 0x24c   : > { %4018 = vpow2.f32 %v794_v13  ;;  %v786_v26 = vsub.f32 %v4624_v45, %v773_v14  ;;  %v504_v14 = vld [vmem:[%s4377_s14 + $0x60] sm:$0xff] }
 0x24e   : > { %v800_v47 = vmul.f32 1.442695, %v786_v26 }
 0x24f   : > { %v763_v24 = vpop.permute.xlu1 %762 }
 0x250   : > { %v784_v29 = vsub.f32 %v4629_v46, %v763_v24  ;;  %v506_v24 = vld [vmem:[%s4377_s14 + $0x70] sm:$0xff] }
 0x251   : > { %v4744_v37 = vpop.eup %4012 }
 0x252   : > { %v796_v25 = vmul.f32 1.442695, %v784_v29  ;;  %v3528_v29 = vcombine.high %v504_v14, %v506_v24 }
 0x253   : > { %v768_v27 = vpop.permute.xlu1 %767 }
 0x254   : > { %v785_v39 = vsub.f32 %v4642_v52, %v768_v27  ;;  %4020 = vpow2.f32 %v796_v25 }
 0x255   : > { %v4747_v38 = vpop.eup %4014 }
 0x256   : > { %v798_v43 = vmul.f32 1.442695, %v785_v39  ;;  %v917_v35 = vpack.c.bf16 %v4747_v38, %v4744_v37  ;;  %v4751_v49 = vpop.eup %4016 }
 0x257   : > { %v778_v48 = vpop.permute.xlu1 %777 }
 0x258   : > { %4022 = vpow2.f32 %v798_v43  ;;  %v787_v45 = vsub.f32 %v4649_v54, %v778_v48  ;;  %3732 = vmatprep.mubr.msk.bf16.mxu1 %vm683_vm2, %v917_v35 }
 0x259   : > { %v4755_v46 = vpop.eup %4018  ;;  %4024 = vpow2.f32 %v800_v47 }
 0x25a   : > { %v802_v52 = vmul.f32 1.442695, %v787_v45  ;;  %v918_v50 = vpack.c.bf16 %v4755_v46, %v4751_v49 }
 0x25c   : > { %4026 = vpow2.f32 %v802_v52  ;;  %3733 = vmatmul.mubr.msk.bf16.vlgmr.msra.gmra.mxu1 %vm683_vm2, %v918_v50 }
 0x25d   : > { %3741 = vmatpush3.bf16.xpose.msra.mxu1 %v4538_v2 }
 0x25e   : > { %3742 = vmatprep.subr.bf16.mxu1 %v4541_v3 }
 0x261   : > { %v4762_v51 = vpop.eup %4020 }
 0x265   : > { %v4764_v54 = vpop.eup %4022  ;;  %3743 = vmatpush3.bf16.xpose.msra.mxu1 %v4541_v3  ;;  %v500_v3 = vld [vmem:[%s4377_s14 + $0x40] sm:$0xff] }
 0x266   : > { %v919_v53 = vpack.c.bf16 %v4764_v54, %v4762_v51  ;;  %3744 = vmatprep.subr.bf16.mxu1 %v4548_v5  ;;  %v4770_v55 = vpop.eup %4024  ;;  %v3527_v13 = vcombine.high %v500_v3, %v502_v0 }
 0x268   : > { %3736 = vmatprep.mubr.msk.bf16.mxu1 %vm683_vm2, %v919_v53 }
 0x269   : > { %v4773_v2 = vpop.eup %4026 }
 0x26a   : > { %v920_v60 = vpack.c.bf16 %v4773_v2, %v4770_v55 }
 0x26c   : > { %3737 = vmatmul.mubr.msk.bf16.gmra.mxu1 %vm683_vm2, %v920_v60 }
 0x26d   : > { %3745 = vmatpush3.bf16.xpose.msra.mxu1 %v4548_v5  ;;  %3748 = vmatprep.mubr.bf16.mxu1 %v3988_v57 }
 0x26e   : > { %3746 = vmatprep.subr.bf16.mxu1 %v4553_v6 }
 0x275   : > { %3747 = vmatpush3.bf16.xpose.msra.mxu1 %v4553_v6 }
 0x27c   : > { %3749 = vmatmul.mubr.bf16.vlgmr.msra.gmra.mxu1 %v3991_v8 }
 0x27d   : > { %3752 = vmatprep.mubr.bf16.mxu1 %v3527_v13 }
 0x284   : > { %3753 = vmatmul.mubr.bf16.gmra.mxu1 %v3528_v29 }
 0x31c   : > { %v4787_v26 = vpop.f32.mrf.mxu1 }
 0x31e   : > { %v4789_v25 = vpop.f32.mrf.mxu1 }
 0x320   : > { %v4791_v5 = vpop.f32.mrf.mxu1 }
 0x321   : > { %5956 = vst [vmem:[#allocation6_spill] sm:$0xff] %v4791_v5 }
 0x322   : > { %v4793_v27 = vpop.f32.mrf.mxu1 }
 0x32c   : > { %v4795_v39 = vpop.f32.mrf.mxu1 }
 0x32d   : > { %5957 = vst [vmem:[#allocation7_spill] sm:$0xff] %v4795_v39  ;;  %v4909_v39 = vld [vmem:[#allocation2 + $0x70] sm:$0xff] }
 0x32e   : > { %v4797_v6 = vpop.f32.mrf.mxu1  ;;  %5973 = vst [vmem:[#allocation23_spill] sm:$0xff] %v4909_v39 }
 0x32f   : > { %5958 = vst [vmem:[#allocation8_spill] sm:$0xff] %v4797_v6  ;;  %v4911_v6 = vld [vmem:[#allocation2 + $0x78] sm:$0xff] }
 0x330   : > { %v4799_v43 = vpop.f32.mrf.mxu1  ;;  %5974 = vst [vmem:[#allocation24_spill] sm:$0xff] %v4911_v6 }
 0x331   : > { %5959 = vst [vmem:[#allocation9_spill] sm:$0xff] %v4799_v43 }
 0x332   : > { %v4801_v35 = vpop.f32.mrf.mxu1 }
 0x333   : > { %5960 = vst [vmem:[#allocation10_spill] sm:$0xff] %v4801_v35 }
 0x33c   : > { %v3750_v47 = vpop.f32.mrf.mxu1 }
 0x33d   : > { %v4827_v13 = vsel %vm548_vm1, %v3750_v47, -1e+30 }
 0x33e   : > { %v1096_v48 = vpop.f32.mrf.mxu1 }
 0x33f   : > { %v4806_v45 = vsel %vm546_vm3, %v1096_v48, -1e+30  ;;  %v1150_v48 = vsel %vm683_vm2, %v4827_v13, -inf }
 0x340   : > { %v3751_v52 = vpop.f32.mrf.mxu1  ;;  %v1144_v50 = vsel %vm683_vm2, %v4806_v45, -inf }
 0x341   : > { %v4813_v53 = vsel %vm549_vm4, %v3751_v52, -1e+30  ;;  %1145 = vmax.xlane.f32.xlu1 %v1144_v50 }
 0x342   : > { %v1099_v57 = vpop.f32.mrf.mxu1  ;;  %v1153_v0 = vsel %vm683_vm2, %v4813_v53, -inf }
 0x343   : > { %v4818_v60 = vsel %vm547_vm5, %v1099_v57, -1e+30 }
 0x344   : > { %v3754_v3 = vpop.f32.mrf.mxu1  ;;  %v1147_v8 = vsel %vm683_vm2, %v4818_v60, -inf }
 0x345   : > { %1154 = vmax.xlane.f32.xlu1 %v1153_v0  ;;  %1148 = vmax.xlane.f32.xlu0 %v1147_v8  ;;  %v4841_v47 = vsel %vm552_vm6, %v3754_v3, -1e+30 }
 0x346   : > { %v1112_v14 = vpop.f32.mrf.mxu1 }
 0x347   : > { %v4832_v24 = vsel %vm550_vm7, %v1112_v14, -1e+30  ;;  %v1162_v14 = vsel %vm683_vm2, %v4841_v47, -inf }
 0x348   : > { %v3755_v29 = vpop.f32.mrf.mxu1  ;;  %v1156_v50 = vsel %vm683_vm2, %v4832_v24, -inf }
 0x349   : > { %1151 = vmax.xlane.f32.xlu0 %v1150_v48  ;;  %v4846_v57 = vsel %vm553_vm9, %v3755_v29, -1e+30  ;;  %v4859_v29 = vld [vmem:[#allocation2 + $0x40] sm:$0xff] }
 0x34a   : > { %v1115_v52 = vpop.f32.mrf.mxu1  ;;  %v1165_v3 = vsel %vm683_vm2, %v4846_v57, -inf  ;;  %5961 = vst [vmem:[#allocation11_spill] sm:$0xff] %v4859_v29 }
 0x34b   : > { %v4851_v0 = vsel %vm551_vm8, %v1115_v52, -1e+30  ;;  %v4864_v52 = vld [vmem:[#allocation2 + $0x58] sm:$0xff] }
 0x34c   : > { %v1159_v8 = vsel %vm683_vm2, %v4851_v0, -inf  ;;  %5963 = vst [vmem:[#allocation13_spill] sm:$0xff] %v4864_v52 }
 0x34d   : > { %1157 = vmax.xlane.f32.xlu0 %v1156_v50  ;;  %1160 = vmax.xlane.f32.xlu1 %v1159_v8 }
 0x351   : > { %1163 = vmax.xlane.f32.xlu0 %v1162_v14  ;;  %1166 = vmax.xlane.f32.xlu1 %v1165_v3 }
 0x3ca   : > { %v1146_v48 = vpop.xlane.xlu1 %1145 }
 0x3cb   : > { %v4862_v41 = vmax.f32 %v4859_v29, %v1146_v48  ;;  %v5080_v29 = vld [vmem:[#allocation2 + $0x98] sm:$0xff] }
 0x3cc   : > { %5994 = vst [vmem:[#allocation44_spill] sm:$0xff] %v5080_v29 }
 0x3cd   : > { %5962 = vst [vmem:[#allocation12_spill] sm:$0xff] %v4862_v41  ;;  %1475 = vst.msk [vmem:[#allocation2 + $0x40] sm:$0xff] %vm852_vm10, %v4862_v41  ;;  %1202 = vperm.xlu0 %3976, %v4862_v41  }
 0x3ce   : > { %v1155_v8 = vpop.xlane.xlu1 %1154  ;;  %v1149_v14 = vpop.xlane.xlu0 %1148 }
 0x3cf   : > { %v4874_v3 = vmax.f32 %v4864_v52, %v1155_v8  ;;  %v4877_v48 = vmax.f32 %v4866_v36, %v1149_v14 }
 0x3d1   : > { %5965 = vst [vmem:[#allocation15_spill] sm:$0xff] %v4874_v3  ;;  %5966 = vst [vmem:[#allocation16_spill] sm:$0xff] %v4877_v48  ;;  %1217 = vperm.xlu0 %3976, %v4874_v3   ;;  %1207 = vperm.xlu1 %3977, %v4877_v48  }
 0x3d2   : > { %1478 = vst.msk [vmem:[#allocation2 + $0x58] sm:$0xff] %vm852_vm10, %v4874_v3  ;;  %1476 = vst.msk [vmem:[#allocation2 + $0x48] sm:$0xff] %vm852_vm10, %v4877_v48  ;;  %v1152_v8 = vpop.xlane.xlu0 %1151 }
 0x3d3   : > { %v4892_v14 = vmax.f32 %v4879_v34, %v1152_v8 }
 0x3d5   : > { %5968 = vst [vmem:[#allocation18_spill] sm:$0xff] %v4892_v14  ;;  %1477 = vst.msk [vmem:[#allocation2 + $0x50] sm:$0xff] %vm852_vm10, %v4892_v14  ;;  %1212 = vperm.xlu1 %3977, %v4892_v14  }
 0x3d6   : > { %v1158_v50 = vpop.xlane.xlu0 %1157  ;;  %v1161_v62 = vpop.xlane.xlu1 %1160 }
 0x3d7   : > { %v4904_v12 = vmax.f32 %v4894_v23, %v1158_v50  ;;  %v4907_v8 = vmax.f32 %v4896_v9, %v1161_v62 }
 0x3d9   : > { %5971 = vst [vmem:[#allocation21_spill] sm:$0xff] %v4904_v12  ;;  %5972 = vst [vmem:[#allocation22_spill] sm:$0xff] %v4907_v8  ;;  %1222 = vperm.xlu1 %3977, %v4904_v12   ;;  %1227 = vperm.xlu0 %3976, %v4907_v8  }
 0x3da   : > { %1479 = vst.msk [vmem:[#allocation2 + $0x60] sm:$0xff] %vm852_vm10, %v4904_v12  ;;  %1480 = vst.msk [vmem:[#allocation2 + $0x68] sm:$0xff] %vm852_vm10, %v4907_v8  ;;  %v1164_v62 = vpop.xlane.xlu0 %1163  ;;  %v1167_v50 = vpop.xlane.xlu1 %1166  ;;  %v515_v12 = vld [vmem:[%s4382_s18 + $0x38] sm:$0xff] }
 0x3db   : > { %v4924_v35 = vmax.f32 %v4909_v39, %v1164_v62  ;;  %v4927_v4 = vmax.f32 %v4911_v6, %v1167_v50  ;;  %v514_v62 = vld [vmem:[%s4382_s18 + $0x30] sm:$0xff] }
 0x3dc   : > { %v4941_v50 = vcombine.high %v514_v62, %v515_v12 }
 0x3dd   : > { %5975 = vst [vmem:[#allocation25_spill] sm:$0xff] %v4924_v35  ;;  %5976 = vst [vmem:[#allocation26_spill] sm:$0xff] %v4927_v4  ;;  %1232 = vperm.xlu1 %3977, %v4924_v35   ;;  %1237 = vperm.xlu0 %3976, %v4927_v4  }
 0x3de   : > { %1481 = vst.msk [vmem:[#allocation2 + $0x70] sm:$0xff] %vm852_vm10, %v4924_v35  ;;  %1482 = vst.msk [vmem:[#allocation2 + $0x78] sm:$0xff] %vm852_vm10, %v4927_v4  ;;  %3772 = vmatprep.subr.bf16.mxu0 %v4941_v50 }
 0x448   : > { %v1203_v5 = vpop.permute.xlu0 %1202 }
 0x449   : > { %v1240_v39 = vsub.f32 %v4806_v45, %v1203_v5 }
 0x44b   : > { %v1248_v9 = vmul.f32 1.442695, %v1240_v39 }
 0x44c   : > { %v1218_v23 = vpop.permute.xlu0 %1217  ;;  %v1208_v8 = vpop.permute.xlu1 %1207 }
 0x44d   : > { %v1243_v43 = vsub.f32 %v4813_v53, %v1218_v23  ;;  %v1241_v6 = vsub.f32 %v4818_v60, %v1208_v8  ;;  %4028 = vpow2.f32 %v1248_v9 }
 0x44f   : > { %v1250_v48 = vmul.f32 1.442695, %v1241_v6  ;;  %v1254_v35 = vmul.f32 1.442695, %v1243_v43 }
 0x450   : > { %v1213_v36 = vpop.permute.xlu1 %1212 }
 0x451   : > { %v1242_v4 = vsub.f32 %v4827_v13, %v1213_v36  ;;  %4030 = vpow2.f32 %v1250_v48  ;;  %v512_v13 = vld [vmem:[%s4382_s18 + $0x20] sm:$0xff] }
 0x452   : > { %4032 = vpow2.f32 %v1254_v35 }
 0x453   : > { %v1252_v12 = vmul.f32 1.442695, %v1242_v4 }
 0x454   : > { %v1228_v62 = vpop.permute.xlu0 %1227  ;;  %v1223_v3 = vpop.permute.xlu1 %1222 }
 0x455   : > { %4034 = vpow2.f32 %v1252_v12  ;;  %v1245_v5 = vsub.f32 %v4851_v0, %v1228_v62  ;;  %v1244_v39 = vsub.f32 %v4832_v24, %v1223_v3  ;;  %v513_v24 = vld [vmem:[%s4382_s18 + $0x28] sm:$0xff] }
 0x456   : > { %v4967_v48 = vcombine.high %v512_v13, %v513_v24  ;;  %v4006_v13 = vld [vmem:[%s4377_s14 + $0x28] ss:$16 sps:$4 sm:$0xff]  }
 0x457   : > { %v1258_v23 = vmul.f32 1.442695, %v1245_v5  ;;  %v1256_v45 = vmul.f32 1.442695, %v1244_v39  ;;  %v510_v5 = vld [vmem:[%s4382_s18 + $0x10] sm:$0xff]  ;;  %v511_v39 = vld [vmem:[%s4382_s18 + $0x18] sm:$0xff] }
 0x458   : > { %v1238_v6 = vpop.permute.xlu0 %1237  ;;  %v1233_v43 = vpop.permute.xlu1 %1232  ;;  %v4008_v24 = vld [vmem:[%s4377_s14 + $0x48] ss:$16 sps:$4 sm:$0xff]  }
 0x459   : > { %4036 = vpow2.f32 %v1258_v23  ;;  %v1247_v9 = vsub.f32 %v4846_v57, %v1238_v6  ;;  %v1246_v36 = vsub.f32 %v4841_v47, %v1233_v43  ;;  %v4004_v6 = vld [vmem:[%s4377_s14 + $0x8] ss:$16 sps:$4 sm:$0xff]  }
 0x45a   : > { %4038 = vpow2.f32 %v1256_v45  ;;  %v4952_v53 = vpop.eup %4028 }
 0x45b   : > { %v1262_v4 = vmul.f32 1.442695, %v1247_v9  ;;  %v1260_v35 = vmul.f32 1.442695, %v1246_v36  ;;  %v4988_v9 = vcombine.high %v510_v5, %v511_v39  ;;  %v508_v36 = vld [vmem:[%s4382_s18] sm:$0xff] }
 0x45d   : > { %4040 = vpow2.f32 %v1262_v4  ;;  %v509_v4 = vld [vmem:[%s4382_s18 + $0x8] sm:$0xff] }
 0x45e   : > { %4042 = vpow2.f32 %v1260_v35  ;;  %v4954_v60 = vpop.eup %4030  ;;  %v4995_v35 = vcombine.high %v508_v36, %v509_v4 }
 0x45f   : > { %5977 = vst [vmem:[#allocation27_spill] sm:$0xff] %v4954_v60  ;;  %v1378_v0 = vpack.c.bf16 %v4954_v60, %v4952_v53  ;;  %v4960_v3 = vpop.eup %4032  ;;  %v5116_v60 = vld [vmem:[#allocation2 + $0xa8] sm:$0xff] }
 0x460   : > { %5978 = vst [vmem:[#allocation28_spill] sm:$0xff] %v4960_v3  ;;  %6000 = vst [vmem:[#allocation50_spill] sm:$0xff] %v5116_v60 }
 0x461   : > { %3764 = vmatprep.mubr.msk.bf16.mxu0 %vm683_vm2, %v1378_v0  ;;  %v4010_v0 = vld [vmem:[%s4377_s14 + $0x68] ss:$16 sps:$4 sm:$0xff]  }
 0x462   : > { %v4962_v47 = vpop.eup %4034 }
 0x463   : > { %5979 = vst [vmem:[#allocation29_spill] sm:$0xff] %v4962_v47  ;;  %v1379_v57 = vpack.c.bf16 %v4960_v3, %v4962_v47  ;;  %v517_v47 = vld [vmem:[%s4387_s21 + $0x8] sm:$0xff] }
 0x465   : > { %3765 = vmatmul.mubr.msk.bf16.vlgmr.msra.gmra.mxu0 %vm683_vm2, %v1379_v57 }
 0x466   : > { %v4970_v8 = vpop.eup %4036  ;;  %3773 = vmatpush3.bf16.xpose.msra.mxu0 %v4941_v50 }
 0x467   : > { %5980 = vst [vmem:[#allocation30_spill] sm:$0xff] %v4970_v8  ;;  %v4973_v12 = vpop.eup %4038  ;;  %3774 = vmatprep.subr.bf16.mxu0 %v4967_v48 }
 0x468   : > { %5981 = vst [vmem:[#allocation31_spill] sm:$0xff] %v4973_v12  ;;  %v1380_v62 = vpack.c.bf16 %v4970_v8, %v4973_v12  ;;  %v523_v8 = vld [vmem:[%s4387_s21 + $0x38] sm:$0xff]  ;;  %v5097_v12 = vld [vmem:[#allocation2 + $0x90] sm:$0xff] }
 0x469   : > { %5998 = vst [vmem:[#allocation48_spill] sm:$0xff] %v5097_v12 }
 0x46a   : > { %v4980_v23 = vpop.eup %4040  ;;  %3768 = vmatprep.mubr.msk.bf16.mxu0 %vm683_vm2, %v1380_v62 }
 0x46b   : > { %5982 = vst [vmem:[#allocation32_spill] sm:$0xff] %v4980_v23  ;;  %v4983_v45 = vpop.eup %4042 }
 0x46c   : > { %5983 = vst [vmem:[#allocation33_spill] sm:$0xff] %v4983_v45  ;;  %v1381_v43 = vpack.c.bf16 %v4980_v23, %v4983_v45  ;;  %v522_v45 = vld [vmem:[%s4387_s21 + $0x30] sm:$0xff] }
 0x46d   : > { %v3544_v3 = vcombine.high %v522_v45, %v523_v8 }
 0x46e   : > { %3769 = vmatmul.mubr.msk.bf16.gmra.mxu0 %vm683_vm2, %v1381_v43 }
 0x46f   : > { %3775 = vmatpush3.bf16.xpose.msra.mxu0 %v4967_v48  ;;  %3780 = vmatprep.mubr.bf16.mxu0 %v4004_v6 }
 0x470   : > { %3776 = vmatprep.subr.bf16.mxu0 %v4988_v9  ;;  %3788 = vmatprep.subr.bf16.mxu1 %v3544_v3 }
 0x471   : > { %3789 = vmatpush3.bf16.msra.mxu1 %v3544_v3 }
 0x477   : > { %3777 = vmatpush3.bf16.xpose.msra.mxu0 %v4988_v9 }
 0x478   : > { %3778 = vmatprep.subr.bf16.mxu0 %v4995_v35 }
 0x47f   : > { %3779 = vmatpush3.bf16.xpose.msra.mxu0 %v4995_v35 }
 0x480   : > { %3820 = vmatprep.subr.bf16.mxu0 %v3544_v3 }
 0x486   : > { %3781 = vmatmul.mubr.bf16.vlgmr.msra.gmra.mxu0 %v4006_v13 }
 0x487   : > { %3784 = vmatprep.mubr.bf16.mxu0 %v4008_v24  ;;  %3821 = vmatpush3.bf16.msra.mxu0 %v3544_v3 }
 0x48e   : > { %3785 = vmatmul.mubr.bf16.gmra.mxu0 %v4010_v0 }
 0x525   : > { %v5003_v57 = vpop.f32.mrf.mxu0 }
 0x526   : > { %5984 = vst [vmem:[#allocation34_spill] sm:$0xff] %v5003_v57 }
 0x527   : > { %v5005_v62 = vpop.f32.mrf.mxu0 }
 0x528   : > { %5985 = vst [vmem:[#allocation35_spill] sm:$0xff] %v5005_v62 }
 0x529   : > { %v5007_v5 = vpop.f32.mrf.mxu0 }
 0x52a   : > { %5986 = vst [vmem:[#allocation36_spill] sm:$0xff] %v5007_v5 }
 0x52b   : > { %v5009_v39 = vpop.f32.mrf.mxu0 }
 0x52c   : > { %5987 = vst [vmem:[#allocation37_spill] sm:$0xff] %v5009_v39 }
 0x52e   : > { %v5011_v6 = vpop.f32.mrf.mxu0 }
 0x52f   : > { %5988 = vst [vmem:[#allocation38_spill] sm:$0xff] %v5011_v6 }
 0x530   : > { %v5013_v43 = vpop.f32.mrf.mxu0 }
 0x531   : > { %5989 = vst [vmem:[#allocation39_spill] sm:$0xff] %v5013_v43 }
 0x532   : > { %v5015_v36 = vpop.f32.mrf.mxu0 }
 0x533   : > { %5990 = vst [vmem:[#allocation40_spill] sm:$0xff] %v5015_v36 }
 0x534   : > { %v5017_v4 = vpop.f32.mrf.mxu0 }
 0x535   : > { %5991 = vst [vmem:[#allocation41_spill] sm:$0xff] %v5017_v4 }
 0x546   : > { %v3782_v13 = vpop.f32.mrf.mxu0 }
 0x547   : > { %v5043_v62 = vsel %vm548_vm1, %v3782_v13, -1e+30 }
 0x548   : > { %v1557_v24 = vpop.f32.mrf.mxu0  ;;  %v1611_v52 = vsel %vm683_vm2, %v5043_v62, -inf }
 0x549   : > { %v5022_v0 = vsel %vm546_vm3, %v1557_v24, -1e+30 }
 0x54a   : > { %v3783_v57 = vpop.f32.mrf.mxu0  ;;  %v1605_v5 = vsel %vm683_vm2, %v5022_v0, -inf }
 0x54b   : > { %v5029_v6 = vsel %vm549_vm4, %v3783_v57, -1e+30  ;;  %1606 = vmax.xlane.f32.xlu1 %v1605_v5 }
 0x54c   : > { %v1560_v36 = vpop.f32.mrf.mxu0  ;;  %v1614_v24 = vsel %vm683_vm2, %v5029_v6, -inf }
 0x54d   : > { %v5034_v43 = vsel %vm547_vm5, %v1560_v36, -1e+30 }
 0x54e   : > { %v3786_v4 = vpop.f32.mrf.mxu0  ;;  %v1608_v39 = vsel %vm683_vm2, %v5034_v43, -inf }
 0x54f   : > { %1615 = vmax.xlane.f32.xlu1 %v1614_v24  ;;  %1609 = vmax.xlane.f32.xlu0 %v1608_v39  ;;  %v5057_v13 = vsel %vm552_vm6, %v3786_v4, -1e+30 }
 0x550   : > { %v1573_v57 = vpop.f32.mrf.mxu0 }
 0x551   : > { %v5048_v5 = vsel %vm550_vm7, %v1573_v57, -1e+30  ;;  %v1623_v57 = vsel %vm683_vm2, %v5057_v13, -inf }
 0x552   : > { %v3787_v36 = vpop.f32.mrf.mxu0  ;;  %v1617_v34 = vsel %vm683_vm2, %v5048_v5, -inf }
 0x553   : > { %1612 = vmax.xlane.f32.xlu0 %v1611_v52  ;;  %v5062_v39 = vsel %vm553_vm9, %v3787_v36, -1e+30  ;;  %v5075_v36 = vld [vmem:[#allocation2 + $0x80] sm:$0xff] }
 0x554   : > { %v1576_v14 = vpop.f32.mrf.mxu0  ;;  %v1626_v4 = vsel %vm683_vm2, %v5062_v39, -inf  ;;  %5992 = vst [vmem:[#allocation42_spill] sm:$0xff] %v5075_v36 }
 0x555   : > { %v5067_v24 = vsel %vm551_vm8, %v1576_v14, -1e+30 }
 0x556   : > { %v1620_v52 = vsel %vm683_vm2, %v5067_v24, -inf }
 0x557   : > { %1618 = vmax.xlane.f32.xlu0 %v1617_v34  ;;  %1621 = vmax.xlane.f32.xlu1 %v1620_v52  ;;  %v5082_v34 = vld [vmem:[#allocation2 + $0x88] sm:$0xff] }
 0x558   : > { %5995 = vst [vmem:[#allocation45_spill] sm:$0xff] %v5082_v34  ;;  %v521_v52 = vld [vmem:[%s4387_s21 + $0x28] sm:$0xff] }
 0x55b   : > { %1624 = vmax.xlane.f32.xlu0 %v1623_v57  ;;  %1627 = vmax.xlane.f32.xlu1 %v1626_v4 }
 0x5d4   : > { %v1607_v41 = vpop.xlane.xlu1 %1606 }
 0x5d5   : > { %v5078_v14 = vmax.f32 %v5075_v36, %v1607_v41 }
 0x5d7   : > { %5993 = vst [vmem:[#allocation43_spill] sm:$0xff] %v5078_v14  ;;  %1952 = vst.msk [vmem:[#allocation2 + $0x80] sm:$0xff] %vm852_vm10, %v5078_v14  ;;  %1663 = vperm.xlu0 %3976, %v5078_v14   ;;  %v5131_v14 = vld [vmem:[#allocation2 + $0xb8] sm:$0xff] }
 0x5d8   : > { %v1616_v57 = vpop.xlane.xlu1 %1615  ;;  %v1610_v4 = vpop.xlane.xlu0 %1609 }
 0x5d9   : > { %v5090_v23 = vmax.f32 %v5080_v29, %v1616_v57  ;;  %v5093_v41 = vmax.f32 %v5082_v34, %v1610_v4  ;;  %v520_v4 = vld [vmem:[%s4387_s21 + $0x20] sm:$0xff]  ;;  %v5129_v34 = vld [vmem:[#allocation2 + $0xb0] sm:$0xff] }
 0x5da   : > { %v5114_v29 = vld [vmem:[#allocation2 + $0xa0] sm:$0xff] }
 0x5db   : > { %5996 = vst [vmem:[#allocation46_spill] sm:$0xff] %v5090_v23  ;;  %5997 = vst [vmem:[#allocation47_spill] sm:$0xff] %v5093_v41  ;;  %1678 = vperm.xlu0 %3976, %v5090_v23   ;;  %1668 = vperm.xlu1 %3977, %v5093_v41  }
 0x5dc   : > { %1955 = vst.msk [vmem:[#allocation2 + $0x98] sm:$0xff] %vm852_vm10, %v5090_v23  ;;  %1953 = vst.msk [vmem:[#allocation2 + $0x88] sm:$0xff] %vm852_vm10, %v5093_v41  ;;  %v1613_v57 = vpop.xlane.xlu0 %1612  ;;  %v3543_v41 = vcombine.high %v520_v4, %v521_v52 }
 0x5dd   : > { %v5111_v36 = vmax.f32 %v5097_v12, %v1613_v57  ;;  %v518_v12 = vld [vmem:[%s4387_s21 + $0x10] sm:$0xff] }
 0x5de   : > { %3790 = vmatprep.subr.bf16.mxu1 %v3543_v41  ;;  %3822 = vmatprep.subr.bf16.mxu0 %v3543_v41 }
 0x5df   : > { %5999 = vst [vmem:[#allocation49_spill] sm:$0xff] %v5111_v36  ;;  %1954 = vst.msk [vmem:[#allocation2 + $0x90] sm:$0xff] %vm852_vm10, %v5111_v36  ;;  %1673 = vperm.xlu1 %3977, %v5111_v36   ;;  %v519_v36 = vld [vmem:[%s4387_s21 + $0x18] sm:$0xff]  ;;  %3791 = vmatpush3.bf16.msra.mxu1 %v3543_v41 }
 0x5e0   : > { %v1619_v23 = vpop.xlane.xlu0 %1618  ;;  %v1622_v57 = vpop.xlane.xlu1 %1621  ;;  %3823 = vmatpush3.bf16.msra.mxu0 %v3543_v41  ;;  %v826_v41 = vsel %vm683_vm2, %v4751_v49, 0.0  ;;  %v835_v49 = vsel %vm683_vm2, %v4764_v54, 0.0 }
 0x5e1   : > { %v5124_v8 = vmax.f32 %v5114_v29, %v1619_v23  ;;  %v5127_v45 = vmax.f32 %v5116_v60, %v1622_v57  ;;  %v516_v23 = vld [vmem:[%s4387_s21] sm:$0xff]  ;;  %v3542_v60 = vcombine.high %v518_v12, %v519_v36  ;;  %v823_v36 = vsel %vm683_vm2, %v4747_v38, 0.0 }
 0x5e2   : > { %v3541_v12 = vcombine.high %v516_v23, %v517_v47  ;;  %v829_v47 = vsel %vm683_vm2, %v4755_v46, 0.0  ;;  %v838_v38 = vsel %vm683_vm2, %v4770_v55, 0.0 }
 0x5e3   : > { %6001 = vst [vmem:[#allocation51_spill] sm:$0xff] %v5124_v8  ;;  %6002 = vst [vmem:[#allocation52_spill] sm:$0xff] %v5127_v45  ;;  %1683 = vperm.xlu1 %3977, %v5124_v8   ;;  %1688 = vperm.xlu0 %3976, %v5127_v45  }
 0x5e4   : > { %1956 = vst.msk [vmem:[#allocation2 + $0xa0] sm:$0xff] %vm852_vm10, %v5124_v8  ;;  %1957 = vst.msk [vmem:[#allocation2 + $0xa8] sm:$0xff] %vm852_vm10, %v5127_v45  ;;  %v1625_v3 = vpop.xlane.xlu0 %1624  ;;  %v1628_v52 = vpop.xlane.xlu1 %1627  ;;  %3792 = vmatprep.subr.bf16.mxu1 %v3542_v60  ;;  %3824 = vmatprep.subr.bf16.mxu0 %v3542_v60  ;;  %v6012_v45 = vld [vmem:[#allocation29_spill] sm:$0xff] }
 0x5e5   : > { %v5146_v4 = vmax.f32 %v5129_v34, %v1625_v3  ;;  %v5149_v57 = vmax.f32 %v5131_v14, %v1628_v52  ;;  %3793 = vmatpush3.bf16.msra.mxu1 %v3542_v60  ;;  %3825 = vmatpush3.bf16.msra.mxu0 %v3542_v60  ;;  %v820_v3 = vsel %vm683_vm2, %v4744_v37, 0.0  ;;  %v832_v60 = vsel %vm683_vm2, %v4762_v51, 0.0 }
 0x5e6   : > { %3794 = vmatprep.subr.bf16.mxu1 %v3541_v12  ;;  %3826 = vmatprep.subr.bf16.mxu0 %v3541_v12  ;;  %v841_v37 = vsel %vm683_vm2, %v4773_v2, 0.0  ;;  %v1287_v8 = vsel %vm683_vm2, %v6012_v45, 0.0 }
 0x5e7   : > { %1958 = vst.msk [vmem:[#allocation2 + $0xb0] sm:$0xff] %vm852_vm10, %v5146_v4  ;;  %1959 = vst.msk [vmem:[#allocation2 + $0xb8] sm:$0xff] %vm852_vm10, %v5149_v57  ;;  %1693 = vperm.xlu1 %3977, %v5146_v4   ;;  %1698 = vperm.xlu0 %3976, %v5149_v57  }
 0x5e9   : > { %3795 = vmatpush3.bf16.msra.mxu1 %v3541_v12  ;;  %3827 = vmatpush3.bf16.msra.mxu0 %v3541_v12 }
 0x5ea   : > { %3804 = vmatprep.subr.bf16.mxu1 %v4941_v50 }
 0x606   : > { %824 = vadd.xlane.f32.xlu0 %v823_v36 }
 0x60a   : > { %827 = vadd.xlane.f32.xlu0 %v826_v41 }
 0x60b   : > { %821 = vadd.xlane.f32.xlu1 %v820_v3 }
 0x60e   : > { %833 = vadd.xlane.f32.xlu0 %v832_v60 }
 0x60f   : > { %830 = vadd.xlane.f32.xlu1 %v829_v47 }
 0x612   : > { %839 = vadd.xlane.f32.xlu0 %v838_v38 }
 0x613   : > { %836 = vadd.xlane.f32.xlu1 %v835_v49 }
 0x617   : > { %842 = vadd.xlane.f32.xlu1 %v841_v37 }
 0x652   : > { %v1664_v23 = vpop.permute.xlu0 %1663 }
 0x653   : > { %v1701_v51 = vsub.f32 %v5022_v0, %v1664_v23 }
 0x655   : > { %v1709_v36 = vmul.f32 1.442695, %v1701_v51 }
 0x656   : > { %v1679_v52 = vpop.permute.xlu0 %1678  ;;  %v1669_v12 = vpop.permute.xlu1 %1668 }
 0x657   : > { %v1704_v46 = vsub.f32 %v5029_v6, %v1679_v52  ;;  %v1702_v41 = vsub.f32 %v5034_v43, %v1669_v12  ;;  %4044 = vpow2.f32 %v1709_v36 }
 0x659   : > { %v1711_v55 = vmul.f32 1.442695, %v1702_v41  ;;  %v1715_v3 = vmul.f32 1.442695, %v1704_v46 }
 0x65a   : > { %v1674_v60 = vpop.permute.xlu1 %1673 }
 0x65b   : > { %v1703_v54 = vsub.f32 %v5043_v62, %v1674_v60  ;;  %4046 = vpow2.f32 %v1711_v55  ;;  %v495_v60 = vld [vmem:[%s4377_s14 + $0x18] sm:$0xff] }
 0x65c   : > { %4048 = vpow2.f32 %v1715_v3  ;;  %v493_v3 = vld [vmem:[%s4377_s14 + $0x8] sm:$0xff] }
 0x65d   : > { %v1713_v47 = vmul.f32 1.442695, %v1703_v54 }
 0x65e   : > { %v1689_v2 = vpop.permute.xlu0 %1688  ;;  %v1684_v38 = vpop.permute.xlu1 %1683 }
 0x65f   : > { %4050 = vpow2.f32 %v1713_v47  ;;  %v1706_v0 = vsub.f32 %v5067_v24, %v1689_v2  ;;  %v1705_v49 = vsub.f32 %v5048_v5, %v1684_v38  ;;  %v3549_v38 = vcombine.high %v493_v3, %v495_v60  ;;  %v804_v60 = vld [vmem:[#allocation3] sm:$0xff] }
 0x661   : > { %v1719_v37 = vmul.f32 1.442695, %v1706_v0  ;;  %v1717_v6 = vmul.f32 1.442695, %v1705_v49 }
 0x662   : > { %v1699_v23 = vpop.permute.xlu0 %1698  ;;  %v1694_v43 = vpop.permute.xlu1 %1693 }
 0x663   : > { %4052 = vpow2.f32 %v1719_v37  ;;  %v1708_v51 = vsub.f32 %v5062_v39, %v1699_v23  ;;  %v1707_v52 = vsub.f32 %v5057_v13, %v1694_v43  ;;  %v6004_v37 = vsub.f32 %v4653_v56, %v4658_v59 }
 0x664   : > { %4054 = vpow2.f32 %v1717_v6  ;;  %v5188_v36 = vpop.eup %4044  ;;  %v6005_v23 = vsub.f32 %v4655_v58, %v4667_v63  ;;  %v6007_v56 = vsub.f32 %v4660_v61, %v4677_v7  ;;  %v6008_v58 = vsub.f32 %v4698_v18, %v4709_v28  ;;  %v805_v28 = vld [vmem:[#allocation3 + $0x8] sm:$0xff] }
 0x665   : > { %v1723_v62 = vmul.f32 1.442695, %v1708_v51  ;;  %v1721_v12 = vmul.f32 1.442695, %v1707_v52  ;;  %v728_v6 = vmul.f32 1.442695, %v6004_v37  ;;  %v6010_v7 = vsub.f32 %v4714_v31, %v4727_v40 }
 0x666   : > { %v724_v43 = vmul.f32 1.442695, %v6005_v23  ;;  %v730_v59 = vmul.f32 1.442695, %v6007_v56  ;;  %v736_v63 = vmul.f32 1.442695, %v6008_v58 }
 0x667   : > { %4056 = vpow2.f32 %v1723_v62  ;;  %v497_v51 = vld [vmem:[%s4377_s14 + $0x28] sm:$0xff]  ;;  %v503_v52 = vld [vmem:[%s4377_s14 + $0x58] sm:$0xff]  ;;  %v738_v18 = vmul.f32 1.442695, %v6010_v7 }
 0x668   : > { %4058 = vpow2.f32 %v1721_v12  ;;  %v5190_v24 = vpop.eup %4046 }
 0x669   : > { %v1839_v5 = vpack.c.bf16 %v5190_v24, %v5188_v36  ;;  %v5194_v46 = vpop.eup %4048 }
 0x66b   : > { %3796 = vmatprep.mubr.msk.bf16.mxu1 %vm683_vm2, %v1839_v5  ;;  %v806_v5 = vld [vmem:[#allocation3 + $0x10] sm:$0xff] }
 0x66c   : > { %v5196_v41 = vpop.eup %4050 }
 0x66d   : > { %v1840_v13 = vpack.c.bf16 %v5194_v46, %v5196_v41 }
 0x66f   : > { %3797 = vmatmul.mubr.msk.bf16.vlgmr.msra.gmra.mxu1 %vm683_vm2, %v1840_v13 }
 0x670   : > { %v5202_v39 = vpop.eup %4052  ;;  %3805 = vmatpush3.bf16.xpose.msra.mxu1 %v4941_v50  ;;  %v6003_v50 = vsub.f32 %v4670_v1, %v4685_v10  ;;  %v6006_v1 = vsub.f32 %v4687_v11, %v4696_v15  ;;  %v499_v11 = vld [vmem:[%s4377_s14 + $0x38] sm:$0xff]  ;;  %v501_v15 = vld [vmem:[%s4377_s14 + $0x48] sm:$0xff] }
 0x671   : > { %v5205_v55 = vpop.eup %4054  ;;  %3806 = vmatprep.subr.bf16.mxu1 %v4967_v48  ;;  %v3550_v62 = vcombine.high %v497_v51, %v499_v11 }
 0x672   : > { %v1841_v54 = vpack.c.bf16 %v5202_v39, %v5205_v55  ;;  %v726_v49 = vmul.f32 1.442695, %v6003_v50  ;;  %v732_v10 = vmul.f32 1.442695, %v6006_v1  ;;  %v807_v1 = vld [vmem:[#allocation3 + $0x18] sm:$0xff] }
 0x674   : > { %v5212_v47 = vpop.eup %4056  ;;  %3800 = vmatprep.mubr.msk.bf16.mxu1 %vm683_vm2, %v1841_v54  ;;  %4060 = vpow2.f32 %v726_v49  ;;  %v505_v54 = vld [vmem:[%s4377_s14 + $0x68] sm:$0xff]  ;;  %v808_v49 = vld [vmem:[#allocation3 + $0x20] sm:$0xff] }
 0x675   : > { %v5215_v2 = vpop.eup %4058  ;;  %4062 = vpow2.f32 %v728_v6 }
 0x676   : > { %v1842_v0 = vpack.c.bf16 %v5212_v47, %v5215_v2  ;;  %4064 = vpow2.f32 %v724_v43 }
 0x677   : > { %4066 = vpow2.f32 %v732_v10 }
 0x678   : > { %3801 = vmatmul.mubr.msk.bf16.gmra.mxu1 %vm683_vm2, %v1842_v0  ;;  %4068 = vpow2.f32 %v730_v59 }
 0x679   : > { %3807 = vmatpush3.bf16.xpose.msra.mxu1 %v4967_v48  ;;  %3812 = vmatprep.mubr.bf16.mxu1 %v3549_v38  ;;  %v6009_v48 = vsub.f32 %v4700_v19, %v4712_v30  ;;  %4070 = vpow2.f32 %v736_v63  ;;  %v3551_v19 = vcombine.high %v501_v15, %v503_v52  ;;  %v507_v38 = vld [vmem:[%s4377_s14 + $0x78] sm:$0xff]  ;;  %v809_v15 = vld [vmem:[#allocation3 + $0x28] sm:$0xff] }
 0x67a   : > { %3808 = vmatprep.subr.bf16.mxu1 %v4988_v9  ;;  %v3552_v43 = vcombine.high %v505_v54, %v507_v38 }
 0x681   : > { %3809 = vmatpush3.bf16.xpose.msra.mxu1 %v4988_v9  ;;  %v734_v9 = vmul.f32 1.442695, %v6009_v48  ;;  %v5250_v61 = vpop.eup %4060  ;;  %v810_v48 = vld [vmem:[#allocation3 + $0x30] sm:$0xff] }
 0x682   : > { %3810 = vmatprep.subr.bf16.mxu1 %v4995_v35  ;;  %v813_v30 = vmul.f32 %v5250_v61, %v805_v28  ;;  %v5256_v12 = vpop.eup %4062 }
 0x683   : > { %4072 = vpow2.f32 %v734_v9  ;;  %v5258_v13 = vpop.eup %4064  ;;  %v814_v31 = vmul.f32 %v5256_v12, %v806_v5 }
 0x684   : > { %4074 = vpow2.f32 %v738_v18  ;;  %v5264_v40 = vpop.eup %4066  ;;  %v812_v50 = vmul.f32 %v5258_v13, %v804_v60 }
 0x685   : > { %v5267_v37 = vpop.eup %4068  ;;  %v816_v56 = vmul.f32 %v5264_v40, %v808_v49 }
 0x686   : > { %v5271_v59 = vpop.eup %4070  ;;  %v815_v63 = vmul.f32 %v5267_v37, %v807_v1 }
 0x687   : > { %v818_v7 = vmul.f32 %v5271_v59, %v810_v48 }
 0x689   : > { %3811 = vmatpush3.bf16.xpose.msra.mxu1 %v4995_v35 }
 0x68f   : > { %v825_v35 = vpop.xlane.xlu0 %824 }
 0x690   : > { %3813 = vmatmul.mubr.bf16.vlgmr.msra.gmra.mxu1 %v3550_v62  ;;  %v845_v3 = vadd.f32 %v825_v35, %v813_v30  ;;  %v5275_v9 = vpop.eup %4072  ;;  %v811_v35 = vld [vmem:[#allocation3 + $0x38] sm:$0xff] }
 0x691   : > { %3816 = vmatprep.mubr.bf16.mxu1 %v3551_v19  ;;  %v817_v28 = vmul.f32 %v5275_v9, %v809_v15  ;;  %v5281_v62 = vpop.eup %4074 }
 0x692   : > { %854 = vst.msk [vmem:[#allocation3 + $0x8] sm:$0xff] %vm852_vm10, %v845_v3  ;;  %v819_v3 = vmul.f32 %v5281_v62, %v811_v35 }
 0x693   : > { %v828_v0 = vpop.xlane.xlu0 %827 }
 0x694   : > { %v846_v6 = vadd.f32 %v828_v0, %v814_v31  ;;  %v822_v23 = vpop.xlane.xlu1 %821 }
 0x695   : > { %v844_v10 = vadd.f32 %v822_v23, %v812_v50 }
 0x696   : > { %855 = vst.msk [vmem:[#allocation3 + $0x10] sm:$0xff] %vm852_vm10, %v846_v6 }
 0x697   : > { %853 = vst.msk [vmem:[#allocation3] sm:$0xff] %vm852_vm10, %v844_v10  ;;  %v834_v58 = vpop.xlane.xlu0 %833 }
 0x698   : > { %3817 = vmatmul.mubr.bf16.gmra.mxu1 %v3552_v43  ;;  %v848_v51 = vadd.f32 %v834_v58, %v816_v56  ;;  %v831_v11 = vpop.xlane.xlu1 %830 }
 0x699   : > { %v847_v52 = vadd.f32 %v831_v11, %v815_v63 }
 0x69a   : > { %857 = vst.msk [vmem:[#allocation3 + $0x20] sm:$0xff] %vm852_vm10, %v848_v51 }
 0x69b   : > { %856 = vst.msk [vmem:[#allocation3 + $0x18] sm:$0xff] %vm852_vm10, %v847_v52  ;;  %v840_v18 = vpop.xlane.xlu0 %839 }
 0x69c   : > { %v850_v19 = vadd.f32 %v840_v18, %v818_v7  ;;  %v837_v30 = vpop.xlane.xlu1 %836 }
 0x69d   : > { %v849_v5 = vadd.f32 %v837_v30, %v817_v28 }
 0x69e   : > { %859 = vst.msk [vmem:[#allocation3 + $0x30] sm:$0xff] %vm852_vm10, %v850_v19 }
 0x69f   : > { %858 = vst.msk [vmem:[#allocation3 + $0x28] sm:$0xff] %vm852_vm10, %v849_v5 }
 0x6a0   : > { %v843_v60 = vpop.xlane.xlu1 %842 }
 0x6a1   : > { %v851_v54 = vadd.f32 %v843_v60, %v819_v3 }
 0x6a3   : > { %860 = vst.msk [vmem:[#allocation3 + $0x38] sm:$0xff] %vm852_vm10, %v851_v54 }
 0x72f   : > { %v5287_v38 = vpop.f32.mrf.mxu1 }
 0x731   : > { %v5289_v31 = vpop.f32.mrf.mxu1 }
 0x733   : > { %v5291_v0 = vpop.f32.mrf.mxu1 }
 0x735   : > { %v5293_v50 = vpop.f32.mrf.mxu1 }
 0x738   : > { %v5295_v49 = vpop.f32.mrf.mxu1 }
 0x73a   : > { %v5297_v6 = vpop.f32.mrf.mxu1 }
 0x73c   : > { %v5299_v23 = vpop.f32.mrf.mxu1 }
 0x73d   : > { %6011 = vst [vmem:[#allocation53_spill] sm:$0xff] %v5299_v23  ;;  %v6013_v23 = vld [vmem:[#allocation27_spill] sm:$0xff] }
 0x73e   : > { %v5301_v43 = vpop.f32.mrf.mxu1 }
 0x750   : > { %v3814_v1 = vpop.f32.mrf.mxu1 }
 0x751   : > { %v5306_v10 = vsel %vm548_vm1, %v3814_v1, -1e+30 }
 0x752   : > { %v2010_v56 = vpop.f32.mrf.mxu1  ;;  %v2064_v58 = vsel %vm683_vm2, %v5306_v10, -inf }
 0x753   : > { %v5313_v63 = vsel %vm546_vm3, %v2010_v56, -1e+30  ;;  %2065 = vmax.xlane.f32.xlu1 %v2064_v58 }
 0x754   : > { %v3815_v48 = vpop.f32.mrf.mxu1  ;;  %v2058_v11 = vsel %vm683_vm2, %v5313_v63, -inf }
 0x755   : > { %v5320_v16 = vsel %vm549_vm4, %v3815_v48, -1e+30  ;;  %v5386_v48 = vld [vmem:[#allocation2 + $0xc8] sm:$0xff] }
 0x756   : > { %v2013_v51 = vpop.f32.mrf.mxu1  ;;  %v2067_v7 = vsel %vm683_vm2, %v5320_v16, -inf }
 0x757   : > { %2059 = vmax.xlane.f32.xlu1 %v2058_v11  ;;  %v5327_v20 = vsel %vm547_vm5, %v2013_v51, -1e+30 }
 0x758   : > { %v3818_v15 = vpop.f32.mrf.mxu1  ;;  %v2061_v19 = vsel %vm683_vm2, %v5327_v20, -inf }
 0x759   : > { %v5348_v5 = vsel %vm552_vm6, %v3818_v15, -1e+30  ;;  %v5393_v15 = vld [vmem:[#allocation2 + $0xe8] sm:$0xff] }
 0x75a   : > { %v2026_v52 = vpop.f32.mrf.mxu1  ;;  %v2076_v33 = vsel %vm683_vm2, %v5348_v5, -inf }
 0x75b   : > { %2068 = vmax.xlane.f32.xlu1 %v2067_v7  ;;  %v5334_v21 = vsel %vm550_vm7, %v2026_v52, -1e+30 }
 0x75c   : > { %v3819_v18 = vpop.f32.mrf.mxu1  ;;  %v2070_v35 = vsel %vm683_vm2, %v5334_v21, -inf }
 0x75d   : > { %v5355_v42 = vsel %vm553_vm9, %v3819_v18, -1e+30  ;;  %v5398_v18 = vld [vmem:[#allocation2 + $0xe0] sm:$0xff] }
 0x75e   : > { %v2029_v28 = vpop.f32.mrf.mxu1  ;;  %v2079_v3 = vsel %vm683_vm2, %v5355_v42, -inf }
 0x75f   : > { %v5339_v30 = vsel %vm551_vm8, %v2029_v28, -1e+30  ;;  %2062 = vmax.xlane.f32.xlu1 %v2061_v19  ;;  %v1281_v28 = vsel %vm683_vm2, %v4952_v53, 0.0 }
 0x760   : > { %v2073_v22 = vsel %vm683_vm2, %v5339_v30, -inf }
 0x761   : > { %2074 = vmax.xlane.f32.xlu0 %v2073_v22 }
 0x763   : > { %2071 = vmax.xlane.f32.xlu1 %v2070_v35  ;;  %v5426_v35 = vld [vmem:[#allocation2 + $0xf8] sm:$0xff] }
 0x767   : > { %2077 = vmax.xlane.f32.xlu1 %v2076_v33 }
 0x76b   : > { %2080 = vmax.xlane.f32.xlu1 %v2079_v3  ;;  %v5416_v3 = vld [vmem:[#allocation2 + $0xf0] sm:$0xff] }
 0x777   : > { %871 = vperm.xlu0 %3976, %v5258_v13  }
 0x77c   : > { %876 = vperm.xlu1 %3977, %v5250_v61   ;;  %v5376_v61 = vld [vmem:[#allocation2 + $0xd8] sm:$0xff] }
 0x780   : > { %881 = vperm.xlu1 %3977, %v5256_v12  }
 0x7dc   : > { %v2066_v60 = vpop.xlane.xlu1 %2065 }
 0x7dd   : > { %v5365_v54 = vmax.f32 %v5362_v32, %v2066_v60 }
 0x7df   : > { %2391 = vst.msk [vmem:[#allocation2 + $0xd0] sm:$0xff] %vm852_vm10, %v5365_v54 }
 0x7e0   : > { %v2060_v1 = vpop.xlane.xlu1 %2059 }
 0x7e1   : > { %v5374_v13 = vmax.f32 %v5367_v17, %v2060_v1 }
 0x7e3   : > { %2389 = vst.msk [vmem:[#allocation2 + $0xc0] sm:$0xff] %vm852_vm10, %v5374_v13  ;;  %2116 = vperm.xlu1 %3977, %v5374_v13  }
 0x7e4   : > { %v2069_v56 = vpop.xlane.xlu1 %2068 }
 0x7e5   : > { %v5384_v58 = vmax.f32 %v5376_v61, %v2069_v56  ;;  %v861_v56 = vld [vmem:[#allocation4 + $0xb0] sm:$0xff] }
 0x7e7   : > { %2392 = vst.msk [vmem:[#allocation2 + $0xd8] sm:$0xff] %vm852_vm10, %v5384_v58  ;;  %2126 = vperm.xlu1 %3977, %v5365_v54  }
 0x7e8   : > { %v2063_v11 = vpop.xlane.xlu1 %2062 }
 0x7e9   : > { %v5396_v52 = vmax.f32 %v5386_v48, %v2063_v11 }
 0x7ea   : > { %v2075_v7 = vpop.xlane.xlu0 %2074 }
 0x7eb   : > { %2390 = vst.msk [vmem:[#allocation2 + $0xc8] sm:$0xff] %vm852_vm10, %v5396_v52  ;;  %v5405_v19 = vmax.f32 %v5393_v15, %v2075_v7  ;;  %2131 = vperm.xlu1 %3977, %v5384_v58   ;;  %2121 = vperm.xlu0 %3976, %v5396_v52  }
 0x7ec   : > { %v2072_v22 = vpop.xlane.xlu1 %2071 }
 0x7ed   : > { %2394 = vst.msk [vmem:[#allocation2 + $0xe8] sm:$0xff] %vm852_vm10, %v5405_v19  ;;  %v5414_v33 = vmax.f32 %v5398_v18, %v2072_v22  ;;  %v863_v22 = vld [vmem:[#allocation4 + $0xd8] sm:$0xff] }
 0x7ef   : > { %2393 = vst.msk [vmem:[#allocation2 + $0xe0] sm:$0xff] %vm852_vm10, %v5414_v33  ;;  %2136 = vperm.xlu1 %3977, %v5414_v33  }
 0x7f0   : > { %v2078_v1 = vpop.xlane.xlu1 %2077 }
 0x7f1   : > { %v5424_v11 = vmax.f32 %v5416_v3, %v2078_v1  ;;  %v862_v1 = vld [vmem:[#allocation4] sm:$0xff] }
 0x7f2   : > { %v872_v7 = vpop.permute.xlu0 %871 }
 0x7f3   : > { %2395 = vst.msk [vmem:[#allocation2 + $0xf0] sm:$0xff] %vm852_vm10, %v5424_v11  ;;  %v909_v51 = vmul.f32 %v872_v7, %v861_v56  ;;  %2141 = vperm.xlu1 %3977, %v5405_v19  }
 0x7f4   : > { %v2081_v12 = vpop.xlane.xlu1 %2080 }
 0x7f5   : > { %v1022_v60 = vadd.f32 %v4789_v25, %v909_v51  ;;  %v5435_v44 = vmax.f32 %v5426_v35, %v2081_v12 }
 0x7f7   : > { %1030 = vst [vmem:[#allocation4 + $0xb0] sm:$0xff] %v1022_v60  ;;  %2396 = vst.msk [vmem:[#allocation2 + $0xf8] sm:$0xff] %vm852_vm10, %v5435_v44  ;;  %2146 = vperm.xlu1 %3977, %v5424_v11   ;;  %2151 = vperm.xlu0 %3976, %v5435_v44  }
 0x7f8   : > { %v877_v56 = vpop.permute.xlu1 %876 }
 0x7f9   : > { %v910_v7 = vmul.f32 %v877_v56, %v862_v1  ;;  %v1284_v1 = vsel %vm683_vm2, %v6013_v23, 0.0  ;;  %v6014_v56 = vld [vmem:[#allocation28_spill] sm:$0xff] }
 0x7fb   : > { %v1023_v25 = vadd.f32 %v4793_v27, %v910_v7  ;;  %v1290_v27 = vsel %vm683_vm2, %v6014_v56, 0.0  ;;  %v6016_v7 = vld [vmem:[#allocation30_spill] sm:$0xff]  ;;  %v6019_v56 = vld [vmem:[#allocation11_spill] sm:$0xff] }
 0x7fc   : > { %v882_v51 = vpop.permute.xlu1 %881  ;;  %v1296_v53 = vsel %vm683_vm2, %v6016_v7, 0.0 }
 0x7fd   : > { %1031 = vst [vmem:[#allocation4] sm:$0xff] %v1023_v25  ;;  %v911_v12 = vmul.f32 %v882_v51, %v863_v22  ;;  %v6015_v22 = vld [vmem:[#allocation31_spill] sm:$0xff]  ;;  %v1745_v25 = vsel %vm683_vm2, %v5190_v24, 0.0  ;;  %v1742_v51 = vsel %vm683_vm2, %v5188_v36, 0.0  ;;  %v1751_v24 = vsel %vm683_vm2, %v5194_v46, 0.0  ;;  %v6025_v46 = vld [vmem:[#allocation13_spill] sm:$0xff] }
 0x7fe   : > { %v1757_v36 = vsel %vm683_vm2, %v5202_v39, 0.0 }
 0x7ff   : > { %v1024_v60 = vadd.f32 %v4787_v26, %v911_v12  ;;  %v1293_v26 = vsel %vm683_vm2, %v6015_v22, 0.0  ;;  %v1754_v12 = vsel %vm683_vm2, %v5205_v55, 0.0  ;;  %v1763_v55 = vsel %vm683_vm2, %v5212_v47, 0.0  ;;  %v6028_v47 = vld [vmem:[#allocation14_spill] sm:$0xff] }
 0x801   : > { %1032 = vst [vmem:[#allocation4 + $0xd8] sm:$0xff] %v1024_v60  ;;  %v1748_v60 = vsel %vm683_vm2, %v5196_v41, 0.0 }
 0x816   : > { %1282 = vadd.xlane.f32.xlu0 %v1281_v28  ;;  %v6017_v28 = vld [vmem:[#allocation33_spill] sm:$0xff] }
 0x817   : > { %v1299_v45 = vsel %vm683_vm2, %v6017_v28, 0.0  ;;  %v6026_v28 = vld [vmem:[#allocation15_spill] sm:$0xff] }
 0x81a   : > { %1288 = vadd.xlane.f32.xlu0 %v1287_v8  ;;  %v6018_v8 = vld [vmem:[#allocation32_spill] sm:$0xff] }
 0x81b   : > { %1285 = vadd.xlane.f32.xlu1 %v1284_v1  ;;  %v1302_v23 = vsel %vm683_vm2, %v6018_v8, 0.0  ;;  %v1760_v1 = vsel %vm683_vm2, %v5215_v2, 0.0  ;;  %v6023_v2 = vld [vmem:[#allocation18_spill] sm:$0xff]  ;;  %v6029_v8 = vld [vmem:[#allocation16_spill] sm:$0xff] }
 0x81e   : > { %1291 = vadd.xlane.f32.xlu0 %v1290_v27  ;;  %v6020_v27 = vld [vmem:[#allocation12_spill] sm:$0xff] }
 0x81f   : > { %1294 = vadd.xlane.f32.xlu1 %v1293_v26  ;;  %v6021_v22 = vsub.f32 %v6019_v56, %v6020_v27  ;;  %v6022_v26 = vld [vmem:[#allocation17_spill] sm:$0xff]  ;;  %v6037_v56 = vld [vmem:[#allocation24_spill] sm:$0xff]  ;;  %v6038_v27 = vld [vmem:[#allocation26_spill] sm:$0xff] }
 0x820   : > { %v6024_v7 = vsub.f32 %v6022_v26, %v6023_v2  ;;  %v6040_v26 = vld [vmem:[#allocation23_spill] sm:$0xff]  ;;  %v6041_v2 = vld [vmem:[#allocation25_spill] sm:$0xff] }
 0x821   : > { %v1184_v41 = vmul.f32 1.442695, %v6021_v22 }
 0x822   : > { %1297 = vadd.xlane.f32.xlu0 %v1296_v53  ;;  %v1188_v53 = vmul.f32 1.442695, %v6024_v7  ;;  %v6042_v7 = vsub.f32 %v6040_v26, %v6041_v2  ;;  %v6058_v2 = vld [vmem:[#allocation52_spill] sm:$0xff] }
 0x823   : > { %1300 = vadd.xlane.f32.xlu1 %v1299_v45  ;;  %4076 = vpow2.f32 %v1184_v41  ;;  %v6027_v45 = vsub.f32 %v6025_v46, %v6026_v28  ;;  %v6044_v46 = vld [vmem:[#allocation43_spill] sm:$0xff] }
 0x824   : > { %4078 = vpow2.f32 %v1188_v53  ;;  %v1196_v53 = vmul.f32 1.442695, %v6042_v7 }
 0x825   : > { %v1190_v39 = vmul.f32 1.442695, %v6027_v45 }
 0x826   : > { %1303 = vadd.xlane.f32.xlu0 %v1302_v23  ;;  %v6030_v23 = vsub.f32 %v6028_v47, %v6029_v8  ;;  %v6046_v47 = vld [vmem:[#allocation45_spill] sm:$0xff]  ;;  %v6047_v8 = vld [vmem:[#allocation47_spill] sm:$0xff] }
 0x827   : > { %1746 = vadd.xlane.f32.xlu1 %v1745_v25  ;;  %4080 = vpow2.f32 %v1190_v39 }
 0x828   : > { %v1186_v25 = vmul.f32 1.442695, %v6030_v23  ;;  %v6048_v23 = vsub.f32 %v6046_v47, %v6047_v8 }
 0x82a   : > { %1743 = vadd.xlane.f32.xlu0 %v1742_v51  ;;  %v6031_v51 = vld [vmem:[#allocation20_spill] sm:$0xff]  ;;  %4082 = vpow2.f32 %v1186_v25  ;;  %v1647_v25 = vmul.f32 1.442695, %v6048_v23  ;;  %v6062_v23 = vsub.f32 %v5386_v48, %v5396_v52  ;;  %v6064_v48 = vsub.f32 %v5398_v18, %v5414_v33 }
 0x82b   : > { %1755 = vadd.xlane.f32.xlu1 %v1754_v12  ;;  %v6032_v12 = vld [vmem:[#allocation22_spill] sm:$0xff] }
 0x82c   : > { %v2106_v52 = vmul.f32 1.442695, %v6064_v48 }
 0x82e   : > { %1749 = vadd.xlane.f32.xlu0 %v1748_v60  ;;  %v6033_v60 = vsub.f32 %v6031_v51, %v6032_v12  ;;  %v6049_v51 = vld [vmem:[#allocation48_spill] sm:$0xff]  ;;  %v6050_v12 = vld [vmem:[#allocation49_spill] sm:$0xff] }
 0x82f   : > { %1761 = vadd.xlane.f32.xlu1 %v1760_v1 }
 0x830   : > { %v1194_v1 = vmul.f32 1.442695, %v6033_v60  ;;  %v5501_v41 = vpop.eup %4076  ;;  %v6051_v60 = vsub.f32 %v6049_v51, %v6050_v12  ;;  %v6063_v51 = vsub.f32 %v5362_v32, %v5365_v54 }
 0x831   : > { %v5510_v39 = vpop.eup %4078 }
 0x832   : > { %1752 = vadd.xlane.f32.xlu0 %v1751_v24  ;;  %v6035_v24 = vld [vmem:[#allocation21_spill] sm:$0xff]  ;;  %4084 = vpow2.f32 %v1194_v1  ;;  %v1649_v1 = vmul.f32 1.442695, %v6051_v60 }
 0x836   : > { %1758 = vadd.xlane.f32.xlu0 %v1757_v36 }
 0x83a   : > { %1764 = vadd.xlane.f32.xlu0 %v1763_v55 }
 0x840   : > { %886 = vperm.xlu1 %3977, %v5267_v37   ;;  %v6034_v37 = vld [vmem:[#allocation19_spill] sm:$0xff] }
 0x841   : > { %v6036_v36 = vsub.f32 %v6034_v37, %v6035_v24  ;;  %v5520_v37 = vpop.eup %4080  ;;  %v6052_v24 = vld [vmem:[#allocation44_spill] sm:$0xff] }
 0x843   : > { %v1192_v55 = vmul.f32 1.442695, %v6036_v36  ;;  %v6053_v36 = vld [vmem:[#allocation46_spill] sm:$0xff] }
 0x844   : > { %896 = vperm.xlu1 %3977, %v5275_v9   ;;  %v6039_v9 = vsub.f32 %v6037_v56, %v6038_v27  ;;  %v5527_v56 = vpop.eup %4082  ;;  %v6055_v27 = vld [vmem:[#allocation51_spill] sm:$0xff] }
 0x845   : > { %4086 = vpow2.f32 %v1192_v55  ;;  %v6054_v55 = vsub.f32 %v6052_v24, %v6053_v36  ;;  %v5532_v26 = vpop.eup %4084  ;;  %v6065_v36 = vsub.f32 %v5367_v17, %v5374_v13 }
 0x846   : > { %v1198_v22 = vmul.f32 1.442695, %v6039_v9  ;;  %v6056_v9 = vsub.f32 %v5114_v29, %v6055_v27 }
 0x848   : > { %906 = vperm.xlu1 %3977, %v5281_v62   ;;  %4088 = vpow2.f32 %v1198_v22  ;;  %v6043_v62 = vld [vmem:[#allocation42_spill] sm:$0xff]  ;;  %v1653_v22 = vmul.f32 1.442695, %v6056_v9 }
 0x849   : > { %v6045_v28 = vsub.f32 %v6043_v62, %v6044_v46  ;;  %4090 = vpow2.f32 %v1196_v53  ;;  %v6060_v46 = vsub.f32 %v5129_v34, %v5146_v4 }
 0x84b   : > { %v1645_v45 = vmul.f32 1.442695, %v6045_v28  ;;  %v1657_v28 = vmul.f32 1.442695, %v6060_v46 }
 0x84c   : > { %1332 = vperm.xlu1 %3977, %v5501_v41  }
 0x84d   : > { %4092 = vpow2.f32 %v1645_v45  ;;  %v6061_v45 = vsub.f32 %v5131_v14, %v5149_v57  ;;  %v2102_v14 = vmul.f32 1.442695, %v6063_v51 }
 0x84e   : > { %4094 = vpow2.f32 %v1647_v25  ;;  %v2100_v25 = vmul.f32 1.442695, %v6062_v23 }
 0x84f   : > { %4096 = vpow2.f32 %v1649_v1  ;;  %v1659_v47 = vmul.f32 1.442695, %v6061_v45 }
 0x850   : > { %1342 = vperm.xlu1 %3977, %v5510_v39   ;;  %891 = vperm.xlu0 %3976, %v5264_v40   ;;  %v1651_v40 = vmul.f32 1.442695, %v6054_v55  ;;  %v2098_v55 = vmul.f32 1.442695, %v6065_v36 }
 0x852   : > { %4098 = vpow2.f32 %v1651_v40  ;;  %v5539_v62 = vpop.eup %4086 }
 0x853   : > { %4100 = vpow2.f32 %v1653_v22  ;;  %v6066_v22 = vsub.f32 %v5376_v61, %v5384_v58 }
 0x854   : > { %1347 = vperm.xlu1 %3977, %v5520_v37   ;;  %901 = vperm.xlu0 %3976, %v5271_v59   ;;  %v6057_v59 = vld [vmem:[#allocation50_spill] sm:$0xff] }
 0x855   : > { %v6059_v7 = vsub.f32 %v6057_v59, %v6058_v2  ;;  %v5544_v29 = vpop.eup %4088  ;;  %v2104_v59 = vmul.f32 1.442695, %v6066_v22  ;;  %v1265_v22 = vld [vmem:[#allocation3 + $0x40] sm:$0xff] }
 0x856   : > { %v5551_v8 = vpop.eup %4090 }
 0x857   : > { %v1655_v53 = vmul.f32 1.442695, %v6059_v7 }
 0x858   : > { %1357 = vperm.xlu1 %3977, %v5532_v26   ;;  %1337 = vperm.xlu0 %3976, %v5527_v56  }
 0x859   : > { %4102 = vpow2.f32 %v1655_v53 }
 0x85a   : > { %4104 = vpow2.f32 %v1657_v28  ;;  %v5556_v4 = vpop.eup %4092 }
 0x85b   : > { %4106 = vpow2.f32 %v1659_v47  ;;  %v5564_v12 = vpop.eup %4094 }
 0x85c   : > { %1367 = vperm.xlu1 %3977, %v5544_v29   ;;  %1352 = vperm.xlu0 %3976, %v5539_v62   ;;  %4108 = vpow2.f32 %v2100_v25  ;;  %v5569_v1 = vpop.eup %4096 }
 0x85d   : > { %4110 = vpow2.f32 %v2102_v14 }
 0x85e   : > { %v2117_v34 = vpop.permute.xlu1 %2116  ;;  %4112 = vpow2.f32 %v2106_v52 }
 0x85f   : > { %v2154_v57 = vsub.f32 %v5313_v63, %v2117_v34  ;;  %v5577_v32 = vpop.eup %4098  ;;  %4114 = vpow2.f32 %v2098_v55 }
 0x860   : > { %1793 = vperm.xlu1 %3977, %v5556_v4   ;;  %1362 = vperm.xlu0 %3976, %v5551_v8   ;;  %v5579_v40 = vpop.eup %4100 }
 0x861   : > { %v2162_v63 = vmul.f32 1.442695, %v2154_v57 }
 0x862   : > { %v2127_v60 = vpop.permute.xlu1 %2126 }
 0x863   : > { %v2156_v24 = vsub.f32 %v5306_v10, %v2127_v60  ;;  %4116 = vpow2.f32 %v2162_v63 }
 0x864   : > { %1803 = vperm.xlu1 %3977, %v5569_v1   ;;  %1798 = vperm.xlu0 %3976, %v5564_v12  }
 0x865   : > { %v2166_v54 = vmul.f32 1.442695, %v2156_v24 }
 0x866   : > { %v2122_v18 = vpop.permute.xlu0 %2121  ;;  %v2132_v33 = vpop.permute.xlu1 %2131 }
 0x867   : > { %v2155_v10 = vsub.f32 %v5327_v20, %v2122_v18  ;;  %v2157_v27 = vsub.f32 %v5320_v16, %v2132_v33  ;;  %v5585_v9 = vpop.eup %4102  ;;  %4118 = vpow2.f32 %v2166_v54  ;;  %v6067_v20 = vsub.f32 %v5393_v15, %v5405_v19 }
 0x868   : > { %1808 = vperm.xlu1 %3977, %v5577_v32   ;;  %1813 = vperm.xlu0 %3976, %v5579_v40   ;;  %v5590_v7 = vpop.eup %4104 }
 0x869   : > { %v2164_v17 = vmul.f32 1.442695, %v2155_v10  ;;  %v2168_v13 = vmul.f32 1.442695, %v2157_v27  ;;  %v2108_v53 = vmul.f32 1.442695, %v6067_v20  ;;  %v5598_v46 = vpop.eup %4106 }
 0x86a   : > { %v2137_v2 = vpop.permute.xlu1 %2136  ;;  %v5600_v28 = vpop.eup %4108  ;;  %v1267_v20 = vld [vmem:[#allocation3 + $0x50] sm:$0xff] }
 0x86b   : > { %4120 = vpow2.f32 %v2164_v17  ;;  %v2158_v16 = vsub.f32 %v5334_v21, %v2137_v2  ;;  %v5605_v47 = vpop.eup %4110 }
 0x86c   : > { %4122 = vpow2.f32 %v2168_v13  ;;  %1818 = vperm.xlu1 %3977, %v5585_v9   ;;  %1823 = vperm.xlu0 %3976, %v5590_v7   ;;  %v5607_v23 = vpop.eup %4112 }
 0x86d   : > { %4124 = vpow2.f32 %v2104_v59  ;;  %v2170_v61 = vmul.f32 1.442695, %v2158_v16  ;;  %v1273_v59 = vmul.f32 %v5501_v41, %v1265_v22  ;;  %v1268_v41 = vld [vmem:[#allocation3 + $0x58] sm:$0xff]  ;;  %v1727_v22 = vld [vmem:[#allocation3 + $0x88] sm:$0xff] }
 0x86e   : > { %v2142_v58 = vpop.permute.xlu1 %2141  ;;  %4126 = vpow2.f32 %v2108_v53 }
 0x86f   : > { %v2159_v45 = vsub.f32 %v5339_v30, %v2142_v58  ;;  %4128 = vpow2.f32 %v2170_v61  ;;  %v5613_v30 = vpop.eup %4114  ;;  %v1266_v61 = vld [vmem:[#allocation3 + $0x48] sm:$0xff]  ;;  %v1275_v58 = vmul.f32 %v5510_v39, %v1267_v20  ;;  %v6068_v39 = vsub.f32 %v5416_v3, %v5424_v11 }
 0x870   : > { %1828 = vperm.xlu1 %3977, %v5598_v46   ;;  %2251 = vperm.xlu0 %3976, %v5600_v28   ;;  %v4117_v57 = vpop.eup %4116  ;;  %v6069_v3 = vsub.f32 %v5426_v35, %v5435_v44  ;;  %v1735_v35 = vmul.f32 %v5564_v12, %v1727_v22 }
 0x871   : > { %v2172_v21 = vmul.f32 1.442695, %v2159_v45  ;;  %v2195_v17 = vsel %vm683_vm2, %v4117_v57, 0.0 }
 0x872   : > { %v2152_v15 = vpop.permute.xlu0 %2151  ;;  %v2147_v19 = vpop.permute.xlu1 %2146  ;;  %v2112_v11 = vmul.f32 1.442695, %v6069_v3 }
 0x873   : > { %4130 = vpow2.f32 %v2172_v21  ;;  %v2161_v25 = vsub.f32 %v5355_v42, %v2152_v15  ;;  %v2160_v34 = vsub.f32 %v5348_v5, %v2147_v19  ;;  %v1274_v19 = vmul.f32 %v5527_v56, %v1266_v61 }
 0x874   : > { %2256 = vperm.xlu1 %3977, %v5605_v47   ;;  %2266 = vperm.xlu0 %3976, %v5607_v23   ;;  %v4119_v48 = vpop.eup %4118 }
 0x875   : > { %v2176_v51 = vmul.f32 1.442695, %v2161_v25  ;;  %v2174_v14 = vmul.f32 1.442695, %v2160_v34  ;;  %v2201_v27 = vsel %vm683_vm2, %v4119_v48, 0.0 }
 0x877   : > { %4132 = vpow2.f32 %v2176_v51  ;;  %v1269_v51 = vld [vmem:[#allocation3 + $0x60] sm:$0xff] }
 0x878   : > { %v4121_v52 = vpop.eup %4120  ;;  %4134 = vpow2.f32 %v2174_v14  ;;  %2246 = vperm.xlu1 %3977, %v5613_v30   ;;  %v1277_v56 = vmul.f32 %v5539_v62, %v1269_v51 }
 0x879   : > { %v4123_v60 = vpop.eup %4122  ;;  %v2292_v24 = vpack.c.bf16 %v4121_v52, %v4117_v57  ;;  %v2198_v15 = vsel %vm683_vm2, %v4121_v52, 0.0  ;;  %v1276_v57 = vmul.f32 %v5520_v37, %v1268_v41 }
 0x87a   : > { %v2293_v42 = vpack.c.bf16 %v4123_v60, %v4119_v48  ;;  %v5616_v36 = vpop.eup %4124  ;;  %v2204_v13 = vsel %vm683_vm2, %v4123_v60, 0.0  ;;  %v2110_v48 = vmul.f32 1.442695, %v6068_v39  ;;  %v864_v39 = vld [vmem:[#allocation4 + $0x18] sm:$0xff] }
 0x87b   : > { %3828 = vmatprep.mubr.msk.bf16.mxu0 %vm683_vm2, %v2292_v24  ;;  %v5621_v5 = vpop.eup %4126  ;;  %v1270_v24 = vld [vmem:[#allocation3 + $0x68] sm:$0xff] }
 0x87c   : > { %2261 = vperm.xlu1 %3977, %v5616_v36   ;;  %3829 = vmatmul.mubr.msk.bf16.vlgmr.msra.gmra.mxu0 %vm683_vm2, %v2293_v42  ;;  %v4129_v55 = vpop.eup %4128  ;;  %v1278_v37 = vmul.f32 %v5532_v26, %v1270_v24  ;;  %4136 = vpow2.f32 %v2110_v48  ;;  %v1731_v48 = vld [vmem:[#allocation3 + $0xa8] sm:$0xff] }
 0x87d   : > { %v2207_v62 = vsel %vm683_vm2, %v4129_v55, 0.0  ;;  %4138 = vpow2.f32 %v2112_v11  ;;  %v1739_v24 = vmul.f32 %v5585_v9, %v1731_v48 }
 0x880   : > { %v4131_v63 = vpop.eup %4130  ;;  %2271 = vperm.xlu1 %3977, %v5621_v5  }
 0x881   : > { %v2294_v54 = vpack.c.bf16 %v4131_v63, %v4129_v55  ;;  %v2210_v45 = vsel %vm683_vm2, %v4131_v63, 0.0 }
 0x883   : > { %3832 = vmatprep.mubr.msk.bf16.mxu0 %vm683_vm2, %v2294_v54  ;;  %v1271_v54 = vld [vmem:[#allocation3 + $0x70] sm:$0xff] }
 0x884   : > { %v4133_v18 = vpop.eup %4132 }
 0x885   : > { %v4135_v33 = vpop.eup %4134  ;;  %v2216_v2 = vsel %vm683_vm2, %v4133_v18, 0.0 }
 0x886   : > { %v2295_v10 = vpack.c.bf16 %v4133_v18, %v4135_v33  ;;  %v2213_v52 = vsel %vm683_vm2, %v4135_v33, 0.0 }
 0x888   : > { %3833 = vmatmul.mubr.msk.bf16.gmra.mxu0 %vm683_vm2, %v2295_v10  ;;  %v1279_v10 = vmul.f32 %v5551_v8, %v1271_v54  ;;  %v1730_v8 = vld [vmem:[#allocation3 + $0xa0] sm:$0xff] }
 0x893   : > { %2202 = vadd.xlane.f32.xlu0 %v2201_v27  ;;  %v1272_v27 = vld [vmem:[#allocation3 + $0x78] sm:$0xff] }
 0x894   : > { %v1280_v26 = vmul.f32 %v5544_v29, %v1272_v27  ;;  %v1738_v29 = vmul.f32 %v5579_v40, %v1730_v8  ;;  %v6073_v8 = vld [vmem:[#allocation35_spill] sm:$0xff] }
 0x897   : > { %2196 = vadd.xlane.f32.xlu0 %v2195_v17 }
 0x89b   : > { %2205 = vadd.xlane.f32.xlu0 %v2204_v13 }
 0x89f   : > { %v1283_v16 = vpop.xlane.xlu0 %1282  ;;  %2217 = vadd.xlane.f32.xlu0 %v2216_v2  ;;  %v1726_v2 = vld [vmem:[#allocation3 + $0x80] sm:$0xff] }
 0x8a0   : > { %v1305_v53 = vadd.f32 %v1283_v16, %v1273_v59 }
 0x8a2   : > { %1313 = vst.msk [vmem:[#allocation3 + $0x40] sm:$0xff] %vm852_vm10, %v1305_v53  ;;  %v1734_v53 = vmul.f32 %v5556_v4, %v1726_v2  ;;  %v1729_v4 = vld [vmem:[#allocation3 + $0x98] sm:$0xff] }
 0x8a3   : > { %v1289_v21 = vpop.xlane.xlu0 %1288  ;;  %2211 = vadd.xlane.f32.xlu0 %v2210_v45 }
 0x8a4   : > { %v1307_v25 = vadd.f32 %v1289_v21, %v1275_v58  ;;  %2199 = vadd.xlane.f32.xlu1 %v2198_v15  ;;  %v1286_v34 = vpop.xlane.xlu1 %1285  ;;  %v1728_v58 = vld [vmem:[#allocation3 + $0x90] sm:$0xff] }
 0x8a5   : > { %v1306_v14 = vadd.f32 %v1286_v34, %v1274_v19  ;;  %v1732_v15 = vld [vmem:[#allocation3 + $0xb0] sm:$0xff]  ;;  %v1736_v12 = vmul.f32 %v5569_v1, %v1728_v58  ;;  %v5664_v34 = vpop.eup %4136 }
 0x8a6   : > { %1315 = vst.msk [vmem:[#allocation3 + $0x50] sm:$0xff] %vm852_vm10, %v1307_v25  ;;  %v1740_v25 = vmul.f32 %v5590_v7, %v1732_v15  ;;  %v867_v58 = vld [vmem:[#allocation4 + $0x30] sm:$0xff]  ;;  %v1325_v15 = vld [vmem:[#allocation4 + $0xb8] sm:$0xff] }
 0x8a7   : > { %1314 = vst.msk [vmem:[#allocation3 + $0x48] sm:$0xff] %vm852_vm10, %v1306_v14  ;;  %v1292_v60 = vpop.xlane.xlu0 %1291 }
 0x8a8   : > { %v1308_v42 = vadd.f32 %v1292_v60, %v1276_v57  ;;  %2214 = vadd.xlane.f32.xlu1 %v2213_v52  ;;  %v1295_v63 = vpop.xlane.xlu1 %1294  ;;  %v1737_v57 = vmul.f32 %v5577_v32, %v1729_v4  ;;  %v5670_v60 = vpop.eup %4138 }
 0x8a9   : > { %v1309_v18 = vadd.f32 %v1295_v63, %v1277_v56  ;;  %v6070_v63 = vld [vmem:[#allocation6_spill] sm:$0xff] }
 0x8aa   : > { %1316 = vst.msk [vmem:[#allocation3 + $0x58] sm:$0xff] %vm852_vm10, %v1308_v42  ;;  %v866_v42 = vld [vmem:[#allocation4 + $0x68] sm:$0xff] }
 0x8ab   : > { %1317 = vst.msk [vmem:[#allocation3 + $0x60] sm:$0xff] %vm852_vm10, %v1309_v18  ;;  %v1298_v33 = vpop.xlane.xlu0 %1297  ;;  %v1733_v18 = vld [vmem:[#allocation3 + $0xb8] sm:$0xff] }
 0x8ac   : > { %v1310_v17 = vadd.f32 %v1298_v33, %v1278_v37  ;;  %2208 = vadd.xlane.f32.xlu1 %v2207_v62  ;;  %v1301_v13 = vpop.xlane.xlu1 %1300  ;;  %v1741_v33 = vmul.f32 %v5598_v46, %v1733_v18  ;;  %v868_v62 = vld [vmem:[#allocation4 + $0x48] sm:$0xff]  ;;  %v6079_v18 = vld [vmem:[#allocation41_spill] sm:$0xff] }
 0x8ad   : > { %v1311_v59 = vadd.f32 %v1301_v13, %v1279_v10  ;;  %v6071_v10 = vld [vmem:[#allocation10_spill] sm:$0xff] }
 0x8ae   : > { %1318 = vst.msk [vmem:[#allocation3 + $0x68] sm:$0xff] %vm852_vm10, %v1310_v17 }
 0x8af   : > { %1319 = vst.msk [vmem:[#allocation3 + $0x70] sm:$0xff] %vm852_vm10, %v1311_v59  ;;  %v1304_v44 = vpop.xlane.xlu0 %1303  ;;  %v1322_v59 = vld [vmem:[#allocation4 + $0x80] sm:$0xff] }
 0x8b0   : > { %v1312_v55 = vadd.f32 %v1304_v44, %v1280_v26  ;;  %v1747_v16 = vpop.xlane.xlu1 %1746  ;;  %v6072_v26 = vld [vmem:[#allocation9_spill] sm:$0xff] }
 0x8b1   : > { %v1767_v20 = vadd.f32 %v1747_v16, %v1735_v35  ;;  %v1324_v16 = vld [vmem:[#allocation4 + $0xe8] sm:$0xff] }
 0x8b2   : > { %1320 = vst.msk [vmem:[#allocation3 + $0x78] sm:$0xff] %vm852_vm10, %v1312_v55  ;;  %v865_v55 = vld [vmem:[#allocation4 + $0x50] sm:$0xff] }
 0x8b3   : > { %1775 = vst.msk [vmem:[#allocation3 + $0x88] sm:$0xff] %vm852_vm10, %v1767_v20  ;;  %v1744_v61 = vpop.xlane.xlu0 %1743 }
 0x8b4   : > { %v1766_v45 = vadd.f32 %v1744_v61, %v1734_v53  ;;  %v1756_v21 = vpop.xlane.xlu1 %1755 }
 0x8b5   : > { %v1770_v19 = vadd.f32 %v1756_v21, %v1738_v29 }
 0x8b6   : > { %1774 = vst.msk [vmem:[#allocation3 + $0x80] sm:$0xff] %vm852_vm10, %v1766_v45  ;;  %v6074_v45 = vld [vmem:[#allocation8_spill] sm:$0xff] }
 0x8b7   : > { %1778 = vst.msk [vmem:[#allocation3 + $0xa0] sm:$0xff] %vm852_vm10, %v1770_v19  ;;  %v1750_v41 = vpop.xlane.xlu0 %1749  ;;  %v6075_v19 = vld [vmem:[#allocation34_spill] sm:$0xff] }
 0x8b8   : > { %v1768_v51 = vadd.f32 %v1750_v41, %v1736_v12  ;;  %v1762_v14 = vpop.xlane.xlu1 %1761 }
 0x8b9   : > { %v1772_v40 = vadd.f32 %v1762_v14, %v1740_v25  ;;  %2276 = vperm.xlu0 %3976, %v5664_v34   ;;  %v1323_v14 = vld [vmem:[#allocation4 + $0x88] sm:$0xff] }
 0x8ba   : > { %1776 = vst.msk [vmem:[#allocation3 + $0x90] sm:$0xff] %vm852_vm10, %v1768_v51 }
 0x8bb   : > { %1780 = vst.msk [vmem:[#allocation3 + $0xb0] sm:$0xff] %vm852_vm10, %v1772_v40  ;;  %v1753_v1 = vpop.xlane.xlu0 %1752  ;;  %v6076_v40 = vld [vmem:[#allocation7_spill] sm:$0xff] }
 0x8bc   : > { %v1769_v7 = vadd.f32 %v1753_v1, %v1737_v57  ;;  %v887_v52 = vpop.permute.xlu1 %886  ;;  %v6077_v1 = vld [vmem:[#allocation36_spill] sm:$0xff] }
 0x8bd   : > { %v912_v56 = vmul.f32 %v887_v52, %v864_v39  ;;  %2281 = vperm.xlu1 %3977, %v5670_v60   ;;  %v1327_v39 = vld [vmem:[#allocation4 + $0xf0] sm:$0xff] }
 0x8be   : > { %1777 = vst.msk [vmem:[#allocation3 + $0x98] sm:$0xff] %vm852_vm10, %v1769_v7 }
 0x8bf   : > { %v1025_v54 = vadd.f32 %v6070_v63, %v912_v56  ;;  %v1759_v32 = vpop.xlane.xlu0 %1758  ;;  %v6078_v63 = vld [vmem:[#allocation37_spill] sm:$0xff] }
 0x8c0   : > { %v1771_v37 = vadd.f32 %v1759_v32, %v1739_v24  ;;  %v897_v3 = vpop.permute.xlu1 %896  ;;  %v1329_v32 = vld [vmem:[#allocation4 + $0x78] sm:$0xff] }
 0x8c1   : > { %1033 = vst [vmem:[#allocation4 + $0x18] sm:$0xff] %v1025_v54  ;;  %v914_v11 = vmul.f32 %v897_v3, %v866_v42  ;;  %v1326_v42 = vld [vmem:[#allocation4 + $0x60] sm:$0xff] }
 0x8c2   : > { %1779 = vst.msk [vmem:[#allocation3 + $0xa8] sm:$0xff] %vm852_vm10, %v1771_v37 }
 0x8c3   : > { %v1027_v27 = vadd.f32 %v6071_v10, %v914_v11  ;;  %v1765_v17 = vpop.xlane.xlu0 %1764  ;;  %v1328_v10 = vld [vmem:[#allocation4 + $0x8] sm:$0xff] }
 0x8c4   : > { %v1773_v13 = vadd.f32 %v1765_v17, %v1741_v33  ;;  %v907_v22 = vpop.permute.xlu1 %906 }
 0x8c5   : > { %1035 = vst [vmem:[#allocation4 + $0x68] sm:$0xff] %v1027_v27  ;;  %v916_v9 = vmul.f32 %v907_v22, %v868_v62  ;;  %v6080_v27 = vld [vmem:[#allocation39_spill] sm:$0xff]  ;;  %v6081_v22 = vld [vmem:[#allocation40_spill] sm:$0xff] }
 0x8c6   : > { %1781 = vst.msk [vmem:[#allocation3 + $0xb8] sm:$0xff] %vm852_vm10, %v1773_v13  ;;  %v1783_v13 = vld [vmem:[#allocation4 + $0x38] sm:$0xff] }
 0x8c7   : > { %v1029_v44 = vadd.f32 %v6072_v26, %v916_v9 }
 0x8c8   : > { %v1333_v35 = vpop.permute.xlu1 %1332 }
 0x8c9   : > { %1037 = vst [vmem:[#allocation4 + $0x48] sm:$0xff] %v1029_v44  ;;  %v1370_v2 = vmul.f32 %v1333_v35, %v1322_v59 }
 0x8cb   : > { %v1459_v46 = vadd.f32 %v6073_v8, %v1370_v2  ;;  %v892_v20 = vpop.permute.xlu0 %891  ;;  %v1784_v2 = vld [vmem:[#allocation4 + $0x58] sm:$0xff]  ;;  %v1785_v8 = vld [vmem:[#allocation4 + $0x40] sm:$0xff] }
 0x8cc   : > { %v913_v53 = vmul.f32 %v892_v20, %v865_v55  ;;  %v1343_v61 = vpop.permute.xlu1 %1342  ;;  %v6082_v55 = vld [vmem:[#allocation38_spill] sm:$0xff] }
 0x8cd   : > { %1467 = vst [vmem:[#allocation4 + $0x80] sm:$0xff] %v1459_v46  ;;  %v1372_v29 = vmul.f32 %v1343_v61, %v1324_v16 }
 0x8ce   : > { %v1026_v21 = vadd.f32 %v6074_v45, %v913_v53 }
 0x8cf   : > { %v1461_v12 = vadd.f32 %v6075_v19, %v1372_v29  ;;  %v902_v41 = vpop.permute.xlu0 %901 }
 0x8d0   : > { %1034 = vst [vmem:[#allocation4 + $0x50] sm:$0xff] %v1026_v21  ;;  %v915_v25 = vmul.f32 %v902_v41, %v867_v58  ;;  %v1348_v4 = vpop.permute.xlu1 %1347  ;;  %v1787_v58 = vld [vmem:[#allocation4 + $0xe0] sm:$0xff]  ;;  %v1786_v21 = vld [vmem:[#allocation4 + $0xc8] sm:$0xff] }
 0x8d1   : > { %1469 = vst [vmem:[#allocation4 + $0xe8] sm:$0xff] %v1461_v12  ;;  %v1373_v51 = vmul.f32 %v1348_v4, %v1325_v15  ;;  %v1789_v4 = vld [vmem:[#allocation4 + $0x70] sm:$0xff] }
 0x8d2   : > { %v1028_v57 = vadd.f32 %v6076_v40, %v915_v25 }
 0x8d3   : > { %v1462_v48 = vadd.f32 %v6077_v1, %v1373_v51  ;;  %v1338_v7 = vpop.permute.xlu0 %1337  ;;  %v1788_v51 = vld [vmem:[#allocation4 + $0x90] sm:$0xff]  ;;  %v1790_v1 = vld [vmem:[#allocation4 + $0xc0] sm:$0xff] }
 0x8d4   : > { %1036 = vst [vmem:[#allocation4 + $0x30] sm:$0xff] %v1028_v57  ;;  %v1371_v52 = vmul.f32 %v1338_v7, %v1323_v14  ;;  %v1358_v56 = vpop.permute.xlu1 %1357 }
 0x8d5   : > { %1470 = vst [vmem:[#allocation4 + $0xb8] sm:$0xff] %v1462_v48  ;;  %v1375_v24 = vmul.f32 %v1358_v56, %v1327_v39  ;;  %v6083_v56 = vld [vmem:[#allocation53_spill] sm:$0xff] }
 0x8d6   : > { %v1460_v54 = vadd.f32 %v6078_v63, %v1371_v52  ;;  %v2181_v63 = vld [vmem:[#allocation3 + $0xd0] sm:$0xff] }
 0x8d7   : > { %v1464_v37 = vadd.f32 %v6079_v18, %v1375_v24  ;;  %v1353_v3 = vpop.permute.xlu0 %1352  ;;  %v2179_v18 = vld [vmem:[#allocation3 + $0xc0] sm:$0xff] }
 0x8d8   : > { %1468 = vst [vmem:[#allocation4 + $0x88] sm:$0xff] %v1460_v54  ;;  %v1374_v11 = vmul.f32 %v1353_v3, %v1326_v42  ;;  %v1368_v33 = vpop.permute.xlu1 %1367  ;;  %v2189_v54 = vmul.f32 %v5605_v47, %v2181_v63 }
 0x8d9   : > { %1472 = vst [vmem:[#allocation4 + $0xf0] sm:$0xff] %v1464_v37  ;;  %v1377_v62 = vmul.f32 %v1368_v33, %v1329_v32 }
 0x8da   : > { %v1463_v17 = vadd.f32 %v6080_v27, %v1374_v11  ;;  %v2182_v11 = vld [vmem:[#allocation3 + $0xd8] sm:$0xff] }
 0x8db   : > { %v1466_v9 = vadd.f32 %v6081_v22, %v1377_v62  ;;  %v1363_v59 = vpop.permute.xlu0 %1362 }
 0x8dc   : > { %1471 = vst [vmem:[#allocation4 + $0x60] sm:$0xff] %v1463_v17  ;;  %v1376_v26 = vmul.f32 %v1363_v59, %v1328_v10  ;;  %v1794_v44 = vpop.permute.xlu1 %1793  ;;  %v2190_v10 = vmul.f32 %v5616_v36, %v2182_v11  ;;  %v2186_v17 = vld [vmem:[#allocation3 + $0xf8] sm:$0xff] }
 0x8dd   : > { %1474 = vst [vmem:[#allocation4 + $0x78] sm:$0xff] %v1466_v9  ;;  %v1831_v35 = vmul.f32 %v1794_v44, %v1783_v13  ;;  %v2194_v47 = vmul.f32 %v5670_v60, %v2186_v17  ;;  %v2184_v9 = vld [vmem:[#allocation3 + $0xe8] sm:$0xff] }
 0x8de   : > { %v1465_v16 = vadd.f32 %v6082_v55, %v1376_v26  ;;  %v2192_v44 = vmul.f32 %v5621_v5, %v2184_v9 }
 0x8df   : > { %v1936_v46 = vadd.f32 %v5289_v31, %v1831_v35  ;;  %v1799_v20 = vpop.permute.xlu0 %1798 }
 0x8e0   : > { %1473 = vst [vmem:[#allocation4 + $0x8] sm:$0xff] %v1465_v16  ;;  %v1832_v53 = vmul.f32 %v1799_v20, %v1784_v2  ;;  %v1804_v61 = vpop.permute.xlu1 %1803  ;;  %v2185_v16 = vld [vmem:[#allocation3 + $0xf0] sm:$0xff]  ;;  %v2183_v20 = vld [vmem:[#allocation3 + $0xe0] sm:$0xff] }
 0x8e1   : > { %1944 = vst [vmem:[#allocation4 + $0x38] sm:$0xff] %v1936_v46  ;;  %v1833_v29 = vmul.f32 %v1804_v61, %v1785_v8  ;;  %v2193_v60 = vmul.f32 %v5664_v34, %v2185_v16  ;;  %v2191_v5 = vmul.f32 %v5607_v23, %v2183_v20 }
 0x8e2   : > { %v1937_v45 = vadd.f32 %v5293_v50, %v1832_v53 }
 0x8e3   : > { %v1938_v15 = vadd.f32 %v5287_v38, %v1833_v29  ;;  %v1814_v19 = vpop.permute.xlu0 %1813 }
 0x8e4   : > { %1945 = vst [vmem:[#allocation4 + $0x58] sm:$0xff] %v1937_v45  ;;  %v1835_v12 = vmul.f32 %v1814_v19, %v1787_v58  ;;  %v1809_v41 = vpop.permute.xlu1 %1808  ;;  %v2236_v58 = vld [vmem:[#allocation4 + $0xa8] sm:$0xff] }
 0x8e5   : > { %1946 = vst [vmem:[#allocation4 + $0x40] sm:$0xff] %v1938_v15  ;;  %v1834_v25 = vmul.f32 %v1809_v41, %v1786_v21  ;;  %v2239_v21 = vld [vmem:[#allocation4 + $0x28] sm:$0xff]  ;;  %v2237_v41 = vld [vmem:[#allocation4 + $0xd0] sm:$0xff] }
 0x8e6   : > { %v1940_v31 = vadd.f32 %v5297_v6, %v1835_v12 }
 0x8e7   : > { %v1939_v14 = vadd.f32 %v5291_v0, %v1834_v25  ;;  %v1824_v40 = vpop.permute.xlu0 %1823 }
 0x8e8   : > { %1948 = vst [vmem:[#allocation4 + $0xe0] sm:$0xff] %v1940_v31  ;;  %v1837_v57 = vmul.f32 %v1824_v40, %v1789_v4  ;;  %v1819_v39 = vpop.permute.xlu1 %1818 }
 0x8e9   : > { %1947 = vst [vmem:[#allocation4 + $0xc8] sm:$0xff] %v1939_v14  ;;  %v1836_v50 = vmul.f32 %v1819_v39, %v1788_v51 }
 0x8ea   : > { %v1942_v38 = vadd.f32 %v5295_v49, %v1837_v57  ;;  %v2242_v57 = vld [vmem:[#allocation4 + $0x20] sm:$0xff] }
 0x8eb   : > { %v1941_v48 = vadd.f32 %v5301_v43, %v1836_v50  ;;  %v2252_v24 = vpop.permute.xlu0 %2251  ;;  %v2187_v43 = vmul.f32 %v5613_v30, %v2179_v18  ;;  %v2180_v30 = vld [vmem:[#allocation3 + $0xc8] sm:$0xff]  ;;  %v2240_v50 = vld [vmem:[#allocation4 + $0xa0] sm:$0xff] }
 0x8ec   : > { %1950 = vst [vmem:[#allocation4 + $0x70] sm:$0xff] %v1942_v38  ;;  %v1829_v7 = vpop.permute.xlu1 %1828  ;;  %v2188_v2 = vmul.f32 %v5600_v28, %v2180_v30  ;;  %v2238_v28 = vld [vmem:[#allocation4 + $0x10] sm:$0xff]  ;;  %v2285_v51 = vmul.f32 %v2252_v24, %v2237_v41 }
 0x8ed   : > { %1949 = vst [vmem:[#allocation4 + $0x90] sm:$0xff] %v1941_v48  ;;  %v1838_v52 = vmul.f32 %v1829_v7, %v1790_v1  ;;  %v2243_v1 = vld [vmem:[#allocation4 + $0x98] sm:$0xff] }
 0x8ef   : > { %v1943_v6 = vadd.f32 %v6083_v56, %v1838_v52  ;;  %v5699_v42 = vpop.permute.xlu0 %2266 }
 0x8f0   : > { %v2257_v0 = vpop.permute.xlu1 %2256  ;;  %v2288_v52 = vmul.f32 %v5699_v42, %v2240_v50 }
 0x8f1   : > { %1951 = vst [vmem:[#allocation4 + $0xc0] sm:$0xff] %v1943_v6  ;;  %v2286_v45 = vmul.f32 %v2257_v0, %v2238_v28  ;;  %v2241_v6 = vld [vmem:[#allocation4 + $0xf8] sm:$0xff] }
 0x8f4   : > { %v2247_v49 = vpop.permute.xlu1 %2246 }
 0x8f5   : > { %v2284_v19 = vmul.f32 %v2247_v49, %v2236_v58 }
 0x8f8   : > { %v2262_v62 = vpop.permute.xlu1 %2261 }
 0x8f9   : > { %v2287_v25 = vmul.f32 %v2262_v62, %v2239_v21 }
 0x8fc   : > { %v2272_v59 = vpop.permute.xlu1 %2271 }
 0x91c   : > { %v2203_v32 = vpop.xlane.xlu0 %2202 }
 0x91d   : > { %v2221_v37 = vadd.f32 %v2203_v32, %v2189_v54  ;;  %v2289_v32 = vmul.f32 %v2272_v59, %v2241_v6 }
 0x91f   : > { %2229 = vst.msk [vmem:[#allocation3 + $0xd0] sm:$0xff] %vm852_vm10, %v2221_v37 }
 0x920   : > { %v2197_v3 = vpop.xlane.xlu0 %2196 }
 0x921   : > { %v2219_v33 = vadd.f32 %v2197_v3, %v2187_v43 }
 0x923   : > { %2227 = vst.msk [vmem:[#allocation3 + $0xc0] sm:$0xff] %vm852_vm10, %v2219_v33 }
 0x924   : > { %v2206_v27 = vpop.xlane.xlu0 %2205 }
 0x925   : > { %v2222_v13 = vadd.f32 %v2206_v27, %v2190_v10 }
 0x927   : > { %2230 = vst.msk [vmem:[#allocation3 + $0xd8] sm:$0xff] %vm852_vm10, %v2222_v13 }
 0x928   : > { %v2218_v22 = vpop.xlane.xlu0 %2217 }
 0x929   : > { %v2226_v26 = vadd.f32 %v2218_v22, %v2194_v47 }
 0x92b   : > { %2234 = vst.msk [vmem:[#allocation3 + $0xf8] sm:$0xff] %vm852_vm10, %v2226_v26 }
 0x92c   : > { %v2212_v35 = vpop.xlane.xlu0 %2211 }
 0x92d   : > { %v2224_v36 = vadd.f32 %v2212_v35, %v2192_v44  ;;  %v2200_v55 = vpop.xlane.xlu1 %2199 }
 0x92e   : > { %v2220_v8 = vadd.f32 %v2200_v55, %v2188_v2 }
 0x92f   : > { %2232 = vst.msk [vmem:[#allocation3 + $0xe8] sm:$0xff] %vm852_vm10, %v2224_v36 }
 0x930   : > { %2228 = vst.msk [vmem:[#allocation3 + $0xc8] sm:$0xff] %vm852_vm10, %v2220_v8 }
 0x931   : > { %v2215_v46 = vpop.xlane.xlu1 %2214 }
 0x932   : > { %v2225_v53 = vadd.f32 %v2215_v46, %v2193_v60 }
 0x934   : > { %2233 = vst.msk [vmem:[#allocation3 + $0xf0] sm:$0xff] %vm852_vm10, %v2225_v53  ;;  %v2277_v39 = vpop.permute.xlu0 %2276 }
 0x935   : > { %v2209_v61 = vpop.xlane.xlu1 %2208  ;;  %v2290_v38 = vmul.f32 %v2277_v39, %v2242_v57 }
 0x936   : > { %v2223_v29 = vadd.f32 %v2209_v61, %v2191_v5 }
 0x938   : > { %2231 = vst.msk [vmem:[#allocation3 + $0xe0] sm:$0xff] %vm852_vm10, %v2223_v29 }
 0x939   : > { %v2282_v48 = vpop.permute.xlu1 %2281 }
 0x93a   : > { %v2291_v63 = vmul.f32 %v2282_v48, %v2243_v1 }
 0x93c   : > { %v3830_v15 = vpop.f32.mrf.mxu0 }
 0x93d   : > { %v2375_v12 = vadd.f32 %v3830_v15, %v2286_v45 }
 0x93e   : > { %v2342_v34 = vpop.f32.mrf.mxu0 }
 0x93f   : > { %2383 = vst [vmem:[#allocation4 + $0x10] sm:$0xff] %v2375_v12  ;;  %v2373_v4 = vadd.f32 %v2342_v34, %v2284_v19 }
 0x940   : > { %v3831_v31 = vpop.f32.mrf.mxu0 }
 0x941   : > { %2381 = vst [vmem:[#allocation4 + $0xa8] sm:$0xff] %v2373_v4  ;;  %v2376_v23 = vadd.f32 %v3831_v31, %v2287_v25 }
 0x942   : > { %v2345_v14 = vpop.f32.mrf.mxu0 }
 0x943   : > { %2384 = vst [vmem:[#allocation4 + $0x28] sm:$0xff] %v2376_v23  ;;  %v2374_v40 = vadd.f32 %v2345_v14, %v2285_v51 }
 0x945   : > { %2382 = vst [vmem:[#allocation4 + $0xd0] sm:$0xff] %v2374_v40 }
 0x948   : > { %v3834_v7 = vpop.f32.mrf.mxu0 }
 0x949   : > { %v2379_v56 = vadd.f32 %v3834_v7, %v2290_v38 }
 0x94a   : > { %v2358_v0 = vpop.f32.mrf.mxu0 }
 0x94b   : > { %2387 = vst [vmem:[#allocation4 + $0x20] sm:$0xff] %v2379_v56  ;;  %v2377_v24 = vadd.f32 %v2358_v0, %v2288_v52 }
 0x94c   : > { %v3835_v54 = vpop.f32.mrf.mxu0 }
 0x94d   : > { %2385 = vst [vmem:[#allocation4 + $0xa0] sm:$0xff] %v2377_v24  ;;  %v2380_v18 = vadd.f32 %v3835_v54, %v2291_v63 }
 0x94e   : > { %v2361_v49 = vpop.f32.mrf.mxu0 }
 0x94f   : > { %2388 = vst [vmem:[#allocation4 + $0x98] sm:$0xff] %v2380_v18  ;;  %v2378_v37 = vadd.f32 %v2361_v49, %v2289_v32 }
 0x951   : > { %2386 = vst [vmem:[#allocation4 + $0xf8] sm:$0xff] %v2378_v37 }
 0x952 PF: > { %p3557_p9 = scmp.ne.s32.totalorder %s4276_s24, 1 }
 0x954   : > { %2400 = sbr.rel (%p3557_p9) target bundleno = 2968 (0xb98), region = 56 }
 0x959   : > { %v2505_v43 = vld [vmem:[#allocation3 + $0x50] sm:$0xff]  ;;  %v2503_v42 = vld [vmem:[#allocation3 + $0x40] sm:$0xff]  ;;  %v2506_v3 = vld [vmem:[#allocation3 + $0x58] sm:$0xff]  ;;  %v4297_v11 = vmov 0  }
 0x95a   : > { %4141 = vset.pattern.permute.xlu1 %v4297_v11  ;;  %4140 = vset.pattern.permute.xlu0 %v4297_v11  ;;  %4174 = vrcp.f32 %v2505_v43  ;;  %v2504_v33 = vld [vmem:[#allocation3 + $0x48] sm:$0xff]  ;;  %v2409_v10 = vld [vmem:[#allocation3] sm:$0xff]  ;;  %v2412_v27 = vld [vmem:[#allocation3 + $0x18] sm:$0xff] }
 0x95b   : > { %4176 = vrcp.f32 %v2503_v42  ;;  %v2410_v62 = vld [vmem:[#allocation3 + $0x8] sm:$0xff]  ;;  %v2411_v17 = vld [vmem:[#allocation3 + $0x10] sm:$0xff]  ;;  %v4142_v47 = vld [vmem:[%s5916_s3 + $0x78] sm:$0xff]  }
 0x95c   : > { %4178 = vrcp.f32 %v2506_v3  ;;  %v2508_v13 = vld [vmem:[#allocation3 + $0x68] sm:$0xff]  ;;  %v4143_v22 = vld [vmem:[%s5916_s3 + $0x70] sm:$0xff]   ;;  %v2507_v9 = vld [vmem:[#allocation3 + $0x60] sm:$0xff]  ;;  %3836 = vmatprep.subr.bf16.mxu0 %v4142_v47 }
 0x95d   : > { %4180 = vrcp.f32 %v2504_v33  ;;  %v2510_v26 = vld [vmem:[#allocation3 + $0x78] sm:$0xff]  ;;  %3837 = vmatpush3.bf16.msra.mxu0 %v4142_v47  ;;  %v4144_v35 = vld [vmem:[%s5916_s3 + $0x68] sm:$0xff]   ;;  %v4147_v36 = vld [vmem:[%s5916_s3 + $0x30] sm:$0xff]  }
 0x95e   : > { %4182 = vrcp.f32 %v2410_v62  ;;  %v4145_v30 = vld [vmem:[%s5916_s3 + $0x38] sm:$0xff]   ;;  %3838 = vmatprep.subr.bf16.mxu0 %v4143_v22  ;;  %v2509_v16 = vld [vmem:[#allocation3 + $0x70] sm:$0xff]  ;;  %v4149_v8 = vld [vmem:[%s5916_s3 + $0x28] sm:$0xff]  }
 0x95f   : > { %4184 = vrcp.f32 %v2409_v10  ;;  %3860 = vmatprep.subr.bf16.mxu1 %v4145_v30  ;;  %v4146_v60 = vld [vmem:[%s5916_s3 + $0x60] sm:$0xff]   ;;  %v2414_v20 = vld [vmem:[#allocation3 + $0x28] sm:$0xff]  ;;  %v4148_v29 = vld [vmem:[%s5916_s3 + $0x58] sm:$0xff]  }
 0x960   : > { %4186 = vrcp.f32 %v2412_v27  ;;  %3861 = vmatpush3.bf16.msra.mxu1 %v4145_v30  ;;  %v2413_v5 = vld [vmem:[#allocation3 + $0x20] sm:$0xff]  ;;  %v2416_v58 = vld [vmem:[#allocation3 + $0x38] sm:$0xff]  ;;  %v2415_v21 = vld [vmem:[#allocation3 + $0x30] sm:$0xff] }
 0x961   : > { %4188 = vrcp.f32 %v2411_v17  ;;  %3839 = vmatpush3.bf16.msra.mxu0 %v4143_v22  ;;  %3862 = vmatprep.subr.bf16.mxu1 %v4147_v36  ;;  %v4151_v61 = vld [vmem:[%s5916_s3 + $0x20] sm:$0xff]   ;;  %v4153_v15 = vld [vmem:[%s5916_s3 + $0x18] sm:$0xff]   ;;  %v4150_v19 = vld [vmem:[%s5916_s3 + $0x50] sm:$0xff]  }
 0x962   : > { %4190 = vrcp.f32 %v2508_v13  ;;  %3840 = vmatprep.subr.bf16.mxu0 %v4144_v35  ;;  %v2824_v41 = vld [vmem:[#allocation3 + $0x88] sm:$0xff]  ;;  %v2823_v25 = vld [vmem:[#allocation3 + $0x80] sm:$0xff]  ;;  %v4155_v4 = vld [vmem:[%s5916_s3 + $0x10] sm:$0xff]  }
 0x963   : > { %4192 = vrcp.f32 %v2507_v9  ;;  %v4152_v31 = vld [vmem:[%s5916_s3 + $0x48] sm:$0xff]   ;;  %v2826_v23 = vld [vmem:[#allocation3 + $0x98] sm:$0xff]  ;;  %v2825_v40 = vld [vmem:[#allocation3 + $0x90] sm:$0xff] }
 0x964   : > { %4194 = vrcp.f32 %v2510_v26  ;;  %3863 = vmatpush3.bf16.msra.mxu1 %v4147_v36  ;;  %v4156_v57 = vld [vmem:[%s5916_s3 + $0x8] sm:$0xff]   ;;  %v4154_v39 = vld [vmem:[%s5916_s3 + $0x40] sm:$0xff]   ;;  %v5770_v52 = vld [vmem:[%s5916_s3 + $0xb8] sm:$0xff]  }
 0x965   : > { %4196 = vrcp.f32 %v2509_v16  ;;  %3841 = vmatpush3.bf16.msra.mxu0 %v4144_v35  ;;  %3864 = vmatprep.subr.bf16.mxu1 %v4149_v8  ;;  %v3039_v38 = vld [vmem:[#allocation3 + $0xc8] sm:$0xff]  ;;  %v3038_v48 = vld [vmem:[#allocation3 + $0xc0] sm:$0xff]  ;;  %v3041_v6 = vld [vmem:[#allocation3 + $0xd8] sm:$0xff] }
 0x966   : > { %4198 = vrcp.f32 %v2414_v20  ;;  %3842 = vmatprep.subr.bf16.mxu0 %v4146_v60  ;;  %v4158_v7 = vld [vmem:[%s5916_s3] sm:$0xff]   ;;  %v3040_v63 = vld [vmem:[#allocation3 + $0xd0] sm:$0xff]  ;;  %v5775_v24 = vld [vmem:[%s5916_s3 + $0xf8] sm:$0xff]  }
 0x967   : > { %v4175_v59 = vpop.eup %4174  ;;  %4200 = vrcp.f32 %v2413_v5  ;;  %v2828_v54 = vld [vmem:[#allocation3 + $0xa8] sm:$0xff]  ;;  %v2827_v18 = vld [vmem:[#allocation3 + $0xa0] sm:$0xff]  ;;  %v2830_v43 = vld [vmem:[#allocation3 + $0xb8] sm:$0xff] }
 0x968   : > { %v4177_v44 = vpop.eup %4176  ;;  %2531 = vperm.xlu1 %4141, %v4175_v59   ;;  %3865 = vmatpush3.bf16.msra.mxu1 %v4149_v8  ;;  %4202 = vrcp.f32 %v2416_v58  ;;  %v2829_v3 = vld [vmem:[#allocation3 + $0xb0] sm:$0xff]  ;;  %v3043_v33 = vld [vmem:[#allocation3 + $0xe8] sm:$0xff]  ;;  %v3042_v10 = vld [vmem:[#allocation3 + $0xe0] sm:$0xff] }
 0x969   : > { %v4179_v2 = vpop.eup %4178  ;;  %2521 = vperm.xlu0 %4140, %v4177_v44   ;;  %3843 = vmatpush3.bf16.msra.mxu0 %v4146_v60  ;;  %4204 = vrcp.f32 %v2415_v21  ;;  %v3045_v17 = vld [vmem:[#allocation3 + $0xf8] sm:$0xff]  ;;  %v3044_v47 = vld [vmem:[#allocation3 + $0xf0] sm:$0xff]  ;;  %v2496_v16 = vld [vmem:[#allocation4 + $0xe8] sm:$0xff] }
 0x96a   : > { %v4181_v55 = vpop.eup %4180  ;;  %3866 = vmatprep.subr.bf16.mxu1 %v4151_v61  ;;  %3844 = vmatprep.subr.bf16.mxu0 %v4148_v29  ;;  %4206 = vrcp.f32 %v2824_v41  ;;  %v2497_v8 = vld [vmem:[#allocation4 + $0xb8] sm:$0xff]  ;;  %v2494_v60 = vld [vmem:[#allocation4 + $0x80] sm:$0xff]  ;;  %v2401_v21 = vld [vmem:[#allocation4 + $0xb0] sm:$0xff] }
 0x96b   : > { %v4183_v46 = vpop.eup %4182  ;;  %4208 = vrcp.f32 %v2823_v25  ;;  %v2402_v58 = vld [vmem:[#allocation4] sm:$0xff] }
 0x96c   : > { %2536 = vperm.xlu1 %4141, %v4179_v2   ;;  %v4185_v53 = vpop.eup %4184  ;;  %3867 = vmatpush3.bf16.msra.mxu1 %v4151_v61  ;;  %4210 = vrcp.f32 %v2826_v23 }
 0x96d   : > { %2526 = vperm.xlu0 %4140, %v4181_v55   ;;  %v4187_v28 = vpop.eup %4186  ;;  %3845 = vmatpush3.bf16.msra.mxu0 %v4148_v29  ;;  %4212 = vrcp.f32 %v2825_v40 }
 0x96e   : > { %v4189_v45 = vpop.eup %4188  ;;  %3868 = vmatprep.subr.bf16.mxu1 %v4153_v15  ;;  %3846 = vmatprep.subr.bf16.mxu0 %v4150_v19  ;;  %4214 = vrcp.f32 %v3039_v38  ;;  %v2498_v38 = vld [vmem:[#allocation4 + $0x60] sm:$0xff] }
 0x96f   : > { %v4191_v12 = vpop.eup %4190  ;;  %4216 = vrcp.f32 %v3038_v48 }
 0x970   : > { %2432 = vperm.xlu1 %4141, %v4183_v46   ;;  %v4193_v34 = vpop.eup %4192  ;;  %3869 = vmatpush3.bf16.msra.mxu1 %v4153_v15  ;;  %4218 = vrcp.f32 %v3041_v6  ;;  %v2495_v46 = vld [vmem:[#allocation4 + $0x88] sm:$0xff]  ;;  %v4162_v6 = vld [vmem:[%s5916_s3 + $0xa0] sm:$0xff]  }
 0x971   : > { %2427 = vperm.xlu0 %4140, %v4185_v53   ;;  %v4195_v51 = vpop.eup %4194  ;;  %3847 = vmatpush3.bf16.msra.mxu0 %v4150_v19  ;;  %4220 = vrcp.f32 %v3040_v63  ;;  %v2501_v63 = vld [vmem:[#allocation4 + $0x78] sm:$0xff] }
 0x972   : > { %v4197_v14 = vpop.eup %4196  ;;  %3870 = vmatprep.subr.bf16.mxu1 %v4155_v4  ;;  %3848 = vmatprep.subr.bf16.mxu0 %v4152_v31  ;;  %4222 = vrcp.f32 %v2828_v54  ;;  %v2500_v54 = vld [vmem:[#allocation4 + $0x8] sm:$0xff] }
 0x973   : > { %v4199_v50 = vpop.eup %4198  ;;  %4224 = vrcp.f32 %v2827_v18 }
 0x974   : > { %2442 = vperm.xlu1 %4141, %v4187_v28   ;;  %v4201_v1 = vpop.eup %4200  ;;  %3871 = vmatpush3.bf16.msra.mxu1 %v4155_v4  ;;  %4226 = vrcp.f32 %v2830_v43  ;;  %v2404_v4 = vld [vmem:[#allocation4 + $0x18] sm:$0xff] }
 0x975   : > { %2437 = vperm.xlu0 %4140, %v4189_v45   ;;  %3849 = vmatpush3.bf16.msra.mxu0 %v4152_v31  ;;  %v4203_v56 = vpop.eup %4202  ;;  %4228 = vrcp.f32 %v2829_v3  ;;  %v2403_v31 = vld [vmem:[#allocation4 + $0xd8] sm:$0xff] }
 0x976   : > { %3872 = vmatprep.subr.bf16.mxu1 %v4156_v57  ;;  %3850 = vmatprep.subr.bf16.mxu0 %v4154_v39  ;;  %v4205_v0 = vpop.eup %4204  ;;  %4230 = vrcp.f32 %v3043_v33 }
 0x977   : > { %v4207_v32 = vpop.eup %4206  ;;  %4232 = vrcp.f32 %v3042_v10  ;;  %v4167_v10 = vld [vmem:[%s5916_s3 + $0xe0] sm:$0xff]  }
 0x978   : > { %2546 = vperm.xlu1 %4141, %v4191_v12   ;;  %3873 = vmatpush3.bf16.msra.mxu1 %v4156_v57  ;;  %v4209_v49 = vpop.eup %4208  ;;  %4234 = vrcp.f32 %v3045_v17  ;;  %v4160_v57 = vld [vmem:[%s5916_s3 + $0xa8] sm:$0xff]  }
 0x979   : > { %2541 = vperm.xlu0 %4140, %v4193_v34   ;;  %3851 = vmatpush3.bf16.msra.mxu0 %v4154_v39  ;;  %v4211_v37 = vpop.eup %4210  ;;  %4236 = vrcp.f32 %v3044_v47  ;;  %v4159_v34 = vld [vmem:[%s5916_s3 + $0xb0] sm:$0xff]  }
 0x97a   : > { %3874 = vmatprep.subr.bf16.mxu1 %v4158_v7  ;;  %3884 = vmatprep.subr.bf16.mxu0 %v5770_v52  ;;  %v4213_v42 = vpop.eup %4212 }
 0x97b   : > { %v4215_v11 = vpop.eup %4214 }
 0x97c   : > { %2556 = vperm.xlu1 %4141, %v4195_v51   ;;  %3875 = vmatpush3.bf16.msra.mxu1 %v4158_v7  ;;  %v4217_v62 = vpop.eup %4216  ;;  %v4163_v7 = vld [vmem:[%s5916_s3 + $0xf0] sm:$0xff]  }
 0x97d   : > { %2551 = vperm.xlu0 %4140, %v4197_v14   ;;  %3908 = vmatprep.subr.bf16.mxu1 %v5775_v24  ;;  %v4219_v27 = vpop.eup %4218 }
 0x97e   : > { %v4221_v13 = vpop.eup %4220 }
 0x97f   : > { %v4223_v22 = vpop.eup %4222 }
 0x980   : > { %2452 = vperm.xlu1 %4141, %v4199_v50   ;;  %v4225_v9 = vpop.eup %4224  ;;  %v2499_v50 = vld [vmem:[#allocation4 + $0xf0] sm:$0xff] }
 0x981   : > { %2447 = vperm.xlu0 %4140, %v4201_v1   ;;  %v4227_v59 = vpop.eup %4226 }
 0x982   : > { %v4229_v26 = vpop.eup %4228 }
 0x983   : > { %v4231_v30 = vpop.eup %4230 }
 0x984   : > { %2462 = vperm.xlu1 %4141, %v4203_v56   ;;  %v4233_v44 = vpop.eup %4232 }
 0x985   : > { %2457 = vperm.xlu0 %4140, %v4205_v0   ;;  %v4235_v35 = vpop.eup %4234 }
 0x986   : > { %v4237_v2 = vpop.eup %4236 }
 0x988   : > { %2846 = vperm.xlu1 %4141, %v4207_v32  }
 0x989   : > { %2841 = vperm.xlu0 %4140, %v4209_v49   ;;  %v4165_v49 = vld [vmem:[%s5916_s3 + $0xe8] sm:$0xff]  }
 0x98c   : > { %2856 = vperm.xlu1 %4141, %v4211_v37  }
 0x98d   : > { %2851 = vperm.xlu0 %4140, %v4213_v42   ;;  %v4164_v42 = vld [vmem:[%s5916_s3 + $0x98] sm:$0xff]  }
 0x990   : > { %3061 = vperm.xlu1 %4141, %v4215_v11   ;;  %v2406_v11 = vld [vmem:[#allocation4 + $0x68] sm:$0xff] }
 0x991   : > { %3056 = vperm.xlu0 %4140, %v4217_v62  }
 0x994   : > { %3071 = vperm.xlu1 %4141, %v4219_v27  }
 0x995   : > { %3066 = vperm.xlu0 %4140, %v4221_v13   ;;  %v4166_v13 = vld [vmem:[%s5916_s3 + $0x90] sm:$0xff]  }
 0x998   : > { %2866 = vperm.xlu1 %4141, %v4223_v22   ;;  %v2408_v22 = vld [vmem:[#allocation4 + $0x48] sm:$0xff] }
 0x999   : > { %2861 = vperm.xlu0 %4140, %v4225_v9   ;;  %v2407_v9 = vld [vmem:[#allocation4 + $0x30] sm:$0xff] }
 0x99c   : > { %2876 = vperm.xlu1 %4141, %v4227_v59  }
 0x99d   : > { %2871 = vperm.xlu0 %4140, %v4229_v26  }
 0x9a0   : > { %3081 = vperm.xlu1 %4141, %v4231_v30   ;;  %v4169_v30 = vld [vmem:[%s5916_s3 + $0xd8] sm:$0xff]  }
 0x9a1   : > { %3076 = vperm.xlu0 %4140, %v4233_v44  }
 0x9a4   : > { %3091 = vperm.xlu1 %4141, %v4235_v35  }
 0x9a5   : > { %3086 = vperm.xlu0 %4140, %v4237_v2   ;;  %v4168_v2 = vld [vmem:[%s5916_s3 + $0x88] sm:$0xff]  }
 0x9e3   : > { %v2532_v36 = vpop.permute.xlu1 %2531 }
 0x9e4   : > { %v2522_v55 = vpop.permute.xlu0 %2521  ;;  %v2561_v53 = vmul.f32 %v2532_v36, %v2496_v16  ;;  %v2814_v16 = vld [vmem:[#allocation4 + $0x38] sm:$0xff] }
 0x9e5   : > { %v2559_v29 = vmul.f32 %v2522_v55, %v2494_v60  ;;  %v2815_v55 = vld [vmem:[#allocation4 + $0x58] sm:$0xff] }
 0x9e7   : > { %v2537_v20 = vpop.permute.xlu1 %2536 }
 0x9e8   : > { %v2562_v5 = vmul.f32 %v2537_v20, %v2497_v8  ;;  %v2527_v61 = vpop.permute.xlu0 %2526 }
 0x9e9   : > { %v2560_v28 = vmul.f32 %v2527_v61, %v2495_v46  ;;  %v4171_v46 = vld [vmem:[%s5916_s3 + $0xd0] sm:$0xff]  }
 0x9ea   : > { %v2568_v45 = vpack.c.bf16 %v2562_v5, %v2561_v53  ;;  %v4170_v5 = vld [vmem:[%s5916_s3 + $0x80] sm:$0xff]  }
 0x9eb   : > { %v2433_v15 = vpop.permute.xlu1 %2432  ;;  %v2567_v19 = vpack.c.bf16 %v2560_v28, %v2559_v29  ;;  %v2817_v29 = vld [vmem:[#allocation4 + $0xc8] sm:$0xff]  ;;  %v2816_v28 = vld [vmem:[#allocation4 + $0x40] sm:$0xff] }
 0x9ec   : > { %v2466_v12 = vmul.f32 %v2433_v15, %v2402_v58  ;;  %v2428_v41 = vpop.permute.xlu0 %2427 }
 0x9ed   : > { %v2465_v25 = vmul.f32 %v2428_v41, %v2401_v21  ;;  %3852 = vmatprep.mubr.bf16.mxu0 %v2567_v19  ;;  %v4172_v21 = vld [vmem:[%s5916_s3 + $0xc8] sm:$0xff]   ;;  %v3030_v41 = vld [vmem:[#allocation4 + $0xd0] sm:$0xff] }
 0x9ee   : > { %3853 = vmatmul.mubr.bf16.vlgmr.msra.gmra.mxu0 %v2568_v45 }
 0x9ef   : > { %3885 = vmatpush3.bf16.msra.mxu0 %v5770_v52  ;;  %v2443_v51 = vpop.permute.xlu1 %2442  ;;  %v2473_v23 = vpack.c.bf16 %v2466_v12, %v2465_v25 }
 0x9f0   : > { %v2468_v14 = vmul.f32 %v2443_v51, %v2404_v4  ;;  %v2438_v40 = vpop.permute.xlu0 %2437  ;;  %3886 = vmatprep.subr.bf16.mxu0 %v4159_v34 }
 0x9f1   : > { %v2467_v39 = vmul.f32 %v2438_v40, %v2403_v31  ;;  %3876 = vmatprep.mubr.bf16.mxu1 %v2473_v23  ;;  %v4173_v31 = vld [vmem:[%s5916_s3 + $0xc0] sm:$0xff]   ;;  %v3032_v40 = vld [vmem:[#allocation4 + $0x28] sm:$0xff] }
 0x9f3   : > { %v2474_v1 = vpack.c.bf16 %v2468_v14, %v2467_v39  ;;  %3887 = vmatpush3.bf16.msra.mxu0 %v4159_v34  ;;  %v2547_v48 = vpop.permute.xlu1 %2546  ;;  %v3029_v34 = vld [vmem:[#allocation4 + $0xa8] sm:$0xff] }
 0x9f4   : > { %v2564_v52 = vmul.f32 %v2547_v48, %v2499_v50  ;;  %v2542_v56 = vpop.permute.xlu0 %2541  ;;  %3888 = vmatprep.subr.bf16.mxu0 %v4160_v57 }
 0x9f5   : > { %v2563_v0 = vmul.f32 %v2542_v56, %v2498_v38  ;;  %3877 = vmatmul.mubr.bf16.vlgmr.msra.gmra.mxu1 %v2474_v1 }
 0x9f6   : > { %3909 = vmatpush3.bf16.msra.mxu1 %v5775_v24  ;;  %v2405_v24 = vld [vmem:[#allocation4 + $0x50] sm:$0xff] }
 0x9f7   : > { %v2569_v32 = vpack.c.bf16 %v2564_v52, %v2563_v0  ;;  %3889 = vmatpush3.bf16.msra.mxu0 %v4160_v57  ;;  %v2557_v18 = vpop.permute.xlu1 %2556  ;;  %3910 = vmatprep.subr.bf16.mxu1 %v4163_v7  ;;  %v3031_v57 = vld [vmem:[#allocation4 + $0x10] sm:$0xff]  ;;  %v2818_v52 = vld [vmem:[#allocation4 + $0xe0] sm:$0xff] }
 0x9f8   : > { %v2566_v37 = vmul.f32 %v2557_v18, %v2501_v63  ;;  %v2552_v43 = vpop.permute.xlu0 %2551  ;;  %3890 = vmatprep.subr.bf16.mxu0 %v4162_v6  ;;  %v2820_v18 = vld [vmem:[#allocation4 + $0x70] sm:$0xff] }
 0x9f9   : > { %v2565_v3 = vmul.f32 %v2552_v43, %v2500_v54  ;;  %3856 = vmatprep.mubr.bf16.mxu0 %v2569_v32  ;;  %v2821_v32 = vld [vmem:[#allocation4 + $0xc0] sm:$0xff] }
 0x9fa   : > { %3911 = vmatpush3.bf16.msra.mxu1 %v4163_v7  ;;  %v2819_v7 = vld [vmem:[#allocation4 + $0x90] sm:$0xff] }
 0x9fb   : > { %v2570_v33 = vpack.c.bf16 %v2566_v37, %v2565_v3  ;;  %3891 = vmatpush3.bf16.msra.mxu0 %v4162_v6  ;;  %v2453_v62 = vpop.permute.xlu1 %2452  ;;  %3912 = vmatprep.subr.bf16.mxu1 %v4165_v49 }
 0x9fc   : > { %v2470_v27 = vmul.f32 %v2453_v62, %v2406_v11  ;;  %v2448_v17 = vpop.permute.xlu0 %2447  ;;  %3892 = vmatprep.subr.bf16.mxu0 %v4164_v42  ;;  %v3034_v11 = vld [vmem:[#allocation4 + $0xf8] sm:$0xff] }
 0x9fd   : > { %v2469_v47 = vmul.f32 %v2448_v17, %v2405_v24  ;;  %3857 = vmatmul.mubr.bf16.gmra.mxu0 %v2570_v33  ;;  %v3033_v24 = vld [vmem:[#allocation4 + $0xa0] sm:$0xff] }
 0x9fe   : > { %3913 = vmatpush3.bf16.msra.mxu1 %v4165_v49 }
 0x9ff   : > { %v2475_v59 = vpack.c.bf16 %v2470_v27, %v2469_v47  ;;  %3893 = vmatpush3.bf16.msra.mxu0 %v4164_v42  ;;  %v2463_v26 = vpop.permute.xlu1 %2462  ;;  %3914 = vmatprep.subr.bf16.mxu1 %v4167_v10  ;;  %v3035_v47 = vld [vmem:[#allocation4 + $0x20] sm:$0xff] }
 0xa00   : > { %v2472_v44 = vmul.f32 %v2463_v26, %v2408_v22  ;;  %v2458_v35 = vpop.permute.xlu0 %2457  ;;  %3894 = vmatprep.subr.bf16.mxu0 %v4166_v13 }
 0xa01   : > { %v2471_v36 = vmul.f32 %v2458_v35, %v2407_v9  ;;  %3880 = vmatprep.mubr.bf16.mxu1 %v2475_v59 }
 0xa02   : > { %3915 = vmatpush3.bf16.msra.mxu1 %v4167_v10 }
 0xa03   : > { %v2476_v8 = vpack.c.bf16 %v2472_v44, %v2471_v36  ;;  %3895 = vmatpush3.bf16.msra.mxu0 %v4166_v13  ;;  %v2847_v60 = vpop.permute.xlu1 %2846  ;;  %3916 = vmatprep.subr.bf16.mxu1 %v4169_v30  ;;  %v3036_v13 = vld [vmem:[#allocation4 + $0x98] sm:$0xff] }
 0xa04   : > { %v2880_v20 = vmul.f32 %v2847_v60, %v2815_v55  ;;  %v2842_v53 = vpop.permute.xlu0 %2841  ;;  %3896 = vmatprep.subr.bf16.mxu0 %v4168_v2 }
 0xa05   : > { %v2879_v61 = vmul.f32 %v2842_v53, %v2814_v16  ;;  %3881 = vmatmul.mubr.bf16.gmra.mxu1 %v2476_v8 }
 0xa06   : > { %3917 = vmatpush3.bf16.msra.mxu1 %v4169_v30 }
 0xa07   : > { %v2887_v58 = vpack.c.bf16 %v2880_v20, %v2879_v61  ;;  %3897 = vmatpush3.bf16.msra.mxu0 %v4168_v2  ;;  %v2857_v45 = vpop.permute.xlu1 %2856  ;;  %3918 = vmatprep.subr.bf16.mxu1 %v4171_v46 }
 0xa08   : > { %v2882_v15 = vmul.f32 %v2857_v45, %v2817_v29  ;;  %v2852_v19 = vpop.permute.xlu0 %2851  ;;  %3898 = vmatprep.subr.bf16.mxu0 %v4170_v5 }
 0xa09   : > { %v2881_v12 = vmul.f32 %v2852_v19, %v2816_v28  ;;  %3900 = vmatprep.mubr.bf16.mxu0 %v2887_v58 }
 0xa0a   : > { %3919 = vmatpush3.bf16.msra.mxu1 %v4171_v46 }
 0xa0b   : > { %v2888_v25 = vpack.c.bf16 %v2882_v15, %v2881_v12  ;;  %3899 = vmatpush3.bf16.msra.mxu0 %v4170_v5  ;;  %v3062_v4 = vpop.permute.xlu1 %3061  ;;  %3920 = vmatprep.subr.bf16.mxu1 %v4172_v21 }
 0xa0c   : > { %v3095_v51 = vmul.f32 %v3062_v4, %v3030_v41  ;;  %v3057_v23 = vpop.permute.xlu0 %3056  ;;  %v3245_v4 = vld [vmem:[%s4392_s8 + $0x10] sm:$0xff] }
 0xa0d   : > { %v3094_v14 = vmul.f32 %v3057_v23, %v3029_v34 }
 0xa0e   : > { %3901 = vmatmul.mubr.bf16.vlgmr.msra.gmra.mxu0 %v2888_v25  ;;  %3921 = vmatpush3.bf16.msra.mxu1 %v4172_v21 }
 0xa0f   : > { %v3102_v39 = vpack.c.bf16 %v3095_v51, %v3094_v14  ;;  %v3072_v50 = vpop.permute.xlu1 %3071  ;;  %3922 = vmatprep.subr.bf16.mxu1 %v4173_v31 }
 0xa10   : > { %v3097_v38 = vmul.f32 %v3072_v50, %v3032_v40  ;;  %v3067_v1 = vpop.permute.xlu0 %3066  ;;  %v3246_v40 = vld [vmem:[%s4392_s8 + $0x18] sm:$0xff] }
 0xa11   : > { %v3096_v48 = vmul.f32 %v3067_v1, %v3031_v57  ;;  %3924 = vmatprep.mubr.bf16.mxu1 %v3102_v39  ;;  %v3244_v57 = vld [vmem:[%s4392_s8 + $0x8] sm:$0xff]  ;;  %v3249_v39 = vld [vmem:[%s4392_s8 + $0x30] sm:$0xff]  ;;  %v3247_v1 = vld [vmem:[%s4392_s8 + $0x20] sm:$0xff] }
 0xa12   : > { %3923 = vmatpush3.bf16.msra.mxu1 %v4173_v31  ;;  %v3243_v31 = vld [vmem:[%s4392_s8] sm:$0xff] }
 0xa13   : > { %v3103_v56 = vpack.c.bf16 %v3097_v38, %v3096_v48  ;;  %v2867_v6 = vpop.permute.xlu1 %2866  ;;  %v3250_v48 = vld [vmem:[%s4392_s8 + $0x38] sm:$0xff] }
 0xa14   : > { %v2884_v0 = vmul.f32 %v2867_v6, %v2819_v7  ;;  %v2862_v63 = vpop.permute.xlu0 %2861  ;;  %v3248_v7 = vld [vmem:[%s4392_s8 + $0x28] sm:$0xff] }
 0xa15   : > { %v2883_v54 = vmul.f32 %v2862_v63, %v2818_v52  ;;  %3925 = vmatmul.mubr.bf16.vlgmr.msra.gmra.mxu1 %v3103_v56 }
 0xa17   : > { %v2889_v49 = vpack.c.bf16 %v2884_v0, %v2883_v54  ;;  %v2877_v37 = vpop.permute.xlu1 %2876 }
 0xa18   : > { %v2886_v43 = vmul.f32 %v2877_v37, %v2821_v32  ;;  %v2872_v42 = vpop.permute.xlu0 %2871 }
 0xa19   : > { %v2885_v3 = vmul.f32 %v2872_v42, %v2820_v18  ;;  %3904 = vmatprep.mubr.bf16.mxu0 %v2889_v49 }
 0xa1b   : > { %v2890_v33 = vpack.c.bf16 %v2886_v43, %v2885_v3  ;;  %v3082_v62 = vpop.permute.xlu1 %3081 }
 0xa1c   : > { %v3099_v10 = vmul.f32 %v3082_v62, %v3034_v11  ;;  %v3077_v27 = vpop.permute.xlu0 %3076 }
 0xa1d   : > { %v3098_v17 = vmul.f32 %v3077_v27, %v3033_v24  ;;  %3905 = vmatmul.mubr.bf16.gmra.mxu0 %v2890_v33 }
 0xa1f   : > { %v3104_v22 = vpack.c.bf16 %v3099_v10, %v3098_v17  ;;  %v3092_v9 = vpop.permute.xlu1 %3091 }
 0xa20   : > { %v3101_v59 = vmul.f32 %v3092_v9, %v3036_v13  ;;  %v3087_v26 = vpop.permute.xlu0 %3086 }
 0xa21   : > { %v3100_v30 = vmul.f32 %v3087_v26, %v3035_v47  ;;  %3928 = vmatprep.mubr.bf16.mxu1 %v3104_v22 }
 0xa23   : > { %v3105_v44 = vpack.c.bf16 %v3101_v59, %v3100_v30 }
 0xa25   : > { %3929 = vmatmul.mubr.bf16.gmra.mxu1 %v3105_v44 }
 0xaae   : > { %v3854_v35 = vpop.f32.mrf.mxu0 }
 0xab0   : > { %v2669_v2 = vpop.f32.mrf.mxu0 }
 0xab2   : > { %v3855_v55 = vpop.f32.mrf.mxu0 }
 0xab4   : > { %v2672_v8 = vpop.f32.mrf.mxu0 }
 0xab5   : > { %v3878_v36 = vpop.f32.mrf.mxu1 }
 0xab6   : > { %v2791_v15 = vadd.f32 %v3878_v36, %v3854_v35 }
 0xab7   : > { %v2782_v16 = vpop.f32.mrf.mxu1 }
 0xab8   : > { %v2783_v41 = vadd.f32 %v2782_v16, %v2669_v2 }
 0xab9   : > { %v3879_v46 = vpop.f32.mrf.mxu1 }
 0xaba   : > { %v2794_v51 = vadd.f32 %v3879_v46, %v3855_v55 }
 0xabb   : > { %v2785_v53 = vpop.f32.mrf.mxu1 }
 0xabc   : > { %v2786_v52 = vadd.f32 %v2785_v53, %v2672_v8 }
 0xabd   : > { %v3858_v60 = vpop.f32.mrf.mxu0 }
 0xabf   : > { %v2685_v20 = vpop.f32.mrf.mxu0 }
 0xac1   : > { %v3859_v61 = vpop.f32.mrf.mxu0 }
 0xac3   : > { %v2688_v28 = vpop.f32.mrf.mxu0 }
 0xac5   : > { %v3882_v5 = vpop.f32.mrf.mxu1 }
 0xac6   : > { %v2807_v10 = vadd.f32 %v3882_v5, %v3858_v60 }
 0xac7   : > { %v2798_v29 = vpop.f32.mrf.mxu1 }
 0xac8   : > { %v2799_v13 = vadd.f32 %v2798_v29, %v2685_v20 }
 0xac9   : > { %v3883_v45 = vpop.f32.mrf.mxu1 }
 0xaca   : > { %v2810_v9 = vadd.f32 %v3883_v45, %v3859_v61 }
 0xacb   : > { %v2801_v19 = vpop.f32.mrf.mxu1 }
 0xacc   : > { %v2802_v35 = vadd.f32 %v2801_v19, %v2688_v28 }
 0xace   : > { %v3902_v58 = vpop.f32.mrf.mxu0 }
 0xacf   : > { %v3022_v34 = vadd.f32 %v3902_v58, %v2791_v15 }
 0xad0   : > { %v2989_v21 = vpop.f32.mrf.mxu0 }
 0xad1   : > { %v3020_v23 = vadd.f32 %v2989_v21, %v2783_v41 }
 0xad2   : > { %v3903_v12 = vpop.f32.mrf.mxu0 }
 0xad3   : > { %v3023_v56 = vadd.f32 %v3903_v12, %v2794_v51 }
 0xad4   : > { %v2992_v50 = vpop.f32.mrf.mxu0 }
 0xad5   : > { %v3926_v25 = vpop.f32.mrf.mxu1  ;;  %v3021_v54 = vadd.f32 %v2992_v50, %v2786_v52 }
 0xad6   : > { %v3237_v14 = vadd.f32 %v3926_v25, %v3022_v34 }
 0xad7   : > { %v3204_v38 = vpop.f32.mrf.mxu1 }
 0xad8   : > { %v5831_v6 = vadd.f32 %v3245_v4, %v3237_v14  ;;  %v3235_v0 = vadd.f32 %v3204_v38, %v3020_v23 }
 0xad9   : > { %v3927_v63 = vpop.f32.mrf.mxu1 }
 0xada   : > { %v5833_v32 = vadd.f32 %v3243_v31, %v3235_v0  ;;  %v3238_v18 = vadd.f32 %v3927_v63, %v3023_v56  ;;  %v3269_v49 = vmul.f32 %v5831_v6, %v5831_v6  ;;  %3261 = vst [vmem:[%s4402_s16 + $0x10] sm:$0xff] %v5831_v6 }
 0xadb   : > { %v3207_v37 = vpop.f32.mrf.mxu1 }
 0xadc   : > { %v5839_v43 = vadd.f32 %v3246_v40, %v3238_v18  ;;  %v3236_v42 = vadd.f32 %v3207_v37, %v3021_v54  ;;  %3279 = vadd.xlane.f32.xlu0 %v3269_v49  ;;  %3259 = vst [vmem:[%s4402_s16] sm:$0xff] %v5833_v32  ;;  %v3267_v24 = vmul.f32 %v5833_v32, %v5833_v32 }
 0xadd   : > { %v3906_v3 = vpop.f32.mrf.mxu0 }
 0xade   : > { %v5843_v11 = vadd.f32 %v3244_v57, %v3236_v42  ;;  %3262 = vst [vmem:[%s4402_s16 + $0x18] sm:$0xff] %v5839_v43  ;;  %v3270_v27 = vmul.f32 %v5839_v43, %v5839_v43  ;;  %v3026_v47 = vadd.f32 %v3906_v3, %v2807_v10  ;;  %v3590_v57 = vld [vmem:[%s5918_s5] ss:$0 sm:$0xff] }
 0xadf   : > { %v3005_v33 = vpop.f32.mrf.mxu0 }
 0xae0   : > { %3275 = vadd.xlane.f32.xlu0 %v3267_v24  ;;  %v3268_v62 = vmul.f32 %v5843_v11, %v5843_v11  ;;  %3260 = vst [vmem:[%s4402_s16 + $0x8] sm:$0xff] %v5843_v11  ;;  %v3024_v59 = vadd.f32 %v3005_v33, %v2799_v13 }
 0xae1   : > { %v3907_v17 = vpop.f32.mrf.mxu0 }
 0xae2   : > { %3277 = vadd.xlane.f32.xlu1 %v3268_v62  ;;  %v3027_v2 = vadd.f32 %v3907_v17, %v2810_v9 }
 0xae3   : > { %v3008_v30 = vpop.f32.mrf.mxu0 }
 0xae4   : > { %3281 = vadd.xlane.f32.xlu0 %v3270_v27  ;;  %v3025_v8 = vadd.f32 %v3008_v30, %v2802_v35 }
 0xae5   : > { %v3930_v22 = vpop.f32.mrf.mxu1 }
 0xae6   : > { %v3241_v26 = vadd.f32 %v3930_v22, %v3026_v47 }
 0xae7   : > { %v3220_v44 = vpop.f32.mrf.mxu1 }
 0xae8   : > { %v5855_v36 = vadd.f32 %v3249_v39, %v3241_v26  ;;  %v3239_v55 = vadd.f32 %v3220_v44, %v3024_v59 }
 0xae9   : > { %v3931_v16 = vpop.f32.mrf.mxu1 }
 0xaea   : > { %v5857_v60 = vadd.f32 %v3247_v1, %v3239_v55  ;;  %v3242_v46 = vadd.f32 %v3931_v16, %v3027_v2  ;;  %3265 = vst [vmem:[%s4402_s16 + $0x30] sm:$0xff] %v5855_v36  ;;  %v3273_v28 = vmul.f32 %v5855_v36, %v5855_v36 }
 0xaeb   : > { %v3223_v20 = vpop.f32.mrf.mxu1 }
 0xaec   : > { %v5861_v53 = vadd.f32 %v3250_v48, %v3242_v46  ;;  %v3240_v5 = vadd.f32 %v3223_v20, %v3025_v8  ;;  %3263 = vst [vmem:[%s4402_s16 + $0x20] sm:$0xff] %v5857_v60  ;;  %v3271_v61 = vmul.f32 %v5857_v60, %v5857_v60 }
 0xaee   : > { %v5867_v29 = vadd.f32 %v3248_v7, %v3240_v5  ;;  %3266 = vst [vmem:[%s4402_s16 + $0x38] sm:$0xff] %v5861_v53  ;;  %3283 = vadd.xlane.f32.xlu1 %v3271_v61  ;;  %v3274_v45 = vmul.f32 %v5861_v53, %v5861_v53 }
 0xaf0   : > { %3264 = vst [vmem:[%s4402_s16 + $0x28] sm:$0xff] %v5867_v29  ;;  %v3272_v58 = vmul.f32 %v5867_v29, %v5867_v29 }
 0xaf2   : > { %3287 = vadd.xlane.f32.xlu1 %v3273_v28  ;;  %3285 = vadd.xlane.f32.xlu0 %v3272_v58 }
 0xaf6   : > { %3289 = vadd.xlane.f32.xlu0 %v3274_v45 }
 0xb65   : > { %v3280_v21 = vpop.xlane.xlu0 %3279 }
 0xb66   : > { %v3294_v15 = vmul.f32 0.0078125, %v3280_v21 }
 0xb68   : > { %v3302_v19 = vadd.f32 1e-06, %v3294_v15 }
 0xb69   : > { %v3276_v12 = vpop.xlane.xlu0 %3275 }
 0xb6a   : > { %4238 = vrsqrt.f32 %v3302_v19  ;;  %v3292_v41 = vmul.f32 0.0078125, %v3276_v12 }
 0xb6b   : > { %v3278_v34 = vpop.xlane.xlu1 %3277 }
 0xb6c   : > { %v3300_v25 = vadd.f32 1e-06, %v3292_v41  ;;  %v3293_v4 = vmul.f32 0.0078125, %v3278_v34 }
 0xb6d   : > { %v3282_v31 = vpop.xlane.xlu0 %3281 }
 0xb6e   : > { %4240 = vrsqrt.f32 %v3300_v25  ;;  %v3301_v51 = vadd.f32 1e-06, %v3293_v4  ;;  %v3295_v23 = vmul.f32 0.0078125, %v3282_v31 }
 0xb70   : > { %4242 = vrsqrt.f32 %v3301_v51  ;;  %v3303_v14 = vadd.f32 1e-06, %v3295_v23 }
 0xb72   : > { %4244 = vrsqrt.f32 %v3303_v14 }
 0xb77   : > { %v4239_v40 = vpop.eup %4238  ;;  %v3284_v39 = vpop.xlane.xlu1 %3283 }
 0xb78   : > { %v3318_v50 = vmul.f32 %v4239_v40, %v5831_v6  ;;  %v3296_v38 = vmul.f32 0.0078125, %v3284_v39 }
 0xb7a   : > { %v3333_v1 = vmul.f32 %v3590_v57, %v3318_v50  ;;  %v3304_v48 = vadd.f32 1e-06, %v3296_v38 }
 0xb7b   : > { %v4241_v7 = vpop.eup %4240  ;;  %v3288_v52 = vpop.xlane.xlu1 %3287 }
 0xb7c   : > { %v3286_v56 = vpop.xlane.xlu0 %3285  ;;  %3341 = vst [vmem:[%s4397_s10 + $0x10] sm:$0xff] %v3333_v1  ;;  %v3316_v0 = vmul.f32 %v4241_v7, %v5833_v32  ;;  %4246 = vrsqrt.f32 %v3304_v48  ;;  %v3298_v63 = vmul.f32 0.0078125, %v3288_v52 }
 0xb7d   : > { %v3297_v54 = vmul.f32 0.0078125, %v3286_v56  ;;  %v4243_v18 = vpop.eup %4242 }
 0xb7e   : > { %v3331_v49 = vmul.f32 %v3590_v57, %v3316_v0  ;;  %v3317_v37 = vmul.f32 %v4243_v18, %v5843_v11  ;;  %v3306_v6 = vadd.f32 1e-06, %v3298_v63 }
 0xb7f   : > { %v3305_v42 = vadd.f32 1e-06, %v3297_v54  ;;  %v4245_v3 = vpop.eup %4244 }
 0xb80   : > { %v3290_v24 = vpop.xlane.xlu0 %3289  ;;  %3339 = vst [vmem:[%s4397_s10] sm:$0xff] %v3331_v49  ;;  %v3332_v33 = vmul.f32 %v3590_v57, %v3317_v37  ;;  %v3319_v62 = vmul.f32 %v4245_v3, %v5839_v43  ;;  %4248 = vrsqrt.f32 %v3306_v6 }
 0xb81   : > { %v3299_v32 = vmul.f32 0.0078125, %v3290_v24  ;;  %4250 = vrsqrt.f32 %v3305_v42 }
 0xb82   : > { %3340 = vst [vmem:[%s4397_s10 + $0x8] sm:$0xff] %v3332_v33  ;;  %v3334_v10 = vmul.f32 %v3590_v57, %v3319_v62 }
 0xb83   : > { %v3307_v27 = vadd.f32 1e-06, %v3299_v32 }
 0xb84   : > { %3342 = vst [vmem:[%s4397_s10 + $0x18] sm:$0xff] %v3334_v10 }
 0xb85   : > { %4252 = vrsqrt.f32 %v3307_v27 }
 0xb89   : > { %v4247_v11 = vpop.eup %4246 }
 0xb8a   : > { %v3320_v17 = vmul.f32 %v4247_v11, %v5857_v60 }
 0xb8c   : > { %v3335_v13 = vmul.f32 %v3590_v57, %v3320_v17 }
 0xb8d   : > { %v4249_v47 = vpop.eup %4248 }
 0xb8e   : > { %v4251_v22 = vpop.eup %4250  ;;  %3343 = vst [vmem:[%s4397_s10 + $0x20] sm:$0xff] %v3335_v13  ;;  %v3322_v43 = vmul.f32 %v4249_v47, %v5855_v36 }
 0xb8f   : > { %v3321_v9 = vmul.f32 %v4251_v22, %v5867_v29 }
 0xb90   : > { %v3337_v59 = vmul.f32 %v3590_v57, %v3322_v43 }
 0xb91   : > { %v3336_v30 = vmul.f32 %v3590_v57, %v3321_v9 }
 0xb92   : > { %v4253_v26 = vpop.eup %4252  ;;  %3345 = vst [vmem:[%s4397_s10 + $0x30] sm:$0xff] %v3337_v59 }
 0xb93   : > { %v3323_v44 = vmul.f32 %v4253_v26, %v5861_v53  ;;  %3344 = vst [vmem:[%s4397_s10 + $0x28] sm:$0xff] %v3336_v30 }
 0xb95   : > { %v3338_v35 = vmul.f32 %v3590_v57, %v3323_v44 }
 0xb97   : > { %3346 = vst [vmem:[%s4397_s10 + $0x38] sm:$0xff] %v3338_v35 }
 0xb98 PF: > { %s18_s28 = sadd.s32 1, %s4292_s28   ;;  %s6084_s14 = sld [smem:[#allocation5_spill]] }
 0xb99   : > { %p15_p10 = scmp.ge.s32.totalorder %s18_s28, 6   ;;  %s6085_s24 = smov %s4284_s26 }
 0xb9a   : > { %s6086_s25 = smov %s4288_s27  ;;  %s6087_s26 = smov %s6090_s29 }
 0xb9b   :  { %17 = sbr.rel (!%p15_p10) target bundleno = 3 (0x3), region = 122 }
 0xb9e   : > { %s6088_s27 = smov %s6084_s14 }

// kernel: _lambda_.13
= control target key start
LH: loop header
LB: loop body
LE: loop exit
PB: predicated region body
PF: predicated region fallthrough
CT: control target
= control target key end

     0   :  { %8 = vsyncpa [#allocation3], 0  ;;  %s695_s0 = inlined_call_operand.vmem [shape: f32[128,128], index: 0, kind: input, shape index: {}]   ;;  %s696_s1 = inlined_call_operand.vmem [shape: f32[128,128], index: 1, kind: input, shape index: {}]   ;;  %s697_s2 = inlined_call_operand.vmem [shape: f32[1,128], index: 2, kind: input, shape index: {}]   ;;  %s698_s3 = inlined_call_operand.hbm [shape: f32[128,128], index: 3, kind: output, shape index: {}]  }
   0x1   :  { %10 = vsyncpa [#allocation3 + $0x1], 0  ;;  %s544_s12 = smov 0   ;;  %s546_s13 = smov 0  }
   0x2   :  { %s548_s14 = smov 0   ;;  %s550_s15 = smov 0  }
   0x3 LB: > { %s565_s16 = sadd.s32 4294967295, %s519_s15   ;;  %s386_s17 = sadd.s32 4294967294, %s519_s15   ;;  %s519_s15 = sphi %s550_s15, %s704_s15   ;;  %s515_s14 = sphi %s548_s14, %s703_s14   ;;  %s511_s13 = sphi %s546_s13, %s702_s13   ;;  %s507_s12 = sphi %s544_s12, %s701_s12  }
   0x4   : > { %s569_s18 = sadd.s32 1, %s519_s15   ;;  %s96_s19 = sadd.s32 1, %s515_s14 }
   0x5   : > { %s93_s20 = ssub.s32 %s519_s15, %s569_s18  ;;  %p106_p0 = scmp.ne.s32.totalorder %s515_s14, %s511_s13 }
   0x6   : > { %p94_p1 = scmp.eq.s32.totalorder %s93_s20, 0  ;;  %p107_p2 = scmp.eq.s32.totalorder %s565_s16, 1 }
   0x7   : > { %p112_p3 = scmp.ne.s32.totalorder %s511_s13, %s507_s12  ;;  %p113_p4 = scmp.eq.s32.totalorder %s386_s17, 1 }
   0x8   : > { %s580_s21 = scalar_select %p94_p1, %s515_s14, %s96_s19  }
   0x9   : > { %p582_p5 = por %p107_p2, %p106_p0  ;;  %p586_p6 = por %p113_p4, %p112_p3 }
   0xa   : > { %p389_p7 = scmp.ge.s32.totalorder %s519_s15, 1  ;;  %p152_p8 = scmp.lt.s32.totalorder %s519_s15, 3 }
   0xc   : > { %p153_p9 = pnand %p389_p7, %p152_p8 }
   0xd   : > { %s391_s24 = sshll.u32 (!%p153_p9), %s565_s16, 3  ;;  %s178_s5 = sand.u32 (!%p153_p9), 1, %s511_s13  }
   0xe   : > { %156 = sbr.rel (%p153_p9) target bundleno = 215 (0xd7), region = 32  ;;  %p182_p10 = scmp.lt.s32.totalorder (!%p153_p9), %s391_s24, 15 }
   0xf   : > { %s390_s6 = sshll.u32 (!%p153_p9), %s178_s5, 6  ;;  %s401_s10 = sshll.u32 (!%p153_p9), %s565_s16, 10 }
  0x10   : > { %s180_s9 = scalar_lea.vmem (!%p153_p9), [#allocation2], %s390_s6  ;;  %s649_s20 = scalar_lea.hbm (!%p153_p9), %s698_s3, %s401_s10 }
  0x11   : > { %s312_s11 = sshll.u32 (!%p153_p9), %s180_s9, 4  ;;  %s655_s16 = scalar_lea.sflag (!%p153_p9), [#allocation3], %s178_s5  ;;  %s651_s11 = int_to_ptr.vmem [resolvable:$true] %s312_s11 }
  0x13   : > { %s706_s24 = smov (!%p182_p10, %s391_s24), 15  ;;  %v395_v57 = vld [vmem:[%s697_s2] ss:$0 sm:$0xff] }
  0x14   : > { %s392_s25 = sshll.u32 %s706_s24, 3  ;;  %s459_s24 = scalar_lea.vmem %s651_s11, 1024 }
  0x15   : > { %s185_s28 = scalar_lea.vmem %s695_s0, %s392_s25  ;;  %s191_s4 = scalar_lea.vmem %s696_s1, %s392_s25 }
  0x16   : > { %v196_v0 = vld [vmem:[%s185_s28 + $0x10] sm:$0xff]  ;;  %v194_v2 = vld [vmem:[%s185_s28] sm:$0xff]  ;;  %v197_v5 = vld [vmem:[%s185_s28 + $0x18] sm:$0xff]  ;;  %p460_p11 = scmp.ne.s32.totalorder %s651_s11, %s459_s24  ;;  %s521_s25 = smov [#allocation2]  }
  0x17   : > { %v204_v1 = vld [vmem:[%s191_s4 + $0x10] sm:$0xff]  ;;  %v202_v4 = vld [vmem:[%s191_s4] sm:$0xff]  ;;  %v205_v6 = vld [vmem:[%s191_s4 + $0x18] sm:$0xff]  ;;  %s463_s26 = sshll.u32 %s521_s25, 4  ;;  %s464_s26 = int_to_ptr.vmem [resolvable:$false] %s463_s26 }
  0x18   : > { %v599_v3 = vadd.f32 %v204_v1, %v196_v0  ;;  %v601_v7 = vadd.f32 %v202_v4, %v194_v2  ;;  %v603_v8 = vadd.f32 %v205_v6, %v197_v5  ;;  %v195_v9 = vld [vmem:[%s185_s28 + $0x8] sm:$0xff]  ;;  %v198_v15 = vld [vmem:[%s185_s28 + $0x20] sm:$0xff]  ;;  %v201_v22 = vld [vmem:[%s185_s28 + $0x38] sm:$0xff]  ;;  %p461_p12 = pnand %p460_p11, %p582_p5  ;;  %s465_s27 = scalar_lea.vmem %s464_s26, 2048 }
  0x19   : > { %v203_v10 = vld [vmem:[%s191_s4 + $0x8] sm:$0xff]  ;;  %v206_v16 = vld [vmem:[%s191_s4 + $0x20] sm:$0xff]  ;;  %v209_v23 = vld [vmem:[%s191_s4 + $0x38] sm:$0xff]  ;;  %p466_p0 = scmp.lt.s32.totalorder %s651_s11, %s464_s26  ;;  %p467_p1 = scmp.lt.s32.totalorder %s465_s27, %s459_s24 }
  0x1a   : > { %v199_v11 = vld [vmem:[%s185_s28 + $0x28] sm:$0xff]  ;;  %v220_v12 = vmul.f32 %v599_v3, %v599_v3  ;;  %v607_v13 = vadd.f32 %v203_v10, %v195_v9  ;;  %v218_v17 = vmul.f32 %v601_v7, %v601_v7  ;;  %v221_v18 = vmul.f32 %v603_v8, %v603_v8  ;;  %v200_v24 = vld [vmem:[%s185_s28 + $0x30] sm:$0xff]  ;;  %p462_p13 = pneg %p461_p12 }
  0x1b   : > { %v207_v14 = vld [vmem:[%s191_s4 + $0x28] sm:$0xff]  ;;  %v617_v21 = vadd.f32 %v206_v16, %v198_v15  ;;  %v208_v25 = vld [vmem:[%s191_s4 + $0x30] sm:$0xff]  ;;  %v621_v27 = vadd.f32 %v209_v23, %v201_v22  ;;  %p468_p2 = por %p467_p1, %p466_p0 }
  0x1c   : > { %230 = vadd.xlane.f32.xlu1 %v220_v12  ;;  %v613_v19 = vadd.f32 %v207_v14, %v199_v11  ;;  %226 = vadd.xlane.f32.xlu0 %v218_v17  ;;  %v219_v20 = vmul.f32 %v607_v13, %v607_v13  ;;  %v625_v29 = vadd.f32 %v208_v25, %v200_v24 }
  0x1d   : > { %v222_v28 = vmul.f32 %v617_v21, %v617_v21  ;;  %v225_v30 = vmul.f32 %v621_v27, %v621_v27  ;;  %p469_p3 = pnand %p468_p2, %p462_p13 }
  0x1e   : > { %v223_v26 = vmul.f32 %v613_v19, %v613_v19  ;;  %v224_v31 = vmul.f32 %v625_v29, %v625_v29 }
  0x20   : > { %232 = vadd.xlane.f32.xlu1 %v221_v18  ;;  %228 = vadd.xlane.f32.xlu0 %v219_v20 }
  0x24   : > { %236 = vadd.xlane.f32.xlu1 %v223_v26  ;;  %234 = vadd.xlane.f32.xlu0 %v222_v28 }
  0x28   : > { %240 = vadd.xlane.f32.xlu1 %v225_v30  ;;  %238 = vadd.xlane.f32.xlu0 %v224_v31 }
  0xa5   : > { %v231_v32 = vpop.xlane.xlu1 %230  ;;  %v227_v34 = vpop.xlane.xlu0 %226 }
  0xa6   : > { %v245_v33 = vmul.f32 0.0078125, %v231_v32  ;;  %v243_v35 = vmul.f32 0.0078125, %v227_v34 }
  0xa8   : > { %v253_v36 = vadd.f32 1e-06, %v245_v33  ;;  %v251_v37 = vadd.f32 1e-06, %v243_v35 }
  0xa9   : > { %v233_v38 = vpop.xlane.xlu1 %232  ;;  %v229_v40 = vpop.xlane.xlu0 %228 }
  0xaa   : > { %443 = vrsqrt.f32 %v253_v36  ;;  %v246_v39 = vmul.f32 0.0078125, %v233_v38  ;;  %v244_v41 = vmul.f32 0.0078125, %v229_v40 }
  0xab   : > { %445 = vrsqrt.f32 %v251_v37 }
  0xac   : > { %v254_v42 = vadd.f32 1e-06, %v246_v39  ;;  %v252_v43 = vadd.f32 1e-06, %v244_v41 }
  0xad   : > { %v237_v44 = vpop.xlane.xlu1 %236  ;;  %v235_v46 = vpop.xlane.xlu0 %234 }
  0xae   : > { %447 = vrsqrt.f32 %v254_v42  ;;  %v248_v45 = vmul.f32 0.0078125, %v237_v44  ;;  %v247_v47 = vmul.f32 0.0078125, %v235_v46 }
  0xaf   : > { %449 = vrsqrt.f32 %v252_v43 }
  0xb0   : > { %v256_v48 = vadd.f32 1e-06, %v248_v45  ;;  %v255_v49 = vadd.f32 1e-06, %v247_v47 }
  0xb1   : > { %v241_v50 = vpop.xlane.xlu1 %240  ;;  %v239_v52 = vpop.xlane.xlu0 %238 }
  0xb2   : > { %451 = vrsqrt.f32 %v256_v48  ;;  %v250_v51 = vmul.f32 0.0078125, %v241_v50  ;;  %v249_v53 = vmul.f32 0.0078125, %v239_v52 }
  0xb3   : > { %453 = vrsqrt.f32 %v255_v49 }
  0xb4   : > { %v258_v54 = vadd.f32 1e-06, %v250_v51  ;;  %v257_v55 = vadd.f32 1e-06, %v249_v53 }
  0xb6   : > { %455 = vrsqrt.f32 %v258_v54 }
  0xb7   : > { %v444_v56 = vpop.eup %443  ;;  %457 = vrsqrt.f32 %v257_v55 }
  0xb8   : > { %v446_v58 = vpop.eup %445  ;;  %v269_v59 = vmul.f32 %v444_v56, %v599_v3 }
  0xb9   : > { %v267_v60 = vmul.f32 %v446_v58, %v601_v7 }
  0xba   : > { %v284_v61 = vmul.f32 %v395_v57, %v269_v59 }
  0xbb   : > { %v448_v62 = vpop.eup %447  ;;  %v282_v63 = vmul.f32 %v395_v57, %v267_v60 }
  0xbc   : > { %v450_v0 = vpop.eup %449  ;;  %292 = vst [vmem:[%s180_s9 + $0x10] sm:$0xff] %v284_v61  ;;  %v270_v1 = vmul.f32 %v448_v62, %v603_v8 }
  0xbd   : > { %290 = vst [vmem:[%s180_s9] sm:$0xff] %v282_v63  ;;  %v268_v2 = vmul.f32 %v450_v0, %v607_v13 }
  0xbe   : > { %v285_v4 = vmul.f32 %v395_v57, %v270_v1 }
  0xbf   : > { %v452_v5 = vpop.eup %451  ;;  %v283_v6 = vmul.f32 %v395_v57, %v268_v2 }
  0xc0   : > { %v454_v9 = vpop.eup %453  ;;  %293 = vst [vmem:[%s180_s9 + $0x18] sm:$0xff] %v285_v4  ;;  %v272_v3 = vmul.f32 %v452_v5, %v613_v19 }
  0xc1   : > { %291 = vst [vmem:[%s180_s9 + $0x8] sm:$0xff] %v283_v6  ;;  %v271_v7 = vmul.f32 %v454_v9, %v617_v21 }
  0xc2   : > { %v287_v10 = vmul.f32 %v395_v57, %v272_v3 }
  0xc3   : > { %v456_v11 = vpop.eup %455  ;;  %v286_v12 = vmul.f32 %v395_v57, %v271_v7 }
  0xc4   : > { %v458_v8 = vpop.eup %457  ;;  %295 = vst [vmem:[%s180_s9 + $0x28] sm:$0xff] %v287_v10  ;;  %v274_v13 = vmul.f32 %v456_v11, %v621_v27 }
  0xc5   : > { %294 = vst [vmem:[%s180_s9 + $0x20] sm:$0xff] %v286_v12  ;;  %v273_v14 = vmul.f32 %v458_v8, %v625_v29 }
  0xc6   : > { %v289_v15 = vmul.f32 %v395_v57, %v274_v13 }
  0xc7   : > { %v288_v16 = vmul.f32 %v395_v57, %v273_v14 }
  0xc8   : > { %297 = vst [vmem:[%s180_s9 + $0x38] sm:$0xff] %v289_v15 }
  0xc9   : > { %296 = vst [vmem:[%s180_s9 + $0x30] sm:$0xff] %v288_v16 }
  0xca   : > { %472 = shalt.err (!%p469_p3)
}
  0xcb   : > { %s473_s28 = scalar_lea.hbm %s649_s20, 1024  ;;  %s477_s4 = scalar_lea.hbm %s698_s3, 2048 }
  0xcc   : > { %p474_p4 = scmp.ne.s32.totalorder %s649_s20, %s473_s28  ;;  %p478_p9 = scmp.lt.s32.totalorder %s649_s20, %s698_s3 }
  0xcd   : > { %p479_p10 = scmp.lt.s32.totalorder %s477_s4, %s473_s28 }
  0xce   : > { %p475_p7 = pnand %p474_p4, %p582_p5 }
  0xcf   : > { %p480_p11 = por %p479_p10, %p478_p9 }
  0xd0   : > { %p476_p8 = pneg %p475_p7 }
  0xd2   : > { %p481_p12 = pnand %p480_p11, %p476_p8 }
  0xd4   : > { %484 = shalt.err (!%p481_p12)
}
  0xd5   : > { %s522_s7 = smov 128   ;;  %s523_s8 = smov 8  }
  0xd6   : > { %402 = dma.vmem_to_hbm [thread:$0]  (%p582_p5), %s651_s11, 1024, %s649_s20, %s655_s16, %s522_s7, %s522_s7, %s523_s8  }
  0xd7 PF: > { %p408_p13 = scmp.ge.s32.totalorder %s519_s15, 2  ;;  %s327_s9 = sand.u32 1, %s507_s12  }
  0xd8   : > { %s328_s10 = scalar_lea.sflag [#allocation3], %s327_s9 }
  0xd9   : > { %p405_p0 = pnand %p408_p13, %p586_p6 }
  0xdb   : > { %p406_p1 = pneg %p405_p0 }
  0xdd   : > { %502 = dma.done.wait (%p406_p1), %s328_s10, 1024  }
  0xde   : > { %504 = vsyncadd (%p406_p1), %s328_s10, 4294966272  ;;  %p13_p2 = scmp.ge.s32.totalorder %s569_s18, 4   ;;  %s701_s12 = smov %s511_s13 }
  0xdf   : > { %s702_s13 = smov %s515_s14  ;;  %s703_s14 = smov %s580_s21 }
  0xe0   : > { %s704_s15 = smov %s569_s18  ;;  %15 = sbr.rel (!%p13_p2) target bundleno = 3 (0x3), region = 70 }
  0xe5   :  { %333 = vsyncpa [#allocation3], 1 }
  0xe6   :  { %335 = vsyncpa [#allocation3 + $0x1], 1 }

// kernel: _lambda_.12
= control target key start
LH: loop header
LB: loop body
LE: loop exit
PB: predicated region body
PF: predicated region fallthrough
CT: control target
= control target key end

     0   :  { %s2499_s30 = smov 0   ;;  %s2501_s10 = smov 0   ;;  %s2790_s0 = inlined_call_operand.vmem [shape: f32[128,128], index: 0, kind: input, shape index: {}]   ;;  %s2791_s1 = inlined_call_operand.vmem [shape: bf16[4,128,128], index: 1, kind: input, shape index: {}]   ;;  %s2792_s2 = inlined_call_operand.vmem [shape: bf16[4,128,128], index: 2, kind: input, shape index: {}]   ;;  %s2793_s3 = inlined_call_operand.vmem [shape: bf16[4,128,128], index: 3, kind: input, shape index: {}]   ;;  %s2794_s4 = inlined_call_operand.vmem [shape: f32[4,128,1], index: 4, kind: input, shape index: {}]   ;;  %s2795_s5 = inlined_call_operand.vmem [shape: bf16[128,128], index: 5, kind: input, shape index: {}]   ;;  %s2796_s6 = inlined_call_operand.vmem [shape: bf16[128,128], index: 6, kind: input, shape index: {}]   ;;  %s2797_s7 = inlined_call_operand.vmem [shape: bf16[128,128], index: 7, kind: input, shape index: {}]   ;;  %s2798_s8 = inlined_call_operand.vmem [shape: bf16[128,1], index: 8, kind: input, shape index: {}]   ;;  %s2799_s9 = inlined_call_operand.vmem [shape: f32[128,128], index: 9, kind: output, shape index: {}]  }
   0x1   :  { %2800 = sst [smem:[#allocation4_spill]] %s2791_s1  ;;  %s2503_s11 = smov 0  }
   0x2   :  { %s2505_s12 = smov 0   ;;  %s2507_s13 = smov 0  }
   0x3 LB: > { %s28_s14 = sadd.s32 1, %s2436_s11  ;;  %s31_s15 = sadd.s32 1, %s2440_s12  ;;  %s2444_s13 = sphi %s2507_s13, %s19_s13   ;;  %s2440_s12 = sphi %s2505_s12, %s2809_s12   ;;  %s2436_s11 = sphi %s2503_s11, %s2808_s11   ;;  %s2432_s10 = sphi %s2501_s10, %s2807_s10   ;;  %s2428_s30 = sphi %s2499_s30, %s2806_s30  }
   0x4   : > { %p29_p0 = scmp.ge.s32.totalorder %s28_s14, 4  ;;  %p1838_p1 = scmp.ge.s32.totalorder %s2444_s13, 1 }
   0x5   : > { %p347_p2 = scmp.lt.s32.totalorder %s2444_s13, 9 }
   0x6   : > { %s2811_s14 = smov (%p29_p0, %s28_s14), 0  ;;  %s2813_s15 = smov (!%p29_p0, %s31_s15), %s2440_s12 }
   0x7   : > { %2801 = sst [smem:[#allocation2_spill]] %s2811_s14  ;;  %p348_p3 = pnand %p1838_p1, %p347_p2 }
   0x8   : > { %p33_p4 = scmp.ge.s32.totalorder %s2813_s15, 2  ;;  %s1839_s16 = sshll.u32 (!%p348_p3), %s2432_s10, 3 }
   0x9   : > { %351 = sbr.rel (%p348_p3) target bundleno = 997 (0x3e5), region = 56  ;;  %p413_p5 = scmp.lt.s32.totalorder (!%p348_p3), %s2428_s30, 3 }
   0xa   : > { %s2815_s15 = smov (%p33_p4, %s2813_s15), 0  ;;  %p408_p6 = scmp.lt.s32.totalorder (!%p348_p3), %s1839_s16, 15 }
   0xb   : > { %2802 = sst [smem:[#allocation3_spill]] %s2815_s15  ;;  %p1852_p7 = scmp.ne.s32.totalorder (!%p348_p3), %s2428_s30, 0 }
   0xc   : > { %s2803_s1 = sld [smem:[#allocation4_spill]] (!%p348_p3) }
   0xe   : > { %s414_s17 = scalar_select %p413_p5, %s2428_s30, 3 }
   0xf   : > { %s2817_s16 = smov (!%p408_p6, %s1839_s16), 15 }
  0x10   : > { %s1936_s18 = sshll.u32 %s414_s17, 6  ;;  %s1848_s19 = sshll.u32 %s414_s17, 4 }
  0x11   : > { %s1840_s20 = sshll.u32 %s2817_s16, 3  ;;  %s2544_s29 = scalar_lea.vmem %s2792_s2, %s1936_s18 }
  0x12   : > { %s2536_s23 = scalar_lea.vmem %s2803_s1, %s1936_s18  ;;  %s411_s26 = scalar_lea.vmem %s2790_s0, %s1840_s20 }
  0x13   : > { %s2549_s14 = scalar_lea.vmem %s2793_s3, %s1936_s18  ;;  %s434_s17 = sadd.s32 %s1848_s19, %s2817_s16  ;;  %v445_v0 = vld [vmem:[%s411_s26] sm:$0xff]  ;;  %v446_v1 = vld [vmem:[%s411_s26 + $0x8] sm:$0xff]  ;;  %v447_v2 = vld [vmem:[%s411_s26 + $0x10] sm:$0xff] }
  0x14   : > { %s1849_s21 = sshll.u32 %s434_s17, 3  ;;  %s2554_s24 = scalar_lea.vmem %s2799_s9, %s1840_s20  ;;  %v448_v3 = vld [vmem:[%s411_s26 + $0x18] sm:$0xff]  ;;  %v449_v4 = vld [vmem:[%s411_s26 + $0x20] sm:$0xff]  ;;  %v450_v5 = vld [vmem:[%s411_s26 + $0x28] sm:$0xff]  ;;  %v2556_v6 = vpack.c.bf16 %v446_v1, %v445_v0 }
  0x15   : > { %s2561_s15 = scalar_lea.vmem %s2794_s4, %s1849_s21  ;;  %v451_v7 = vld [vmem:[%s411_s26 + $0x30] sm:$0xff]  ;;  %v452_v8 = vld [vmem:[%s411_s26 + $0x38] sm:$0xff]  ;;  %v2563_v9 = vpack.c.bf16 %v448_v3, %v447_v2  ;;  %v2565_v10 = vpack.c.bf16 %v450_v5, %v449_v4  ;;  %460 = sbr.rel (%p1852_p7) target bundleno = 31 (0x1f), region = 60 }
  0x16   : > { %v2567_v11 = vpack.c.bf16 %v452_v8, %v451_v7 }
  0x1a   : > { %v2446_v12 = vmov 0.0  }
  0x1b   : > { %461 = vst [vmem:[%s2554_s24] sm:$0xff] %v2446_v12  ;;  %462 = vst [vmem:[%s2554_s24 + $0x8] sm:$0xff] %v2446_v12 }
  0x1c   : > { %463 = vst [vmem:[%s2554_s24 + $0x10] sm:$0xff] %v2446_v12  ;;  %464 = vst [vmem:[%s2554_s24 + $0x18] sm:$0xff] %v2446_v12 }
  0x1d   : > { %465 = vst [vmem:[%s2554_s24 + $0x20] sm:$0xff] %v2446_v12  ;;  %466 = vst [vmem:[%s2554_s24 + $0x28] sm:$0xff] %v2446_v12 }
  0x1e   : > { %467 = vst [vmem:[%s2554_s24 + $0x30] sm:$0xff] %v2446_v12  ;;  %468 = vst [vmem:[%s2554_s24 + $0x38] sm:$0xff] %v2446_v12 }
  0x1f PF: > { %v2252_v13 = vld [vmem:[%s2536_s23 + $0x38] sm:$0xff]   ;;  %2039 = vmatprep.mubr.bf16.mxu0 %v2556_v6  ;;  %2063 = vmatprep.mubr.bf16.mxu1 %v2556_v6  ;;  %v2253_v14 = vld [vmem:[%s2536_s23 + $0x30] sm:$0xff]   ;;  %v2254_v15 = vld [vmem:[%s2536_s23 + $0x28] sm:$0xff]   ;;  %v2447_v39 = vmov 0   ;;  %p1885_p8 = scmp.ne.s32.totalorder %s2428_s30, 3 }
  0x20   : > { %2023 = vmatprep.subr.bf16.mxu0 %v2252_v13  ;;  %v2255_v16 = vld [vmem:[%s2536_s23 + $0x20] sm:$0xff]   ;;  %v2260_v17 = vld [vmem:[%s2544_s29 + $0x38] sm:$0xff]   ;;  %v2261_v18 = vld [vmem:[%s2544_s29 + $0x30] sm:$0xff]   ;;  %2251 = vset.pattern.permute.xlu1 %v2447_v39 }
  0x21   : > { %2024 = vmatpush3.bf16.msra.mxu0 %v2252_v13  ;;  %2047 = vmatprep.subr.bf16.mxu1 %v2260_v17  ;;  %v2256_v19 = vld [vmem:[%s2536_s23 + $0x18] sm:$0xff]   ;;  %v2262_v20 = vld [vmem:[%s2544_s29 + $0x28] sm:$0xff]   ;;  %v2257_v21 = vld [vmem:[%s2536_s23 + $0x10] sm:$0xff]  }
  0x22   : > { %2025 = vmatprep.subr.bf16.mxu0 %v2253_v14  ;;  %2048 = vmatpush3.bf16.msra.mxu1 %v2260_v17  ;;  %v2263_v22 = vld [vmem:[%s2544_s29 + $0x20] sm:$0xff]   ;;  %v2258_v23 = vld [vmem:[%s2536_s23 + $0x8] sm:$0xff]   ;;  %v2264_v24 = vld [vmem:[%s2544_s29 + $0x18] sm:$0xff]  }
  0x23   : > { %2049 = vmatprep.subr.bf16.mxu1 %v2261_v18  ;;  %v2259_v25 = vld [vmem:[%s2536_s23] sm:$0xff]   ;;  %v2265_v26 = vld [vmem:[%s2544_s29 + $0x10] sm:$0xff]   ;;  %v2266_v27 = vld [vmem:[%s2544_s29 + $0x8] sm:$0xff]   ;;  %2250 = vset.pattern.permute.xlu0 %v2447_v39 }
  0x24   : > { %v2267_v28 = vld [vmem:[%s2544_s29] sm:$0xff]   ;;  %v2268_v29 = vld [vmem:[%s2549_s14 + $0x38] sm:$0xff]   ;;  %v2269_v30 = vld [vmem:[%s2549_s14 + $0x30] sm:$0xff]  }
  0x25   : > { %2026 = vmatpush3.bf16.msra.mxu0 %v2253_v14  ;;  %v2270_v31 = vld [vmem:[%s2549_s14 + $0x28] sm:$0xff]   ;;  %v2271_v32 = vld [vmem:[%s2549_s14 + $0x20] sm:$0xff]   ;;  %v2272_v33 = vld [vmem:[%s2549_s14 + $0x18] sm:$0xff]  }
  0x26   : > { %2027 = vmatprep.subr.bf16.mxu0 %v2254_v15  ;;  %2050 = vmatpush3.bf16.msra.mxu1 %v2261_v18  ;;  %v2273_v34 = vld [vmem:[%s2549_s14 + $0x10] sm:$0xff]   ;;  %v2274_v35 = vld [vmem:[%s2549_s14 + $0x8] sm:$0xff]   ;;  %v2275_v36 = vld [vmem:[%s2549_s14] sm:$0xff]  }
  0x27   : > { %2051 = vmatprep.subr.bf16.mxu1 %v2262_v20  ;;  %v934_v37 = vld [vmem:[%s2561_s15 + $0x10] sm:$0xff]  ;;  %v932_v38 = vld [vmem:[%s2561_s15] sm:$0xff]  ;;  %v935_v40 = vld [vmem:[%s2561_s15 + $0x18] sm:$0xff] }
  0x28   : > { %952 = vperm.xlu1 %2251, %v934_v37   ;;  %942 = vperm.xlu0 %2250, %v932_v38   ;;  %v933_v41 = vld [vmem:[%s2561_s15 + $0x8] sm:$0xff]  ;;  %v936_v43 = vld [vmem:[%s2561_s15 + $0x20] sm:$0xff]  ;;  %v939_v44 = vld [vmem:[%s2561_s15 + $0x38] sm:$0xff] }
  0x29   : > { %2028 = vmatpush3.bf16.msra.mxu0 %v2254_v15  ;;  %v937_v42 = vld [vmem:[%s2561_s15 + $0x28] sm:$0xff]  ;;  %v938_v45 = vld [vmem:[%s2561_s15 + $0x30] sm:$0xff] }
  0x2a   : > { %2029 = vmatprep.subr.bf16.mxu0 %v2255_v16  ;;  %2052 = vmatpush3.bf16.msra.mxu1 %v2262_v20 }
  0x2b   : > { %2053 = vmatprep.subr.bf16.mxu1 %v2263_v22 }
  0x2c   : > { %957 = vperm.xlu1 %2251, %v935_v40   ;;  %947 = vperm.xlu0 %2250, %v933_v41  }
  0x2d   : > { %2030 = vmatpush3.bf16.msra.mxu0 %v2255_v16 }
  0x2e   : > { %2031 = vmatprep.subr.bf16.mxu0 %v2256_v19  ;;  %2054 = vmatpush3.bf16.msra.mxu1 %v2263_v22 }
  0x2f   : > { %2055 = vmatprep.subr.bf16.mxu1 %v2264_v24 }
  0x30   : > { %967 = vperm.xlu1 %2251, %v937_v42   ;;  %962 = vperm.xlu0 %2250, %v936_v43  }
  0x31   : > { %2032 = vmatpush3.bf16.msra.mxu0 %v2256_v19 }
  0x32   : > { %2033 = vmatprep.subr.bf16.mxu0 %v2257_v21  ;;  %2056 = vmatpush3.bf16.msra.mxu1 %v2264_v24 }
  0x33   : > { %2057 = vmatprep.subr.bf16.mxu1 %v2265_v26 }
  0x34   : > { %977 = vperm.xlu1 %2251, %v939_v44   ;;  %972 = vperm.xlu0 %2250, %v938_v45  }
  0x35   : > { %2034 = vmatpush3.bf16.msra.mxu0 %v2257_v21 }
  0x36   : > { %2035 = vmatprep.subr.bf16.mxu0 %v2258_v23  ;;  %2058 = vmatpush3.bf16.msra.mxu1 %v2265_v26 }
  0x37   : > { %2059 = vmatprep.subr.bf16.mxu1 %v2266_v27 }
  0x39   : > { %2036 = vmatpush3.bf16.msra.mxu0 %v2258_v23 }
  0x3a   : > { %2037 = vmatprep.subr.bf16.mxu0 %v2259_v25  ;;  %2060 = vmatpush3.bf16.msra.mxu1 %v2266_v27 }
  0x3b   : > { %2061 = vmatprep.subr.bf16.mxu1 %v2267_v28 }
  0x3d   : > { %2038 = vmatpush3.bf16.msra.mxu0 %v2259_v25 }
  0x3e   : > { %2062 = vmatpush3.bf16.msra.mxu1 %v2267_v28  ;;  %2071 = vmatprep.subr.bf16.mxu0 %v2268_v29 }
  0x3f   : > { %2191 = vmatprep.subr.bf16.mxu1 %v2268_v29 }
  0x40   : > { %2040 = vmatmul.mubr.bf16.vlgmr.msra.gmra.mxu0 %v2563_v9 }
  0x41   : > { %2043 = vmatprep.mubr.bf16.mxu0 %v2565_v10  ;;  %2064 = vmatmul.mubr.bf16.vlgmr.msra.gmra.mxu1 %v2563_v9 }
  0x42   : > { %2067 = vmatprep.mubr.bf16.mxu1 %v2565_v10  ;;  %2072 = vmatpush3.bf16.msra.mxu0 %v2268_v29 }
  0x43   : > { %2199 = vmatpush3.bf16.msra.mxu1 %v2268_v29  ;;  %2073 = vmatprep.subr.bf16.mxu0 %v2269_v30 }
  0x44   : > { %2192 = vmatprep.subr.bf16.mxu1 %v2269_v30 }
  0x46   : > { %2074 = vmatpush3.bf16.msra.mxu0 %v2269_v30 }
  0x47   : > { %2200 = vmatpush3.bf16.msra.mxu1 %v2269_v30  ;;  %2075 = vmatprep.subr.bf16.mxu0 %v2270_v31 }
  0x48   : > { %2044 = vmatmul.mubr.bf16.gmra.mxu0 %v2567_v11  ;;  %2193 = vmatprep.subr.bf16.mxu1 %v2270_v31 }
  0x49   : > { %2068 = vmatmul.mubr.bf16.gmra.mxu1 %v2567_v11 }
  0x4a   : > { %2076 = vmatpush3.bf16.msra.mxu0 %v2270_v31 }
  0x4b   : > { %2201 = vmatpush3.bf16.msra.mxu1 %v2270_v31  ;;  %2077 = vmatprep.subr.bf16.mxu0 %v2271_v32 }
  0x4c   : > { %2194 = vmatprep.subr.bf16.mxu1 %v2271_v32 }
  0x4e   : > { %2078 = vmatpush3.bf16.msra.mxu0 %v2271_v32 }
  0x4f   : > { %2202 = vmatpush3.bf16.msra.mxu1 %v2271_v32  ;;  %2079 = vmatprep.subr.bf16.mxu0 %v2272_v33 }
  0x50   : > { %2195 = vmatprep.subr.bf16.mxu1 %v2272_v33 }
  0x52   : > { %2080 = vmatpush3.bf16.msra.mxu0 %v2272_v33 }
  0x53   : > { %2203 = vmatpush3.bf16.msra.mxu1 %v2272_v33  ;;  %2081 = vmatprep.subr.bf16.mxu0 %v2273_v34 }
  0x54   : > { %2196 = vmatprep.subr.bf16.mxu1 %v2273_v34 }
  0x56   : > { %2082 = vmatpush3.bf16.msra.mxu0 %v2273_v34 }
  0x57   : > { %2204 = vmatpush3.bf16.msra.mxu1 %v2273_v34  ;;  %2083 = vmatprep.subr.bf16.mxu0 %v2274_v35 }
  0x58   : > { %2197 = vmatprep.subr.bf16.mxu1 %v2274_v35 }
  0x5a   : > { %2084 = vmatpush3.bf16.msra.mxu0 %v2274_v35 }
  0x5b   : > { %2205 = vmatpush3.bf16.msra.mxu1 %v2274_v35  ;;  %2085 = vmatprep.subr.bf16.mxu0 %v2275_v36 }
  0x5c   : > { %2198 = vmatprep.subr.bf16.mxu1 %v2275_v36 }
  0x5e   : > { %2086 = vmatpush3.bf16.msra.mxu0 %v2275_v36 }
  0x5f   : > { %2206 = vmatpush3.bf16.msra.mxu1 %v2275_v36 }
 0x100   : > { %v2041_v46 = vpop.f32.mrf.mxu0 }
 0x101   : > { %v1871_v47 = vmul.f32 -1.442695, %v2041_v46  ;;  %v2065_v3 = vpop.f32.mrf.mxu1 }
 0x102   : > { %v567_v48 = vpop.f32.mrf.mxu0 }
 0x103   : > { %2276 = vpow2.f32 %v1871_v47  ;;  %v1869_v49 = vmul.f32 -1.442695, %v567_v48  ;;  %v696_v12 = vpop.f32.mrf.mxu1 }
 0x104   : > { %v2042_v50 = vpop.f32.mrf.mxu0 }
 0x105   : > { %2278 = vpow2.f32 %v1869_v49  ;;  %v1872_v51 = vmul.f32 -1.442695, %v2042_v50  ;;  %v2066_v17 = vpop.f32.mrf.mxu1 }
 0x106   : > { %v570_v52 = vpop.f32.mrf.mxu0 }
 0x107   : > { %2280 = vpow2.f32 %v1872_v51  ;;  %v1870_v53 = vmul.f32 -1.442695, %v570_v52  ;;  %v699_v21 = vpop.f32.mrf.mxu1 }
 0x108   : > { %v2618_v54 = vpop.f32.mrf.mxu0 }
 0x109   : > { %2282 = vpow2.f32 %v1870_v53  ;;  %v1875_v55 = vmul.f32 -1.442695, %v2618_v54  ;;  %v2069_v25 = vpop.f32.mrf.mxu1 }
 0x10a   : > { %v583_v56 = vpop.f32.mrf.mxu0 }
 0x10b   : > { %2284 = vpow2.f32 %v1875_v55  ;;  %v1873_v57 = vmul.f32 -1.442695, %v583_v56  ;;  %v712_v32 = vpop.f32.mrf.mxu1  ;;  %v943_v55 = vpop.permute.xlu0 %942 }
 0x10c   : > { %v2046_v58 = vpop.f32.mrf.mxu0 }
 0x10d   : > { %2286 = vpow2.f32 %v1873_v57  ;;  %v1876_v59 = vmul.f32 -1.442695, %v2046_v58  ;;  %v2070_v41 = vpop.f32.mrf.mxu1 }
 0x10e   : > { %v586_v60 = vpop.f32.mrf.mxu0 }
 0x10f   : > { %2288 = vpow2.f32 %v1876_v59  ;;  %v1874_v61 = vmul.f32 -1.442695, %v586_v60  ;;  %v948_v57 = vpop.permute.xlu0 %947  ;;  %v926_v59 = vld [vmem:[%s2554_s24 + $0x10] sm:$0xff] }
 0x110   : > { %v2277_v62 = vpop.eup %2276 }
 0x111   : > { %2290 = vpow2.f32 %v1874_v61  ;;  %v753_v0 = vadd.f32 1.0, %v2277_v62 }
 0x112   : > { %v2279_v63 = vpop.eup %2278 }
 0x113   : > { %v751_v1 = vadd.f32 1.0, %v2279_v63  ;;  %v963_v61 = vpop.permute.xlu0 %962  ;;  %v924_v63 = vld [vmem:[%s2554_s24] sm:$0xff] }
 0x114   : > { %v2281_v2 = vpop.eup %2280 }
 0x115   : > { %2292 = vrcp.f32 %v751_v1  ;;  %v754_v4 = vadd.f32 1.0, %v2281_v2 }
 0x116   : > { %v2283_v5 = vpop.eup %2282  ;;  %2294 = vrcp.f32 %v753_v0 }
 0x117   : > { %2296 = vrcp.f32 %v754_v4  ;;  %v752_v7 = vadd.f32 1.0, %v2283_v5 }
 0x118   : > { %v2285_v8 = vpop.eup %2284 }
 0x119   : > { %2298 = vrcp.f32 %v752_v7  ;;  %v757_v14 = vadd.f32 1.0, %v2285_v8 }
 0x11a   : > { %v2287_v13 = vpop.eup %2286 }
 0x11b   : > { %v755_v15 = vadd.f32 1.0, %v2287_v13 }
 0x11c   : > { %v2289_v16 = vpop.eup %2288 }
 0x11d   : > { %2300 = vrcp.f32 %v755_v15  ;;  %v758_v18 = vadd.f32 1.0, %v2289_v16  ;;  %v973_v15 = vpop.permute.xlu0 %972 }
 0x11e   : > { %v2291_v19 = vpop.eup %2290  ;;  %2302 = vrcp.f32 %v757_v14 }
 0x11f   : > { %2304 = vrcp.f32 %v758_v18  ;;  %v756_v20 = vadd.f32 1.0, %v2291_v19 }
 0x121   : > { %2306 = vrcp.f32 %v756_v20 }
 0x122   : > { %v2293_v22 = vpop.eup %2292 }
 0x123   : > { %v2295_v23 = vpop.eup %2294  ;;  %v775_v26 = vmul.f32 %v2293_v22, %v567_v48  ;;  %v715_v48 = vpop.f32.mrf.mxu1 }
 0x124   : > { %v2297_v24 = vpop.eup %2296  ;;  %v777_v29 = vmul.f32 %v2295_v23, %v2041_v46 }
 0x125   : > { %v778_v27 = vmul.f32 %v2297_v24, %v2042_v50  ;;  %v783_v33 = vmul.f32 %v775_v26, %v696_v12  ;;  %v925_v12 = vld [vmem:[%s2554_s24 + $0x8] sm:$0xff]  ;;  %v931_v26 = vld [vmem:[%s2554_s24 + $0x38] sm:$0xff] }
 0x126   : > { %v2299_v28 = vpop.eup %2298  ;;  %v785_v36 = vmul.f32 %v2065_v3, %v777_v29  ;;  %v927_v3 = vld [vmem:[%s2554_s24 + $0x18] sm:$0xff] }
 0x127   : > { %v776_v30 = vmul.f32 %v2299_v28, %v570_v52  ;;  %v786_v31 = vmul.f32 %v2066_v17, %v778_v27  ;;  %v930_v17 = vld [vmem:[%s2554_s24 + $0x30] sm:$0xff] }
 0x129   : > { %v784_v34 = vmul.f32 %v776_v30, %v699_v21  ;;  %v792_v40 = vpack.c.bf16 %v786_v31, %v785_v36  ;;  %v928_v21 = vld [vmem:[%s2554_s24 + $0x20] sm:$0xff]  ;;  %v929_v30 = vld [vmem:[%s2554_s24 + $0x28] sm:$0xff] }
 0x12a   : > { %v2301_v35 = vpop.eup %2300 }
 0x12b   : > { %v2303_v37 = vpop.eup %2302  ;;  %v791_v38 = vpack.c.bf16 %v784_v34, %v783_v33  ;;  %v779_v42 = vmul.f32 %v2301_v35, %v583_v56  ;;  %v953_v56 = vpop.permute.xlu1 %952 }
 0x12c   : > { %v2305_v39 = vpop.eup %2304  ;;  %v781_v45 = vmul.f32 %v2303_v37, %v2618_v54 }
 0x12d   : > { %v782_v43 = vmul.f32 %v2305_v39, %v2046_v58  ;;  %2087 = vmatprep.mubr.bf16.mxu0 %v791_v38  ;;  %v787_v49 = vmul.f32 %v779_v42, %v712_v32 }
 0x12e   : > { %v2307_v44 = vpop.eup %2306  ;;  %2088 = vmatmul.mubr.bf16.vlgmr.msra.gmra.mxu0 %v792_v40  ;;  %v789_v51 = vmul.f32 %v2069_v25, %v781_v45 }
 0x12f   : > { %v780_v46 = vmul.f32 %v2307_v44, %v586_v60  ;;  %v790_v47 = vmul.f32 %v2070_v41, %v782_v43  ;;  %v958_v58 = vpop.permute.xlu1 %957 }
 0x131   : > { %v788_v50 = vmul.f32 %v780_v46, %v715_v48  ;;  %v794_v53 = vpack.c.bf16 %v790_v47, %v789_v51 }
 0x133   : > { %v793_v52 = vpack.c.bf16 %v788_v50, %v787_v49  ;;  %v968_v7 = vpop.permute.xlu1 %967 }
 0x135   : > { %2091 = vmatprep.mubr.bf16.mxu1 %v793_v52 }
 0x136   : > { %2092 = vmatmul.mubr.bf16.vlgmr.msra.gmra.mxu1 %v794_v53 }
 0x137   : > { %v978_v24 = vpop.permute.xlu1 %977 }
 0x1ee   : > { %v2089_v54 = vpop.f32.mrf.mxu0 }
 0x1ef   : > { %v982_v60 = vmul.f32 %v2089_v54, %v953_v56 }
 0x1f0   : > { %v893_v62 = vpop.f32.mrf.mxu0 }
 0x1f1   : > { %v990_v0 = vadd.f32 %v982_v60, %v926_v59  ;;  %v980_v1 = vmul.f32 %v943_v55, %v893_v62 }
 0x1f2   : > { %v2090_v2 = vpop.f32.mrf.mxu0 }
 0x1f3   : > { %998 = vst [vmem:[%s2554_s24 + $0x10] sm:$0xff] %v990_v0  ;;  %v988_v4 = vadd.f32 %v980_v1, %v924_v63  ;;  %v983_v5 = vmul.f32 %v2090_v2, %v958_v58 }
 0x1f4   : > { %v896_v8 = vpop.f32.mrf.mxu0 }
 0x1f5   : > { %996 = vst [vmem:[%s2554_s24] sm:$0xff] %v988_v4  ;;  %v991_v13 = vadd.f32 %v983_v5, %v927_v3  ;;  %v981_v14 = vmul.f32 %v948_v57, %v896_v8 }
 0x1f6   : > { %v2093_v16 = vpop.f32.mrf.mxu1 }
 0x1f7   : > { %999 = vst [vmem:[%s2554_s24 + $0x18] sm:$0xff] %v991_v13  ;;  %v989_v18 = vadd.f32 %v981_v14, %v925_v12  ;;  %v986_v19 = vmul.f32 %v2093_v16, %v973_v15 }
 0x1f8   : > { %v909_v20 = vpop.f32.mrf.mxu1 }
 0x1f9   : > { %997 = vst [vmem:[%s2554_s24 + $0x8] sm:$0xff] %v989_v18  ;;  %v994_v22 = vadd.f32 %v986_v19, %v930_v17  ;;  %v984_v23 = vmul.f32 %v963_v61, %v909_v20 }
 0x1fa   : > { %v2094_v25 = vpop.f32.mrf.mxu1 }
 0x1fb   : > { %1002 = vst [vmem:[%s2554_s24 + $0x30] sm:$0xff] %v994_v22  ;;  %v992_v27 = vadd.f32 %v984_v23, %v928_v21  ;;  %v987_v28 = vmul.f32 %v2094_v25, %v978_v24 }
 0x1fc   : > { %v912_v29 = vpop.f32.mrf.mxu1 }
 0x1fd   : > { %1000 = vst [vmem:[%s2554_s24 + $0x20] sm:$0xff] %v992_v27  ;;  %v995_v31 = vadd.f32 %v987_v28, %v931_v26  ;;  %v985_v32 = vmul.f32 %v968_v7, %v912_v29  ;;  %1007 = sbr.rel (%p1885_p8) target bundleno = 997 (0x3e5), region = 64 }
 0x1ff   : > { %1003 = vst [vmem:[%s2554_s24 + $0x38] sm:$0xff] %v995_v31  ;;  %v993_v33 = vadd.f32 %v985_v32, %v929_v30 }
 0x201   : > { %1001 = vst [vmem:[%s2554_s24 + $0x28] sm:$0xff] %v993_v33 }
 0x202   : > { %v2310_v34 = vld [vmem:[%s2795_s5 + $0x38] sm:$0xff]   ;;  %2111 = vmatprep.mubr.bf16.mxu0 %v2556_v6  ;;  %2135 = vmatprep.mubr.bf16.mxu1 %v2556_v6  ;;  %v2311_v35 = vld [vmem:[%s2795_s5 + $0x30] sm:$0xff]   ;;  %v2312_v36 = vld [vmem:[%s2795_s5 + $0x28] sm:$0xff]   ;;  %v2448_v62 = vmov 0  }
 0x203   : > { %2095 = vmatprep.subr.bf16.mxu0 %v2310_v34  ;;  %v2313_v37 = vld [vmem:[%s2795_s5 + $0x20] sm:$0xff]   ;;  %v2318_v38 = vld [vmem:[%s2796_s6 + $0x38] sm:$0xff]   ;;  %v2319_v39 = vld [vmem:[%s2796_s6 + $0x30] sm:$0xff]   ;;  %2309 = vset.pattern.permute.xlu0 %v2448_v62 }
 0x204   : > { %2096 = vmatpush3.bf16.msra.mxu0 %v2310_v34  ;;  %2119 = vmatprep.subr.bf16.mxu1 %v2318_v38  ;;  %v2314_v40 = vld [vmem:[%s2795_s5 + $0x18] sm:$0xff]   ;;  %v2320_v41 = vld [vmem:[%s2796_s6 + $0x28] sm:$0xff]   ;;  %v2315_v42 = vld [vmem:[%s2795_s5 + $0x10] sm:$0xff]  }
 0x205   : > { %2097 = vmatprep.subr.bf16.mxu0 %v2311_v35  ;;  %2120 = vmatpush3.bf16.msra.mxu1 %v2318_v38  ;;  %v2321_v43 = vld [vmem:[%s2796_s6 + $0x20] sm:$0xff]   ;;  %v2316_v44 = vld [vmem:[%s2795_s5 + $0x8] sm:$0xff]   ;;  %v2322_v45 = vld [vmem:[%s2796_s6 + $0x18] sm:$0xff]  }
 0x206   : > { %2121 = vmatprep.subr.bf16.mxu1 %v2319_v39  ;;  %v2317_v46 = vld [vmem:[%s2795_s5] sm:$0xff]   ;;  %v2323_v47 = vld [vmem:[%s2796_s6 + $0x10] sm:$0xff]   ;;  %v2324_v48 = vld [vmem:[%s2796_s6 + $0x8] sm:$0xff]   ;;  %2308 = vset.pattern.permute.xlu1 %v2448_v62 }
 0x207   : > { %v2325_v49 = vld [vmem:[%s2796_s6] sm:$0xff]   ;;  %v2326_v50 = vld [vmem:[%s2798_s8 + $0x38] sm:$0xff]   ;;  %v2327_v51 = vld [vmem:[%s2798_s8 + $0x30] sm:$0xff]  }
 0x208   : > { %2098 = vmatpush3.bf16.msra.mxu0 %v2311_v35  ;;  %v2328_v52 = vld [vmem:[%s2798_s8 + $0x28] sm:$0xff]   ;;  %v2329_v53 = vld [vmem:[%s2798_s8 + $0x20] sm:$0xff]   ;;  %v2330_v55 = vld [vmem:[%s2798_s8 + $0x18] sm:$0xff]  }
 0x209   : > { %2099 = vmatprep.subr.bf16.mxu0 %v2312_v36  ;;  %2122 = vmatpush3.bf16.msra.mxu1 %v2319_v39  ;;  %v2331_v56 = vld [vmem:[%s2798_s8 + $0x10] sm:$0xff]   ;;  %v2332_v57 = vld [vmem:[%s2798_s8 + $0x8] sm:$0xff]   ;;  %v2334_v58 = vld [vmem:[%s2797_s7 + $0x38] sm:$0xff]  }
 0x20a   : > { %2123 = vmatprep.subr.bf16.mxu1 %v2320_v41  ;;  %v2335_v54 = vld [vmem:[%s2797_s7 + $0x30] sm:$0xff]   ;;  %v2340_v60 = vld [vmem:[%s2797_s7 + $0x8] sm:$0xff]   ;;  %v2341_v61 = vld [vmem:[%s2797_s7] sm:$0xff]  }
 0x20b   : > { %v2339_v59 = vld [vmem:[%s2797_s7 + $0x10] sm:$0xff]  }
 0x20c   : > { %2100 = vmatpush3.bf16.msra.mxu0 %v2312_v36 }
 0x20d   : > { %2101 = vmatprep.subr.bf16.mxu0 %v2313_v37  ;;  %2124 = vmatpush3.bf16.msra.mxu1 %v2320_v41 }
 0x20e   : > { %2125 = vmatprep.subr.bf16.mxu1 %v2321_v43 }
 0x210   : > { %2102 = vmatpush3.bf16.msra.mxu0 %v2313_v37 }
 0x211   : > { %2103 = vmatprep.subr.bf16.mxu0 %v2314_v40  ;;  %2126 = vmatpush3.bf16.msra.mxu1 %v2321_v43 }
 0x212   : > { %2127 = vmatprep.subr.bf16.mxu1 %v2322_v45 }
 0x214   : > { %2104 = vmatpush3.bf16.msra.mxu0 %v2314_v40 }
 0x215   : > { %2105 = vmatprep.subr.bf16.mxu0 %v2315_v42  ;;  %2128 = vmatpush3.bf16.msra.mxu1 %v2322_v45 }
 0x216   : > { %2129 = vmatprep.subr.bf16.mxu1 %v2323_v47 }
 0x218   : > { %2106 = vmatpush3.bf16.msra.mxu0 %v2315_v42 }
 0x219   : > { %2107 = vmatprep.subr.bf16.mxu0 %v2316_v44  ;;  %2130 = vmatpush3.bf16.msra.mxu1 %v2323_v47 }
 0x21a   : > { %2131 = vmatprep.subr.bf16.mxu1 %v2324_v48 }
 0x21c   : > { %2108 = vmatpush3.bf16.msra.mxu0 %v2316_v44 }
 0x21d   : > { %2109 = vmatprep.subr.bf16.mxu0 %v2317_v46  ;;  %2132 = vmatpush3.bf16.msra.mxu1 %v2324_v48 }
 0x21e   : > { %2133 = vmatprep.subr.bf16.mxu1 %v2325_v49 }
 0x220   : > { %2110 = vmatpush3.bf16.msra.mxu0 %v2317_v46 }
 0x221   : > { %2134 = vmatpush3.bf16.msra.mxu1 %v2325_v49  ;;  %2143 = vmatprep.subr.bf16.mxu0 %v2334_v58 }
 0x222   : > { %2167 = vmatprep.subr.bf16.mxu1 %v2326_v50 }
 0x223   : > { %2112 = vmatmul.mubr.bf16.vlgmr.msra.gmra.mxu0 %v2563_v9 }
 0x224   : > { %2115 = vmatprep.mubr.bf16.mxu0 %v2565_v10  ;;  %2136 = vmatmul.mubr.bf16.vlgmr.msra.gmra.mxu1 %v2563_v9 }
 0x225   : > { %2139 = vmatprep.mubr.bf16.mxu1 %v2565_v10  ;;  %2168 = vmatpush3.bf16.msra.mxu1 %v2326_v50 }
 0x226   : > { %2169 = vmatprep.subr.bf16.mxu1 %v2327_v51  ;;  %2144 = vmatpush3.bf16.msra.mxu0 %v2334_v58 }
 0x227   : > { %2145 = vmatprep.subr.bf16.mxu0 %v2335_v54 }
 0x229   : > { %2170 = vmatpush3.bf16.msra.mxu1 %v2327_v51 }
 0x22a   : > { %2171 = vmatprep.subr.bf16.mxu1 %v2328_v52  ;;  %2146 = vmatpush3.bf16.msra.mxu0 %v2335_v54 }
 0x22b   : > { %2116 = vmatmul.mubr.bf16.gmra.mxu0 %v2567_v11 }
 0x22c   : > { %2140 = vmatmul.mubr.bf16.gmra.mxu1 %v2567_v11 }
 0x22d   : > { %2172 = vmatpush3.bf16.msra.mxu1 %v2328_v52  ;;  %2183 = vmatprep.mubr.bf16.mxu1 %v2556_v6  ;;  %v2333_v6 = vld [vmem:[%s2798_s8] sm:$0xff]  }
 0x22e   : > { %2173 = vmatprep.subr.bf16.mxu1 %v2329_v53 }
 0x231   : > { %2174 = vmatpush3.bf16.msra.mxu1 %v2329_v53 }
 0x232   : > { %2175 = vmatprep.subr.bf16.mxu1 %v2330_v55 }
 0x235   : > { %2176 = vmatpush3.bf16.msra.mxu1 %v2330_v55 }
 0x236   : > { %2177 = vmatprep.subr.bf16.mxu1 %v2331_v56 }
 0x239   : > { %2178 = vmatpush3.bf16.msra.mxu1 %v2331_v56 }
 0x23a   : > { %2179 = vmatprep.subr.bf16.mxu1 %v2332_v57 }
 0x23d   : > { %2180 = vmatpush3.bf16.msra.mxu1 %v2332_v57 }
 0x23e   : > { %2181 = vmatprep.subr.bf16.mxu1 %v2333_v6 }
 0x241   : > { %2182 = vmatpush3.bf16.msra.mxu1 %v2333_v6 }
 0x244   : > { %2184 = vmatmul.mubr.bf16.vlgmr.msra.gmra.mxu1 %v2563_v9  ;;  %v2336_v9 = vld [vmem:[%s2797_s7 + $0x28] sm:$0xff]  }
 0x245   : > { %2187 = vmatprep.mubr.bf16.mxu1 %v2565_v10  ;;  %2147 = vmatprep.subr.bf16.mxu0 %v2336_v9  ;;  %v2337_v10 = vld [vmem:[%s2797_s7 + $0x20] sm:$0xff]  }
 0x246   : > { %2148 = vmatpush3.bf16.msra.mxu0 %v2336_v9 }
 0x247   : > { %2149 = vmatprep.subr.bf16.mxu0 %v2337_v10 }
 0x24a   : > { %2150 = vmatpush3.bf16.msra.mxu0 %v2337_v10 }
 0x24c   : > { %2188 = vmatmul.mubr.bf16.gmra.mxu1 %v2567_v11  ;;  %v2338_v11 = vld [vmem:[%s2797_s7 + $0x18] sm:$0xff]  }
 0x24d   : > { %2151 = vmatprep.subr.bf16.mxu0 %v2338_v11 }
 0x24e   : > { %2152 = vmatpush3.bf16.msra.mxu0 %v2338_v11 }
 0x24f   : > { %2153 = vmatprep.subr.bf16.mxu0 %v2339_v59 }
 0x252   : > { %2154 = vmatpush3.bf16.msra.mxu0 %v2339_v59 }
 0x253   : > { %2155 = vmatprep.subr.bf16.mxu0 %v2340_v60 }
 0x256   : > { %2156 = vmatpush3.bf16.msra.mxu0 %v2340_v60 }
 0x257   : > { %2157 = vmatprep.subr.bf16.mxu0 %v2341_v61 }
 0x25a   : > { %2158 = vmatpush3.bf16.msra.mxu0 %v2341_v61 }
 0x2e3   : > { %v2113_v63 = vpop.f32.mrf.mxu0 }
 0x2e4   : > { %v1904_v0 = vmul.f32 -1.442695, %v2113_v63  ;;  %v2137_v14 = vpop.f32.mrf.mxu1 }
 0x2e5   : > { %v1106_v1 = vpop.f32.mrf.mxu0 }
 0x2e6   : > { %2342 = vpow2.f32 %v1904_v0  ;;  %v1902_v2 = vmul.f32 -1.442695, %v1106_v1  ;;  %v1235_v19 = vpop.f32.mrf.mxu1 }
 0x2e7   : > { %v2114_v3 = vpop.f32.mrf.mxu0 }
 0x2e8   : > { %2344 = vpow2.f32 %v1902_v2  ;;  %v1905_v4 = vmul.f32 -1.442695, %v2114_v3  ;;  %v2138_v24 = vpop.f32.mrf.mxu1 }
 0x2e9   : > { %v1109_v5 = vpop.f32.mrf.mxu0 }
 0x2ea   : > { %2346 = vpow2.f32 %v1905_v4  ;;  %v1903_v7 = vmul.f32 -1.442695, %v1109_v5  ;;  %v1238_v29 = vpop.f32.mrf.mxu1 }
 0x2eb   : > { %v2747_v8 = vpop.f32.mrf.mxu0 }
 0x2ec   : > { %2348 = vpow2.f32 %v1903_v7  ;;  %v1908_v12 = vmul.f32 -1.442695, %v2747_v8  ;;  %v2141_v34 = vpop.f32.mrf.mxu1 }
 0x2ed   : > { %v2750_v13 = vpop.f32.mrf.mxu0 }
 0x2ee   : > { %2350 = vpow2.f32 %v1908_v12  ;;  %v1906_v15 = vmul.f32 -1.442695, %v2750_v13  ;;  %v1251_v39 = vpop.f32.mrf.mxu1 }
 0x2ef   : > { %v2118_v16 = vpop.f32.mrf.mxu0 }
 0x2f0   : > { %2352 = vpow2.f32 %v1906_v15  ;;  %v1909_v17 = vmul.f32 -1.442695, %v2118_v16  ;;  %v2142_v42 = vpop.f32.mrf.mxu1 }
 0x2f1   : > { %v2753_v18 = vpop.f32.mrf.mxu0 }
 0x2f2   : > { %2354 = vpow2.f32 %v1909_v17  ;;  %v1907_v20 = vmul.f32 -1.442695, %v2753_v18  ;;  %v1254_v49 = vpop.f32.mrf.mxu1 }
 0x2f3   : > { %v2343_v21 = vpop.eup %2342 }
 0x2f4   : > { %2356 = vpow2.f32 %v1907_v20  ;;  %v1292_v23 = vadd.f32 1.0, %v2343_v21 }
 0x2f5   : > { %v2345_v22 = vpop.eup %2344 }
 0x2f6   : > { %v1290_v25 = vadd.f32 1.0, %v2345_v22 }
 0x2f7   : > { %v2347_v26 = vpop.eup %2346 }
 0x2f8   : > { %2358 = vrcp.f32 %v1290_v25  ;;  %v1293_v27 = vadd.f32 1.0, %v2347_v26 }
 0x2f9   : > { %v2349_v28 = vpop.eup %2348  ;;  %2360 = vrcp.f32 %v1292_v23 }
 0x2fa   : > { %2362 = vrcp.f32 %v1293_v27  ;;  %v1291_v30 = vadd.f32 1.0, %v2349_v28 }
 0x2fb   : > { %v2351_v31 = vpop.eup %2350 }
 0x2fc   : > { %2364 = vrcp.f32 %v1291_v30  ;;  %v1296_v33 = vadd.f32 1.0, %v2351_v31 }
 0x2fd   : > { %v2353_v32 = vpop.eup %2352 }
 0x2fe   : > { %v1294_v35 = vadd.f32 1.0, %v2353_v32 }
 0x2ff   : > { %v2355_v36 = vpop.eup %2354 }
 0x300   : > { %2366 = vrcp.f32 %v1294_v35  ;;  %v1297_v37 = vadd.f32 1.0, %v2355_v36 }
 0x301   : > { %v2357_v38 = vpop.eup %2356  ;;  %2368 = vrcp.f32 %v1296_v33 }
 0x302   : > { %2370 = vrcp.f32 %v1297_v37  ;;  %v1295_v40 = vadd.f32 1.0, %v2357_v38 }
 0x304   : > { %2372 = vrcp.f32 %v1295_v40  ;;  %v2185_v52 = vpop.f32.mrf.mxu1 }
 0x305   : > { %v2359_v41 = vpop.eup %2358  ;;  %v1928_v56 = vmul.f32 -1.442695, %v2185_v52  ;;  %v1642_v52 = vld [vmem:[%s2554_s24 + $0x10] sm:$0xff] }
 0x306   : > { %v2361_v43 = vpop.eup %2360  ;;  %v1314_v45 = vmul.f32 %v2359_v41, %v1106_v1  ;;  %v1561_v58 = vpop.f32.mrf.mxu1 }
 0x307   : > { %v2363_v44 = vpop.eup %2362  ;;  %v1316_v48 = vmul.f32 %v2361_v43, %v2113_v63  ;;  %2374 = vpow2.f32 %v1928_v56  ;;  %v1926_v59 = vmul.f32 -1.442695, %v1561_v58 }
 0x308   : > { %v1317_v46 = vmul.f32 %v2363_v44, %v2114_v3  ;;  %v1322_v53 = vmul.f32 %v1314_v45, %v1235_v19  ;;  %v2186_v60 = vpop.f32.mrf.mxu1 }
 0x309   : > { %v2365_v47 = vpop.eup %2364  ;;  %v1324_v6 = vmul.f32 %v2137_v14, %v1316_v48  ;;  %v1929_v63 = vmul.f32 -1.442695, %v2186_v60  ;;  %2376 = vpow2.f32 %v1926_v59 }
 0x30a   : > { %v1315_v50 = vmul.f32 %v2365_v47, %v1109_v5  ;;  %v1325_v51 = vmul.f32 %v2138_v24, %v1317_v46  ;;  %v1564_v2 = vpop.f32.mrf.mxu1 }
 0x30b   : > { %2378 = vpow2.f32 %v1929_v63  ;;  %v1927_v4 = vmul.f32 -1.442695, %v1564_v2  ;;  %v1646_v2 = vld [vmem:[%s2554_s24 + $0x30] sm:$0xff] }
 0x30c   : > { %v1323_v55 = vmul.f32 %v1315_v50, %v1238_v29  ;;  %v1331_v11 = vpack.c.bf16 %v1325_v51, %v1324_v6  ;;  %v2189_v7 = vpop.f32.mrf.mxu1 }
 0x30d   : > { %v2367_v57 = vpop.eup %2366  ;;  %2380 = vpow2.f32 %v1927_v4  ;;  %v1932_v15 = vmul.f32 -1.442695, %v2189_v7  ;;  %v1644_v7 = vld [vmem:[%s2554_s24 + $0x20] sm:$0xff] }
 0x30e   : > { %v2369_v54 = vpop.eup %2368  ;;  %v1330_v9 = vpack.c.bf16 %v1323_v55, %v1322_v53  ;;  %v1318_v61 = vmul.f32 %v2367_v57, %v2750_v13  ;;  %v1640_v57 = vld [vmem:[%s2554_s24] sm:$0xff] }
 0x30f   : > { %v2371_v10 = vpop.eup %2370  ;;  %v1320_v1 = vmul.f32 %v2369_v54, %v2747_v8  ;;  %2382 = vpow2.f32 %v1932_v15 }
 0x310   : > { %v1321_v62 = vmul.f32 %v2371_v10, %v2118_v16  ;;  %2159 = vmatprep.mubr.bf16.mxu0 %v1330_v9  ;;  %v1326_v12 = vmul.f32 %v1318_v61, %v1251_v39  ;;  %v1577_v16 = vpop.f32.mrf.mxu1  ;;  %v1643_v9 = vld [vmem:[%s2554_s24 + $0x18] sm:$0xff]  ;;  %v1641_v61 = vld [vmem:[%s2554_s24 + $0x8] sm:$0xff] }
 0x311   : > { %v2373_v0 = vpop.eup %2372  ;;  %2160 = vmatmul.mubr.bf16.vlgmr.msra.gmra.mxu0 %v1331_v11  ;;  %v1328_v13 = vmul.f32 %v2141_v34, %v1320_v1  ;;  %v1930_v19 = vmul.f32 -1.442695, %v1577_v16  ;;  %v1647_v16 = vld [vmem:[%s2554_s24 + $0x38] sm:$0xff] }
 0x312   : > { %v1319_v3 = vmul.f32 %v2373_v0, %v2753_v18  ;;  %v1329_v5 = vmul.f32 %v2142_v42, %v1321_v62  ;;  %v2190_v8 = vpop.f32.mrf.mxu1 }
 0x313   : > { %2384 = vpow2.f32 %v1930_v19  ;;  %v1933_v21 = vmul.f32 -1.442695, %v2190_v8  ;;  %v1645_v8 = vld [vmem:[%s2554_s24 + $0x28] sm:$0xff] }
 0x314   : > { %v1327_v14 = vmul.f32 %v1319_v3, %v1254_v49  ;;  %v1333_v20 = vpack.c.bf16 %v1329_v5, %v1328_v13  ;;  %v1580_v18 = vpop.f32.mrf.mxu1  ;;  %v2375_v23 = vpop.eup %2374 }
 0x315   : > { %2386 = vpow2.f32 %v1933_v21  ;;  %v1931_v22 = vmul.f32 -1.442695, %v1580_v18  ;;  %v1618_v24 = vadd.f32 1.0, %v2375_v23 }
 0x316   : > { %v1332_v17 = vpack.c.bf16 %v1327_v14, %v1326_v12  ;;  %v2377_v25 = vpop.eup %2376 }
 0x317   : > { %2388 = vpow2.f32 %v1931_v22  ;;  %v1616_v27 = vadd.f32 1.0, %v2377_v25 }
 0x318   : > { %2163 = vmatprep.mubr.bf16.mxu0 %v1332_v17  ;;  %2390 = vrcp.f32 %v1618_v24  ;;  %v2379_v26 = vpop.eup %2378 }
 0x319   : > { %2164 = vmatmul.mubr.bf16.gmra.mxu0 %v1333_v20  ;;  %v1619_v28 = vadd.f32 1.0, %v2379_v26  ;;  %2392 = vrcp.f32 %v1616_v27 }
 0x31a   : > { %v2381_v29 = vpop.eup %2380 }
 0x31b   : > { %2394 = vrcp.f32 %v1619_v28  ;;  %v1617_v30 = vadd.f32 1.0, %v2381_v29 }
 0x31c   : > { %v2383_v31 = vpop.eup %2382 }
 0x31d   : > { %2396 = vrcp.f32 %v1617_v30  ;;  %v1622_v35 = vadd.f32 1.0, %v2383_v31 }
 0x320   : > { %v2385_v32 = vpop.eup %2384 }
 0x321   : > { %v1620_v33 = vadd.f32 1.0, %v2385_v32 }
 0x322   : > { %v2387_v34 = vpop.eup %2386 }
 0x323   : > { %2398 = vrcp.f32 %v1620_v33  ;;  %v1623_v37 = vadd.f32 1.0, %v2387_v34 }
 0x324   : > { %v2389_v36 = vpop.eup %2388  ;;  %2400 = vrcp.f32 %v1622_v35 }
 0x325   : > { %v1621_v38 = vadd.f32 1.0, %v2389_v36  ;;  %v2391_v39 = vpop.eup %2390 }
 0x326   : > { %1660 = vperm.xlu1 %2308, %v2391_v39   ;;  %v2393_v40 = vpop.eup %2392 }
 0x327   : > { %2402 = vrcp.f32 %v1621_v38  ;;  %1650 = vperm.xlu0 %2309, %v2393_v40  }
 0x328   : > { %2404 = vrcp.f32 %v1623_v37  ;;  %v2395_v41 = vpop.eup %2394 }
 0x32a   : > { %1665 = vperm.xlu1 %2308, %v2395_v41   ;;  %v2397_v42 = vpop.eup %2396 }
 0x32b   : > { %1655 = vperm.xlu0 %2309, %v2397_v42  }
 0x330   : > { %v2399_v43 = vpop.eup %2398 }
 0x331   : > { %1670 = vperm.xlu0 %2309, %v2399_v43   ;;  %v2401_v44 = vpop.eup %2400 }
 0x334   : > { %v2403_v45 = vpop.eup %2402 }
 0x335   : > { %1675 = vperm.xlu1 %2308, %v2403_v45   ;;  %v2405_v46 = vpop.eup %2404  ;;  %1680 = vperm.xlu0 %2309, %v2401_v44  }
 0x339   : > { %1685 = vperm.xlu1 %2308, %v2405_v46  }
 0x3a1   : > { %v1661_v48 = vpop.permute.xlu1 %1660 }
 0x3a2   : > { %v1651_v47 = vpop.permute.xlu0 %1650 }
 0x3a5   : > { %v1666_v50 = vpop.permute.xlu1 %1665 }
 0x3a6   : > { %v1656_v49 = vpop.permute.xlu0 %1655 }
 0x3ac   : > { %v1671_v55 = vpop.permute.xlu0 %1670 }
 0x3b0   : > { %v1676_v59 = vpop.permute.xlu1 %1675  ;;  %v1681_v0 = vpop.permute.xlu0 %1680 }
 0x3b4   : > { %v1686_v15 = vpop.permute.xlu1 %1685 }
 0x3d1   : > { %v2161_v51 = vpop.f32.mrf.mxu0 }
 0x3d2   : > { %v1690_v53 = vmul.f32 %v2161_v51, %v1661_v48 }
 0x3d3   : > { %v1432_v56 = vpop.f32.mrf.mxu0 }
 0x3d4   : > { %v1698_v6 = vadd.f32 %v1690_v53, %v1642_v52  ;;  %v1688_v58 = vmul.f32 %v1651_v47, %v1432_v56 }
 0x3d5   : > { %v2162_v54 = vpop.f32.mrf.mxu0 }
 0x3d6   : > { %1706 = vst [vmem:[%s2554_s24 + $0x10] sm:$0xff] %v1698_v6  ;;  %v1696_v10 = vadd.f32 %v1688_v58, %v1640_v57  ;;  %v1691_v11 = vmul.f32 %v2162_v54, %v1666_v50 }
 0x3d7   : > { %v1435_v60 = vpop.f32.mrf.mxu0 }
 0x3d8   : > { %1704 = vst [vmem:[%s2554_s24] sm:$0xff] %v1696_v10  ;;  %v1699_v62 = vadd.f32 %v1691_v11, %v1643_v9  ;;  %v1689_v63 = vmul.f32 %v1656_v49, %v1435_v60 }
 0x3d9   : > { %v2165_v1 = vpop.f32.mrf.mxu0 }
 0x3da   : > { %1707 = vst [vmem:[%s2554_s24 + $0x18] sm:$0xff] %v1699_v62  ;;  %v1697_v3 = vadd.f32 %v1689_v63, %v1641_v61  ;;  %v1694_v4 = vmul.f32 %v2165_v1, %v1681_v0 }
 0x3db   : > { %v1448_v5 = vpop.f32.mrf.mxu0 }
 0x3dc   : > { %1705 = vst [vmem:[%s2554_s24 + $0x8] sm:$0xff] %v1697_v3  ;;  %v1702_v12 = vadd.f32 %v1694_v4, %v1646_v2  ;;  %v1692_v14 = vmul.f32 %v1671_v55, %v1448_v5 }
 0x3dd   : > { %v2166_v13 = vpop.f32.mrf.mxu0 }
 0x3de   : > { %1710 = vst [vmem:[%s2554_s24 + $0x30] sm:$0xff] %v1702_v12  ;;  %v1700_v17 = vadd.f32 %v1692_v14, %v1644_v7  ;;  %v1695_v19 = vmul.f32 %v2166_v13, %v1686_v15 }
 0x3df   : > { %v1451_v20 = vpop.f32.mrf.mxu0 }
 0x3e0   : > { %1708 = vst [vmem:[%s2554_s24 + $0x20] sm:$0xff] %v1700_v17  ;;  %v1703_v21 = vadd.f32 %v1695_v19, %v1647_v16  ;;  %v1693_v18 = vmul.f32 %v1676_v59, %v1451_v20 }
 0x3e2   : > { %1711 = vst [vmem:[%s2554_s24 + $0x38] sm:$0xff] %v1703_v21  ;;  %v1701_v22 = vadd.f32 %v1693_v18, %v1645_v8 }
 0x3e4   : > { %1709 = vst [vmem:[%s2554_s24 + $0x28] sm:$0xff] %v1701_v22 }
 0x3e5 PF: > { %s19_s13 = sadd.s32 1, %s2444_s13   ;;  %s2804_s29 = sld [smem:[#allocation2_spill]] }
 0x3e6   : > { %p16_p9 = scmp.ge.s32.totalorder %s19_s13, 10   ;;  %s2805_s17 = sld [smem:[#allocation3_spill]] }
 0x3e7   : > { %s2806_s30 = smov %s2436_s11  ;;  %s2807_s10 = smov %s2440_s12 }
 0x3e8   :  { %18 = sbr.rel (!%p16_p9) target bundleno = 3 (0x3), region = 106 }
 0x3eb   : > { %s2808_s11 = smov %s2804_s29 }
 0x3ec   : > { %s2809_s12 = smov %s2805_s17 }

</bundles_post_ra>
